<compile_context>
chip_gen: v7x
topology: tpu7x:2x2x1
jax: 0.10.0
libtpu: 0.0.40
codegen_flags: <defaults>
</compile_context>

<pallas_src>
import math
import functools

import jax
import jax.numpy as jnp
from jax.experimental import pallas as pl
from jax.experimental.pallas import tpu as pltpu


def _encoder_kernel(x_ref, s1_ref, t1_ref, wqkv_ref, bqkv_ref, wo_ref, bo_ref,
                    s2_ref, t2_ref, w1_ref, b1_ref, w2_ref, b2_ref, o_ref,
                    *, num_heads, head_dim, scale):
    f32 = jnp.float32
    bf16 = jnp.bfloat16

    x = x_ref[...].astype(f32)                      # (C, S), channel-major tile
    C = num_heads * head_dim
    S = x.shape[1]

    # ---- BatchNorm2d (inference: per-channel affine) -> SelfAttention -> residual
    xn = x * s1_ref[...] + t1_ref[...]              # (C,1) broadcast along lanes
    xn_bf = xn.astype(bf16)

    qkv = jnp.dot(wqkv_ref[...], xn_bf,
                  preferred_element_type=f32) + bqkv_ref[...]       # (3C, S)
    # (3C, S) -> (3*H, hd, S): pure sublane split (hd == 8), layout-free.
    qkv3 = qkv.reshape(3 * num_heads, head_dim, S)
    q = (qkv3[:num_heads] * scale).astype(bf16)                     # (H, hd, S)
    k = qkv3[num_heads:2 * num_heads].astype(bf16)                  # (H, hd, S)
    v = qkv3[2 * num_heads:]                                        # (H, hd, S) f32

    # scores[h, sq, sk] = sum_d q[h,d,sq] * k[h,d,sk]  (head = batch dim, no slices)
    scores = jnp.einsum('hds,hdt->hst', q, k,
                        preferred_element_type=f32)                 # (H, S, S)
    scores = scores - jnp.max(scores, axis=-1, keepdims=True)
    p = jnp.exp(scores)
    p = p * pl.reciprocal(jnp.sum(p, axis=-1, keepdims=True), approx=True)

    # ctx[h, d, sq] = sum_sk v[h,d,sk] * p[h,sq,sk]
    ctx = jnp.einsum('hdt,hst->hds', v.astype(bf16), p.astype(bf16),
                     preferred_element_type=f32)                    # (H, hd, S)
    attn = ctx.reshape(C, S).astype(bf16)                           # sublane merge
    attn = jnp.dot(wo_ref[...], attn,
                   preferred_element_type=f32) + bo_ref[...]        # (C, S)

    x1 = x + attn                                                    # residual 1

    # ---- BatchNorm2d -> FeedForward (1x1 convs == per-token MLP) -> residual
    x2n = (x1 * s2_ref[...] + t2_ref[...]).astype(bf16)
    h1 = jnp.dot(w1_ref[...], x2n,
                 preferred_element_type=f32) + b1_ref[...]           # (hidden, S)
    h1 = jax.nn.gelu(h1, approximate=True).astype(bf16)              # tanh GELU (EUP)
    ff = jnp.dot(w2_ref[...], h1,
                 preferred_element_type=f32) + b2_ref[...]           # (C, S)

    o_ref[...] = (x1 + ff).astype(o_ref.dtype)                       # residual 2


def _prepare_params(params, eps):
    """Host-side prep: fold BN running stats into scale/shift, cast weights to bf16,
    shape biases as (rows, 1) columns for lane-broadcast in channel-major layout."""
    (g1, be1, m1, va1, wqkv, bqkv, wo, bo,
     g2, be2, m2, va2, w1, b1, w2, b2) = params
    f32, bf16 = jnp.float32, jnp.bfloat16

    s1 = (g1 / jnp.sqrt(va1 + eps)).astype(f32)
    t1 = (be1 - m1 * s1).astype(f32)
    s2 = (g2 / jnp.sqrt(va2 + eps)).astype(f32)
    t2 = (be2 - m2 * s2).astype(f32)

    col = lambda a: a.astype(f32).reshape(-1, 1)
    return (col(s1), col(t1),
            wqkv.astype(bf16), col(bqkv),
            wo.astype(bf16), col(bo),
            col(s2), col(t2),
            w1.astype(bf16), col(b1),
            w2.astype(bf16), col(b2))


def encoder_forward(x, params, *, num_heads, eps=1e-5):
    """x: (B, C, H, W) float32 -> (B, C, H, W) float32 (inference forward)."""
    B, C, H, W = x.shape
    S = H * W
    assert C % num_heads == 0
    head_dim = C // num_heads
    # head_dim should be a multiple of 8 so the head split stays sublane-aligned.

    xr = x.reshape(B, C, S)                      # free reshape, no transpose
    prepared = _prepare_params(params, eps)

    kernel = functools.partial(_encoder_kernel, num_heads=num_heads,
                               head_dim=head_dim, scale=1.0 / math.sqrt(head_dim))

    in_specs = [pl.BlockSpec((None, C, S), lambda b: (b, 0, 0))]     # one batch row/step
    in_specs += [pl.BlockSpec(p.shape, lambda b, nd=p.ndim: (0,) * nd)
                 for p in prepared]

    out = pl.pallas_call(
        kernel,
        out_shape=jax.ShapeDtypeStruct((B, C, S), x.dtype),
        grid=(B,),
        in_specs=in_specs,
        out_specs=pl.BlockSpec((None, C, S), lambda b: (b, 0, 0)),
        compiler_params=pltpu.CompilerParams(
            dimension_semantics=("parallel",)),
    )(xr, *prepared)

    return out.reshape(B, C, H, W)


def init_params(key, C, num_heads, mlp_ratio):
    """Deterministic synthetic parameters matching the module's __init__ shapes."""
    hidden = C * mlp_ratio
    ks = jax.random.split(key, 16)

    def rnd(k, shape, scale=0.05):
        return (scale * jax.random.normal(k, shape)).astype(jnp.float32)

    g1 = 1.0 + rnd(ks[0], (C,));   be1 = rnd(ks[1], (C,))            # norm_1 (BN)
    m1 = rnd(ks[2], (C,), 0.1)
    va1 = (1.0 + 0.1 * jnp.abs(jax.random.normal(ks[3], (C,)))).astype(jnp.float32)
    g2 = 1.0 + rnd(ks[4], (C,));   be2 = rnd(ks[5], (C,))            # norm_2 (BN)
    m2 = rnd(ks[6], (C,), 0.1)
    va2 = (1.0 + 0.1 * jnp.abs(jax.random.normal(ks[7], (C,)))).astype(jnp.float32)
    wqkv = rnd(ks[8], (3 * C, C));  bqkv = rnd(ks[9], (3 * C,))       # attention qkv
    wo = rnd(ks[10], (C, C));       bo = rnd(ks[11], (C,))            # attention out
    w1 = rnd(ks[12], (hidden, C));  b1 = rnd(ks[13], (hidden,))       # ffn conv1x1 #1
    w2 = rnd(ks[14], (C, hidden));  b2 = rnd(ks[15], (C,))            # ffn conv1x1 #2
    return (g1, be1, m1, va1, wqkv, bqkv, wo, bo,
            g2, be2, m2, va2, w1, b1, w2, b2)


def reference(x, params, num_heads, eps=1e-5):
    """Pure-JAX reference (same bf16 matmul precision) for a correctness check."""
    (g1, be1, m1, va1, wqkv, bqkv, wo, bo,
     g2, be2, m2, va2, w1, b1, w2, b2) = params
    B, C, H, W = x.shape
    S = H * W
    hd = C // num_heads
    bf = jnp.bfloat16
    f32 = jnp.float32
    xt = x.reshape(B, C, S).astype(f32)

    def bn(v, g, b, m, var):
        return ((v - m[None, :, None]) / jnp.sqrt(var[None, :, None] + eps)
                * g[None, :, None] + b[None, :, None])

    xn = bn(xt, g1, be1, m1, va1)
    qkv = jnp.einsum('oc,bcs->bos', wqkv.astype(bf), xn.astype(bf),
                     preferred_element_type=f32) + bqkv[None, :, None]
    qkv = qkv.reshape(B, 3, num_heads, hd, S)
    q = qkv[:, 0] * (1.0 / math.sqrt(hd))
    k = qkv[:, 1]
    v = qkv[:, 2]
    scores = jnp.einsum('bhds,bhdt->bhst', q.astype(bf), k.astype(bf),
                        preferred_element_type=f32)
    p = jax.nn.softmax(scores, axis=-1)
    ctx = jnp.einsum('bhdt,bhst->bhds', v.astype(bf), p.astype(bf),
                     preferred_element_type=f32)
    attn = jnp.einsum('oc,bcs->bos', wo.astype(bf),
                      ctx.reshape(B, C, S).astype(bf),
                      preferred_element_type=f32) + bo[None, :, None]
    x1 = xt + attn
    x2n = bn(x1, g2, be2, m2, va2)
    h1 = jnp.einsum('oc,bcs->bos', w1.astype(bf), x2n.astype(bf),
                    preferred_element_type=f32) + b1[None, :, None]
    h1 = jax.nn.gelu(h1, approximate=True)
    ff = jnp.einsum('oc,bcs->bos', w2.astype(bf), h1.astype(bf),
                    preferred_element_type=f32) + b2[None, :, None]
    return (x1 + ff).reshape(B, C, H, W)


if __name__ == "__main__":
    B, C, H, W = 2, 32, 16, 16          # S = H*W = 256 (lane-dense), head_dim = 8
    num_heads, mlp_ratio = 4, 4

    key = jax.random.PRNGKey(0)
    kx, kp = jax.random.split(key)
    x = jax.random.normal(kx, (B, C, H, W), dtype=jnp.float32)
    params = init_params(kp, C, num_heads, mlp_ratio)

    y = jax.block_until_ready(encoder_forward(x, params, num_heads=num_heads))
    y_ref = reference(x, params, num_heads)

    assert y.shape == x.shape
    max_err = float(jnp.max(jnp.abs(y - y_ref)))
    assert max_err < 1e-2, f"max_err={max_err}"

    print("KERNEL_OK")
</pallas_src>

<mosaic_0001>
module attributes {stable_mosaic.version = 11 : i64} {
  func.func @_encoder_kernel(%arg0: i32, %arg1: memref<1x32x256xf32, #tpu.memory_space<vmem>>, %arg2: memref<32x1xf32, #tpu.memory_space<vmem>>, %arg3: memref<32x1xf32, #tpu.memory_space<vmem>>, %arg4: memref<96x32xbf16, #tpu.memory_space<vmem>>, %arg5: memref<96x1xf32, #tpu.memory_space<vmem>>, %arg6: memref<32x32xbf16, #tpu.memory_space<vmem>>, %arg7: memref<32x1xf32, #tpu.memory_space<vmem>>, %arg8: memref<32x1xf32, #tpu.memory_space<vmem>>, %arg9: memref<32x1xf32, #tpu.memory_space<vmem>>, %arg10: memref<128x32xbf16, #tpu.memory_space<vmem>>, %arg11: memref<128x1xf32, #tpu.memory_space<vmem>>, %arg12: memref<32x128xbf16, #tpu.memory_space<vmem>>, %arg13: memref<32x1xf32, #tpu.memory_space<vmem>>, %arg14: memref<1x32x256xf32, #tpu.memory_space<vmem>>) attributes {dimension_semantics = [#tpu.dimension_semantics<parallel>], iteration_bounds = array<i64: 2>, scalar_prefetch = 0 : i64, scratch_operands = 0 : i64, tpu.core_type = #tpu.core_type<tc>, window_params = [{transform_indices = @transform_0, window_bounds = array<i64: 1, 32, 256>}, {pipeline_mode = #tpu.pipeline_mode<synchronous>, transform_indices = @transform_1, window_bounds = array<i64: 32, 1>}, {pipeline_mode = #tpu.pipeline_mode<synchronous>, transform_indices = @transform_2, window_bounds = array<i64: 32, 1>}, {pipeline_mode = #tpu.pipeline_mode<synchronous>, transform_indices = @transform_3, window_bounds = array<i64: 96, 32>}, {pipeline_mode = #tpu.pipeline_mode<synchronous>, transform_indices = @transform_4, window_bounds = array<i64: 96, 1>}, {pipeline_mode = #tpu.pipeline_mode<synchronous>, transform_indices = @transform_5, window_bounds = array<i64: 32, 32>}, {pipeline_mode = #tpu.pipeline_mode<synchronous>, transform_indices = @transform_6, window_bounds = array<i64: 32, 1>}, {pipeline_mode = #tpu.pipeline_mode<synchronous>, transform_indices = @transform_7, window_bounds = array<i64: 32, 1>}, {pipeline_mode = #tpu.pipeline_mode<synchronous>, transform_indices = @transform_8, window_bounds = array<i64: 32, 1>}, {pipeline_mode = #tpu.pipeline_mode<synchronous>, transform_indices = @transform_9, window_bounds = array<i64: 128, 32>}, {pipeline_mode = #tpu.pipeline_mode<synchronous>, transform_indices = @transform_10, window_bounds = array<i64: 128, 1>}, {pipeline_mode = #tpu.pipeline_mode<synchronous>, transform_indices = @transform_11, window_bounds = array<i64: 32, 128>}, {pipeline_mode = #tpu.pipeline_mode<synchronous>, transform_indices = @transform_12, window_bounds = array<i64: 32, 1>}, {transform_indices = @transform_13, window_bounds = array<i64: 1, 32, 256>}]} {
    %c0 = arith.constant 0 : index
    %c0_0 = arith.constant 0 : index
    %c0_1 = arith.constant 0 : index
    %0 = vector.load %arg1[%c0, %c0_0, %c0_1] : memref<1x32x256xf32, #tpu.memory_space<vmem>>, vector<1x32x256xf32>
    %1 = vector.shape_cast %0 : vector<1x32x256xf32> to vector<32x256xf32>
    %c0_2 = arith.constant 0 : index
    %c0_3 = arith.constant 0 : index
    %2 = vector.load %arg2[%c0_2, %c0_3] : memref<32x1xf32, #tpu.memory_space<vmem>>, vector<32x1xf32>
    %3 = vector.broadcast %2 : vector<32x1xf32> to vector<32x256xf32>
    %4 = arith.mulf %1, %3 : vector<32x256xf32>
    %c0_4 = arith.constant 0 : index
    %c0_5 = arith.constant 0 : index
    %5 = vector.load %arg3[%c0_4, %c0_5] : memref<32x1xf32, #tpu.memory_space<vmem>>, vector<32x1xf32>
    %6 = vector.broadcast %5 : vector<32x1xf32> to vector<32x256xf32>
    %7 = arith.addf %4, %6 : vector<32x256xf32>
    %8 = arith.truncf %7 : vector<32x256xf32> to vector<32x256xbf16>
    %c0_6 = arith.constant 0 : index
    %c0_7 = arith.constant 0 : index
    %9 = vector.load %arg4[%c0_6, %c0_7] : memref<96x32xbf16, #tpu.memory_space<vmem>>, vector<96x32xbf16>
    %cst = arith.constant dense<0.000000e+00> : vector<96x256xf32>
    %10 = tpu.matmul %9, %8, %cst {dimension_numbers = #tpu.dot_dimension_numbers<[1], [0], [0], [1], [0, 0, 1, 1], [], []>} : vector<96x32xbf16>, vector<32x256xbf16>, vector<96x256xf32> -> vector<96x256xf32>
    %c0_8 = arith.constant 0 : index
    %c0_9 = arith.constant 0 : index
    %11 = vector.load %arg5[%c0_8, %c0_9] : memref<96x1xf32, #tpu.memory_space<vmem>>, vector<96x1xf32>
    %12 = vector.broadcast %11 : vector<96x1xf32> to vector<96x256xf32>
    %13 = arith.addf %10, %12 : vector<96x256xf32>
    %14 = vector.shape_cast %13 : vector<96x256xf32> to vector<12x8x256xf32>
    %15 = vector.extract_strided_slice %14 {offsets = [0, 0, 0], sizes = [4, 8, 256], strides = [1, 1, 1]} : vector<12x8x256xf32> to vector<4x8x256xf32>
    %cst_10 = arith.constant 0.353553385 : f32
    %16 = vector.broadcast %cst_10 : f32 to vector<4x8x256xf32>
    %17 = arith.mulf %15, %16 : vector<4x8x256xf32>
    %18 = arith.truncf %17 : vector<4x8x256xf32> to vector<4x8x256xbf16>
    %19 = vector.extract_strided_slice %14 {offsets = [4, 0, 0], sizes = [4, 8, 256], strides = [1, 1, 1]} : vector<12x8x256xf32> to vector<4x8x256xf32>
    %20 = arith.truncf %19 : vector<4x8x256xf32> to vector<4x8x256xbf16>
    %21 = vector.extract_strided_slice %14 {offsets = [8, 0, 0], sizes = [4, 8, 256], strides = [1, 1, 1]} : vector<12x8x256xf32> to vector<4x8x256xf32>
    "tpu.trace_start"() <{level = 10 : i32, message = "hds,hdt->hst"}> : () -> ()
    %cst_11 = arith.constant dense<0.000000e+00> : vector<4x256x256xf32>
    %22 = tpu.matmul %18, %20, %cst_11 {dimension_numbers = #tpu.dot_dimension_numbers<[1], [1], [2], [2], [0, 0, 0, 2, 1, 2], [0], [0]>} : vector<4x8x256xbf16>, vector<4x8x256xbf16>, vector<4x256x256xf32> -> vector<4x256x256xf32>
    "tpu.trace_stop"() : () -> ()
    %cst_12 = arith.constant dense<0xFF800000> : vector<4x256xf32>
    %23 = vector.multi_reduction <maximumf>, %22, %cst_12 [2] : vector<4x256x256xf32> to vector<4x256xf32>
    %24 = vector.shape_cast %23 : vector<4x256xf32> to vector<4x256x1xf32>
    %25 = vector.broadcast %24 : vector<4x256x1xf32> to vector<4x256x256xf32>
    %26 = arith.subf %22, %25 : vector<4x256x256xf32>
    %27 = math.exp %26 : vector<4x256x256xf32>
    %cst_13 = arith.constant dense<0.000000e+00> : vector<4x256xf32>
    %28 = vector.multi_reduction <add>, %27, %cst_13 [2] : vector<4x256x256xf32> to vector<4x256xf32>
    %29 = vector.shape_cast %28 : vector<4x256xf32> to vector<4x256x1xf32>
    %30 = tpu.reciprocal %29 {approx = true} : vector<4x256x1xf32> -> vector<4x256x1xf32>
    %31 = vector.broadcast %30 : vector<4x256x1xf32> to vector<4x256x256xf32>
    %32 = arith.mulf %27, %31 : vector<4x256x256xf32>
    %33 = arith.truncf %21 : vector<4x8x256xf32> to vector<4x8x256xbf16>
    %34 = arith.truncf %32 : vector<4x256x256xf32> to vector<4x256x256xbf16>
    "tpu.trace_start"() <{level = 10 : i32, message = "hdt,hst->hds"}> : () -> ()
    %cst_14 = arith.constant dense<0.000000e+00> : vector<4x8x256xf32>
    %35 = tpu.matmul %33, %34, %cst_14 {dimension_numbers = #tpu.dot_dimension_numbers<[2], [2], [1], [1], [0, 0, 0, 1, 1, 1], [0], [0]>} : vector<4x8x256xbf16>, vector<4x256x256xbf16>, vector<4x8x256xf32> -> vector<4x8x256xf32>
    "tpu.trace_stop"() : () -> ()
    %36 = vector.shape_cast %35 : vector<4x8x256xf32> to vector<32x256xf32>
    %37 = arith.truncf %36 : vector<32x256xf32> to vector<32x256xbf16>
    %c0_15 = arith.constant 0 : index
    %c0_16 = arith.constant 0 : index
    %38 = vector.load %arg6[%c0_15, %c0_16] : memref<32x32xbf16, #tpu.memory_space<vmem>>, vector<32x32xbf16>
    %cst_17 = arith.constant dense<0.000000e+00> : vector<32x256xf32>
    %39 = tpu.matmul %38, %37, %cst_17 {dimension_numbers = #tpu.dot_dimension_numbers<[1], [0], [0], [1], [0, 0, 1, 1], [], []>} : vector<32x32xbf16>, vector<32x256xbf16>, vector<32x256xf32> -> vector<32x256xf32>
    %c0_18 = arith.constant 0 : index
    %c0_19 = arith.constant 0 : index
    %40 = vector.load %arg7[%c0_18, %c0_19] : memref<32x1xf32, #tpu.memory_space<vmem>>, vector<32x1xf32>
    %41 = vector.broadcast %40 : vector<32x1xf32> to vector<32x256xf32>
    %42 = arith.addf %39, %41 : vector<32x256xf32>
    %43 = arith.addf %1, %42 : vector<32x256xf32>
    %c0_20 = arith.constant 0 : index
    %c0_21 = arith.constant 0 : index
    %44 = vector.load %arg8[%c0_20, %c0_21] : memref<32x1xf32, #tpu.memory_space<vmem>>, vector<32x1xf32>
    %45 = vector.broadcast %44 : vector<32x1xf32> to vector<32x256xf32>
    %46 = arith.mulf %43, %45 : vector<32x256xf32>
    %c0_22 = arith.constant 0 : index
    %c0_23 = arith.constant 0 : index
    %47 = vector.load %arg9[%c0_22, %c0_23] : memref<32x1xf32, #tpu.memory_space<vmem>>, vector<32x1xf32>
    %48 = vector.broadcast %47 : vector<32x1xf32> to vector<32x256xf32>
    %49 = arith.addf %46, %48 : vector<32x256xf32>
    %50 = arith.truncf %49 : vector<32x256xf32> to vector<32x256xbf16>
    %c0_24 = arith.constant 0 : index
    %c0_25 = arith.constant 0 : index
    %51 = vector.load %arg10[%c0_24, %c0_25] : memref<128x32xbf16, #tpu.memory_space<vmem>>, vector<128x32xbf16>
    %cst_26 = arith.constant dense<0.000000e+00> : vector<128x256xf32>
    %52 = tpu.matmul %51, %50, %cst_26 {dimension_numbers = #tpu.dot_dimension_numbers<[1], [0], [0], [1], [0, 0, 1, 1], [], []>} : vector<128x32xbf16>, vector<32x256xbf16>, vector<128x256xf32> -> vector<128x256xf32>
    %c0_27 = arith.constant 0 : index
    %c0_28 = arith.constant 0 : index
    %53 = vector.load %arg11[%c0_27, %c0_28] : memref<128x1xf32, #tpu.memory_space<vmem>>, vector<128x1xf32>
    %54 = vector.broadcast %53 : vector<128x1xf32> to vector<128x256xf32>
    %55 = arith.addf %52, %54 : vector<128x256xf32>
    %56 = arith.mulf %55, %55 : vector<128x256xf32>
    %57 = arith.mulf %55, %56 : vector<128x256xf32>
    %cst_29 = arith.constant 4.471500e-02 : f32
    %58 = vector.broadcast %cst_29 : f32 to vector<128x256xf32>
    %59 = arith.mulf %58, %57 : vector<128x256xf32>
    %60 = arith.addf %55, %59 : vector<128x256xf32>
    %cst_30 = arith.constant 0.797884583 : f32
    %61 = vector.broadcast %cst_30 : f32 to vector<128x256xf32>
    %62 = arith.mulf %61, %60 : vector<128x256xf32>
    %63 = math.tanh %62 : vector<128x256xf32>
    %cst_31 = arith.constant 1.000000e+00 : f32
    %64 = vector.broadcast %cst_31 : f32 to vector<128x256xf32>
    %65 = arith.addf %64, %63 : vector<128x256xf32>
    %cst_32 = arith.constant 5.000000e-01 : f32
    %66 = vector.broadcast %cst_32 : f32 to vector<128x256xf32>
    %67 = arith.mulf %66, %65 : vector<128x256xf32>
    %68 = arith.mulf %55, %67 : vector<128x256xf32>
    %69 = arith.truncf %68 : vector<128x256xf32> to vector<128x256xbf16>
    %c0_33 = arith.constant 0 : index
    %c0_34 = arith.constant 0 : index
    %70 = vector.load %arg12[%c0_33, %c0_34] : memref<32x128xbf16, #tpu.memory_space<vmem>>, vector<32x128xbf16>
    %cst_35 = arith.constant dense<0.000000e+00> : vector<32x256xf32>
    %71 = tpu.matmul %70, %69, %cst_35 {dimension_numbers = #tpu.dot_dimension_numbers<[1], [0], [0], [1], [0, 0, 1, 1], [], []>} : vector<32x128xbf16>, vector<128x256xbf16>, vector<32x256xf32> -> vector<32x256xf32>
    %c0_36 = arith.constant 0 : index
    %c0_37 = arith.constant 0 : index
    %72 = vector.load %arg13[%c0_36, %c0_37] : memref<32x1xf32, #tpu.memory_space<vmem>>, vector<32x1xf32>
    %73 = vector.broadcast %72 : vector<32x1xf32> to vector<32x256xf32>
    %74 = arith.addf %71, %73 : vector<32x256xf32>
    %75 = arith.addf %43, %74 : vector<32x256xf32>
    %c0_38 = arith.constant 0 : index
    %c0_39 = arith.constant 0 : index
    %c0_40 = arith.constant 0 : index
    %76 = vector.load %arg14[%c0_38, %c0_39, %c0_40] : memref<1x32x256xf32, #tpu.memory_space<vmem>>, vector<1x32x256xf32>
    %77 = vector.shape_cast %76 : vector<1x32x256xf32> to vector<32x256xf32>
    %78 = vector.shape_cast %75 : vector<32x256xf32> to vector<1x32x256xf32>
    tpu.vector_store %arg14[%c0_38, %c0_39, %c0_40], %78 {strides = array<i32>} : memref<1x32x256xf32, #tpu.memory_space<vmem>>, vector<1x32x256xf32>,
    return
  }
  func.func @transform_0(%arg0: i32) -> (i32, i32, i32) {
    %c0_i32 = arith.constant 0 : i32
    %c0_i32_0 = arith.constant 0 : i32
    %c0_i32_1 = arith.constant 0 : i32
    return %arg0, %c0_i32, %c0_i32_0 : i32, i32, i32
  }
  func.func @transform_1(%arg0: i32) -> (i32, i32) {
    %c0_i32 = arith.constant 0 : i32
    %c0_i32_0 = arith.constant 0 : i32
    %c0_i32_1 = arith.constant 0 : i32
    return %c0_i32, %c0_i32_0 : i32, i32
  }
  func.func @transform_2(%arg0: i32) -> (i32, i32) {
    %c0_i32 = arith.constant 0 : i32
    %c0_i32_0 = arith.constant 0 : i32
    %c0_i32_1 = arith.constant 0 : i32
    return %c0_i32, %c0_i32_0 : i32, i32
  }
  func.func @transform_3(%arg0: i32) -> (i32, i32) {
    %c0_i32 = arith.constant 0 : i32
    %c0_i32_0 = arith.constant 0 : i32
    %c0_i32_1 = arith.constant 0 : i32
    return %c0_i32, %c0_i32_0 : i32, i32
  }
  func.func @transform_4(%arg0: i32) -> (i32, i32) {
    %c0_i32 = arith.constant 0 : i32
    %c0_i32_0 = arith.constant 0 : i32
    %c0_i32_1 = arith.constant 0 : i32
    return %c0_i32, %c0_i32_0 : i32, i32
  }
  func.func @transform_5(%arg0: i32) -> (i32, i32) {
    %c0_i32 = arith.constant 0 : i32
    %c0_i32_0 = arith.constant 0 : i32
    %c0_i32_1 = arith.constant 0 : i32
    return %c0_i32, %c0_i32_0 : i32, i32
  }
  func.func @transform_6(%arg0: i32) -> (i32, i32) {
    %c0_i32 = arith.constant 0 : i32
    %c0_i32_0 = arith.constant 0 : i32
    %c0_i32_1 = arith.constant 0 : i32
    return %c0_i32, %c0_i32_0 : i32, i32
  }
  func.func @transform_7(%arg0: i32) -> (i32, i32) {
    %c0_i32 = arith.constant 0 : i32
    %c0_i32_0 = arith.constant 0 : i32
    %c0_i32_1 = arith.constant 0 : i32
    return %c0_i32, %c0_i32_0 : i32, i32
  }
  func.func @transform_8(%arg0: i32) -> (i32, i32) {
    %c0_i32 = arith.constant 0 : i32
    %c0_i32_0 = arith.constant 0 : i32
    %c0_i32_1 = arith.constant 0 : i32
    return %c0_i32, %c0_i32_0 : i32, i32
  }
  func.func @transform_9(%arg0: i32) -> (i32, i32) {
    %c0_i32 = arith.constant 0 : i32
    %c0_i32_0 = arith.constant 0 : i32
    %c0_i32_1 = arith.constant 0 : i32
    return %c0_i32, %c0_i32_0 : i32, i32
  }
  func.func @transform_10(%arg0: i32) -> (i32, i32) {
    %c0_i32 = arith.constant 0 : i32
    %c0_i32_0 = arith.constant 0 : i32
    %c0_i32_1 = arith.constant 0 : i32
    return %c0_i32, %c0_i32_0 : i32, i32
  }
  func.func @transform_11(%arg0: i32) -> (i32, i32) {
    %c0_i32 = arith.constant 0 : i32
    %c0_i32_0 = arith.constant 0 : i32
    %c0_i32_1 = arith.constant 0 : i32
    return %c0_i32, %c0_i32_0 : i32, i32
  }
  func.func @transform_12(%arg0: i32) -> (i32, i32) {
    %c0_i32 = arith.constant 0 : i32
    %c0_i32_0 = arith.constant 0 : i32
    %c0_i32_1 = arith.constant 0 : i32
    return %c0_i32, %c0_i32_0 : i32, i32
  }
  func.func @transform_13(%arg0: i32) -> (i32, i32, i32) {
    %c0_i32 = arith.constant 0 : i32
    %c0_i32_0 = arith.constant 0 : i32
    %c0_i32_1 = arith.constant 0 : i32
    return %arg0, %c0_i32, %c0_i32_0 : i32, i32, i32
  }
}

</mosaic_0001>

<bundles_post_ra>
// kernel: tpu_custom_call.1
= control target key start
LH: loop header
LB: loop body
LE: loop exit
PB: predicated region body
PF: predicated region fallthrough
CT: control target
= control target key end

     0   :  { %18 = vsyncpa [#allocation3], 0  ;;  %s10076_s0 = inlined_call_operand.vmem [shape: f32[2,32,256], index: 0, kind: input, shape index: {}]   ;;  %s10077_s1 = inlined_call_operand.vmem [shape: f32[32,1], index: 1, kind: input, shape index: {}]   ;;  %s10078_s2 = inlined_call_operand.vmem [shape: f32[32,1], index: 2, kind: input, shape index: {}]   ;;  %s10079_s3 = inlined_call_operand.vmem [shape: bf16[96,32], index: 3, kind: input, shape index: {}]   ;;  %s10080_s4 = inlined_call_operand.vmem [shape: f32[96,1], index: 4, kind: input, shape index: {}]   ;;  %s10081_s5 = inlined_call_operand.vmem [shape: bf16[32,32], index: 5, kind: input, shape index: {}]   ;;  %s10082_s6 = inlined_call_operand.vmem [shape: f32[32,1], index: 6, kind: input, shape index: {}]   ;;  %s10083_s7 = inlined_call_operand.vmem [shape: f32[32,1], index: 7, kind: input, shape index: {}]   ;;  %s10084_s8 = inlined_call_operand.vmem [shape: f32[32,1], index: 8, kind: input, shape index: {}]   ;;  %s10085_s9 = inlined_call_operand.vmem [shape: bf16[128,32], index: 9, kind: input, shape index: {}]   ;;  %s10086_s10 = inlined_call_operand.vmem [shape: f32[128,1], index: 10, kind: input, shape index: {}]   ;;  %s10087_s11 = inlined_call_operand.vmem [shape: bf16[32,128], index: 11, kind: input, shape index: {}]   ;;  %s10088_s12 = inlined_call_operand.vmem [shape: f32[32,1], index: 12, kind: input, shape index: {}]   ;;  %s10089_s13 = inlined_call_operand.hbm [shape: f32[2,32,256], index: 13, kind: output, shape index: {}]  }
   0x1   :  { %20 = vsyncpa [#allocation3 + $0x1], 0  ;;  %s6231_s25 = smov 0   ;;  %s6233_s26 = smov 0  }
   0x2   :  { %s6235_s27 = smov 0   ;;  %s6237_s28 = smov 0  }
   0x3 LB: > { %10706 = sst [smem:[#allocation5_spill]] %s6151_s27  ;;  %s6252_s29 = sadd.s32 4294967295, %s6155_s28   ;;  %s6155_s28 = sphi %s6237_s28, %s11889_s28   ;;  %s6151_s27 = sphi %s6235_s27, %s11886_s27   ;;  %s6147_s26 = sphi %s6233_s26, %s11888_s26   ;;  %s6143_s25 = sphi %s6231_s25, %s11887_s25  }
   0x4   : > { %s5059_s30 = sadd.s32 4294967294, %s6155_s28   ;;  %s6256_s14 = sadd.s32 1, %s6155_s28  }
   0x5   : > { %s311_s15 = sadd.s32 1, %s6151_s27  ;;  %s308_s16 = ssub.s32 %s6155_s28, %s6256_s14 }
   0x6   : > { %p321_p0 = scmp.ne.s32.totalorder %s6151_s27, %s6147_s26  ;;  %p309_p1 = scmp.eq.s32.totalorder %s308_s16, 0 }
   0x7   : > { %p322_p2 = scmp.eq.s32.totalorder %s6252_s29, 1  ;;  %p327_p3 = scmp.ne.s32.totalorder %s6147_s26, %s6143_s25 }
   0x8   : > { %p328_p4 = scmp.eq.s32.totalorder %s5059_s30, 1  ;;  %p5062_p7 = scmp.ge.s32.totalorder %s6155_s28, 1 }
   0x9   : > { %s6267_s17 = scalar_select %p309_p1, %s6151_s27, %s311_s15  }
   0xa   : > { %p6269_p5 = por %p322_p2, %p321_p0  ;;  %p6273_p6 = por %p328_p4, %p327_p3 }
   0xb   : > { %10707 = sst [smem:[#allocation6_spill]] %s6267_s17  ;;  %p390_p8 = scmp.lt.s32.totalorder %s6155_s28, 3 }
   0xd   : > { %p391_p9 = pnand %p5062_p7, %p390_p8 }
   0xf   : > { %394 = sbr.rel (%p391_p9) target bundleno = 2409 (0x969), region = 72 }
  0x16   : > { %v480_v0 = vld [vmem:[%s10078_s2] sm:$0xff]  ;;  %v10091_v2 = vmov 0   ;;  %v481_v3 = vld [vmem:[%s10078_s2 + $0x8] sm:$0xff]  ;;  %v451_v5 = vld [vmem:[%s10077_s1 + $0x18] sm:$0xff]  ;;  %p434_p10 = scmp.lt.s32.totalorder %s6252_s29, 1  ;;  %vm630_vm0 = vcmask 261120  }
  0x17   : > { %v448_v1 = vld [vmem:[%s10077_s1] sm:$0xff]  ;;  %5234 = vset.pattern.permute.xlu1 %v10091_v2  ;;  %5233 = vset.pattern.permute.xlu0 %v10091_v2  ;;  %v449_v4 = vld [vmem:[%s10077_s1 + $0x8] sm:$0xff]  ;;  %v450_v6 = vld [vmem:[%s10077_s1 + $0x10] sm:$0xff]  ;;  %vm847_vm1 = vcmask 1043456   ;;  %vm798_vm2 = vcmask 64512   ;;  %s5174_s17 = sshll.u32 %s6252_s29, 10 }
  0x18   : > { %486 = vperm.xlu1 %5234, %v480_v0   ;;  %454 = vperm.xlu0 %5233, %v448_v1   ;;  %v483_v7 = vld [vmem:[%s10078_s2 + $0x18] sm:$0xff]  ;;  %v482_v8 = vld [vmem:[%s10078_s2 + $0x10] sm:$0xff]  ;;  %v529_v9 = vld [vmem:[%s10080_s4 + $0x8] sm:$0xff]  ;;  %s435_s15 = scalar_select %p434_p10, %s6252_s29, 1 }
  0x19   : > { %681 = vmatprep.mubr.bf16.mxu0 %v10091_v2  ;;  %886 = vmatprep.mubr.bf16.mxu1 %v10091_v2  ;;  %v528_v10 = vld [vmem:[%s10080_s4] sm:$0xff]  ;;  %v533_v11 = vld [vmem:[%s10080_s4 + $0x28] sm:$0xff]  ;;  %v531_v13 = vld [vmem:[%s10080_s4 + $0x18] sm:$0xff]  ;;  %s10027_s21 = scalar_lea.hbm %s10089_s13, %s5174_s17  ;;  %s6158_s30 = smov [#allocation2]  }
  0x1a   : > { %v532_v12 = vld [vmem:[%s10080_s4 + $0x20] sm:$0xff]  ;;  %v530_v14 = vld [vmem:[%s10080_s4 + $0x10] sm:$0xff]  ;;  %v535_v15 = vld [vmem:[%s10080_s4 + $0x38] sm:$0xff]  ;;  %s5173_s16 = sshll.u32 %s435_s15, 6 }
  0x1b   : > { %v534_v16 = vld [vmem:[%s10080_s4 + $0x30] sm:$0xff]  ;;  %v536_v17 = vld [vmem:[%s10080_s4 + $0x40] sm:$0xff]  ;;  %v537_v18 = vld [vmem:[%s10080_s4 + $0x48] sm:$0xff]  ;;  %s6342_s22 = scalar_lea.vmem %s10076_s0, %s5173_s16 }
  0x1c   : > { %491 = vperm.xlu1 %5234, %v481_v3   ;;  %459 = vperm.xlu0 %5233, %v449_v4   ;;  %v440_v21 = vld [vmem:[%s6342_s22] sm:$0xff]  ;;  %v441_v22 = vld [vmem:[%s6342_s22 + $0x8] sm:$0xff]  ;;  %v442_v23 = vld [vmem:[%s6342_s22 + $0x10] sm:$0xff] }
  0x1d   : > { %v443_v24 = vld [vmem:[%s6342_s22 + $0x18] sm:$0xff]  ;;  %v446_v31 = vld [vmem:[%s6342_s22 + $0x30] sm:$0xff]  ;;  %v444_v37 = vld [vmem:[%s6342_s22 + $0x20] sm:$0xff] }
  0x1e   : > { %v447_v35 = vld [vmem:[%s6342_s22 + $0x38] sm:$0xff]  ;;  %v445_v38 = vld [vmem:[%s6342_s22 + $0x28] sm:$0xff]  ;;  %v5235_v55 = vld [vmem:[%s10079_s3] sm:$0xff]  }
  0x1f   : > { %v5236_v56 = vld [vmem:[%s10079_s3 + $0x8] sm:$0xff]   ;;  %v5237_v57 = vld [vmem:[%s10079_s3 + $0x10] sm:$0xff]   ;;  %v5238_v58 = vld [vmem:[%s10079_s3 + $0x18] sm:$0xff]  }
  0x20   : > { %469 = vperm.xlu1 %5234, %v451_v5   ;;  %464 = vperm.xlu0 %5233, %v450_v6   ;;  %v5239_v59 = vld [vmem:[%s10079_s3 + $0x20] sm:$0xff]   ;;  %v5240_v60 = vld [vmem:[%s10079_s3 + $0x28] sm:$0xff]  }
  0x24   : > { %501 = vperm.xlu1 %5234, %v483_v7   ;;  %496 = vperm.xlu0 %5233, %v482_v8  }
  0x28   : > { %547 = vperm.xlu1 %5234, %v529_v9   ;;  %542 = vperm.xlu0 %5233, %v528_v10  }
  0x2c   : > { %567 = vperm.xlu1 %5234, %v533_v11   ;;  %562 = vperm.xlu0 %5233, %v532_v12  }
  0x30   : > { %557 = vperm.xlu1 %5234, %v531_v13   ;;  %552 = vperm.xlu0 %5233, %v530_v14  }
  0x34   : > { %577 = vperm.xlu1 %5234, %v535_v15   ;;  %572 = vperm.xlu0 %5233, %v534_v16  }
  0x38   : > { %582 = vperm.xlu1 %5234, %v536_v17   ;;  %587 = vperm.xlu0 %5233, %v537_v18  }
  0x97   : > { %v487_v19 = vpop.permute.xlu1 %486  ;;  %v455_v20 = vpop.permute.xlu0 %454 }
  0x98   : > { %v472_v25 = vmul.f32 %v455_v20, %v440_v21  ;;  %v473_v26 = vmul.f32 %v455_v20, %v441_v22 }
  0x9a   : > { %v505_v39 = vadd.f32 %v487_v19, %v473_v26  ;;  %v504_v40 = vadd.f32 %v487_v19, %v472_v25 }
  0x9b   : > { %v492_v27 = vpop.permute.xlu1 %491  ;;  %v460_v28 = vpop.permute.xlu0 %459 }
  0x9c   : > { %v474_v29 = vmul.f32 %v460_v28, %v442_v23  ;;  %v475_v30 = vmul.f32 %v460_v28, %v443_v24 }
  0x9e   : > { %v507_v32 = vadd.f32 %v492_v27, %v475_v30  ;;  %v506_v33 = vadd.f32 %v492_v27, %v474_v29 }
  0x9f   : > { %v470_v34 = vpop.permute.xlu1 %469  ;;  %v465_v36 = vpop.permute.xlu0 %464 }
  0xa0   : > { %v513_v41 = vpack.c.bf16 %v507_v32, %v505_v39  ;;  %v512_v42 = vpack.c.bf16 %v506_v33, %v504_v40  ;;  %v478_v43 = vmul.f32 %v470_v34, %v446_v31  ;;  %v479_v44 = vmul.f32 %v470_v34, %v447_v35 }
  0xa1   : > { %v476_v45 = vmul.f32 %v465_v36, %v444_v37  ;;  %v477_v46 = vmul.f32 %v465_v36, %v445_v38 }
  0xa2   : > { %649 = vmatprep.subr.bf16.mxu0 %v513_v41 }
  0xa3   : > { %v502_v47 = vpop.permute.xlu1 %501  ;;  %v497_v48 = vpop.permute.xlu0 %496  ;;  %650 = vmatpush1.bf16.msra.mxu0 %v512_v42 }
  0xa4   : > { %v510_v49 = vadd.f32 %v502_v47, %v478_v43  ;;  %v511_v50 = vadd.f32 %v502_v47, %v479_v44  ;;  %v508_v51 = vadd.f32 %v497_v48, %v476_v45  ;;  %v509_v52 = vadd.f32 %v497_v48, %v477_v46 }
  0xa6   : > { %v515_v53 = vpack.c.bf16 %v511_v50, %v509_v52  ;;  %v514_v54 = vpack.c.bf16 %v510_v49, %v508_v51 }
  0xa7   : > { %v543_v61 = vpop.permute.xlu0 %542  ;;  %v548_v1 = vpop.permute.xlu1 %547 }
  0xa8   : > { %651 = vmatprep.subr.bf16.mxu0 %v515_v53 }
  0xa9   : > { %652 = vmatpush1.bf16.msra.mxu0 %v514_v54 }
  0xab   : > { %v563_v14 = vpop.permute.xlu0 %562  ;;  %v568_v15 = vpop.permute.xlu1 %567 }
  0xac   : > { %5072 = vmatmul.mubr.msk.bf16.vlgmr.msra.gmra.mrb[0].mxu0 %vm630_vm0, %v5235_v55 }
  0xad   : > { %691 = vmatprep.mubr.bf16.mxu0 %v10091_v2 }
  0xaf   : > { %v553_v19 = vpop.permute.xlu0 %552  ;;  %v558_v25 = vpop.permute.xlu1 %557 }
  0xb3   : > { %v573_v32 = vpop.permute.xlu0 %572  ;;  %v578_v36 = vpop.permute.xlu1 %577 }
  0xb4   : > { %5073 = vmatmul.mubr.msk.bf16.gmra.mrb[4].mxu0 %vm630_vm0, %v5236_v56 }
  0xb5   : > { %701 = vmatprep.mubr.bf16.mxu0 %v10091_v2 }
  0xbc   : > { %5074 = vmatmul.mubr.msk.bf16.gmra.mrb[8].mxu0 %vm630_vm0, %v5237_v57 }
  0xbd   : > { %711 = vmatprep.mubr.bf16.mxu0 %v10091_v2 }
  0xc4   : > { %5075 = vmatmul.mubr.msk.bf16.gmra.mrb[12].mxu0 %vm630_vm0, %v5238_v58 }
  0xc5   : > { %721 = vmatprep.mubr.bf16.mxu0 %v10091_v2 }
  0xcc   : > { %5076 = vmatmul.mubr.msk.bf16.gmra.mrb[16].mxu0 %vm630_vm0, %v5239_v59 }
  0xcd   : > { %731 = vmatprep.mubr.bf16.mxu0 %v10091_v2 }
  0xd4   : > { %5077 = vmatmul.mubr.msk.bf16.gmra.mrb[20].mxu0 %vm630_vm0, %v5240_v60 }
  0xd5   : > { %1165 = vmatprep.mubr.bf16.mxu0 %v10091_v2 }
 0x17f   : > { %v683_v62 = vpop.f32.mrb[0].mxu0 }
 0x180   : > { %v684_v63 = vadd.f32 %v683_v62, %v543_v61  ;;  %v685_v0 = vpop.f32.mrb[1].mxu0 }
 0x181   : > { %v687_v3 = vpop.f32.mrb[2].mxu0  ;;  %v686_v37 = vadd.f32 %v685_v0, %v543_v61 }
 0x182   : > { %v742_v4 = vmul.f32 0.35355338, %v684_v63  ;;  %v688_v5 = vadd.f32 %v687_v3, %v548_v1  ;;  %v689_v6 = vpop.f32.mrb[3].mxu0 }
 0x183   : > { %v690_v43 = vadd.f32 %v689_v6, %v548_v1  ;;  %v743_v48 = vmul.f32 0.35355338, %v686_v37 }
 0x184   : > { %v750_v7 = vpack.c.bf16 %v742_v4, %v742_v4  ;;  %v744_v8 = vmul.f32 0.35355338, %v688_v5 }
 0x185   : > { %v745_v51 = vmul.f32 0.35355338, %v690_v43  ;;  %v751_v54 = vpack.c.bf16 %v743_v48, %v743_v48 }
 0x186   : > { %v752_v9 = vpack.c.bf16 %v744_v8, %v744_v8  ;;  %766 = vxpose.xlu0.c.b16.start.end [1/1] (short) %v750_v7, 128  ;;  %v6404_v7 = vpop.permute.xlu0 %587  ;;  %v6406_v8 = vpop.permute.xlu1 %582 }
 0x187   : > { %v693_v10 = vpop.f32.mrb[4].mxu0  ;;  %v753_v57 = vpack.c.bf16 %v745_v51, %v745_v51  ;;  %10712 = vst [vmem:[#allocation9_spill] sm:$0xff] %v6404_v7  ;;  %10713 = vst [vmem:[#allocation10_spill] sm:$0xff] %v6406_v8 }
 0x188   : > { %v6382_v11 = vpop.f32.mrb[5].mxu0  ;;  %1047 = vxpose.xlu1.c.b16.start.end [1/1] (short) %v752_v9, 128  ;;  %v694_v58 = vadd.f32 %v693_v10, %v553_v19 }
 0x189   : > { %v697_v12 = vpop.f32.mrb[6].mxu0  ;;  %v696_v0 = vadd.f32 %v6382_v11, %v553_v19 }
 0x18a   : > { %v6384_v13 = vpop.f32.mrb[7].mxu0  ;;  %v698_v59 = vadd.f32 %v697_v12, %v558_v25  ;;  %v746_v60 = vmul.f32 0.35355338, %v694_v58 }
 0x18b   : > { %v700_v1 = vadd.f32 %v6384_v13, %v558_v25  ;;  %v747_v3 = vmul.f32 0.35355338, %v696_v0 }
 0x18c   : > { %v748_v61 = vmul.f32 0.35355338, %v698_v59  ;;  %v754_v62 = vpack.c.bf16 %v746_v60, %v746_v60 }
 0x18d   : > { %v749_v4 = vmul.f32 0.35355338, %v700_v1  ;;  %v755_v5 = vpack.c.bf16 %v747_v3, %v747_v3 }
 0x18e   : > { %v756_v63 = vpack.c.bf16 %v748_v61, %v748_v61 }
 0x18f   : > { %v703_v16 = vpop.f32.mrb[8].mxu0  ;;  %v757_v6 = vpack.c.bf16 %v749_v4, %v749_v4 }
 0x190   : > { %v704_v17 = vadd.f32 %v703_v16, %v563_v14  ;;  %v705_v18 = vpop.f32.mrb[9].mxu0 }
 0x191   : > { %v706_v20 = vadd.f32 %v705_v18, %v563_v14  ;;  %v707_v21 = vpop.f32.mrb[10].mxu0 }
 0x192   : > { %v758_v22 = vpack.c.bf16 %v704_v17, %v704_v17  ;;  %v708_v23 = vadd.f32 %v707_v21, %v568_v15  ;;  %v709_v24 = vpop.f32.mrb[11].mxu0 }
 0x193   : > { %v759_v26 = vpack.c.bf16 %v706_v20, %v706_v20  ;;  %v710_v27 = vadd.f32 %v709_v24, %v568_v15 }
 0x194   : > { %v760_v28 = vpack.c.bf16 %v708_v23, %v708_v23  ;;  %v849_v29 = vsel %vm847_vm1, %v758_v22, 0 }
 0x195   : > { %v761_v30 = vpack.c.bf16 %v710_v27, %v710_v27  ;;  %5078 = vmatprep.subr.msk.bf16.mxu1 %vm847_vm1, %v759_v26 }
 0x196   : > { %v1128_v31 = vsel %vm847_vm1, %v760_v28, 0  ;;  %855 = vmatpush1.bf16.msra.mxu1 %v849_v29 }
 0x197   : > { %v713_v33 = vpop.f32.mrb[12].mxu0  ;;  %5095 = vmatprep.subr.msk.bf16.mxu0 %vm847_vm1, %v761_v30 }
 0x198   : > { %v714_v34 = vadd.f32 %v713_v33, %v573_v32  ;;  %v715_v35 = vpop.f32.mrb[13].mxu0  ;;  %1134 = vmatpush1.bf16.msra.mxu0 %v1128_v31 }
 0x199   : > { %v716_v38 = vadd.f32 %v715_v35, %v573_v32  ;;  %v717_v39 = vpop.f32.mrb[14].mxu0 }
 0x19a   : > { %v762_v40 = vpack.c.bf16 %v714_v34, %v714_v34  ;;  %v718_v41 = vadd.f32 %v717_v39, %v578_v36  ;;  %v719_v42 = vpop.f32.mrb[15].mxu0 }
 0x19b   : > { %v763_v44 = vpack.c.bf16 %v716_v38, %v716_v38  ;;  %v720_v45 = vadd.f32 %v719_v42, %v578_v36 }
 0x19c   : > { %v1407_v46 = vsel %vm847_vm1, %v762_v40, 0  ;;  %v764_v47 = vpack.c.bf16 %v718_v41, %v718_v41 }
 0x19d   : > { %v765_v49 = vpack.c.bf16 %v720_v45, %v720_v45  ;;  %5112 = vmatprep.subr.msk.bf16.mxu1 %vm847_vm1, %v763_v44 }
 0x19e   : > { %v1686_v50 = vsel %vm847_vm1, %v764_v47, 0 }
 0x19f   : > { %v6393_v52 = vpop.f32.mrb[16].mxu0  ;;  %5129 = vmatprep.subr.msk.bf16.mxu0 %vm847_vm1, %v765_v49 }
 0x1a0   : > { %10710 = vst [vmem:[#allocation7_spill] sm:$0xff] %v6393_v52  ;;  %v6396_v53 = vpop.f32.mrb[17].mxu0 }
 0x1a1   : > { %v6398_v55 = vpop.f32.mrb[18].mxu0 }
 0x1a2   : > { %10711 = vst [vmem:[#allocation8_spill] sm:$0xff] %v6398_v55  ;;  %v6400_v56 = vpop.f32.mrb[19].mxu0 }
 0x1a3   : > { %782 = vxpose.xlu0.c.b16.start.end [1/1] (short) %v751_v54, 128 }
 0x1a5   : > { %1063 = vxpose.xlu1.c.b16.start.end [1/1] (short) %v753_v57, 128 }
 0x1a7   : > { %v6447_v29 = vpop.f32.mrb[20].mxu0 }
 0x1a8   : > { %10714 = vst [vmem:[#allocation11_spill] sm:$0xff] %v6447_v29  ;;  %v6450_v30 = vpop.f32.mrb[21].mxu0 }
 0x1a9   : > { %10715 = vst [vmem:[#allocation12_spill] sm:$0xff] %v6450_v30  ;;  %v6452_v31 = vpop.f32.mrb[22].mxu0 }
 0x1aa   : > { %10716 = vst [vmem:[#allocation13_spill] sm:$0xff] %v6452_v31  ;;  %v6454_v33 = vpop.f32.mrb[23].mxu0 }
 0x1ab   : > { %10717 = vst [vmem:[#allocation14_spill] sm:$0xff] %v6454_v33 }
 0x1c0   : > { %1326 = vxpose.xlu0.c.b16.start.end [1/1] (short) %v754_v62, 128 }
 0x1c2   : > { %1605 = vxpose.xlu1.c.b16.start.end [1/1] (short) %v756_v63, 128 }
 0x1dd   : > { %1342 = vxpose.xlu0.c.b16.start.end [1/1] (short) %v755_v5, 128 }
 0x1df   : > { %1621 = vxpose.xlu1.c.b16.start.end [1/1] (short) %v757_v6, 128 }
 0x1ec   : > { %v774_v9 = vpop.trf.xlu0 }
 0x1ed   : > { %5079 = vmatmul.mubr.msk.bf16.vlgmr.msra.gmra.mrb[0].mxu1 %vm798_vm2, %v774_v9 }
 0x1ee   : > { %1413 = vmatpush1.bf16.msra.mxu1 %v1407_v46  ;;  %v1055_v10 = vpop.trf.xlu1  ;;  %896 = vmatprep.mubr.bf16.mxu1 %v10091_v2 }
 0x1ef   : > { %5096 = vmatmul.mubr.msk.bf16.vlgmr.msra.gmra.mrb[24].mxu0 %vm798_vm2, %v1055_v10 }
 0x1f0   : > { %1692 = vmatpush1.bf16.msra.mxu0 %v1686_v50  ;;  %1175 = vmatprep.mubr.bf16.mxu0 %v10091_v2  ;;  %v775_v11 = vpop.trf.xlu0 }
 0x1f2   : > { %v1056_v12 = vpop.trf.xlu1 }
 0x1f4   : > { %v776_v13 = vpop.trf.xlu0 }
 0x1f5   : > { %5080 = vmatmul.mubr.msk.bf16.gmra.mrb[4].mxu1 %vm798_vm2, %v775_v11 }
 0x1f6   : > { %906 = vmatprep.mubr.bf16.mxu1 %v10091_v2  ;;  %v1057_v14 = vpop.trf.xlu1 }
 0x1f7   : > { %5097 = vmatmul.mubr.msk.bf16.gmra.mrb[28].mxu0 %vm798_vm2, %v1056_v12 }
 0x1f8   : > { %1185 = vmatprep.mubr.bf16.mxu0 %v10091_v2  ;;  %v777_v15 = vpop.trf.xlu0 }
 0x1fa   : > { %v1058_v16 = vpop.trf.xlu1 }
 0x1fc   : > { %v778_v17 = vpop.trf.xlu0 }
 0x1fd   : > { %5081 = vmatmul.mubr.msk.bf16.gmra.mrb[8].mxu1 %vm798_vm2, %v776_v13 }
 0x1fe   : > { %916 = vmatprep.mubr.bf16.mxu1 %v10091_v2  ;;  %v1059_v18 = vpop.trf.xlu1 }
 0x1ff   : > { %5098 = vmatmul.mubr.msk.bf16.gmra.mrb[32].mxu0 %vm798_vm2, %v1057_v14 }
 0x200   : > { %1195 = vmatprep.mubr.bf16.mxu0 %v10091_v2  ;;  %v779_v19 = vpop.trf.xlu0 }
 0x202   : > { %v1060_v20 = vpop.trf.xlu1 }
 0x204   : > { %v780_v21 = vpop.trf.xlu0 }
 0x205   : > { %5082 = vmatmul.mubr.msk.bf16.gmra.mrb[12].mxu1 %vm798_vm2, %v777_v15 }
 0x206   : > { %926 = vmatprep.mubr.bf16.mxu1 %v10091_v2  ;;  %v1061_v22 = vpop.trf.xlu1 }
 0x207   : > { %5099 = vmatmul.mubr.msk.bf16.gmra.mrb[36].mxu0 %vm798_vm2, %v1058_v16 }
 0x208   : > { %1205 = vmatprep.mubr.bf16.mxu0 %v10091_v2  ;;  %v781_v23 = vpop.trf.xlu0 }
 0x20a   : > { %v1062_v24 = vpop.trf.xlu1 }
 0x20c   : > { %v790_v25 = vpop.trf.xlu0 }
 0x20d   : > { %5083 = vmatmul.mubr.msk.bf16.gmra.mrb[16].mxu1 %vm798_vm2, %v778_v17 }
 0x20e   : > { %936 = vmatprep.mubr.bf16.mxu1 %v10091_v2  ;;  %v1071_v26 = vpop.trf.xlu1 }
 0x20f   : > { %5100 = vmatmul.mubr.msk.bf16.gmra.mrb[40].mxu0 %vm798_vm2, %v1059_v18 }
 0x210   : > { %1215 = vmatprep.mubr.bf16.mxu0 %v10091_v2  ;;  %v791_v27 = vpop.trf.xlu0 }
 0x212   : > { %v1072_v28 = vpop.trf.xlu1 }
 0x214   : > { %v792_v32 = vpop.trf.xlu0 }
 0x215   : > { %5084 = vmatmul.mubr.msk.bf16.gmra.mrb[20].mxu1 %vm798_vm2, %v779_v19 }
 0x216   : > { %946 = vmatprep.mubr.bf16.mxu1 %v10091_v2  ;;  %v1073_v34 = vpop.trf.xlu1 }
 0x217   : > { %5101 = vmatmul.mubr.msk.bf16.gmra.mrb[44].mxu0 %vm798_vm2, %v1060_v20 }
 0x218   : > { %1225 = vmatprep.mubr.bf16.mxu0 %v10091_v2  ;;  %v793_v35 = vpop.trf.xlu0 }
 0x21a   : > { %v1074_v36 = vpop.trf.xlu1 }
 0x21c   : > { %v794_v37 = vpop.trf.xlu0 }
 0x21d   : > { %5085 = vmatmul.mubr.msk.bf16.gmra.mrb[24].mxu1 %vm798_vm2, %v780_v21 }
 0x21e   : > { %956 = vmatprep.mubr.bf16.mxu1 %v10091_v2  ;;  %v1075_v38 = vpop.trf.xlu1 }
 0x21f   : > { %5102 = vmatmul.mubr.msk.bf16.gmra.mrb[48].mxu0 %vm798_vm2, %v1061_v22 }
 0x220   : > { %1235 = vmatprep.mubr.bf16.mxu0 %v10091_v2  ;;  %v795_v39 = vpop.trf.xlu0 }
 0x222   : > { %v1076_v40 = vpop.trf.xlu1 }
 0x224   : > { %v796_v41 = vpop.trf.xlu0 }
 0x225   : > { %5086 = vmatmul.mubr.msk.bf16.gmra.mrb[28].mxu1 %vm798_vm2, %v781_v23 }
 0x226   : > { %966 = vmatprep.mubr.bf16.mxu1 %v10091_v2  ;;  %v1077_v42 = vpop.trf.xlu1 }
 0x227   : > { %5103 = vmatmul.mubr.msk.bf16.gmra.mrb[52].mxu0 %vm798_vm2, %v1062_v24 }
 0x228   : > { %1245 = vmatprep.mubr.bf16.mxu0 %v10091_v2  ;;  %v797_v43 = vpop.trf.xlu0 }
 0x22a   : > { %v1078_v44 = vpop.trf.xlu1 }
 0x22c   : > { %v1334_v45 = vpop.trf.xlu0 }
 0x22d   : > { %5087 = vmatmul.mubr.msk.bf16.gmra.mrb[32].mxu1 %vm798_vm2, %v790_v25 }
 0x22e   : > { %976 = vmatprep.mubr.bf16.mxu1 %v10091_v2  ;;  %v1613_v46 = vpop.trf.xlu1 }
 0x22f   : > { %5104 = vmatmul.mubr.msk.bf16.gmra.mrb[56].mxu0 %vm798_vm2, %v1071_v26 }
 0x230   : > { %1255 = vmatprep.mubr.bf16.mxu0 %v10091_v2  ;;  %v1335_v47 = vpop.trf.xlu0 }
 0x232   : > { %v1614_v48 = vpop.trf.xlu1 }
 0x234   : > { %v1336_v49 = vpop.trf.xlu0 }
 0x235   : > { %5088 = vmatmul.mubr.msk.bf16.gmra.mrb[36].mxu1 %vm798_vm2, %v791_v27 }
 0x236   : > { %986 = vmatprep.mubr.bf16.mxu1 %v10091_v2  ;;  %v1615_v50 = vpop.trf.xlu1 }
 0x237   : > { %5105 = vmatmul.mubr.msk.bf16.gmra.mrb[60].mxu0 %vm798_vm2, %v1072_v28 }
 0x238   : > { %1265 = vmatprep.mubr.bf16.mxu0 %v10091_v2  ;;  %v1337_v51 = vpop.trf.xlu0 }
 0x23a   : > { %v1616_v54 = vpop.trf.xlu1 }
 0x23c   : > { %v1338_v57 = vpop.trf.xlu0 }
 0x23d   : > { %5089 = vmatmul.mubr.msk.bf16.gmra.mrb[40].mxu1 %vm798_vm2, %v792_v32 }
 0x23e   : > { %996 = vmatprep.mubr.bf16.mxu1 %v10091_v2  ;;  %v1617_v58 = vpop.trf.xlu1 }
 0x23f   : > { %5106 = vmatmul.mubr.msk.bf16.gmra.mrb[64].mxu0 %vm798_vm2, %v1073_v34 }
 0x240   : > { %1275 = vmatprep.mubr.bf16.mxu0 %v10091_v2  ;;  %v1339_v59 = vpop.trf.xlu0 }
 0x242   : > { %v1618_v60 = vpop.trf.xlu1 }
 0x244   : > { %v1340_v61 = vpop.trf.xlu0 }
 0x245   : > { %5090 = vmatmul.mubr.msk.bf16.gmra.mrb[44].mxu1 %vm798_vm2, %v793_v35 }
 0x246   : > { %1006 = vmatprep.mubr.bf16.mxu1 %v10091_v2  ;;  %v1619_v62 = vpop.trf.xlu1 }
 0x247   : > { %5107 = vmatmul.mubr.msk.bf16.gmra.mrb[68].mxu0 %vm798_vm2, %v1074_v36 }
 0x248   : > { %1285 = vmatprep.mubr.bf16.mxu0 %v10091_v2  ;;  %v1341_v63 = vpop.trf.xlu0 }
 0x24a   : > { %v1620_v0 = vpop.trf.xlu1 }
 0x24c   : > { %v1350_v1 = vpop.trf.xlu0 }
 0x24d   : > { %5091 = vmatmul.mubr.msk.bf16.gmra.mrb[48].mxu1 %vm798_vm2, %v794_v37 }
 0x24e   : > { %1016 = vmatprep.mubr.bf16.mxu1 %v10091_v2  ;;  %v1629_v3 = vpop.trf.xlu1 }
 0x24f   : > { %5108 = vmatmul.mubr.msk.bf16.gmra.mrb[72].mxu0 %vm798_vm2, %v1075_v38 }
 0x250   : > { %1295 = vmatprep.mubr.bf16.mxu0 %v10091_v2  ;;  %v1351_v4 = vpop.trf.xlu0 }
 0x252   : > { %v1630_v5 = vpop.trf.xlu1 }
 0x254   : > { %v1352_v6 = vpop.trf.xlu0 }
 0x255   : > { %5092 = vmatmul.mubr.msk.bf16.gmra.mrb[52].mxu1 %vm798_vm2, %v795_v39 }
 0x256   : > { %1026 = vmatprep.mubr.bf16.mxu1 %v10091_v2  ;;  %v1631_v9 = vpop.trf.xlu1 }
 0x257   : > { %5109 = vmatmul.mubr.msk.bf16.gmra.mrb[76].mxu0 %vm798_vm2, %v1076_v40 }
 0x258   : > { %1305 = vmatprep.mubr.bf16.mxu0 %v10091_v2  ;;  %v1353_v12 = vpop.trf.xlu0 }
 0x25a   : > { %v1632_v19 = vpop.trf.xlu1 }
 0x25c   : > { %v1354_v26 = vpop.trf.xlu0 }
 0x25d   : > { %5093 = vmatmul.mubr.msk.bf16.gmra.mrb[56].mxu1 %vm798_vm2, %v796_v41 }
 0x25e   : > { %1036 = vmatprep.mubr.bf16.mxu1 %v10091_v2  ;;  %v1633_v37 = vpop.trf.xlu1 }
 0x25f   : > { %5110 = vmatmul.mubr.msk.bf16.gmra.mrb[80].mxu0 %vm798_vm2, %v1077_v42 }
 0x260   : > { %1315 = vmatprep.mubr.bf16.mxu0 %v10091_v2 }
 0x265   : > { %5094 = vmatmul.mubr.msk.bf16.gmra.mrb[60].mxu1 %vm798_vm2, %v797_v43 }
 0x266   : > { %1444 = vmatprep.mubr.bf16.mxu1 %v10091_v2 }
 0x267   : > { %5111 = vmatmul.mubr.msk.bf16.gmra.mrb[84].mxu0 %vm798_vm2, %v1078_v44  ;;  %v1355_v44 = vpop.trf.xlu0 }
 0x268   : > { %1723 = vmatprep.mubr.bf16.mxu0 %v10091_v2 }
 0x26d   : > { %5113 = vmatmul.mubr.msk.bf16.vlgmr.msra.gmra.mrb[64].mxu1 %vm798_vm2, %v1334_v45 }
 0x26e   : > { %1454 = vmatprep.mubr.bf16.mxu1 %v10091_v2 }
 0x26f   : > { %5130 = vmatmul.mubr.msk.bf16.vlgmr.msra.gmra.mrb[88].mxu0 %vm798_vm2, %v1613_v46 }
 0x270   : > { %1733 = vmatprep.mubr.bf16.mxu0 %v10091_v2 }
 0x275   : > { %5114 = vmatmul.mubr.msk.bf16.gmra.mrb[68].mxu1 %vm798_vm2, %v1335_v47 }
 0x276   : > { %1464 = vmatprep.mubr.bf16.mxu1 %v10091_v2 }
 0x277   : > { %5131 = vmatmul.mubr.msk.bf16.gmra.mrb[92].mxu0 %vm798_vm2, %v1614_v48 }
 0x278   : > { %1743 = vmatprep.mubr.bf16.mxu0 %v10091_v2 }
 0x27d   : > { %5115 = vmatmul.mubr.msk.bf16.gmra.mrb[72].mxu1 %vm798_vm2, %v1336_v49 }
 0x27e   : > { %1474 = vmatprep.mubr.bf16.mxu1 %v10091_v2 }
 0x27f   : > { %5132 = vmatmul.mubr.msk.bf16.gmra.mrb[96].mxu0 %vm798_vm2, %v1615_v50 }
 0x280   : > { %1753 = vmatprep.mubr.bf16.mxu0 %v10091_v2 }
 0x285   : > { %5116 = vmatmul.mubr.msk.bf16.gmra.mrb[76].mxu1 %vm798_vm2, %v1337_v51  ;;  %v1634_v51 = vpop.trf.xlu1 }
 0x286   : > { %1484 = vmatprep.mubr.bf16.mxu1 %v10091_v2 }
 0x287   : > { %5133 = vmatmul.mubr.msk.bf16.gmra.mrb[100].mxu0 %vm798_vm2, %v1616_v54 }
 0x288   : > { %1763 = vmatprep.mubr.bf16.mxu0 %v10091_v2 }
 0x28d   : > { %5117 = vmatmul.mubr.msk.bf16.gmra.mrb[80].mxu1 %vm798_vm2, %v1338_v57 }
 0x28e   : > { %1494 = vmatprep.mubr.bf16.mxu1 %v10091_v2 }
 0x28f   : > { %5134 = vmatmul.mubr.msk.bf16.gmra.mrb[104].mxu0 %vm798_vm2, %v1617_v58 }
 0x290   : > { %1773 = vmatprep.mubr.bf16.mxu0 %v10091_v2 }
 0x295   : > { %5118 = vmatmul.mubr.msk.bf16.gmra.mrb[84].mxu1 %vm798_vm2, %v1339_v59 }
 0x296   : > { %1504 = vmatprep.mubr.bf16.mxu1 %v10091_v2 }
 0x297   : > { %5135 = vmatmul.mubr.msk.bf16.gmra.mrb[108].mxu0 %vm798_vm2, %v1618_v60 }
 0x298   : > { %1783 = vmatprep.mubr.bf16.mxu0 %v10091_v2 }
 0x29d   : > { %5119 = vmatmul.mubr.msk.bf16.gmra.mrb[88].mxu1 %vm798_vm2, %v1340_v61 }
 0x29e   : > { %1514 = vmatprep.mubr.bf16.mxu1 %v10091_v2 }
 0x29f   : > { %5136 = vmatmul.mubr.msk.bf16.gmra.mrb[112].mxu0 %vm798_vm2, %v1619_v62  ;;  %v1356_v62 = vpop.trf.xlu0 }
 0x2a0   : > { %1793 = vmatprep.mubr.bf16.mxu0 %v10091_v2 }
 0x2a5   : > { %5120 = vmatmul.mubr.msk.bf16.gmra.mrb[92].mxu1 %vm798_vm2, %v1341_v63 }
 0x2a6   : > { %1524 = vmatprep.mubr.bf16.mxu1 %v10091_v2 }
 0x2a7   : > { %5137 = vmatmul.mubr.msk.bf16.gmra.mrb[116].mxu0 %vm798_vm2, %v1620_v0 }
 0x2a8   : > { %1803 = vmatprep.mubr.bf16.mxu0 %v10091_v2 }
 0x2ad   : > { %5121 = vmatmul.mubr.msk.bf16.gmra.mrb[96].mxu1 %vm798_vm2, %v1350_v1 }
 0x2ae   : > { %1534 = vmatprep.mubr.bf16.mxu1 %v10091_v2 }
 0x2af   : > { %5138 = vmatmul.mubr.msk.bf16.gmra.mrb[120].mxu0 %vm798_vm2, %v1629_v3 }
 0x2b0   : > { %1813 = vmatprep.mubr.bf16.mxu0 %v10091_v2 }
 0x2b5   : > { %5122 = vmatmul.mubr.msk.bf16.gmra.mrb[100].mxu1 %vm798_vm2, %v1351_v4 }
 0x2b6   : > { %1544 = vmatprep.mubr.bf16.mxu1 %v10091_v2 }
 0x2b7   : > { %5139 = vmatmul.mubr.msk.bf16.gmra.mrb[124].mxu0 %vm798_vm2, %v1630_v5 }
 0x2b8   : > { %1823 = vmatprep.mubr.bf16.mxu0 %v10091_v2 }
 0x2bd   : > { %5123 = vmatmul.mubr.msk.bf16.gmra.mrb[104].mxu1 %vm798_vm2, %v1352_v6  ;;  %v1635_v6 = vpop.trf.xlu1 }
 0x2be   : > { %1554 = vmatprep.mubr.bf16.mxu1 %v10091_v2 }
 0x2bf   : > { %5140 = vmatmul.mubr.msk.bf16.gmra.mrb[128].mxu0 %vm798_vm2, %v1631_v9 }
 0x2c0   : > { %v6523_v10 = vpop.f32.mrb[0].mxu1  ;;  %1833 = vmatprep.mubr.bf16.mxu0 %v10091_v2 }
 0x2c1   : > { %v6526_v11 = vpop.f32.mrb[1].mxu1 }
 0x2c2   : > { %v6528_v13 = vpop.f32.mrb[2].mxu1  ;;  %v6530_v14 = vpop.f32.mrb[24].mxu0  ;;  %v1884_v15 = vmax.f32 %v6523_v10, %v6526_v11 }
 0x2c3   : > { %v6534_v16 = vpop.f32.mrb[3].mxu1  ;;  %v6536_v17 = vpop.f32.mrb[25].mxu0 }
 0x2c4   : > { %v6538_v18 = vpop.f32.mrb[26].mxu0  ;;  %1885 = vmax.xlane.f32.xlu0 %v1884_v15  ;;  %v1887_v20 = vmax.f32 %v6528_v13, %v6534_v16  ;;  %v1980_v21 = vmax.f32 %v6530_v14, %v6536_v17 }
 0x2c5   : > { %v6544_v22 = vpop.f32.mrb[27].mxu0  ;;  %5124 = vmatmul.mubr.msk.bf16.gmra.mrb[108].mxu1 %vm798_vm2, %v1353_v12 }
 0x2c6   : > { %1888 = vmax.xlane.f32.xlu1 %v1887_v20  ;;  %v1983_v23 = vmax.f32 %v6538_v18, %v6544_v22  ;;  %1564 = vmatprep.mubr.bf16.mxu1 %v10091_v2  ;;  %v726_v20 = vadd.f32 %v6396_v53, %v6406_v8 }
 0x2c7   : > { %5141 = vmatmul.mubr.msk.bf16.gmra.mrb[132].mxu0 %vm798_vm2, %v1632_v19 }
 0x2c8   : > { %1981 = vmax.xlane.f32.xlu0 %v1980_v21  ;;  %v6551_v24 = vpop.f32.mrb[4].mxu1  ;;  %1843 = vmatprep.mubr.bf16.mxu0 %v10091_v2 }
 0x2c9   : > { %v6554_v25 = vpop.f32.mrb[5].mxu1 }
 0x2ca   : > { %v6556_v27 = vpop.f32.mrb[6].mxu1  ;;  %v6558_v28 = vpop.f32.mrb[28].mxu0  ;;  %v1890_v32 = vmax.f32 %v6551_v24, %v6554_v25 }
 0x2cb   : > { %v6562_v34 = vpop.f32.mrb[7].mxu1  ;;  %v6564_v35 = vpop.f32.mrb[29].mxu0 }
 0x2cc   : > { %1984 = vmax.xlane.f32.xlu0 %v1983_v23  ;;  %1891 = vmax.xlane.f32.xlu1 %v1890_v32  ;;  %v6566_v36 = vpop.f32.mrb[30].mxu0  ;;  %v1986_v38 = vmax.f32 %v6558_v28, %v6564_v35  ;;  %v1893_v39 = vmax.f32 %v6556_v27, %v6562_v34  ;;  %v730_v32 = vadd.f32 %v6400_v56, %v6404_v7 }
 0x2cd   : > { %5125 = vmatmul.mubr.msk.bf16.gmra.mrb[112].mxu1 %vm798_vm2, %v1354_v26  ;;  %v6573_v40 = vpop.f32.mrb[31].mxu0  ;;  %v1357_v26 = vpop.trf.xlu0 }
 0x2ce   : > { %v1989_v41 = vmax.f32 %v6566_v36, %v6573_v40  ;;  %1574 = vmatprep.mubr.bf16.mxu1 %v10091_v2 }
 0x2cf   : > { %5142 = vmatmul.mubr.msk.bf16.gmra.mrb[136].mxu0 %vm798_vm2, %v1633_v37 }
 0x2d0   : > { %1987 = vmax.xlane.f32.xlu1 %v1986_v38  ;;  %1894 = vmax.xlane.f32.xlu0 %v1893_v39  ;;  %v6579_v42 = vpop.f32.mrb[8].mxu1 }
 0x2d1   : > { %v6581_v43 = vpop.f32.mrb[9].mxu1  ;;  %1853 = vmatprep.mubr.bf16.mxu0 %v10091_v2 }
 0x2d2   : > { %v6584_v45 = vpop.f32.mrb[10].mxu1  ;;  %v6586_v46 = vpop.f32.mrb[32].mxu0  ;;  %v1896_v47 = vmax.f32 %v6579_v42, %v6581_v43 }
 0x2d3   : > { %v6590_v48 = vpop.f32.mrb[11].mxu1  ;;  %v6592_v49 = vpop.f32.mrb[33].mxu0 }
 0x2d4   : > { %1990 = vmax.xlane.f32.xlu0 %v1989_v41  ;;  %1897 = vmax.xlane.f32.xlu1 %v1896_v47  ;;  %v6594_v50 = vpop.f32.mrb[34].mxu0  ;;  %v1992_v54 = vmax.f32 %v6586_v46, %v6592_v49  ;;  %v1899_v57 = vmax.f32 %v6584_v45, %v6590_v48 }
 0x2d5   : > { %5126 = vmatmul.mubr.msk.bf16.gmra.mrb[116].mxu1 %vm798_vm2, %v1355_v44  ;;  %v6601_v58 = vpop.f32.mrb[35].mxu0  ;;  %v3805_v44 = vpack.c.bf16 %v726_v20, %v726_v20 }
 0x2d6   : > { %v1995_v59 = vmax.f32 %v6594_v50, %v6601_v58  ;;  %1584 = vmatprep.mubr.bf16.mxu1 %v10091_v2 }
 0x2d7   : > { %5143 = vmatmul.mubr.msk.bf16.gmra.mrb[140].mxu0 %vm798_vm2, %v1634_v51 }
 0x2d8   : > { %1993 = vmax.xlane.f32.xlu1 %v1992_v54  ;;  %1900 = vmax.xlane.f32.xlu0 %v1899_v57  ;;  %v6607_v60 = vpop.f32.mrb[12].mxu1  ;;  %v1636_v54 = vpop.trf.xlu1 }
 0x2d9   : > { %v6609_v61 = vpop.f32.mrb[13].mxu1  ;;  %1863 = vmatprep.mubr.bf16.mxu0 %v10091_v2 }
 0x2da   : > { %v6612_v63 = vpop.f32.mrb[14].mxu1  ;;  %v6614_v0 = vpop.f32.mrb[36].mxu0  ;;  %v1902_v1 = vmax.f32 %v6607_v60, %v6609_v61 }
 0x2db   : > { %v6618_v3 = vpop.f32.mrb[15].mxu1  ;;  %v6620_v4 = vpop.f32.mrb[37].mxu0 }
 0x2dc   : > { %1996 = vmax.xlane.f32.xlu0 %v1995_v59  ;;  %1903 = vmax.xlane.f32.xlu1 %v1902_v1  ;;  %v6622_v5 = vpop.f32.mrb[38].mxu0  ;;  %v1998_v9 = vmax.f32 %v6614_v0, %v6620_v4  ;;  %v1905_v12 = vmax.f32 %v6612_v63, %v6618_v3  ;;  %v3807_v59 = vpack.c.bf16 %v730_v32, %v730_v32 }
 0x2dd   : > { %5127 = vmatmul.mubr.msk.bf16.gmra.mrb[120].mxu1 %vm798_vm2, %v1356_v62  ;;  %v6629_v15 = vpop.f32.mrb[39].mxu0 }
 0x2de   : > { %v2001_v19 = vmax.f32 %v6622_v5, %v6629_v15  ;;  %1594 = vmatprep.mubr.bf16.mxu1 %v10091_v2 }
 0x2df   : > { %5144 = vmatmul.mubr.msk.bf16.gmra.mrb[144].mxu0 %vm798_vm2, %v1635_v6 }
 0x2e0   : > { %1999 = vmax.xlane.f32.xlu1 %v1998_v9  ;;  %1906 = vmax.xlane.f32.xlu0 %v1905_v12  ;;  %v6637_v21 = vpop.f32.mrb[16].mxu1 }
 0x2e1   : > { %v6639_v23 = vpop.f32.mrb[17].mxu1  ;;  %1873 = vmatprep.mubr.bf16.mxu0 %v10091_v2 }
 0x2e2   : > { %v6644_v37 = vpop.f32.mrb[18].mxu1  ;;  %v6646_v38 = vpop.f32.mrb[40].mxu0  ;;  %v1908_v39 = vmax.f32 %v6637_v21, %v6639_v23 }
 0x2e3   : > { %v6650_v53 = vpop.f32.mrb[19].mxu1  ;;  %v6652_v41 = vpop.f32.mrb[41].mxu0 }
 0x2e4   : > { %v1911_v47 = vmax.f32 %v6644_v37, %v6650_v53  ;;  %v2004_v51 = vmax.f32 %v6646_v38, %v6652_v41  ;;  %2002 = vmax.xlane.f32.xlu0 %v2001_v19  ;;  %1909 = vmax.xlane.f32.xlu1 %v1908_v39  ;;  %v6658_v56 = vpop.f32.mrb[42].mxu0 }
 0x2e5   : > { %5128 = vmatmul.mubr.msk.bf16.gmra.mrb[124].mxu1 %vm798_vm2, %v1357_v26  ;;  %v6661_v57 = vpop.f32.mrb[43].mxu0 }
 0x2e6   : > { %v2007_v62 = vmax.f32 %v6658_v56, %v6661_v57  ;;  %3972 = vmatprep.mubr.bf16.mxu1 %v3805_v44 }
 0x2e7   : > { %5145 = vmatmul.mubr.msk.bf16.gmra.mrb[148].mxu0 %vm798_vm2, %v1636_v54 }
 0x2e8   : > { %4013 = vmatprep.mubr.bf16.mxu0 %v3807_v59  ;;  %2005 = vmax.xlane.f32.xlu1 %v2004_v51  ;;  %v6666_v1 = vpop.f32.mrb[20].mxu1 }
 0x2e9   : > { %1912 = vmax.xlane.f32.xlu0 %v1911_v47  ;;  %v6668_v6 = vpop.f32.mrb[21].mxu1 }
 0x2ea   : > { %v1914_v9 = vmax.f32 %v6666_v1, %v6668_v6  ;;  %v6672_v12 = vpop.f32.mrb[22].mxu1  ;;  %v6674_v19 = vpop.f32.mrb[44].mxu0 }
 0x2eb   : > { %v6676_v20 = vpop.f32.mrb[23].mxu1  ;;  %v6678_v26 = vpop.f32.mrb[45].mxu0 }
 0x2ec   : > { %v1917_v32 = vmax.f32 %v6672_v12, %v6676_v20  ;;  %v2010_v39 = vmax.f32 %v6674_v19, %v6678_v26  ;;  %1915 = vmax.xlane.f32.xlu1 %v1914_v9  ;;  %v6684_v44 = vpop.f32.mrb[46].mxu0 }
 0x2ed   : > { %10718 = vst [vmem:[#allocation15_spill] sm:$0xff] %v6684_v44  ;;  %2008 = vmax.xlane.f32.xlu0 %v2007_v62  ;;  %v6686_v47 = vpop.f32.mrb[47].mxu0 }
 0x2ee   : > { %10719 = vst [vmem:[#allocation16_spill] sm:$0xff] %v6686_v47  ;;  %v2013_v51 = vmax.f32 %v6684_v44, %v6686_v47 }
 0x2f0   : > { %2011 = vmax.xlane.f32.xlu1 %v2010_v39  ;;  %v6690_v54 = vpop.f32.mrb[24].mxu1 }
 0x2f1   : > { %1918 = vmax.xlane.f32.xlu0 %v1917_v32  ;;  %v6692_v59 = vpop.f32.mrb[25].mxu1 }
 0x2f2   : > { %v1920_v2 = vmax.f32 %v6690_v54, %v6692_v59  ;;  %v6696_v31 = vpop.f32.mrb[26].mxu1  ;;  %v6698_v9 = vpop.f32.mrb[48].mxu0 }
 0x2f3   : > { %10720 = vst [vmem:[#allocation17_spill] sm:$0xff] %v6696_v31  ;;  %10721 = vst [vmem:[#allocation18_spill] sm:$0xff] %v6698_v9  ;;  %v6700_v29 = vpop.f32.mrb[27].mxu1  ;;  %v6702_v62 = vpop.f32.mrb[49].mxu0 }
 0x2f4   : > { %10722 = vst [vmem:[#allocation19_spill] sm:$0xff] %v6700_v29  ;;  %10723 = vst [vmem:[#allocation20_spill] sm:$0xff] %v6702_v62  ;;  %v1923_v33 = vmax.f32 %v6696_v31, %v6700_v29  ;;  %v2016_v39 = vmax.f32 %v6698_v9, %v6702_v62  ;;  %1921 = vmax.xlane.f32.xlu1 %v1920_v2  ;;  %v6708_v32 = vpop.f32.mrb[50].mxu0 }
 0x2f5   : > { %10724 = vst [vmem:[#allocation21_spill] sm:$0xff] %v6708_v32  ;;  %2014 = vmax.xlane.f32.xlu0 %v2013_v51  ;;  %v6710_v30 = vpop.f32.mrb[51].mxu0 }
 0x2f6   : > { %10725 = vst [vmem:[#allocation22_spill] sm:$0xff] %v6710_v30  ;;  %v2019_v55 = vmax.f32 %v6708_v32, %v6710_v30 }
 0x2f8   : > { %2017 = vmax.xlane.f32.xlu1 %v2016_v39  ;;  %v6714_v7 = vpop.f32.mrb[28].mxu1 }
 0x2f9   : > { %10726 = vst [vmem:[#allocation23_spill] sm:$0xff] %v6714_v7  ;;  %1924 = vmax.xlane.f32.xlu0 %v1923_v33  ;;  %v6716_v52 = vpop.f32.mrb[29].mxu1 }
 0x2fa   : > { %10727 = vst [vmem:[#allocation24_spill] sm:$0xff] %v6716_v52  ;;  %v1926_v8 = vmax.f32 %v6714_v7, %v6716_v52  ;;  %v6720_v29 = vpop.f32.mrb[30].mxu1  ;;  %v6722_v2 = vpop.f32.mrb[52].mxu0 }
 0x2fb   : > { %10728 = vst [vmem:[#allocation25_spill] sm:$0xff] %v6720_v29  ;;  %10729 = vst [vmem:[#allocation26_spill] sm:$0xff] %v6722_v2  ;;  %v6724_v31 = vpop.f32.mrb[31].mxu1  ;;  %v6726_v51 = vpop.f32.mrb[53].mxu0 }
 0x2fc   : > { %10730 = vst [vmem:[#allocation27_spill] sm:$0xff] %v6724_v31  ;;  %10731 = vst [vmem:[#allocation28_spill] sm:$0xff] %v6726_v51  ;;  %v1929_v30 = vmax.f32 %v6720_v29, %v6724_v31  ;;  %v2022_v39 = vmax.f32 %v6722_v2, %v6726_v51  ;;  %1927 = vmax.xlane.f32.xlu1 %v1926_v8  ;;  %v6732_v33 = vpop.f32.mrb[54].mxu0 }
 0x2fd   : > { %10732 = vst [vmem:[#allocation29_spill] sm:$0xff] %v6732_v33  ;;  %2020 = vmax.xlane.f32.xlu0 %v2019_v55  ;;  %v6734_v32 = vpop.f32.mrb[55].mxu0 }
 0x2fe   : > { %10733 = vst [vmem:[#allocation30_spill] sm:$0xff] %v6734_v32  ;;  %v2025_v52 = vmax.f32 %v6732_v33, %v6734_v32 }
 0x300   : > { %2023 = vmax.xlane.f32.xlu1 %v2022_v39  ;;  %v6738_v7 = vpop.f32.mrb[32].mxu1 }
 0x301   : > { %10734 = vst [vmem:[#allocation31_spill] sm:$0xff] %v6738_v7  ;;  %1930 = vmax.xlane.f32.xlu0 %v1929_v30  ;;  %v6740_v62 = vpop.f32.mrb[33].mxu1 }
 0x302   : > { %10735 = vst [vmem:[#allocation32_spill] sm:$0xff] %v6740_v62  ;;  %v1932_v31 = vmax.f32 %v6738_v7, %v6740_v62  ;;  %v6744_v29 = vpop.f32.mrb[34].mxu1  ;;  %v6746_v8 = vpop.f32.mrb[56].mxu0 }
 0x303   : > { %10736 = vst [vmem:[#allocation33_spill] sm:$0xff] %v6744_v29  ;;  %10737 = vst [vmem:[#allocation34_spill] sm:$0xff] %v6746_v8  ;;  %v6748_v51 = vpop.f32.mrb[35].mxu1  ;;  %v6750_v55 = vpop.f32.mrb[57].mxu0 }
 0x304   : > { %10738 = vst [vmem:[#allocation35_spill] sm:$0xff] %v6748_v51  ;;  %10739 = vst [vmem:[#allocation36_spill] sm:$0xff] %v6750_v55  ;;  %v1935_v32 = vmax.f32 %v6744_v29, %v6748_v51  ;;  %v2028_v39 = vmax.f32 %v6746_v8, %v6750_v55  ;;  %1933 = vmax.xlane.f32.xlu1 %v1932_v31  ;;  %v6756_v30 = vpop.f32.mrb[58].mxu0 }
 0x305   : > { %10740 = vst [vmem:[#allocation37_spill] sm:$0xff] %v6756_v30  ;;  %2026 = vmax.xlane.f32.xlu0 %v2025_v52  ;;  %v6758_v33 = vpop.f32.mrb[59].mxu0 }
 0x306   : > { %10741 = vst [vmem:[#allocation38_spill] sm:$0xff] %v6758_v33  ;;  %v2031_v2 = vmax.f32 %v6756_v30, %v6758_v33 }
 0x308   : > { %2029 = vmax.xlane.f32.xlu1 %v2028_v39  ;;  %v6762_v62 = vpop.f32.mrb[36].mxu1 }
 0x309   : > { %10742 = vst [vmem:[#allocation39_spill] sm:$0xff] %v6762_v62  ;;  %1936 = vmax.xlane.f32.xlu0 %v1935_v32  ;;  %v6764_v7 = vpop.f32.mrb[37].mxu1 }
 0x30a   : > { %10743 = vst [vmem:[#allocation40_spill] sm:$0xff] %v6764_v7  ;;  %v1938_v51 = vmax.f32 %v6762_v62, %v6764_v7  ;;  %v6768_v29 = vpop.f32.mrb[38].mxu1  ;;  %v6770_v31 = vpop.f32.mrb[60].mxu0 }
 0x30b   : > { %10744 = vst [vmem:[#allocation41_spill] sm:$0xff] %v6768_v29  ;;  %10745 = vst [vmem:[#allocation42_spill] sm:$0xff] %v6770_v31  ;;  %v6772_v55 = vpop.f32.mrb[39].mxu1  ;;  %v6774_v52 = vpop.f32.mrb[61].mxu0 }
 0x30c   : > { %10746 = vst [vmem:[#allocation43_spill] sm:$0xff] %v6772_v55  ;;  %10747 = vst [vmem:[#allocation44_spill] sm:$0xff] %v6774_v52  ;;  %v1941_v33 = vmax.f32 %v6768_v29, %v6772_v55  ;;  %v2034_v39 = vmax.f32 %v6770_v31, %v6774_v52  ;;  %1939 = vmax.xlane.f32.xlu1 %v1938_v51  ;;  %v6780_v32 = vpop.f32.mrb[62].mxu0 }
 0x30d   : > { %10748 = vst [vmem:[#allocation45_spill] sm:$0xff] %v6780_v32  ;;  %2032 = vmax.xlane.f32.xlu0 %v2031_v2  ;;  %v6782_v30 = vpop.f32.mrb[63].mxu0 }
 0x30e   : > { %10749 = vst [vmem:[#allocation46_spill] sm:$0xff] %v6782_v30  ;;  %v2037_v7 = vmax.f32 %v6780_v32, %v6782_v30 }
 0x310   : > { %2035 = vmax.xlane.f32.xlu1 %v2034_v39  ;;  %v6786_v62 = vpop.f32.mrb[40].mxu1 }
 0x311   : > { %10750 = vst [vmem:[#allocation47_spill] sm:$0xff] %v6786_v62  ;;  %1942 = vmax.xlane.f32.xlu0 %v1941_v33  ;;  %v6788_v8 = vpop.f32.mrb[41].mxu1 }
 0x312   : > { %10751 = vst [vmem:[#allocation48_spill] sm:$0xff] %v6788_v8  ;;  %v1944_v55 = vmax.f32 %v6786_v62, %v6788_v8  ;;  %v6792_v29 = vpop.f32.mrb[42].mxu1  ;;  %v6794_v51 = vpop.f32.mrb[64].mxu0 }
 0x313   : > { %10752 = vst [vmem:[#allocation49_spill] sm:$0xff] %v6792_v29  ;;  %10753 = vst [vmem:[#allocation50_spill] sm:$0xff] %v6794_v51  ;;  %v6796_v52 = vpop.f32.mrb[43].mxu1  ;;  %v6798_v2 = vpop.f32.mrb[65].mxu0 }
 0x314   : > { %10754 = vst [vmem:[#allocation51_spill] sm:$0xff] %v6796_v52  ;;  %10755 = vst [vmem:[#allocation52_spill] sm:$0xff] %v6798_v2  ;;  %v1947_v30 = vmax.f32 %v6792_v29, %v6796_v52  ;;  %v2040_v39 = vmax.f32 %v6794_v51, %v6798_v2  ;;  %1945 = vmax.xlane.f32.xlu1 %v1944_v55  ;;  %v6804_v33 = vpop.f32.mrb[66].mxu0 }
 0x315   : > { %10756 = vst [vmem:[#allocation53_spill] sm:$0xff] %v6804_v33  ;;  %2038 = vmax.xlane.f32.xlu0 %v2037_v7  ;;  %v6806_v32 = vpop.f32.mrb[67].mxu0 }
 0x316   : > { %10757 = vst [vmem:[#allocation54_spill] sm:$0xff] %v6806_v32  ;;  %v2043_v8 = vmax.f32 %v6804_v33, %v6806_v32 }
 0x318   : > { %2041 = vmax.xlane.f32.xlu1 %v2040_v39  ;;  %v6810_v62 = vpop.f32.mrb[44].mxu1 }
 0x319   : > { %10758 = vst [vmem:[#allocation55_spill] sm:$0xff] %v6810_v62  ;;  %1948 = vmax.xlane.f32.xlu0 %v1947_v30  ;;  %v6812_v31 = vpop.f32.mrb[45].mxu1 }
 0x31a   : > { %10759 = vst [vmem:[#allocation56_spill] sm:$0xff] %v6812_v31  ;;  %v1950_v52 = vmax.f32 %v6810_v62, %v6812_v31  ;;  %v6816_v29 = vpop.f32.mrb[46].mxu1  ;;  %v6818_v55 = vpop.f32.mrb[68].mxu0 }
 0x31b   : > { %10760 = vst [vmem:[#allocation57_spill] sm:$0xff] %v6816_v29  ;;  %10761 = vst [vmem:[#allocation58_spill] sm:$0xff] %v6818_v55  ;;  %v6820_v2 = vpop.f32.mrb[47].mxu1  ;;  %v6822_v7 = vpop.f32.mrb[69].mxu0 }
 0x31c   : > { %10762 = vst [vmem:[#allocation59_spill] sm:$0xff] %v6820_v2  ;;  %10763 = vst [vmem:[#allocation60_spill] sm:$0xff] %v6822_v7  ;;  %v1953_v32 = vmax.f32 %v6816_v29, %v6820_v2  ;;  %v2046_v39 = vmax.f32 %v6818_v55, %v6822_v7  ;;  %1951 = vmax.xlane.f32.xlu1 %v1950_v52  ;;  %v6828_v30 = vpop.f32.mrb[70].mxu0 }
 0x31d   : > { %10764 = vst [vmem:[#allocation61_spill] sm:$0xff] %v6828_v30  ;;  %2044 = vmax.xlane.f32.xlu0 %v2043_v8  ;;  %v6830_v33 = vpop.f32.mrb[71].mxu0 }
 0x31e   : > { %10765 = vst [vmem:[#allocation62_spill] sm:$0xff] %v6830_v33  ;;  %v2049_v31 = vmax.f32 %v6828_v30, %v6830_v33 }
 0x320   : > { %2047 = vmax.xlane.f32.xlu1 %v2046_v39  ;;  %v6834_v62 = vpop.f32.mrb[48].mxu1 }
 0x321   : > { %10766 = vst [vmem:[#allocation63_spill] sm:$0xff] %v6834_v62  ;;  %1954 = vmax.xlane.f32.xlu0 %v1953_v32  ;;  %v6836_v51 = vpop.f32.mrb[49].mxu1 }
 0x322   : > { %10767 = vst [vmem:[#allocation64_spill] sm:$0xff] %v6836_v51  ;;  %v1956_v2 = vmax.f32 %v6834_v62, %v6836_v51  ;;  %v6840_v29 = vpop.f32.mrb[50].mxu1  ;;  %v6842_v52 = vpop.f32.mrb[72].mxu0 }
 0x323   : > { %10768 = vst [vmem:[#allocation65_spill] sm:$0xff] %v6840_v29  ;;  %10769 = vst [vmem:[#allocation66_spill] sm:$0xff] %v6842_v52  ;;  %v6844_v7 = vpop.f32.mrb[51].mxu1  ;;  %v6846_v8 = vpop.f32.mrb[73].mxu0 }
 0x324   : > { %10770 = vst [vmem:[#allocation67_spill] sm:$0xff] %v6844_v7  ;;  %10771 = vst [vmem:[#allocation68_spill] sm:$0xff] %v6846_v8  ;;  %v1959_v33 = vmax.f32 %v6840_v29, %v6844_v7  ;;  %v2052_v39 = vmax.f32 %v6842_v52, %v6846_v8  ;;  %1957 = vmax.xlane.f32.xlu1 %v1956_v2  ;;  %v6852_v32 = vpop.f32.mrb[74].mxu0 }
 0x325   : > { %10772 = vst [vmem:[#allocation69_spill] sm:$0xff] %v6852_v32  ;;  %2050 = vmax.xlane.f32.xlu0 %v2049_v31  ;;  %v6854_v30 = vpop.f32.mrb[75].mxu0 }
 0x326   : > { %10773 = vst [vmem:[#allocation70_spill] sm:$0xff] %v6854_v30  ;;  %v2055_v51 = vmax.f32 %v6852_v32, %v6854_v30 }
 0x328   : > { %2053 = vmax.xlane.f32.xlu1 %v2052_v39  ;;  %v6858_v62 = vpop.f32.mrb[52].mxu1 }
 0x329   : > { %10774 = vst [vmem:[#allocation71_spill] sm:$0xff] %v6858_v62  ;;  %1960 = vmax.xlane.f32.xlu0 %v1959_v33  ;;  %v6860_v55 = vpop.f32.mrb[53].mxu1 }
 0x32a   : > { %10775 = vst [vmem:[#allocation72_spill] sm:$0xff] %v6860_v55  ;;  %v1962_v7 = vmax.f32 %v6858_v62, %v6860_v55  ;;  %v6864_v29 = vpop.f32.mrb[54].mxu1  ;;  %v6866_v2 = vpop.f32.mrb[76].mxu0 }
 0x32b   : > { %10776 = vst [vmem:[#allocation73_spill] sm:$0xff] %v6864_v29  ;;  %10777 = vst [vmem:[#allocation74_spill] sm:$0xff] %v6866_v2  ;;  %v6868_v8 = vpop.f32.mrb[55].mxu1  ;;  %v6870_v31 = vpop.f32.mrb[77].mxu0 }
 0x32c   : > { %10778 = vst [vmem:[#allocation75_spill] sm:$0xff] %v6868_v8  ;;  %10779 = vst [vmem:[#allocation76_spill] sm:$0xff] %v6870_v31  ;;  %v1965_v30 = vmax.f32 %v6864_v29, %v6868_v8  ;;  %v2058_v39 = vmax.f32 %v6866_v2, %v6870_v31  ;;  %1963 = vmax.xlane.f32.xlu1 %v1962_v7  ;;  %v6876_v33 = vpop.f32.mrb[78].mxu0 }
 0x32d   : > { %10780 = vst [vmem:[#allocation77_spill] sm:$0xff] %v6876_v33  ;;  %2056 = vmax.xlane.f32.xlu0 %v2055_v51  ;;  %v6878_v32 = vpop.f32.mrb[79].mxu0 }
 0x32e   : > { %10781 = vst [vmem:[#allocation78_spill] sm:$0xff] %v6878_v32  ;;  %v2061_v55 = vmax.f32 %v6876_v33, %v6878_v32 }
 0x330   : > { %2059 = vmax.xlane.f32.xlu1 %v2058_v39  ;;  %v6882_v62 = vpop.f32.mrb[56].mxu1 }
 0x331   : > { %10782 = vst [vmem:[#allocation79_spill] sm:$0xff] %v6882_v62  ;;  %1966 = vmax.xlane.f32.xlu0 %v1965_v30  ;;  %v6884_v52 = vpop.f32.mrb[57].mxu1 }
 0x332   : > { %10783 = vst [vmem:[#allocation80_spill] sm:$0xff] %v6884_v52  ;;  %v1968_v8 = vmax.f32 %v6882_v62, %v6884_v52  ;;  %v6888_v29 = vpop.f32.mrb[58].mxu1  ;;  %v6890_v7 = vpop.f32.mrb[80].mxu0 }
 0x333   : > { %10784 = vst [vmem:[#allocation81_spill] sm:$0xff] %v6888_v29  ;;  %10785 = vst [vmem:[#allocation82_spill] sm:$0xff] %v6890_v7  ;;  %v6892_v31 = vpop.f32.mrb[59].mxu1  ;;  %v6894_v51 = vpop.f32.mrb[81].mxu0 }
 0x334   : > { %10786 = vst [vmem:[#allocation83_spill] sm:$0xff] %v6892_v31  ;;  %10787 = vst [vmem:[#allocation84_spill] sm:$0xff] %v6894_v51  ;;  %v1971_v32 = vmax.f32 %v6888_v29, %v6892_v31  ;;  %v2064_v39 = vmax.f32 %v6890_v7, %v6894_v51  ;;  %1969 = vmax.xlane.f32.xlu1 %v1968_v8  ;;  %v6900_v30 = vpop.f32.mrb[82].mxu0 }
 0x335   : > { %10788 = vst [vmem:[#allocation85_spill] sm:$0xff] %v6900_v30  ;;  %2062 = vmax.xlane.f32.xlu0 %v2061_v55  ;;  %v6902_v33 = vpop.f32.mrb[83].mxu0 }
 0x336   : > { %10789 = vst [vmem:[#allocation86_spill] sm:$0xff] %v6902_v33  ;;  %v2067_v52 = vmax.f32 %v6900_v30, %v6902_v33 }
 0x338   : > { %2065 = vmax.xlane.f32.xlu1 %v2064_v39  ;;  %v6906_v62 = vpop.f32.mrb[60].mxu1 }
 0x339   : > { %10790 = vst [vmem:[#allocation87_spill] sm:$0xff] %v6906_v62  ;;  %1972 = vmax.xlane.f32.xlu0 %v1971_v32  ;;  %v6908_v2 = vpop.f32.mrb[61].mxu1 }
 0x33a   : > { %10791 = vst [vmem:[#allocation88_spill] sm:$0xff] %v6908_v2  ;;  %v1974_v31 = vmax.f32 %v6906_v62, %v6908_v2  ;;  %v6912_v29 = vpop.f32.mrb[62].mxu1  ;;  %v6914_v8 = vpop.f32.mrb[84].mxu0 }
 0x33b   : > { %10792 = vst [vmem:[#allocation89_spill] sm:$0xff] %v6912_v29  ;;  %10793 = vst [vmem:[#allocation90_spill] sm:$0xff] %v6914_v8  ;;  %v6916_v51 = vpop.f32.mrb[63].mxu1  ;;  %v6918_v55 = vpop.f32.mrb[85].mxu0 }
 0x33c   : > { %10794 = vst [vmem:[#allocation91_spill] sm:$0xff] %v6916_v51  ;;  %10795 = vst [vmem:[#allocation92_spill] sm:$0xff] %v6918_v55  ;;  %v1977_v33 = vmax.f32 %v6912_v29, %v6916_v51  ;;  %v2070_v39 = vmax.f32 %v6914_v8, %v6918_v55  ;;  %1975 = vmax.xlane.f32.xlu1 %v1974_v31  ;;  %v6924_v32 = vpop.f32.mrb[86].mxu0 }
 0x33d   : > { %10796 = vst [vmem:[#allocation93_spill] sm:$0xff] %v6924_v32  ;;  %2068 = vmax.xlane.f32.xlu0 %v2067_v52  ;;  %v6926_v30 = vpop.f32.mrb[87].mxu0 }
 0x33e   : > { %10797 = vst [vmem:[#allocation94_spill] sm:$0xff] %v6926_v30  ;;  %v2073_v2 = vmax.f32 %v6924_v32, %v6926_v30 }
 0x340   : > { %2071 = vmax.xlane.f32.xlu1 %v2070_v39  ;;  %v6930_v62 = vpop.f32.mrb[64].mxu1 }
 0x341   : > { %10798 = vst [vmem:[#allocation95_spill] sm:$0xff] %v6930_v62  ;;  %1978 = vmax.xlane.f32.xlu0 %v1977_v33  ;;  %v6932_v7 = vpop.f32.mrb[65].mxu1 }
 0x342   : > { %10799 = vst [vmem:[#allocation96_spill] sm:$0xff] %v6932_v7  ;;  %v2076_v51 = vmax.f32 %v6930_v62, %v6932_v7  ;;  %v6936_v29 = vpop.f32.mrb[66].mxu1  ;;  %v6938_v31 = vpop.f32.mrb[88].mxu0 }
 0x343   : > { %10800 = vst [vmem:[#allocation97_spill] sm:$0xff] %v6936_v29  ;;  %10801 = vst [vmem:[#allocation98_spill] sm:$0xff] %v6938_v31  ;;  %v6940_v55 = vpop.f32.mrb[67].mxu1  ;;  %v6942_v52 = vpop.f32.mrb[89].mxu0 }
 0x344   : > { %10802 = vst [vmem:[#allocation99_spill] sm:$0xff] %v6940_v55  ;;  %10803 = vst [vmem:[#allocation100_spill] sm:$0xff] %v6942_v52  ;;  %v2079_v30 = vmax.f32 %v6936_v29, %v6940_v55  ;;  %v2172_v39 = vmax.f32 %v6938_v31, %v6942_v52  ;;  %2077 = vmax.xlane.f32.xlu1 %v2076_v51  ;;  %v6948_v33 = vpop.f32.mrb[90].mxu0 }
 0x345   : > { %10804 = vst [vmem:[#allocation101_spill] sm:$0xff] %v6948_v33  ;;  %2074 = vmax.xlane.f32.xlu0 %v2073_v2  ;;  %v6950_v32 = vpop.f32.mrb[91].mxu0 }
 0x346   : > { %10805 = vst [vmem:[#allocation102_spill] sm:$0xff] %v6950_v32  ;;  %v2175_v7 = vmax.f32 %v6948_v33, %v6950_v32 }
 0x348   : > { %2173 = vmax.xlane.f32.xlu1 %v2172_v39  ;;  %v6954_v62 = vpop.f32.mrb[68].mxu1 }
 0x349   : > { %10806 = vst [vmem:[#allocation103_spill] sm:$0xff] %v6954_v62  ;;  %2080 = vmax.xlane.f32.xlu0 %v2079_v30  ;;  %v6956_v8 = vpop.f32.mrb[69].mxu1 }
 0x34a   : > { %10807 = vst [vmem:[#allocation104_spill] sm:$0xff] %v6956_v8  ;;  %v2082_v55 = vmax.f32 %v6954_v62, %v6956_v8  ;;  %v6960_v29 = vpop.f32.mrb[70].mxu1  ;;  %v6962_v51 = vpop.f32.mrb[92].mxu0 }
 0x34b   : > { %10808 = vst [vmem:[#allocation105_spill] sm:$0xff] %v6960_v29  ;;  %10809 = vst [vmem:[#allocation106_spill] sm:$0xff] %v6962_v51  ;;  %v6964_v52 = vpop.f32.mrb[71].mxu1  ;;  %v6966_v2 = vpop.f32.mrb[93].mxu0 }
 0x34c   : > { %10810 = vst [vmem:[#allocation107_spill] sm:$0xff] %v6964_v52  ;;  %10811 = vst [vmem:[#allocation108_spill] sm:$0xff] %v6966_v2  ;;  %v2085_v32 = vmax.f32 %v6960_v29, %v6964_v52  ;;  %v2178_v39 = vmax.f32 %v6962_v51, %v6966_v2  ;;  %2083 = vmax.xlane.f32.xlu1 %v2082_v55  ;;  %v6972_v30 = vpop.f32.mrb[94].mxu0 }
 0x34d   : > { %10812 = vst [vmem:[#allocation109_spill] sm:$0xff] %v6972_v30  ;;  %2176 = vmax.xlane.f32.xlu0 %v2175_v7  ;;  %v6974_v33 = vpop.f32.mrb[95].mxu0 }
 0x34e   : > { %10813 = vst [vmem:[#allocation110_spill] sm:$0xff] %v6974_v33  ;;  %v2181_v8 = vmax.f32 %v6972_v30, %v6974_v33 }
 0x350   : > { %2179 = vmax.xlane.f32.xlu1 %v2178_v39  ;;  %v6978_v62 = vpop.f32.mrb[72].mxu1 }
 0x351   : > { %10814 = vst [vmem:[#allocation111_spill] sm:$0xff] %v6978_v62  ;;  %2086 = vmax.xlane.f32.xlu0 %v2085_v32  ;;  %v6980_v31 = vpop.f32.mrb[73].mxu1  ;;  %v1886_v9 = vpop.xlane.xlu0 %1885 }
 0x352   : > { %10815 = vst [vmem:[#allocation112_spill] sm:$0xff] %v6980_v31  ;;  %v2088_v52 = vmax.f32 %v6978_v62, %v6980_v31  ;;  %v2268_v55 = vsub.f32 %v6523_v10, %v1886_v9  ;;  %v2269_v29 = vsub.f32 %v6526_v11, %v1886_v9  ;;  %v6986_v7 = vpop.f32.mrb[74].mxu1  ;;  %v6988_v2 = vpop.f32.mrb[96].mxu0 }
 0x353   : > { %10816 = vst [vmem:[#allocation113_spill] sm:$0xff] %v6986_v7  ;;  %10817 = vst [vmem:[#allocation114_spill] sm:$0xff] %v6988_v2  ;;  %v1889_v51 = vpop.xlane.xlu1 %1888  ;;  %v6990_v33 = vpop.f32.mrb[75].mxu1 }
 0x354   : > { %10818 = vst [vmem:[#allocation115_spill] sm:$0xff] %v6990_v33  ;;  %v2524_v39 = vmul.f32 1.442695, %v2268_v55  ;;  %v2526_v30 = vmul.f32 1.442695, %v2269_v29  ;;  %v2270_v32 = vsub.f32 %v6528_v13, %v1889_v51  ;;  %v2271_v47 = vsub.f32 %v6534_v16, %v1889_v51  ;;  %v6994_v44 = vpop.f32.mrb[97].mxu0  ;;  %2089 = vmax.xlane.f32.xlu1 %v2088_v52 }
 0x355   : > { %10819 = vst [vmem:[#allocation116_spill] sm:$0xff] %v6994_v44  ;;  %v2091_v10 = vmax.f32 %v6986_v7, %v6990_v33  ;;  %v2184_v11 = vmax.f32 %v6988_v2, %v6994_v44  ;;  %2182 = vmax.xlane.f32.xlu0 %v2181_v8  ;;  %v7000_v9 = vpop.f32.mrb[98].mxu0  ;;  %v1982_v31 = vpop.xlane.xlu0 %1981 }
 0x356   : > { %10820 = vst [vmem:[#allocation117_spill] sm:$0xff] %v7000_v9  ;;  %5253 = vpow2.f32 %v2524_v39  ;;  %v2528_v55 = vmul.f32 1.442695, %v2270_v32  ;;  %v2530_v29 = vmul.f32 1.442695, %v2271_v47  ;;  %v2332_v13 = vsub.f32 %v6530_v14, %v1982_v31  ;;  %v7003_v62 = vpop.f32.mrb[99].mxu0 }
 0x357   : > { %10821 = vst [vmem:[#allocation118_spill] sm:$0xff] %v7003_v62  ;;  %5255 = vpow2.f32 %v2526_v30  ;;  %v2333_v16 = vsub.f32 %v6536_v17, %v1982_v31  ;;  %v2187_v52 = vmax.f32 %v7000_v9, %v7003_v62 }
 0x358   : > { %2185 = vmax.xlane.f32.xlu1 %v2184_v11  ;;  %v7008_v51 = vpop.f32.mrb[76].mxu1  ;;  %5257 = vpow2.f32 %v2528_v55  ;;  %v2652_v8 = vmul.f32 1.442695, %v2332_v13 }
 0x359   : > { %10822 = vst [vmem:[#allocation119_spill] sm:$0xff] %v7008_v51  ;;  %2092 = vmax.xlane.f32.xlu0 %v2091_v10  ;;  %v1892_v33 = vpop.xlane.xlu1 %1891  ;;  %v7010_v39 = vpop.f32.mrb[77].mxu1  ;;  %5259 = vpow2.f32 %v2530_v29  ;;  %v2654_v47 = vmul.f32 1.442695, %v2333_v16 }
 0x35a   : > { %10823 = vst [vmem:[#allocation120_spill] sm:$0xff] %v7010_v39  ;;  %v2094_v14 = vmax.f32 %v7008_v51, %v7010_v39  ;;  %v1985_v30 = vpop.xlane.xlu0 %1984  ;;  %v7014_v32 = vpop.f32.mrb[78].mxu1  ;;  %5261 = vpow2.f32 %v2652_v8  ;;  %v2272_v29 = vsub.f32 %v6551_v24, %v1892_v33 }
 0x35b   : > { %10824 = vst [vmem:[#allocation121_spill] sm:$0xff] %v7014_v32  ;;  %v2334_v17 = vsub.f32 %v6538_v18, %v1985_v30  ;;  %v2335_v31 = vsub.f32 %v6544_v22, %v1985_v30  ;;  %v7018_v11 = vpop.f32.mrb[79].mxu1  ;;  %v7020_v55 = vpop.f32.mrb[100].mxu0  ;;  %5263 = vpow2.f32 %v2654_v47  ;;  %v2273_v30 = vsub.f32 %v6554_v25, %v1892_v33 }
 0x35c   : > { %10825 = vst [vmem:[#allocation122_spill] sm:$0xff] %v7018_v11  ;;  %10826 = vst [vmem:[#allocation123_spill] sm:$0xff] %v7020_v55  ;;  %v2097_v10 = vmax.f32 %v7014_v32, %v7018_v11  ;;  %v7024_v13 = vpop.f32.mrb[101].mxu0  ;;  %2095 = vmax.xlane.f32.xlu1 %v2094_v14 }
 0x35d   : > { %10827 = vst [vmem:[#allocation124_spill] sm:$0xff] %v7024_v13  ;;  %v2656_v16 = vmul.f32 1.442695, %v2334_v17  ;;  %v2190_v62 = vmax.f32 %v7020_v55, %v7024_v13  ;;  %2188 = vmax.xlane.f32.xlu0 %v2187_v52  ;;  %v7029_v18 = vpop.f32.mrb[102].mxu0  ;;  %v1988_v22 = vpop.xlane.xlu1 %1987  ;;  %v2658_v9 = vmul.f32 1.442695, %v2335_v31 }
 0x35e   : > { %10828 = vst [vmem:[#allocation125_spill] sm:$0xff] %v7029_v18  ;;  %v1895_v39 = vpop.xlane.xlu0 %1894  ;;  %v7032_v11 = vpop.f32.mrb[103].mxu0  ;;  %v2532_v52 = vmul.f32 1.442695, %v2272_v29  ;;  %v2534_v31 = vmul.f32 1.442695, %v2273_v30 }
 0x35f   : > { %10829 = vst [vmem:[#allocation126_spill] sm:$0xff] %v7032_v11  ;;  %v2193_v8 = vmax.f32 %v7029_v18, %v7032_v11  ;;  %5265 = vpow2.f32 %v2656_v16  ;;  %v2274_v47 = vsub.f32 %v6556_v27, %v1895_v39  ;;  %v2275_v11 = vsub.f32 %v6562_v34, %v1895_v39 }
 0x360   : > { %v7036_v14 = vpop.eup %5253  ;;  %2191 = vmax.xlane.f32.xlu1 %v2190_v62  ;;  %v7038_v24 = vpop.f32.mrb[80].mxu1  ;;  %5267 = vpow2.f32 %v2658_v9  ;;  %v2336_v39 = vsub.f32 %v6558_v28, %v1988_v22 }
 0x361   : > { %10830 = vst [vmem:[#allocation127_spill] sm:$0xff] %v7036_v14  ;;  %10831 = vst [vmem:[#allocation128_spill] sm:$0xff] %v7038_v24  ;;  %v7040_v17 = vpop.eup %5255  ;;  %2098 = vmax.xlane.f32.xlu0 %v2097_v10  ;;  %v7043_v25 = vpop.xlane.xlu1 %1897  ;;  %5269 = vpow2.f32 %v2532_v52  ;;  %v2536_v30 = vmul.f32 1.442695, %v2274_v47 }
 0x362   : > { %10832 = vst [vmem:[#allocation129_spill] sm:$0xff] %v7040_v17  ;;  %v7045_v33 = vpop.f32.mrb[81].mxu1  ;;  %v1991_v18 = vpop.xlane.xlu0 %1990  ;;  %v3036_v27 = vadd.f32 %v7040_v17, %v7036_v14  ;;  %5271 = vpow2.f32 %v2534_v31  ;;  %v2337_v17 = vsub.f32 %v6564_v35, %v1988_v22  ;;  %v2660_v35 = vmul.f32 1.442695, %v2336_v39 }
 0x363   : > { %10833 = vst [vmem:[#allocation130_spill] sm:$0xff] %v7045_v33  ;;  %v2100_v62 = vmax.f32 %v7038_v24, %v7045_v33  ;;  %v7050_v32 = vpop.f32.mrb[82].mxu1  ;;  %v7052_v13 = vpop.eup %5257  ;;  %v2538_v24 = vmul.f32 1.442695, %v2275_v11  ;;  %5273 = vpow2.f32 %v2536_v30  ;;  %v2338_v11 = vsub.f32 %v6566_v36, %v1991_v18 }
 0x364   : > { %10834 = vst [vmem:[#allocation131_spill] sm:$0xff] %v7050_v32  ;;  %10835 = vst [vmem:[#allocation132_spill] sm:$0xff] %v7052_v13  ;;  %v7056_v10 = vpop.f32.mrb[83].mxu1  ;;  %v7058_v29 = vpop.f32.mrb[104].mxu0  ;;  %3037 = vadd.xlane.f32.xlu1 %v3036_v27 }
 0x365   : > { %10836 = vst [vmem:[#allocation133_spill] sm:$0xff] %v7056_v10  ;;  %10837 = vst [vmem:[#allocation134_spill] sm:$0xff] %v7058_v29  ;;  %v7060_v16 = vpop.eup %5259  ;;  %v2103_v34 = vmax.f32 %v7050_v32, %v7056_v10  ;;  %v7064_v9 = vpop.f32.mrb[105].mxu0  ;;  %2194 = vmax.xlane.f32.xlu0 %v2193_v8  ;;  %5275 = vpow2.f32 %v2538_v24  ;;  %v2277_v24 = vsub.f32 %v6581_v43, %v7043_v25 }
 0x366   : > { %10838 = vst [vmem:[#allocation135_spill] sm:$0xff] %v7060_v16  ;;  %10839 = vst [vmem:[#allocation136_spill] sm:$0xff] %v7064_v9  ;;  %v7067_v33 = vpop.xlane.xlu1 %1993  ;;  %v7069_v14 = vpop.f32.mrb[106].mxu0  ;;  %v2196_v10 = vmax.f32 %v7058_v29, %v7064_v9  ;;  %v3039_v28 = vadd.f32 %v7060_v16, %v7052_v13  ;;  %v2662_v9 = vmul.f32 1.442695, %v2337_v17  ;;  %v2339_v13 = vsub.f32 %v6573_v40, %v1991_v18 }
 0x367   : > { %10840 = vst [vmem:[#allocation137_spill] sm:$0xff] %v7069_v14  ;;  %v7072_v55 = vpop.xlane.xlu0 %1900  ;;  %v7076_v32 = vpop.f32.mrb[107].mxu0  ;;  %v2276_v40 = vsub.f32 %v6579_v42, %v7043_v25  ;;  %5277 = vpow2.f32 %v2660_v35  ;;  %v2340_v42 = vsub.f32 %v6586_v46, %v7067_v33  ;;  %v2341_v35 = vsub.f32 %v6592_v49, %v7067_v33 }
 0x368   : > { %10841 = vst [vmem:[#allocation138_spill] sm:$0xff] %v7076_v32  ;;  %v7078_v52 = vpop.eup %5261  ;;  %v7086_v31 = vpop.f32.mrb[84].mxu1  ;;  %2101 = vmax.xlane.f32.xlu1 %v2100_v62  ;;  %5279 = vpow2.f32 %v2662_v9  ;;  %v2666_v51 = vmul.f32 1.442695, %v2339_v13  ;;  %v2278_v46 = vsub.f32 %v6584_v45, %v7072_v55  ;;  %v2279_v43 = vsub.f32 %v6590_v48, %v7072_v55 }
 0x369   : > { %10842 = vst [vmem:[#allocation139_spill] sm:$0xff] %v7078_v52  ;;  %v7082_v8 = vpop.eup %5263  ;;  %10844 = vst [vmem:[#allocation141_spill] sm:$0xff] %v7086_v31  ;;  %3040 = vadd.xlane.f32.xlu0 %v3039_v28  ;;  %v7091_v27 = vpop.f32.mrb[85].mxu1  ;;  %v2664_v28 = vmul.f32 1.442695, %v2338_v11 }
 0x36a   : > { %10843 = vst [vmem:[#allocation140_spill] sm:$0xff] %v7082_v8  ;;  %v7089_v22 = vpop.xlane.xlu1 %1903  ;;  %10845 = vst [vmem:[#allocation142_spill] sm:$0xff] %v7091_v27  ;;  %v7098_v29 = vpop.f32.mrb[86].mxu1  ;;  %v3132_v36 = vadd.f32 %v7082_v8, %v7078_v52  ;;  %v2540_v13 = vmul.f32 1.442695, %v2276_v40 }
 0x36b   : > { %v7094_v16 = vpop.xlane.xlu0 %1996  ;;  %10846 = vst [vmem:[#allocation143_spill] sm:$0xff] %v7098_v29  ;;  %v7100_v39 = vpop.eup %5265  ;;  %v2542_v52 = vmul.f32 1.442695, %v2277_v24  ;;  %5281 = vpow2.f32 %v2664_v28  ;;  %v2668_v40 = vmul.f32 1.442695, %v2340_v42  ;;  %v2280_v45 = vsub.f32 %v6607_v60, %v7089_v22 }
 0x36c   : > { %10847 = vst [vmem:[#allocation144_spill] sm:$0xff] %v7100_v39  ;;  %v7104_v62 = vpop.f32.mrb[87].mxu1  ;;  %v7106_v30 = vpop.f32.mrb[108].mxu0  ;;  %3133 = vadd.xlane.f32.xlu1 %v3132_v36  ;;  %5283 = vpow2.f32 %v2666_v51  ;;  %v2281_v28 = vsub.f32 %v6609_v61, %v7089_v22  ;;  %v2544_v49 = vmul.f32 1.442695, %v2278_v46  ;;  %v2342_v24 = vsub.f32 %v6594_v50, %v7094_v16 }
 0x36d   : > { %10848 = vst [vmem:[#allocation145_spill] sm:$0xff] %v7104_v62  ;;  %10849 = vst [vmem:[#allocation146_spill] sm:$0xff] %v7106_v30  ;;  %v7108_v17 = vpop.eup %5267  ;;  %v7112_v18 = vpop.f32.mrb[109].mxu0  ;;  %2104 = vmax.xlane.f32.xlu0 %v2103_v34  ;;  %5285 = vpow2.f32 %v2540_v13  ;;  %v2343_v61 = vsub.f32 %v6601_v58, %v7094_v16  ;;  %v10864_v22 = vmax.f32 %v7069_v14, %v7076_v32  ;;  %v2548_v50 = vmul.f32 1.442695, %v2280_v45 }
 0x36e   : > { %10850 = vst [vmem:[#allocation147_spill] sm:$0xff] %v7108_v17  ;;  %10851 = vst [vmem:[#allocation148_spill] sm:$0xff] %v7112_v18  ;;  %v7116_v47 = vpop.xlane.xlu1 %1999  ;;  %v7120_v8 = vpop.f32.mrb[110].mxu0  ;;  %v3135_v11 = vadd.f32 %v7108_v17, %v7100_v39  ;;  %5287 = vpow2.f32 %v2542_v52 }
 0x36f   : > { %10852 = vst [vmem:[#allocation149_spill] sm:$0xff] %v7120_v8  ;;  %v7124_v7 = vpop.xlane.xlu0 %1906  ;;  %v7128_v25 = vpop.f32.mrb[111].mxu0  ;;  %5289 = vpow2.f32 %v2668_v40  ;;  %v2344_v52 = vsub.f32 %v6614_v0, %v7116_v47  ;;  %v2345_v13 = vsub.f32 %v6620_v4, %v7116_v47  ;;  %v2672_v0 = vmul.f32 1.442695, %v2342_v24 }
 0x370   : > { %10853 = vst [vmem:[#allocation150_spill] sm:$0xff] %v7128_v25  ;;  %v7130_v34 = vpop.eup %5269  ;;  %v7140_v36 = vpop.f32.mrb[88].mxu1  ;;  %2197 = vmax.xlane.f32.xlu1 %v2196_v10  ;;  %v2670_v10 = vmul.f32 1.442695, %v2341_v35  ;;  %v2546_v35 = vmul.f32 1.442695, %v2279_v43  ;;  %v10870_v4 = vmax.f32 %v7086_v31, %v7091_v27 }
 0x371   : > { %10854 = vst [vmem:[#allocation151_spill] sm:$0xff] %v7130_v34  ;;  %v7136_v9 = vpop.eup %5271  ;;  %10856 = vst [vmem:[#allocation153_spill] sm:$0xff] %v7140_v36  ;;  %3136 = vadd.xlane.f32.xlu0 %v3135_v11  ;;  %v7148_v33 = vpop.f32.mrb[89].mxu1  ;;  %v2674_v32 = vmul.f32 1.442695, %v2343_v61 }
 0x372   : > { %10855 = vst [vmem:[#allocation152_spill] sm:$0xff] %v7136_v9  ;;  %v7144_v44 = vpop.xlane.xlu1 %1909  ;;  %10857 = vst [vmem:[#allocation154_spill] sm:$0xff] %v7148_v33  ;;  %v7156_v48 = vpop.f32.mrb[90].mxu1  ;;  %v3042_v51 = vadd.f32 %v7136_v9, %v7130_v34  ;;  %5291 = vpow2.f32 %v2670_v10  ;;  %v2282_v9 = vsub.f32 %v6612_v63, %v7124_v7  ;;  %v2283_v10 = vsub.f32 %v6618_v3, %v7124_v7 }
 0x373   : > { %v7152_v39 = vpop.xlane.xlu0 %2002  ;;  %10858 = vst [vmem:[#allocation155_spill] sm:$0xff] %v7156_v48  ;;  %v7158_v55 = vpop.eup %5273  ;;  %5293 = vpow2.f32 %v2544_v49  ;;  %v2676_v63 = vmul.f32 1.442695, %v2344_v52 }
 0x374   : > { %10859 = vst [vmem:[#allocation156_spill] sm:$0xff] %v7158_v55  ;;  %v7164_v42 = vpop.f32.mrb[91].mxu1  ;;  %v7166_v11 = vpop.f32.mrb[112].mxu0  ;;  %3043 = vadd.xlane.f32.xlu1 %v3042_v51  ;;  %5295 = vpow2.f32 %v2546_v35  ;;  %v2552_v3 = vmul.f32 1.442695, %v2282_v9 }
 0x375   : > { %10860 = vst [vmem:[#allocation157_spill] sm:$0xff] %v7164_v42  ;;  %10861 = vst [vmem:[#allocation158_spill] sm:$0xff] %v7166_v11  ;;  %v7168_v60 = vpop.eup %5275  ;;  %v7172_v17 = vpop.f32.mrb[113].mxu0  ;;  %2200 = vmax.xlane.f32.xlu0 %v10864_v22  ;;  %v2550_v22 = vmul.f32 1.442695, %v2281_v28  ;;  %5297 = vpow2.f32 %v2548_v50  ;;  %v2284_v28 = vsub.f32 %v6637_v21, %v7144_v44 }
 0x376   : > { %10862 = vst [vmem:[#allocation159_spill] sm:$0xff] %v7168_v60  ;;  %10863 = vst [vmem:[#allocation160_spill] sm:$0xff] %v7172_v17  ;;  %v7179_v34 = vpop.xlane.xlu1 %2005  ;;  %v7183_v46 = vpop.f32.mrb[114].mxu0  ;;  %v3045_v40 = vadd.f32 %v7168_v60, %v7158_v55  ;;  %v2346_v55 = vsub.f32 %v6622_v5, %v7152_v39 }
 0x377   : > { %10865 = vst [vmem:[#allocation161_spill] sm:$0xff] %v7183_v46  ;;  %v7187_v43 = vpop.xlane.xlu0 %1912  ;;  %v7191_v16 = vpop.f32.mrb[115].mxu0  ;;  %5299 = vpow2.f32 %v2550_v22 }
 0x378   : > { %10866 = vst [vmem:[#allocation162_spill] sm:$0xff] %v7191_v16  ;;  %v7193_v51 = vpop.eup %5277  ;;  %v7203_v58 = vpop.f32.mrb[92].mxu1  ;;  %2107 = vmax.xlane.f32.xlu1 %v10870_v4  ;;  %v2285_v4 = vsub.f32 %v6639_v23, %v7144_v44  ;;  %5301 = vpow2.f32 %v2672_v0  ;;  %v2347_v23 = vsub.f32 %v6629_v15, %v7152_v39  ;;  %v10878_v44 = vmax.f32 %v7098_v29, %v7104_v62 }
 0x379   : > { %10867 = vst [vmem:[#allocation163_spill] sm:$0xff] %v7193_v51  ;;  %v7199_v45 = vpop.eup %5279  ;;  %10869 = vst [vmem:[#allocation165_spill] sm:$0xff] %v7203_v58  ;;  %3046 = vadd.xlane.f32.xlu0 %v3045_v40  ;;  %v7214_v24 = vpop.f32.mrb[93].mxu1  ;;  %v2678_v40 = vmul.f32 1.442695, %v2345_v13  ;;  %5303 = vpow2.f32 %v2674_v32 }
 0x37a   : > { %10868 = vst [vmem:[#allocation164_spill] sm:$0xff] %v7199_v45  ;;  %v7210_v47 = vpop.xlane.xlu1 %1915  ;;  %10871 = vst [vmem:[#allocation166_spill] sm:$0xff] %v7214_v24  ;;  %v7222_v7 = vpop.f32.mrb[94].mxu1  ;;  %v3138_v50 = vadd.f32 %v7199_v45, %v7193_v51  ;;  %v2554_v13 = vmul.f32 1.442695, %v2283_v10  ;;  %5305 = vpow2.f32 %v2676_v63  ;;  %v2348_v10 = vsub.f32 %v6646_v38, %v7179_v34 }
 0x37b   : > { %v7218_v35 = vpop.xlane.xlu0 %2008  ;;  %10872 = vst [vmem:[#allocation167_spill] sm:$0xff] %v7222_v7  ;;  %v7224_v61 = vpop.eup %5281  ;;  %v2556_v32 = vmul.f32 1.442695, %v2284_v28  ;;  %5307 = vpow2.f32 %v2678_v40  ;;  %v2558_v9 = vmul.f32 1.442695, %v2285_v4  ;;  %v2349_v51 = vsub.f32 %v6652_v41, %v7179_v34 }
 0x37c   : > { %10873 = vst [vmem:[#allocation168_spill] sm:$0xff] %v7224_v61  ;;  %v7230_v52 = vpop.f32.mrb[95].mxu1  ;;  %v7232_v21 = vpop.f32.mrb[116].mxu0  ;;  %3139 = vadd.xlane.f32.xlu1 %v3138_v50  ;;  %5309 = vpow2.f32 %v2552_v3  ;;  %v2680_v38 = vmul.f32 1.442695, %v2346_v55  ;;  %v2286_v45 = vsub.f32 %v6644_v37, %v7187_v43  ;;  %v2287_v4 = vsub.f32 %v6650_v53, %v7187_v43 }
 0x37d   : > { %10874 = vst [vmem:[#allocation169_spill] sm:$0xff] %v7230_v52  ;;  %10875 = vst [vmem:[#allocation170_spill] sm:$0xff] %v7232_v21  ;;  %v7234_v49 = vpop.eup %5283  ;;  %v7238_v60 = vpop.f32.mrb[117].mxu0  ;;  %2110 = vmax.xlane.f32.xlu0 %v10878_v44  ;;  %5311 = vpow2.f32 %v2554_v13  ;;  %v2682_v40 = vmul.f32 1.442695, %v2347_v23  ;;  %v10886_v41 = vmax.f32 %v7106_v30, %v7112_v18  ;;  %v2288_v23 = vsub.f32 %v6666_v1, %v7210_v47 }
 0x37e   : > { %10876 = vst [vmem:[#allocation171_spill] sm:$0xff] %v7234_v49  ;;  %10877 = vst [vmem:[#allocation172_spill] sm:$0xff] %v7238_v60  ;;  %v7245_v22 = vpop.xlane.xlu1 %2011  ;;  %v7249_v0 = vpop.f32.mrb[118].mxu0  ;;  %v3141_v63 = vadd.f32 %v7234_v49, %v7224_v61  ;;  %5313 = vpow2.f32 %v2556_v32  ;;  %v2684_v13 = vmul.f32 1.442695, %v2348_v10  ;;  %v2289_v61 = vsub.f32 %v6668_v6, %v7210_v47 }
 0x37f   : > { %10879 = vst [vmem:[#allocation173_spill] sm:$0xff] %v7249_v0  ;;  %v7251_v5 = vpop.eup %5285  ;;  %v7255_v15 = vpop.xlane.xlu0 %1918  ;;  %5315 = vpow2.f32 %v2558_v9  ;;  %v2686_v55 = vmul.f32 1.442695, %v2349_v51  ;;  %v2560_v43 = vmul.f32 1.442695, %v2286_v45  ;;  %v2350_v18 = vsub.f32 %v6658_v56, %v7218_v35 }
 0x380   : > { %10880 = vst [vmem:[#allocation174_spill] sm:$0xff] %v7251_v5  ;;  %v7259_v50 = vpop.f32.mrb[119].mxu0  ;;  %v7261_v44 = vpop.eup %5287  ;;  %2203 = vmax.xlane.f32.xlu1 %v10886_v41  ;;  %5317 = vpow2.f32 %v2680_v38  ;;  %v2562_v6 = vmul.f32 1.442695, %v2287_v4  ;;  %v2351_v47 = vsub.f32 %v6661_v57, %v7218_v35  ;;  %v10896_v9 = vmax.f32 %v7120_v8, %v7128_v25 }
 0x381   : > { %10881 = vst [vmem:[#allocation175_spill] sm:$0xff] %v7259_v50  ;;  %10882 = vst [vmem:[#allocation176_spill] sm:$0xff] %v7261_v44  ;;  %v7267_v28 = vpop.eup %5289  ;;  %v7271_v39 = vpop.f32.mrb[96].mxu1  ;;  %3142 = vadd.xlane.f32.xlu0 %v3141_v63  ;;  %v3048_v32 = vadd.f32 %v7261_v44, %v7251_v5  ;;  %5319 = vpow2.f32 %v2682_v40  ;;  %v2564_v40 = vmul.f32 1.442695, %v2288_v23  ;;  %v2352_v4 = vsub.f32 %v6674_v19, %v7245_v22 }
 0x382   : > { %10883 = vst [vmem:[#allocation177_spill] sm:$0xff] %v7267_v28  ;;  %10884 = vst [vmem:[#allocation178_spill] sm:$0xff] %v7271_v39  ;;  %v7273_v62 = vpop.eup %5291  ;;  %v7280_v34 = vpop.xlane.xlu1 %1921  ;;  %5321 = vpow2.f32 %v2684_v13  ;;  %v2566_v45 = vmul.f32 1.442695, %v2289_v61  ;;  %v2353_v44 = vsub.f32 %v6678_v26, %v7245_v22  ;;  %v2688_v19 = vmul.f32 1.442695, %v2350_v18 }
 0x383   : > { %10885 = vst [vmem:[#allocation179_spill] sm:$0xff] %v7273_v62  ;;  %v7284_v37 = vpop.f32.mrb[97].mxu1  ;;  %v7286_v3 = vpop.eup %5293  ;;  %5323 = vpow2.f32 %v2686_v55  ;;  %v2290_v25 = vsub.f32 %v6672_v12, %v7255_v15  ;;  %v2690_v55 = vmul.f32 1.442695, %v2351_v47  ;;  %v2291_v61 = vsub.f32 %v6676_v20, %v7255_v15 }
 0x384   : > { %10887 = vst [vmem:[#allocation180_spill] sm:$0xff] %v7284_v37  ;;  %10888 = vst [vmem:[#allocation181_spill] sm:$0xff] %v7286_v3  ;;  %v7290_v53 = vpop.xlane.xlu0 %2014  ;;  %v7294_v63 = vpop.f32.mrb[98].mxu1  ;;  %3049 = vadd.xlane.f32.xlu1 %v3048_v32  ;;  %5325 = vpow2.f32 %v2560_v43  ;;  %v10904_v26 = vmax.f32 %v7140_v36, %v7148_v33  ;;  %v2292_v47 = vsub.f32 %v6690_v54, %v7280_v34  ;;  %v2694_v18 = vmul.f32 1.442695, %v2353_v44  ;;  %v10912_v33 = vld [vmem:[#allocation15_spill] sm:$0xff] }
 0x385   : > { %10889 = vst [vmem:[#allocation182_spill] sm:$0xff] %v7294_v63  ;;  %v7296_v41 = vpop.eup %5295  ;;  %v7302_v10 = vpop.f32.mrb[99].mxu1  ;;  %2206 = vmax.xlane.f32.xlu0 %v10896_v9  ;;  %5327 = vpow2.f32 %v2562_v6  ;;  %v2692_v6 = vmul.f32 1.442695, %v2352_v4  ;;  %v2568_v15 = vmul.f32 1.442695, %v2290_v25  ;;  %v2354_v36 = vsub.f32 %v10912_v33, %v7290_v53 }
 0x386   : > { %10890 = vst [vmem:[#allocation183_spill] sm:$0xff] %v7296_v41  ;;  %10891 = vst [vmem:[#allocation184_spill] sm:$0xff] %v7302_v10  ;;  %v7304_v1 = vpop.f32.mrb[120].mxu0  ;;  %v7306_v49 = vpop.eup %5297  ;;  %v3051_v13 = vadd.f32 %v7296_v41, %v7286_v3  ;;  %5329 = vpow2.f32 %v2564_v40  ;;  %v2293_v3 = vsub.f32 %v6692_v59, %v7280_v34  ;;  %v3144_v40 = vadd.f32 %v7273_v62, %v7267_v28  ;;  %v10915_v34 = vld [vmem:[#allocation16_spill] sm:$0xff] }
 0x387   : > { %10892 = vst [vmem:[#allocation185_spill] sm:$0xff] %v7304_v1  ;;  %10893 = vst [vmem:[#allocation186_spill] sm:$0xff] %v7306_v49  ;;  %v7310_v30 = vpop.f32.mrb[121].mxu0  ;;  %v7312_v51 = vpop.eup %5299  ;;  %5331 = vpow2.f32 %v2566_v45  ;;  %v2570_v59 = vmul.f32 1.442695, %v2291_v61  ;;  %v2355_v45 = vsub.f32 %v10915_v34, %v7290_v53  ;;  %v10916_v28 = vmax.f32 %v7156_v48, %v7164_v42  ;;  %v10921_v42 = vld [vmem:[#allocation18_spill] sm:$0xff] }
 0x388   : > { %10894 = vst [vmem:[#allocation187_spill] sm:$0xff] %v7310_v30  ;;  %10895 = vst [vmem:[#allocation188_spill] sm:$0xff] %v7312_v51  ;;  %v7319_v5 = vpop.xlane.xlu1 %2017  ;;  %v7323_v56 = vpop.f32.mrb[122].mxu0  ;;  %2113 = vmax.xlane.f32.xlu1 %v10904_v26 }
 0x389   : > { %10897 = vst [vmem:[#allocation189_spill] sm:$0xff] %v7323_v56  ;;  %v7325_v38 = vpop.eup %5301  ;;  %v7329_v57 = vpop.xlane.xlu0 %1924  ;;  %3052 = vadd.xlane.f32.xlu0 %v3051_v13  ;;  %5333 = vpow2.f32 %v2688_v19  ;;  %v2356_v25 = vsub.f32 %v10921_v42, %v7319_v5  ;;  %v10927_v42 = vmax.f32 %v7166_v11, %v7172_v17 }
 0x38a   : > { %10898 = vst [vmem:[#allocation190_spill] sm:$0xff] %v7325_v38  ;;  %v7333_v32 = vpop.f32.mrb[123].mxu0  ;;  %v7335_v9 = vpop.eup %5303  ;;  %5335 = vpow2.f32 %v2690_v55  ;;  %v2572_v55 = vmul.f32 1.442695, %v2292_v47  ;;  %v10923_v47 = vld [vmem:[#allocation20_spill] sm:$0xff] }
 0x38b   : > { %10899 = vst [vmem:[#allocation191_spill] sm:$0xff] %v7333_v32  ;;  %10900 = vst [vmem:[#allocation192_spill] sm:$0xff] %v7335_v9  ;;  %v7341_v23 = vpop.eup %5305  ;;  %v7345_v35 = vpop.f32.mrb[100].mxu1  ;;  %5337 = vpow2.f32 %v2692_v6  ;;  %v3147_v48 = vadd.f32 %v7335_v9, %v7325_v38  ;;  %v2696_v6 = vmul.f32 1.442695, %v2354_v36  ;;  %v2357_v31 = vsub.f32 %v10923_v47, %v7319_v5  ;;  %v10931_v47 = vld [vmem:[#allocation32_spill] sm:$0xff] }
 0x38c   : > { %10901 = vst [vmem:[#allocation193_spill] sm:$0xff] %v7341_v23  ;;  %10902 = vst [vmem:[#allocation194_spill] sm:$0xff] %v7345_v35  ;;  %v7347_v8 = vpop.eup %5307  ;;  %v7354_v22 = vpop.xlane.xlu1 %1927  ;;  %3145 = vadd.xlane.f32.xlu1 %v3144_v40  ;;  %5339 = vpow2.f32 %v2694_v18  ;;  %v2698_v18 = vmul.f32 1.442695, %v2355_v45  ;;  %v2700_v36 = vmul.f32 1.442695, %v2356_v25 }
 0x38d   : > { %10903 = vst [vmem:[#allocation195_spill] sm:$0xff] %v7347_v8  ;;  %v7358_v12 = vpop.f32.mrb[101].mxu1  ;;  %v7360_v43 = vpop.eup %5309  ;;  %2116 = vmax.xlane.f32.xlu0 %v10916_v28  ;;  %v2574_v28 = vmul.f32 1.442695, %v2293_v3  ;;  %5341 = vpow2.f32 %v2568_v15  ;;  %v10926_v3 = vld [vmem:[#allocation17_spill] sm:$0xff] }
 0x38e   : > { %10905 = vst [vmem:[#allocation196_spill] sm:$0xff] %v7358_v12  ;;  %10906 = vst [vmem:[#allocation197_spill] sm:$0xff] %v7360_v43  ;;  %v7364_v20 = vpop.xlane.xlu0 %2020  ;;  %v7368_v13 = vpop.f32.mrb[102].mxu1  ;;  %v2294_v2 = vsub.f32 %v10926_v3, %v7329_v57  ;;  %v2702_v3 = vmul.f32 1.442695, %v2357_v31 }
 0x38f   : > { %10907 = vst [vmem:[#allocation198_spill] sm:$0xff] %v7368_v13  ;;  %v7370_v26 = vpop.eup %5311  ;;  %v7376_v4 = vpop.f32.mrb[103].mxu1  ;;  %5343 = vpow2.f32 %v2570_v59  ;;  %v10930_v59 = vld [vmem:[#allocation31_spill] sm:$0xff] }
 0x390   : > { %10908 = vst [vmem:[#allocation199_spill] sm:$0xff] %v7370_v26  ;;  %10909 = vst [vmem:[#allocation200_spill] sm:$0xff] %v7376_v4  ;;  %v7378_v54 = vpop.f32.mrb[124].mxu0  ;;  %v7380_v41 = vpop.eup %5313  ;;  %2209 = vmax.xlane.f32.xlu1 %v10927_v42  ;;  %5345 = vpow2.f32 %v2572_v55  ;;  %v3054_v55 = vadd.f32 %v7312_v51, %v7306_v49  ;;  %v10940_v49 = vld [vmem:[#allocation23_spill] sm:$0xff] }
 0x391   : > { %10910 = vst [vmem:[#allocation201_spill] sm:$0xff] %v7378_v54  ;;  %10911 = vst [vmem:[#allocation202_spill] sm:$0xff] %v7380_v41  ;;  %v7384_v29 = vpop.f32.mrb[125].mxu0  ;;  %v7386_v44 = vpop.eup %5315  ;;  %3148 = vadd.xlane.f32.xlu0 %v3147_v48  ;;  %5347 = vpow2.f32 %v2574_v28  ;;  %v2576_v28 = vmul.f32 1.442695, %v2294_v2  ;;  %v2296_v51 = vsub.f32 %v10940_v49, %v7354_v22  ;;  %v10951_v49 = vld [vmem:[#allocation35_spill] sm:$0xff]  ;;  %v10957_v54 = vmax.f32 %v7203_v58, %v7214_v24 }
 0x392   : > { %10913 = vst [vmem:[#allocation15_spill] sm:$0xff] %v7384_v29  ;;  %10914 = vst [vmem:[#allocation203_spill] sm:$0xff] %v7386_v44  ;;  %v7393_v62 = vpop.xlane.xlu1 %2023  ;;  %v7397_v33 = vpop.f32.mrb[126].mxu0  ;;  %v10964_v58 = vld [vmem:[#allocation28_spill] sm:$0xff] }
 0x393   : > { %10917 = vst [vmem:[#allocation16_spill] sm:$0xff] %v7397_v33  ;;  %v7399_v19 = vpop.eup %5317  ;;  %v7401_v61 = vpop.xlane.xlu0 %1930  ;;  %5349 = vpow2.f32 %v2696_v6  ;;  %v10937_v33 = vld [vmem:[#allocation19_spill] sm:$0xff]  ;;  %v10941_v6 = vmax.f32 %v7183_v46, %v7191_v16 }
 0x394   : > { %10918 = vst [vmem:[#allocation204_spill] sm:$0xff] %v7399_v19  ;;  %v7405_v40 = vpop.f32.mrb[127].mxu0  ;;  %v7407_v34 = vpop.eup %5319  ;;  %v2295_v48 = vsub.f32 %v10937_v33, %v7329_v57  ;;  %5351 = vpow2.f32 %v2698_v18  ;;  %3055 = vadd.xlane.f32.xlu1 %v3054_v55  ;;  %v10944_v18 = vld [vmem:[#allocation24_spill] sm:$0xff] }
 0x395   : > { %10919 = vst [vmem:[#allocation205_spill] sm:$0xff] %v7405_v40  ;;  %10920 = vst [vmem:[#allocation206_spill] sm:$0xff] %v7407_v34  ;;  %v7413_v27 = vpop.eup %5321  ;;  %v7417_v53 = vpop.f32.mrb[104].mxu1  ;;  %2212 = vmax.xlane.f32.xlu0 %v10941_v6  ;;  %v2297_v2 = vsub.f32 %v10944_v18, %v7354_v22  ;;  %v10946_v55 = vld [vmem:[#allocation36_spill] sm:$0xff]  ;;  %5353 = vpow2.f32 %v2700_v36  ;;  %v10950_v22 = vld [vmem:[#allocation33_spill] sm:$0xff] }
 0x396   : > { %10922 = vst [vmem:[#allocation18_spill] sm:$0xff] %v7413_v27  ;;  %10924 = vst [vmem:[#allocation20_spill] sm:$0xff] %v7417_v53  ;;  %v7419_v14 = vpop.eup %5323  ;;  %v7426_v38 = vpop.xlane.xlu1 %1933  ;;  %5355 = vpow2.f32 %v2702_v3  ;;  %v2578_v4 = vmul.f32 1.442695, %v2295_v48  ;;  %v10953_v6 = vld [vmem:[#allocation22_spill] sm:$0xff] }
 0x397   : > { %10925 = vst [vmem:[#allocation207_spill] sm:$0xff] %v7419_v14  ;;  %v7430_v5 = vpop.f32.mrb[105].mxu1  ;;  %v7432_v15 = vpop.eup %5325  ;;  %5357 = vpow2.f32 %v2576_v28  ;;  %v10956_v18 = vld [vmem:[#allocation26_spill] sm:$0xff] }
 0x398   : > { %10928 = vst [vmem:[#allocation17_spill] sm:$0xff] %v7430_v5  ;;  %10929 = vst [vmem:[#allocation208_spill] sm:$0xff] %v7432_v15  ;;  %v7438_v9 = vpop.xlane.xlu0 %2026  ;;  %v7442_v42 = vpop.f32.mrb[106].mxu1  ;;  %v3057_v5 = vadd.f32 %v7370_v26, %v7360_v43  ;;  %v10945_v26 = vld [vmem:[#allocation34_spill] sm:$0xff]  ;;  %v2360_v12 = vsub.f32 %v10956_v18, %v7393_v62  ;;  %2119 = vmax.xlane.f32.xlu1 %v10957_v54  ;;  %v10961_v18 = vld [vmem:[#allocation40_spill] sm:$0xff] }
 0x399   : > { %10932 = vst [vmem:[#allocation31_spill] sm:$0xff] %v7442_v42  ;;  %v7444_v17 = vpop.eup %5327  ;;  %v7448_v11 = vpop.f32.mrb[107].mxu1  ;;  %v10966_v28 = vld [vmem:[#allocation38_spill] sm:$0xff]  ;;  %5359 = vpow2.f32 %v2578_v4  ;;  %v10974_v4 = vmax.f32 %v7222_v7, %v7230_v52 }
 0x39a   : > { %10933 = vst [vmem:[#allocation32_spill] sm:$0xff] %v7444_v17  ;;  %10934 = vst [vmem:[#allocation209_spill] sm:$0xff] %v7448_v11  ;;  %v7450_v45 = vpop.f32.mrb[128].mxu0  ;;  %v7452_v40 = vpop.eup %5329  ;;  %v10949_v11 = vld [vmem:[#allocation21_spill] sm:$0xff]  ;;  %3058 = vadd.xlane.f32.xlu0 %v3057_v5 }
 0x39b   : > { %10935 = vst [vmem:[#allocation210_spill] sm:$0xff] %v7450_v45  ;;  %10936 = vst [vmem:[#allocation211_spill] sm:$0xff] %v7452_v40  ;;  %v7458_v53 = vpop.f32.mrb[129].mxu0  ;;  %v7460_v25 = vpop.eup %5331  ;;  %v2358_v42 = vsub.f32 %v10949_v11, %v7364_v20  ;;  %v3150_v45 = vadd.f32 %v7347_v8, %v7341_v23  ;;  %v2580_v11 = vmul.f32 1.442695, %v2296_v51  ;;  %v10960_v51 = vld [vmem:[#allocation39_spill] sm:$0xff] }
 0x39c   : > { %10938 = vst [vmem:[#allocation19_spill] sm:$0xff] %v7458_v53  ;;  %10939 = vst [vmem:[#allocation212_spill] sm:$0xff] %v7460_v25  ;;  %v7467_v31 = vpop.xlane.xlu1 %2029  ;;  %v7471_v33 = vpop.f32.mrb[130].mxu0  ;;  %v2359_v53 = vsub.f32 %v10953_v6, %v7364_v20  ;;  %v2582_v23 = vmul.f32 1.442695, %v2297_v2  ;;  %v10965_v2 = vld [vmem:[#allocation37_spill] sm:$0xff] }
 0x39d   : > { %10942 = vst [vmem:[#allocation23_spill] sm:$0xff] %v7471_v33  ;;  %v7473_v43 = vpop.eup %5333  ;;  %v7481_v16 = vpop.xlane.xlu0 %1936  ;;  %v2704_v20 = vmul.f32 1.442695, %v2358_v42  ;;  %5361 = vpow2.f32 %v2580_v11  ;;  %3151 = vadd.xlane.f32.xlu1 %v3150_v45  ;;  %v3060_v45 = vadd.f32 %v7386_v44, %v7380_v41  ;;  %v10990_v44 = vld [vmem:[#allocation47_spill] sm:$0xff] }
 0x39e   : > { %10943 = vst [vmem:[#allocation213_spill] sm:$0xff] %v7473_v43  ;;  %v7485_v46 = vpop.f32.mrb[131].mxu0  ;;  %v7487_v57 = vpop.eup %5335  ;;  %v2706_v54 = vmul.f32 1.442695, %v2359_v53  ;;  %2122 = vmax.xlane.f32.xlu0 %v10974_v4  ;;  %5363 = vpow2.f32 %v2582_v23  ;;  %v10986_v23 = vmax.f32 %v7232_v21, %v7238_v60  ;;  %v3063_v60 = vadd.f32 %v7444_v17, %v7432_v15 }
 0x39f   : > { %10947 = vst [vmem:[#allocation24_spill] sm:$0xff] %v7485_v46  ;;  %10948 = vst [vmem:[#allocation34_spill] sm:$0xff] %v7487_v57  ;;  %v7495_v29 = vpop.eup %5337  ;;  %v7501_v36 = vpop.f32.mrb[108].mxu1  ;;  %v2361_v46 = vsub.f32 %v10964_v58, %v7393_v62  ;;  %v3153_v62 = vadd.f32 %v7407_v34, %v7399_v19  ;;  %5365 = vpow2.f32 %v2704_v20  ;;  %v10985_v20 = vld [vmem:[#allocation29_spill] sm:$0xff] }
 0x3a0   : > { %10952 = vst [vmem:[#allocation36_spill] sm:$0xff] %v7495_v29  ;;  %10954 = vst [vmem:[#allocation21_spill] sm:$0xff] %v7501_v36  ;;  %v7503_v13 = vpop.eup %5339  ;;  %v7510_v3 = vpop.xlane.xlu1 %1939  ;;  %v2708_v29 = vmul.f32 1.442695, %v2360_v12  ;;  %v10973_v36 = vld [vmem:[#allocation27_spill] sm:$0xff]  ;;  %v10977_v12 = vld [vmem:[#allocation42_spill] sm:$0xff]  ;;  %5367 = vpow2.f32 %v2706_v54 }
 0x3a1   : > { %10955 = vst [vmem:[#allocation33_spill] sm:$0xff] %v7503_v13  ;;  %v7514_v48 = vpop.f32.mrb[109].mxu1  ;;  %v7516_v6 = vpop.eup %5341  ;;  %2215 = vmax.xlane.f32.xlu1 %v10986_v23 }
 0x3a2   : > { %10958 = vst [vmem:[#allocation35_spill] sm:$0xff] %v7514_v48  ;;  %10959 = vst [vmem:[#allocation22_spill] sm:$0xff] %v7516_v6  ;;  %v7522_v13 = vpop.xlane.xlu0 %2032  ;;  %v7526_v5 = vpop.f32.mrb[110].mxu1  ;;  %v10970_v48 = vld [vmem:[#allocation25_spill] sm:$0xff]  ;;  %5369 = vpow2.f32 %v2708_v29  ;;  %3154 = vadd.xlane.f32.xlu0 %v3153_v62  ;;  %v10989_v29 = vld [vmem:[#allocation30_spill] sm:$0xff]  ;;  %v10999_v62 = vsub.f32 %v10931_v47, %v7426_v38 }
 0x3a3   : > { %10962 = vst [vmem:[#allocation26_spill] sm:$0xff] %v7526_v5  ;;  %v7528_v24 = vpop.eup %5343  ;;  %v7536_v8 = vpop.f32.mrb[111].mxu1  ;;  %v2298_v42 = vsub.f32 %v10970_v48, %v7401_v61  ;;  %v2710_v48 = vmul.f32 1.442695, %v2361_v46  ;;  %v10982_v5 = vld [vmem:[#allocation43_spill] sm:$0xff]  ;;  %v2362_v46 = vsub.f32 %v10985_v20, %v7438_v9 }
 0x3a4   : > { %10963 = vst [vmem:[#allocation39_spill] sm:$0xff] %v7528_v24  ;;  %10967 = vst [vmem:[#allocation40_spill] sm:$0xff] %v7536_v8  ;;  %v7538_v35 = vpop.f32.mrb[132].mxu0  ;;  %v7540_v6 = vpop.eup %5345  ;;  %v2299_v24 = vsub.f32 %v10973_v36, %v7401_v61  ;;  %v10978_v61 = vld [vmem:[#allocation44_spill] sm:$0xff]  ;;  %v10981_v8 = vld [vmem:[#allocation41_spill] sm:$0xff] }
 0x3a5   : > { %10968 = vst [vmem:[#allocation28_spill] sm:$0xff] %v7538_v35  ;;  %10969 = vst [vmem:[#allocation37_spill] sm:$0xff] %v7540_v6  ;;  %v7546_v58 = vpop.f32.mrb[133].mxu0  ;;  %v7548_v33 = vpop.eup %5347  ;;  %v10991_v35 = vld [vmem:[#allocation48_spill] sm:$0xff]  ;;  %5371 = vpow2.f32 %v2710_v48  ;;  %3061 = vadd.xlane.f32.xlu1 %v3060_v45  ;;  %v11016_v45 = vmax.f32 %v7271_v39, %v7284_v37  ;;  %v11024_v39 = vld [vmem:[#allocation53_spill] sm:$0xff]  ;;  %v11028_v37 = vsub.f32 %v10960_v51, %v7510_v3 }
 0x3a6   : > { %10971 = vst [vmem:[#allocation38_spill] sm:$0xff] %v7546_v58  ;;  %10972 = vst [vmem:[#allocation25_spill] sm:$0xff] %v7548_v33  ;;  %v7555_v53 = vpop.xlane.xlu1 %2035  ;;  %v7559_v19 = vpop.f32.mrb[134].mxu0  ;;  %v2584_v33 = vmul.f32 1.442695, %v2298_v42  ;;  %v3159_v51 = vadd.f32 %v7487_v57, %v7473_v43 }
 0x3a7   : > { %10975 = vst [vmem:[#allocation27_spill] sm:$0xff] %v7559_v19  ;;  %v7561_v34 = vpop.eup %5349  ;;  %v7567_v36 = vpop.xlane.xlu0 %1942  ;;  %v2586_v58 = vmul.f32 1.442695, %v2299_v24  ;;  %v2363_v24 = vsub.f32 %v10989_v29, %v7438_v9  ;;  %v10995_v29 = vld [vmem:[#allocation45_spill] sm:$0xff]  ;;  %v10996_v19 = vld [vmem:[#allocation46_spill] sm:$0xff] }
 0x3a8   : > { %10976 = vst [vmem:[#allocation214_spill] sm:$0xff] %v7561_v34  ;;  %v7571_v52 = vpop.f32.mrb[135].mxu0  ;;  %v7573_v7 = vpop.eup %5351  ;;  %5373 = vpow2.f32 %v2584_v33  ;;  %v11008_v33 = vsub.f32 %v10945_v26, %v7467_v31  ;;  %v11015_v26 = vsub.f32 %v10950_v22, %v7481_v16  ;;  %v11019_v22 = vld [vmem:[#allocation55_spill] sm:$0xff] }
 0x3a9   : > { %10979 = vst [vmem:[#allocation42_spill] sm:$0xff] %v7571_v52  ;;  %10980 = vst [vmem:[#allocation44_spill] sm:$0xff] %v7573_v7  ;;  %v7581_v6 = vpop.f32.mrb[112].mxu1  ;;  %v7583_v4 = vpop.eup %5353  ;;  %v10994_v52 = vsub.f32 %v10930_v59, %v7426_v38  ;;  %5375 = vpow2.f32 %v2586_v58  ;;  %v2712_v59 = vmul.f32 1.442695, %v2362_v46  ;;  %v11004_v58 = vld [vmem:[#allocation50_spill] sm:$0xff]  ;;  %2125 = vmax.xlane.f32.xlu1 %v11016_v45 }
 0x3aa   : > { %10983 = vst [vmem:[#allocation41_spill] sm:$0xff] %v7581_v6  ;;  %10984 = vst [vmem:[#allocation43_spill] sm:$0xff] %v7583_v4  ;;  %v7590_v11 = vpop.xlane.xlu1 %1945  ;;  %v7594_v42 = vpop.f32.mrb[113].mxu1  ;;  %v2714_v47 = vmul.f32 1.442695, %v2363_v24  ;;  %v11005_v46 = vld [vmem:[#allocation52_spill] sm:$0xff] }
 0x3ab   : > { %10987 = vst [vmem:[#allocation29_spill] sm:$0xff] %v7594_v42  ;;  %v7596_v41 = vpop.eup %5355  ;;  %v7604_v23 = vpop.xlane.xlu0 %2038  ;;  %v2588_v9 = vmul.f32 1.442695, %v10994_v52  ;;  %v2590_v42 = vmul.f32 1.442695, %v10999_v62  ;;  %v11001_v52 = vmax.f32 %v7249_v0, %v7259_v50  ;;  %v11009_v0 = vld [vmem:[#allocation49_spill] sm:$0xff]  ;;  %v11012_v50 = vsub.f32 %v10946_v55, %v7467_v31 }
 0x3ac   : > { %10988 = vst [vmem:[#allocation215_spill] sm:$0xff] %v7596_v41  ;;  %v7608_v21 = vpop.f32.mrb[114].mxu1  ;;  %v7610_v54 = vpop.eup %5357  ;;  %v2716_v24 = vmul.f32 1.442695, %v11008_v33  ;;  %v2592_v33 = vmul.f32 1.442695, %v11015_v26  ;;  %v3156_v31 = vadd.f32 %v7419_v14, %v7413_v27 }
 0x3ad   : > { %10992 = vst [vmem:[#allocation30_spill] sm:$0xff] %v7608_v21  ;;  %10993 = vst [vmem:[#allocation47_spill] sm:$0xff] %v7610_v54  ;;  %v7619_v41 = vpop.f32.mrb[115].mxu1  ;;  %v7621_v4 = vpop.f32.mrb[136].mxu0  ;;  %2218 = vmax.xlane.f32.xlu0 %v11001_v52  ;;  %5377 = vpow2.f32 %v2588_v9  ;;  %v11020_v26 = vld [vmem:[#allocation56_spill] sm:$0xff] }
 0x3ae   : > { %10997 = vst [vmem:[#allocation48_spill] sm:$0xff] %v7619_v41  ;;  %10998 = vst [vmem:[#allocation45_spill] sm:$0xff] %v7621_v4  ;;  %v7626_v48 = vpop.f32.mrb[137].mxu0  ;;  %v7631_v20 = vpop.xlane.xlu1 %2041  ;;  %v11010_v41 = vld [vmem:[#allocation51_spill] sm:$0xff]  ;;  %5379 = vpow2.f32 %v2590_v42  ;;  %3157 = vadd.xlane.f32.xlu1 %v3156_v31  ;;  %v11036_v31 = vld [vmem:[#allocation58_spill] sm:$0xff] }
 0x3af   : > { %11000 = vst [vmem:[#allocation46_spill] sm:$0xff] %v7626_v48  ;;  %v7637_v6 = vpop.f32.mrb[138].mxu0  ;;  %v7639_v38 = vpop.eup %5359  ;;  %v2718_v48 = vmul.f32 1.442695, %v11012_v50  ;;  %5381 = vpow2.f32 %v2712_v59  ;;  %v11023_v50 = vsub.f32 %v10951_v49, %v7481_v16  ;;  %v11031_v16 = vsub.f32 %v10961_v18, %v7510_v3 }
 0x3b0   : > { %11002 = vst [vmem:[#allocation216_spill] sm:$0xff] %v7637_v6  ;;  %11003 = vst [vmem:[#allocation217_spill] sm:$0xff] %v7639_v38  ;;  %v7645_v52 = vpop.xlane.xlu0 %1948  ;;  %v7649_v15 = vpop.f32.mrb[139].mxu0  ;;  %5383 = vpow2.f32 %v2714_v47  ;;  %v11035_v3 = vsub.f32 %v10965_v2, %v7522_v13  ;;  %v11040_v2 = vsub.f32 %v10966_v28, %v7522_v13  ;;  %v11046_v13 = vsub.f32 %v10978_v61, %v7555_v53 }
 0x3b1   : > { %11006 = vst [vmem:[#allocation50_spill] sm:$0xff] %v7649_v15  ;;  %v7651_v17 = vpop.eup %5361  ;;  %v7665_v4 = vpop.f32.mrb[116].mxu1  ;;  %3064 = vadd.xlane.f32.xlu0 %v3063_v60  ;;  %5385 = vpow2.f32 %v2716_v24  ;;  %v2594_v47 = vmul.f32 1.442695, %v11023_v50  ;;  %v11025_v15 = vld [vmem:[#allocation54_spill] sm:$0xff]  ;;  %v11032_v50 = vmax.f32 %v7294_v63, %v7302_v10  ;;  %v11041_v63 = vld [vmem:[#allocation57_spill] sm:$0xff]  ;;  %v11064_v61 = vmax.f32 %v7323_v56, %v7333_v32 }
 0x3b2   : > { %11007 = vst [vmem:[#allocation52_spill] sm:$0xff] %v7651_v17  ;;  %v7660_v21 = vpop.eup %5363  ;;  %11013 = vst [vmem:[#allocation51_spill] sm:$0xff] %v7665_v4  ;;  %v7675_v62 = vpop.xlane.xlu1 %1951  ;;  %5387 = vpow2.f32 %v2718_v48  ;;  %v2598_v49 = vmul.f32 1.442695, %v11031_v16  ;;  %v2720_v18 = vmul.f32 1.442695, %v11035_v3 }
 0x3b3   : > { %11011 = vst [vmem:[#allocation49_spill] sm:$0xff] %v7660_v21  ;;  %v7667_v9 = vpop.eup %5365  ;;  %v7681_v55 = vpop.f32.mrb[117].mxu1  ;;  %5389 = vpow2.f32 %v2592_v33  ;;  %v2722_v3 = vmul.f32 1.442695, %v11040_v2  ;;  %v2726_v28 = vmul.f32 1.442695, %v11046_v13 }
 0x3b4   : > { %11014 = vst [vmem:[#allocation218_spill] sm:$0xff] %v7667_v9  ;;  %11017 = vst [vmem:[#allocation219_spill] sm:$0xff] %v7681_v55  ;;  %v7683_v42 = vpop.eup %5367  ;;  %v7689_v60 = vpop.xlane.xlu0 %2044  ;;  %v2596_v55 = vmul.f32 1.442695, %v11028_v37  ;;  %5391 = vpow2.f32 %v2594_v47  ;;  %v11047_v47 = vmax.f32 %v7304_v1, %v7310_v30  ;;  %v11051_v13 = vld [vmem:[#allocation64_spill] sm:$0xff]  ;;  %v11056_v30 = vld [vmem:[#allocation62_spill] sm:$0xff] }
 0x3b5   : > { %11018 = vst [vmem:[#allocation220_spill] sm:$0xff] %v7683_v42  ;;  %v7693_v27 = vpop.f32.mrb[118].mxu1  ;;  %v7695_v14 = vpop.eup %5369  ;;  %2128 = vmax.xlane.f32.xlu0 %v11032_v50  ;;  %v11037_v50 = vld [vmem:[#allocation60_spill] sm:$0xff] }
 0x3b6   : > { %11021 = vst [vmem:[#allocation55_spill] sm:$0xff] %v7693_v27  ;;  %11022 = vst [vmem:[#allocation56_spill] sm:$0xff] %v7695_v14  ;;  %v7704_v6 = vpop.f32.mrb[119].mxu1  ;;  %v7706_v21 = vpop.f32.mrb[140].mxu0  ;;  %5393 = vpow2.f32 %v2596_v55  ;;  %v11043_v27 = vsub.f32 %v10977_v12, %v7555_v53  ;;  %2221 = vmax.xlane.f32.xlu1 %v11047_v47  ;;  %v3066_v12 = vadd.f32 %v7460_v25, %v7452_v40  ;;  %v11050_v53 = vld [vmem:[#allocation63_spill] sm:$0xff]  ;;  %v11055_v25 = vld [vmem:[#allocation61_spill] sm:$0xff] }
 0x3b7   : > { %11026 = vst [vmem:[#allocation53_spill] sm:$0xff] %v7704_v6  ;;  %11027 = vst [vmem:[#allocation54_spill] sm:$0xff] %v7706_v21  ;;  %v7711_v24 = vpop.f32.mrb[141].mxu0  ;;  %v7713_v4 = vpop.eup %5371  ;;  %v11042_v6 = vld [vmem:[#allocation59_spill] sm:$0xff]  ;;  %5395 = vpow2.f32 %v2598_v49 }
 0x3b8   : > { %11029 = vst [vmem:[#allocation221_spill] sm:$0xff] %v7711_v24  ;;  %11030 = vst [vmem:[#allocation222_spill] sm:$0xff] %v7713_v4  ;;  %v7721_v45 = vpop.xlane.xlu1 %2047  ;;  %v7727_v48 = vpop.f32.mrb[142].mxu0  ;;  %v2724_v43 = vmul.f32 1.442695, %v11043_v27  ;;  %5397 = vpow2.f32 %v2720_v18  ;;  %v11054_v27 = vsub.f32 %v10981_v8, %v7567_v36 }
 0x3b9   : > { %11033 = vst [vmem:[#allocation223_spill] sm:$0xff] %v7727_v48  ;;  %v7729_v33 = vpop.eup %5373  ;;  %v7738_v10 = vpop.xlane.xlu0 %1954  ;;  %3160 = vadd.xlane.f32.xlu0 %v3159_v51  ;;  %5399 = vpow2.f32 %v2722_v3  ;;  %v11060_v3 = vsub.f32 %v10982_v5, %v7567_v36 }
 0x3ba   : > { %11034 = vst [vmem:[#allocation224_spill] sm:$0xff] %v7729_v33  ;;  %v7742_v37 = vpop.f32.mrb[143].mxu0  ;;  %v7744_v57 = vpop.eup %5375  ;;  %v2600_v18 = vmul.f32 1.442695, %v11054_v27  ;;  %5401 = vpow2.f32 %v2724_v43  ;;  %v11063_v27 = vsub.f32 %v10990_v44, %v7590_v11  ;;  %3067 = vadd.xlane.f32.xlu1 %v3066_v12  ;;  %v11065_v43 = vld [vmem:[#allocation22_spill] sm:$0xff]  ;;  %v11069_v44 = vsub.f32 %v10991_v35, %v7590_v11 }
 0x3bb   : > { %11038 = vst [vmem:[#allocation58_spill] sm:$0xff] %v7742_v37  ;;  %11039 = vst [vmem:[#allocation60_spill] sm:$0xff] %v7744_v57  ;;  %v7756_v24 = vpop.f32.mrb[120].mxu1  ;;  %v7758_v21 = vpop.eup %5377  ;;  %5403 = vpow2.f32 %v2726_v28  ;;  %v11074_v35 = vsub.f32 %v10995_v29, %v7604_v23  ;;  %v11080_v29 = vsub.f32 %v11004_v58, %v7631_v20  ;;  %v11088_v58 = vld [vmem:[#allocation71_spill] sm:$0xff] }
 0x3bc   : > { %11044 = vst [vmem:[#allocation57_spill] sm:$0xff] %v7756_v24  ;;  %11045 = vst [vmem:[#allocation59_spill] sm:$0xff] %v7758_v21  ;;  %v7766_v2 = vpop.xlane.xlu1 %1957  ;;  %v7772_v55 = vpop.f32.mrb[121].mxu1  ;;  %v2604_v47 = vmul.f32 1.442695, %v11063_v27  ;;  %v11070_v27 = vld [vmem:[#allocation66_spill] sm:$0xff]  ;;  %5405 = vpow2.f32 %v2600_v18 }
 0x3bd   : > { %11048 = vst [vmem:[#allocation225_spill] sm:$0xff] %v7772_v55  ;;  %v7774_v49 = vpop.eup %5379  ;;  %v7780_v51 = vpop.xlane.xlu0 %2050  ;;  %v2602_v55 = vmul.f32 1.442695, %v11060_v3  ;;  %2224 = vmax.xlane.f32.xlu0 %v11064_v61  ;;  %v2606_v12 = vmul.f32 1.442695, %v11069_v44  ;;  %v11071_v61 = vld [vmem:[#allocation68_spill] sm:$0xff] }
 0x3be   : > { %11049 = vst [vmem:[#allocation226_spill] sm:$0xff] %v7774_v49  ;;  %v7784_v16 = vpop.f32.mrb[122].mxu1  ;;  %v7786_v40 = vpop.eup %5381  ;;  %v11066_v49 = vld [vmem:[#allocation39_spill] sm:$0xff]  ;;  %v2728_v11 = vmul.f32 1.442695, %v11074_v35  ;;  %v11075_v44 = vld [vmem:[#allocation65_spill] sm:$0xff] }
 0x3bf   : > { %11052 = vst [vmem:[#allocation63_spill] sm:$0xff] %v7784_v16  ;;  %11053 = vst [vmem:[#allocation64_spill] sm:$0xff] %v7786_v40  ;;  %v7795_v1 = vpop.f32.mrb[123].mxu1  ;;  %v7797_v37 = vpop.f32.mrb[144].mxu0  ;;  %v3069_v5 = vadd.f32 %v11066_v49, %v11065_v43  ;;  %5407 = vpow2.f32 %v2602_v55  ;;  %v11077_v16 = vsub.f32 %v10996_v19, %v7604_v23  ;;  %v2732_v18 = vmul.f32 1.442695, %v11080_v29 }
 0x3c0   : > { %11057 = vst [vmem:[#allocation61_spill] sm:$0xff] %v7795_v1  ;;  %11058 = vst [vmem:[#allocation62_spill] sm:$0xff] %v7797_v37  ;;  %v7799_v59 = vpop.eup %5383  ;;  %v7804_v24 = vpop.f32.mrb[145].mxu0  ;;  %v11076_v1 = vld [vmem:[#allocation67_spill] sm:$0xff]  ;;  %5409 = vpow2.f32 %v2604_v47  ;;  %v11081_v35 = vld [vmem:[#allocation194_spill] sm:$0xff]  ;;  %v11092_v23 = vsub.f32 %v11005_v46, %v7631_v20  ;;  %v11101_v46 = vsub.f32 %v11010_v41, %v7645_v52  ;;  %v11107_v41 = vsub.f32 %v11019_v22, %v7675_v62 }
 0x3c1   : > { %11059 = vst [vmem:[#allocation227_spill] sm:$0xff] %v7799_v59  ;;  %11061 = vst [vmem:[#allocation228_spill] sm:$0xff] %v7804_v24  ;;  %v7806_v8 = vpop.eup %5385  ;;  %v7814_v48 = vpop.xlane.xlu1 %2053  ;;  %v2730_v43 = vmul.f32 1.442695, %v11077_v16  ;;  %3070 = vadd.xlane.f32.xlu0 %v3069_v5  ;;  %v11084_v55 = vld [vmem:[#allocation36_spill] sm:$0xff]  ;;  %5411 = vpow2.f32 %v2606_v12  ;;  %v11112_v22 = vsub.f32 %v11020_v26, %v7675_v62  ;;  %v11118_v62 = vld [vmem:[#allocation201_spill] sm:$0xff] }
 0x3c2   : > { %11062 = vst [vmem:[#allocation229_spill] sm:$0xff] %v7806_v8  ;;  %v7820_v3 = vpop.f32.mrb[146].mxu0  ;;  %v7822_v28 = vpop.eup %5387  ;;  %5413 = vpow2.f32 %v2728_v11  ;;  %v2734_v12 = vmul.f32 1.442695, %v11092_v23  ;;  %v11098_v11 = vsub.f32 %v11009_v0, %v7645_v52  ;;  %v2610_v23 = vmul.f32 1.442695, %v11101_v46 }
 0x3c3   : > { %11067 = vst [vmem:[#allocation230_spill] sm:$0xff] %v7820_v3  ;;  %11068 = vst [vmem:[#allocation231_spill] sm:$0xff] %v7822_v28  ;;  %v7831_v8 = vpop.xlane.xlu0 %1960  ;;  %v7835_v36 = vpop.f32.mrb[147].mxu0  ;;  %v11082_v28 = vld [vmem:[#allocation196_spill] sm:$0xff]  ;;  %v11094_v3 = vld [vmem:[#allocation70_spill] sm:$0xff]  ;;  %5415 = vpow2.f32 %v2730_v43  ;;  %v3165_v0 = vadd.f32 %v7573_v7, %v7561_v34 }
 0x3c4   : > { %11072 = vst [vmem:[#allocation66_spill] sm:$0xff] %v7835_v36  ;;  %v7837_v49 = vpop.eup %5389  ;;  %v7849_v24 = vpop.f32.mrb[124].mxu1  ;;  %v11083_v32 = vmax.f32 %v11081_v35, %v11082_v28  ;;  %v11089_v28 = vld [vmem:[#allocation72_spill] sm:$0xff]  ;;  %v11093_v36 = vld [vmem:[#allocation69_spill] sm:$0xff]  ;;  %5417 = vpow2.f32 %v2732_v18  ;;  %v2612_v52 = vmul.f32 1.442695, %v11107_v41 }
 0x3c5   : > { %11073 = vst [vmem:[#allocation68_spill] sm:$0xff] %v7837_v49  ;;  %11078 = vst [vmem:[#allocation65_spill] sm:$0xff] %v7849_v24  ;;  %v7851_v37 = vpop.eup %5391  ;;  %v7859_v56 = vpop.xlane.xlu1 %1963  ;;  %v11085_v49 = vld [vmem:[#allocation33_spill] sm:$0xff]  ;;  %v11103_v29 = vld [vmem:[#allocation200_spill] sm:$0xff]  ;;  %5419 = vpow2.f32 %v2734_v12  ;;  %v2614_v41 = vmul.f32 1.442695, %v11112_v22  ;;  %v11117_v12 = vsub.f32 %v11025_v15, %v7689_v60  ;;  %v11124_v15 = vsub.f32 %v11036_v31, %v7721_v45 }
 0x3c6   : > { %11079 = vst [vmem:[#allocation67_spill] sm:$0xff] %v7851_v37  ;;  %2131 = vmax.xlane.f32.xlu1 %v11083_v32  ;;  %v3162_v19 = vadd.f32 %v11085_v49, %v11084_v55  ;;  %v7865_v16 = vpop.f32.mrb[125].mxu1  ;;  %v7867_v47 = vpop.eup %5393  ;;  %v11102_v32 = vld [vmem:[#allocation198_spill] sm:$0xff]  ;;  %v11119_v26 = vld [vmem:[#allocation15_spill] sm:$0xff] }
 0x3c7   : > { %11086 = vst [vmem:[#allocation232_spill] sm:$0xff] %v7865_v16  ;;  %11087 = vst [vmem:[#allocation233_spill] sm:$0xff] %v7867_v47  ;;  %v7873_v5 = vpop.xlane.xlu0 %2056  ;;  %v7877_v55 = vpop.f32.mrb[126].mxu1  ;;  %v2608_v16 = vmul.f32 1.442695, %v11098_v11  ;;  %v11120_v22 = vmax.f32 %v11118_v62, %v11119_v26  ;;  %v11130_v31 = vld [vmem:[#allocation78_spill] sm:$0xff] }
 0x3c8   : > { %11090 = vst [vmem:[#allocation71_spill] sm:$0xff] %v7877_v55  ;;  %v7879_v49 = vpop.eup %5395  ;;  %v7888_v47 = vpop.f32.mrb[127].mxu1  ;;  %v11114_v55 = vld [vmem:[#allocation75_spill] sm:$0xff] }
 0x3c9   : > { %11091 = vst [vmem:[#allocation72_spill] sm:$0xff] %v7879_v49  ;;  %11095 = vst [vmem:[#allocation69_spill] sm:$0xff] %v7888_v47  ;;  %v7890_v37 = vpop.f32.mrb[148].mxu0  ;;  %v7892_v35 = vpop.eup %5397  ;;  %v11104_v49 = vmax.f32 %v11102_v32, %v11103_v29  ;;  %v11113_v47 = vld [vmem:[#allocation73_spill] sm:$0xff]  ;;  %5421 = vpow2.f32 %v2608_v16 }
 0x3ca   : > { %11096 = vst [vmem:[#allocation70_spill] sm:$0xff] %v7890_v37  ;;  %11097 = vst [vmem:[#allocation234_spill] sm:$0xff] %v7892_v35  ;;  %v7897_v24 = vpop.f32.mrb[149].mxu0  ;;  %v7899_v20 = vpop.eup %5399  ;;  %3163 = vadd.xlane.f32.xlu1 %v3162_v19  ;;  %v11108_v19 = vld [vmem:[#allocation74_spill] sm:$0xff]  ;;  %5423 = vpow2.f32 %v2610_v23  ;;  %v2738_v37 = vmul.f32 1.442695, %v11117_v12 }
 0x3cb   : > { %11099 = vst [vmem:[#allocation235_spill] sm:$0xff] %v7897_v24  ;;  %11100 = vst [vmem:[#allocation236_spill] sm:$0xff] %v7899_v20  ;;  %2134 = vmax.xlane.f32.xlu0 %v11104_v49  ;;  %v7907_v35 = vpop.xlane.xlu1 %2059  ;;  %v7913_v11 = vpop.f32.mrb[150].mxu0  ;;  %v11109_v49 = vld [vmem:[#allocation76_spill] sm:$0xff]  ;;  %v11121_v29 = vld [vmem:[#allocation37_spill] sm:$0xff]  ;;  %5425 = vpow2.f32 %v2612_v52 }
 0x3cc   : > { %11105 = vst [vmem:[#allocation237_spill] sm:$0xff] %v7913_v11  ;;  %v7915_v18 = vpop.eup %5401  ;;  %v7924_v32 = vpop.xlane.xlu0 %1966  ;;  %v11122_v16 = vld [vmem:[#allocation25_spill] sm:$0xff]  ;;  %v11125_v23 = vld [vmem:[#allocation79_spill] sm:$0xff]  ;;  %5427 = vpow2.f32 %v2614_v41  ;;  %v11135_v41 = vld [vmem:[#allocation16_spill] sm:$0xff] }
 0x3cd   : > { %11106 = vst [vmem:[#allocation238_spill] sm:$0xff] %v7915_v18  ;;  %v7928_v43 = vpop.f32.mrb[151].mxu0  ;;  %v7930_v7 = vpop.eup %5403  ;;  %v11115_v18 = vsub.f32 %v11024_v39, %v7689_v60  ;;  %v2740_v60 = vmul.f32 1.442695, %v11124_v15  ;;  %v11128_v39 = vsub.f32 %v11037_v50, %v7721_v45  ;;  %v11129_v52 = vld [vmem:[#allocation77_spill] sm:$0xff]  ;;  %v11134_v45 = vsub.f32 %v11042_v6, %v7738_v10 }
 0x3ce   : > { %11110 = vst [vmem:[#allocation74_spill] sm:$0xff] %v7928_v43  ;;  %11111 = vst [vmem:[#allocation76_spill] sm:$0xff] %v7930_v7  ;;  %v7942_v24 = vpop.eup %5405  ;;  %2227 = vmax.xlane.f32.xlu1 %v11120_v22  ;;  %v3072_v7 = vadd.f32 %v11122_v16, %v11121_v29  ;;  %v11132_v22 = vsub.f32 %v11041_v63, %v7738_v10  ;;  %v11139_v63 = vsub.f32 %v11050_v53, %v7766_v2  ;;  %v11140_v10 = vld [vmem:[#allocation82_spill] sm:$0xff]  ;;  %v11145_v53 = vld [vmem:[#allocation83_spill] sm:$0xff] }
 0x3cf   : > { %v2736_v34 = vmul.f32 1.442695, %v11115_v18  ;;  %11116 = vst [vmem:[#allocation73_spill] sm:$0xff] %v7942_v24  ;;  %3166 = vadd.xlane.f32.xlu0 %v3165_v0  ;;  %v7950_v46 = vpop.xlane.xlu1 %1969  ;;  %v7956_v18 = vpop.eup %5407  ;;  %v11126_v0 = vld [vmem:[#allocation80_spill] sm:$0xff]  ;;  %v2742_v29 = vmul.f32 1.442695, %v11128_v39  ;;  %v11146_v6 = vsub.f32 %v11055_v25, %v7780_v51  ;;  %v11155_v25 = vsub.f32 %v11070_v27, %v7814_v48 }
 0x3d0   : > { %11123 = vst [vmem:[#allocation75_spill] sm:$0xff] %v7956_v18  ;;  %v7965_v26 = vpop.xlane.xlu0 %2062  ;;  %v7967_v62 = vpop.eup %5409  ;;  %v2616_v12 = vmul.f32 1.442695, %v11132_v22  ;;  %v2618_v50 = vmul.f32 1.442695, %v11134_v45  ;;  %v11136_v39 = vld [vmem:[#allocation205_spill] sm:$0xff] }
 0x3d1   : > { %11127 = vst [vmem:[#allocation79_spill] sm:$0xff] %v7967_v62  ;;  %v7976_v43 = vpop.eup %5411  ;;  %5429 = vpow2.f32 %v2736_v34  ;;  %v11137_v16 = vmax.f32 %v11135_v41, %v11136_v39  ;;  %v3075_v34 = vadd.f32 %v7639_v38, %v7610_v54  ;;  %v11143_v54 = vsub.f32 %v11051_v13, %v7766_v2  ;;  %v11149_v2 = vld [vmem:[#allocation20_spill] sm:$0xff]  ;;  %v11161_v27 = vld [vmem:[#allocation86_spill] sm:$0xff] }
 0x3d2   : > { %11131 = vst [vmem:[#allocation80_spill] sm:$0xff] %v7976_v43  ;;  %v7981_v11 = vpop.eup %5413  ;;  %5431 = vpow2.f32 %v2738_v37  ;;  %3073 = vadd.xlane.f32.xlu1 %v3072_v7  ;;  %v2620_v37 = vmul.f32 1.442695, %v11139_v63  ;;  %v11141_v7 = vld [vmem:[#allocation84_spill] sm:$0xff]  ;;  %v2744_v22 = vmul.f32 1.442695, %v11146_v6 }
 0x3d3   : > { %11133 = vst [vmem:[#allocation77_spill] sm:$0xff] %v7981_v11  ;;  %2230 = vmax.xlane.f32.xlu0 %v11137_v16  ;;  %v7989_v15 = vpop.xlane.xlu1 %2065  ;;  %v7993_v43 = vpop.eup %5415  ;;  %5433 = vpow2.f32 %v2740_v60  ;;  %v2622_v38 = vmul.f32 1.442695, %v11143_v54  ;;  %v11144_v60 = vld [vmem:[#allocation81_spill] sm:$0xff]  ;;  %v11152_v63 = vld [vmem:[#allocation43_spill] sm:$0xff]  ;;  %v11157_v6 = vld [vmem:[#allocation88_spill] sm:$0xff] }
 0x3d4   : > { %11138 = vst [vmem:[#allocation78_spill] sm:$0xff] %v7993_v43  ;;  %v8002_v45 = vpop.xlane.xlu0 %1972  ;;  %v8004_v16 = vpop.eup %5417  ;;  %5435 = vpow2.f32 %v2742_v29  ;;  %v11148_v29 = vsub.f32 %v11056_v30, %v7780_v51  ;;  %v11150_v54 = vld [vmem:[#allocation17_spill] sm:$0xff]  ;;  %v11156_v30 = vld [vmem:[#allocation87_spill] sm:$0xff] }
 0x3d5   : > { %11142 = vst [vmem:[#allocation82_spill] sm:$0xff] %v8004_v16  ;;  %5437 = vpow2.f32 %v2616_v12  ;;  %v8016_v41 = vpop.eup %5419  ;;  %v11151_v13 = vmax.f32 %v11149_v2, %v11150_v54  ;;  %v11153_v12 = vld [vmem:[#allocation215_spill] sm:$0xff] }
 0x3d6   : > { %11147 = vst [vmem:[#allocation84_spill] sm:$0xff] %v8016_v41  ;;  %5439 = vpow2.f32 %v2618_v50  ;;  %v2746_v16 = vmul.f32 1.442695, %v11148_v29  ;;  %v3168_v62 = vadd.f32 %v11153_v12, %v11152_v63  ;;  %v8028_v43 = vpop.eup %5421  ;;  %v2748_v50 = vmul.f32 1.442695, %v11155_v25 }
 0x3d7   : > { %2137 = vmax.xlane.f32.xlu1 %v11151_v13  ;;  %3076 = vadd.xlane.f32.xlu0 %v3075_v34  ;;  %v8024_v39 = vpop.xlane.xlu1 %1975  ;;  %11154 = vst [vmem:[#allocation81_spill] sm:$0xff] %v8028_v43  ;;  %5441 = vpow2.f32 %v2620_v37  ;;  %v8039_v34 = vpop.eup %5423  ;;  %v11159_v63 = vsub.f32 %v11071_v61, %v7814_v48  ;;  %v11160_v37 = vld [vmem:[#allocation85_spill] sm:$0xff]  ;;  %v11163_v29 = vsub.f32 %v11075_v44, %v7831_v8  ;;  %v11166_v61 = vld [vmem:[#allocation31_spill] sm:$0xff] }
 0x3d8   : > { %v8037_v13 = vpop.xlane.xlu0 %2068  ;;  %11158 = vst [vmem:[#allocation83_spill] sm:$0xff] %v8039_v34  ;;  %5443 = vpow2.f32 %v2622_v38  ;;  %v8048_v2 = vpop.eup %5425  ;;  %v11165_v38 = vsub.f32 %v11076_v1, %v7831_v8  ;;  %v11170_v44 = vsub.f32 %v11088_v58, %v7859_v56  ;;  %v11171_v1 = vld [vmem:[#allocation90_spill] sm:$0xff]  ;;  %v11176_v58 = vld [vmem:[#allocation91_spill] sm:$0xff] }
 0x3d9   : > { %v2750_v12 = vmul.f32 1.442695, %v11159_v63  ;;  %11162 = vst [vmem:[#allocation87_spill] sm:$0xff] %v8048_v2  ;;  %5445 = vpow2.f32 %v2744_v22  ;;  %v2624_v51 = vmul.f32 1.442695, %v11163_v29  ;;  %v8053_v41 = vpop.eup %5427  ;;  %v11167_v63 = vld [vmem:[#allocation209_spill] sm:$0xff]  ;;  %v3171_v22 = vadd.f32 %v7683_v42, %v7667_v9 }
 0x3da   : > { %11164 = vst [vmem:[#allocation88_spill] sm:$0xff] %v8053_v41  ;;  %5447 = vpow2.f32 %v2746_v16  ;;  %v2626_v48 = vmul.f32 1.442695, %v11165_v38  ;;  %v11168_v54 = vmax.f32 %v11166_v61, %v11167_v63  ;;  %v2628_v16 = vmul.f32 1.442695, %v11170_v44 }
 0x3db   : > { %3169 = vadd.xlane.f32.xlu1 %v3168_v62  ;;  %v8061_v25 = vpop.xlane.xlu1 %2071  ;;  %v8065_v2 = vpop.eup %5429  ;;  %5449 = vpow2.f32 %v2748_v50  ;;  %v11172_v62 = vld [vmem:[#allocation92_spill] sm:$0xff]  ;;  %v11174_v9 = vsub.f32 %v11089_v28, %v7859_v56  ;;  %v11175_v50 = vld [vmem:[#allocation89_spill] sm:$0xff]  ;;  %v11178_v29 = vsub.f32 %v11093_v36, %v7873_v5  ;;  %v11180_v56 = vsub.f32 %v11094_v3, %v7873_v5  ;;  %v11181_v28 = vld [vmem:[#allocation210_spill] sm:$0xff] }
 0x3dc   : > { %2140 = vmax.xlane.f32.xlu0 %v11168_v54  ;;  %11169 = vst [vmem:[#allocation85_spill] sm:$0xff] %v8065_v2  ;;  %v8074_v38 = vpop.xlane.xlu0 %1978  ;;  %v8076_v54 = vpop.eup %5431  ;;  %5451 = vpow2.f32 %v2750_v12  ;;  %v11182_v12 = vld [vmem:[#allocation19_spill] sm:$0xff]  ;;  %v11186_v36 = vsub.f32 %v11108_v19, %v7907_v35  ;;  %v11192_v19 = vld [vmem:[#allocation94_spill] sm:$0xff] }
 0x3dd   : > { %11173 = vst [vmem:[#allocation86_spill] sm:$0xff] %v8076_v54  ;;  %v2630_v42 = vmul.f32 1.442695, %v11174_v9  ;;  %v8085_v61 = vpop.eup %5433  ;;  %5453 = vpow2.f32 %v2624_v51  ;;  %v2752_v8 = vmul.f32 1.442695, %v11178_v29  ;;  %v11183_v63 = vmax.f32 %v11181_v28, %v11182_v12  ;;  %v11184_v51 = vld [vmem:[#allocation49_spill] sm:$0xff] }
 0x3de   : > { %11177 = vst [vmem:[#allocation90_spill] sm:$0xff] %v8085_v61  ;;  %v8090_v41 = vpop.eup %5435  ;;  %5455 = vpow2.f32 %v2626_v48  ;;  %v2754_v9 = vmul.f32 1.442695, %v11180_v56  ;;  %v3078_v61 = vadd.f32 %v11184_v51, %v7651_v17  ;;  %v2756_v48 = vmul.f32 1.442695, %v11186_v36  ;;  %v11187_v3 = vld [vmem:[#allocation95_spill] sm:$0xff] }
 0x3df   : > { %11179 = vst [vmem:[#allocation92_spill] sm:$0xff] %v8090_v41  ;;  %2233 = vmax.xlane.f32.xlu1 %v11183_v63  ;;  %v8098_v44 = vpop.xlane.xlu1 %2077  ;;  %v8102_v54 = vpop.eup %5437  ;;  %5457 = vpow2.f32 %v2628_v16  ;;  %v11188_v29 = vld [vmem:[#allocation96_spill] sm:$0xff]  ;;  %v11190_v17 = vsub.f32 %v11109_v49, %v7907_v35  ;;  %v11191_v16 = vld [vmem:[#allocation93_spill] sm:$0xff]  ;;  %v11194_v56 = vsub.f32 %v11113_v47, %v7924_v32  ;;  %v11197_v35 = vld [vmem:[#allocation23_spill] sm:$0xff]  ;;  %v11201_v47 = vsub.f32 %v11125_v23, %v7950_v46 }
 0x3e0   : > { %3172 = vadd.xlane.f32.xlu0 %v3171_v22  ;;  %11185 = vst [vmem:[#allocation89_spill] sm:$0xff] %v8102_v54  ;;  %v8111_v63 = vpop.xlane.xlu0 %2074  ;;  %v8113_v22 = vpop.eup %5439  ;;  %5459 = vpow2.f32 %v2630_v42  ;;  %v11196_v42 = vsub.f32 %v11114_v55, %v7924_v32  ;;  %v11198_v49 = vld [vmem:[#allocation24_spill] sm:$0xff]  ;;  %v11202_v55 = vld [vmem:[#allocation98_spill] sm:$0xff]  ;;  %v11207_v23 = vld [vmem:[#allocation99_spill] sm:$0xff] }
 0x3e1   : > { %11189 = vst [vmem:[#allocation91_spill] sm:$0xff] %v8113_v22  ;;  %v2758_v51 = vmul.f32 1.442695, %v11190_v17  ;;  %v8122_v28 = vpop.eup %5441  ;;  %5461 = vpow2.f32 %v2752_v8  ;;  %v2632_v5 = vmul.f32 1.442695, %v11194_v56  ;;  %v11199_v12 = vmax.f32 %v11197_v35, %v11198_v49 }
 0x3e2   : > { %11193 = vst [vmem:[#allocation95_spill] sm:$0xff] %v8122_v28  ;;  %v8127_v41 = vpop.eup %5443  ;;  %5463 = vpow2.f32 %v2754_v9  ;;  %v2634_v17 = vmul.f32 1.442695, %v11196_v42  ;;  %v3081_v8 = vadd.f32 %v7744_v57, %v7729_v33  ;;  %v2636_v9 = vmul.f32 1.442695, %v11201_v47 }
 0x3e3   : > { %11195 = vst [vmem:[#allocation96_spill] sm:$0xff] %v8127_v41  ;;  %3079 = vadd.xlane.f32.xlu1 %v3078_v61  ;;  %v8135_v36 = vpop.xlane.xlu1 %2173  ;;  %v8139_v28 = vpop.eup %5445  ;;  %5465 = vpow2.f32 %v2756_v48  ;;  %v11203_v61 = vld [vmem:[#allocation100_spill] sm:$0xff]  ;;  %v11205_v33 = vsub.f32 %v11126_v0, %v7950_v46  ;;  %v11206_v48 = vld [vmem:[#allocation97_spill] sm:$0xff]  ;;  %v11209_v56 = vsub.f32 %v11129_v52, %v7965_v26  ;;  %v11211_v46 = vsub.f32 %v11130_v31, %v7965_v26  ;;  %v11217_v26 = vld [vmem:[#allocation103_spill] sm:$0xff] }
 0x3e4   : > { %2236 = vmax.xlane.f32.xlu0 %v11199_v12  ;;  %11200 = vst [vmem:[#allocation93_spill] sm:$0xff] %v8139_v28  ;;  %v8148_v42 = vpop.xlane.xlu0 %2080  ;;  %v8150_v12 = vpop.eup %5447  ;;  %5467 = vpow2.f32 %v2758_v51  ;;  %v11212_v0 = vld [vmem:[#allocation21_spill] sm:$0xff]  ;;  %v11213_v51 = vld [vmem:[#allocation35_spill] sm:$0xff]  ;;  %v11216_v52 = vsub.f32 %v11140_v10, %v7989_v15  ;;  %v11222_v10 = vld [vmem:[#allocation102_spill] sm:$0xff] }
 0x3e5   : > { %11204 = vst [vmem:[#allocation94_spill] sm:$0xff] %v8150_v12  ;;  %v2638_v57 = vmul.f32 1.442695, %v11205_v33  ;;  %v8159_v35 = vpop.eup %5449  ;;  %5469 = vpow2.f32 %v2632_v5  ;;  %v2760_v32 = vmul.f32 1.442695, %v11209_v56  ;;  %v11214_v49 = vmax.f32 %v11212_v0, %v11213_v51  ;;  %v11218_v56 = vld [vmem:[#allocation104_spill] sm:$0xff] }
 0x3e6   : > { %11208 = vst [vmem:[#allocation98_spill] sm:$0xff] %v8159_v35  ;;  %v8164_v41 = vpop.eup %5451  ;;  %5471 = vpow2.f32 %v2634_v17  ;;  %v2762_v33 = vmul.f32 1.442695, %v11211_v46  ;;  %v3174_v5 = vadd.f32 %v7713_v4, %v7695_v14  ;;  %v2764_v17 = vmul.f32 1.442695, %v11216_v52 }
 0x3e7   : > { %11210 = vst [vmem:[#allocation100_spill] sm:$0xff] %v8164_v41  ;;  %2143 = vmax.xlane.f32.xlu1 %v11214_v49  ;;  %v8172_v47 = vpop.xlane.xlu1 %2083  ;;  %v8176_v35 = vpop.eup %5453  ;;  %5473 = vpow2.f32 %v2636_v9  ;;  %v11220_v14 = vsub.f32 %v11141_v7, %v7989_v15  ;;  %v11221_v9 = vld [vmem:[#allocation101_spill] sm:$0xff]  ;;  %v11224_v46 = vsub.f32 %v11144_v60, %v8002_v45  ;;  %v11227_v15 = vld [vmem:[#allocation26_spill] sm:$0xff]  ;;  %v11228_v7 = vld [vmem:[#allocation40_spill] sm:$0xff]  ;;  %v11231_v60 = vsub.f32 %v11156_v30, %v8024_v39 }
 0x3e8   : > { %3082 = vadd.xlane.f32.xlu0 %v3081_v8  ;;  %11215 = vst [vmem:[#allocation97_spill] sm:$0xff] %v8176_v35  ;;  %v8185_v49 = vpop.xlane.xlu0 %2176  ;;  %v8187_v8 = vpop.eup %5455  ;;  %5475 = vpow2.f32 %v2638_v57  ;;  %v11226_v57 = vsub.f32 %v11145_v53, %v8002_v45  ;;  %v11229_v51 = vmax.f32 %v11227_v15, %v11228_v7  ;;  %v11232_v45 = vld [vmem:[#allocation106_spill] sm:$0xff]  ;;  %v11237_v30 = vld [vmem:[#allocation107_spill] sm:$0xff] }
 0x3e9   : > { %11219 = vst [vmem:[#allocation99_spill] sm:$0xff] %v8187_v8  ;;  %v2766_v4 = vmul.f32 1.442695, %v11220_v14  ;;  %v8196_v0 = vpop.eup %5457  ;;  %5477 = vpow2.f32 %v2760_v32  ;;  %v2640_v31 = vmul.f32 1.442695, %v11224_v46  ;;  %v3177_v32 = vadd.f32 %v7799_v59, %v7786_v40 }
 0x3ea   : > { %11223 = vst [vmem:[#allocation103_spill] sm:$0xff] %v8196_v0  ;;  %v8201_v35 = vpop.eup %5459  ;;  %5479 = vpow2.f32 %v2762_v33  ;;  %v2642_v14 = vmul.f32 1.442695, %v11226_v57  ;;  %v2644_v33 = vmul.f32 1.442695, %v11231_v60  ;;  %v11235_v40 = vsub.f32 %v11157_v6, %v8024_v39  ;;  %v11242_v39 = vld [vmem:[#allocation28_spill] sm:$0xff] }
 0x3eb   : > { %11225 = vst [vmem:[#allocation104_spill] sm:$0xff] %v8201_v35  ;;  %3175 = vadd.xlane.f32.xlu1 %v3174_v5  ;;  %v8209_v52 = vpop.xlane.xlu1 %2179  ;;  %v8213_v0 = vpop.eup %5461  ;;  %5481 = vpow2.f32 %v2764_v17  ;;  %v11233_v5 = vld [vmem:[#allocation108_spill] sm:$0xff]  ;;  %v11236_v17 = vld [vmem:[#allocation105_spill] sm:$0xff]  ;;  %v11239_v46 = vsub.f32 %v11160_v37, %v8037_v13  ;;  %v11243_v6 = vld [vmem:[#allocation38_spill] sm:$0xff]  ;;  %v11247_v37 = vsub.f32 %v11171_v1, %v8061_v25 }
 0x3ec   : > { %2146 = vmax.xlane.f32.xlu0 %v11229_v51  ;;  %11230 = vst [vmem:[#allocation101_spill] sm:$0xff] %v8213_v0  ;;  %v8222_v57 = vpop.xlane.xlu0 %2086  ;;  %v8224_v51 = vpop.eup %5463  ;;  %5483 = vpow2.f32 %v2766_v4  ;;  %v2646_v59 = vmul.f32 1.442695, %v11235_v40  ;;  %v11241_v4 = vsub.f32 %v11161_v27, %v8037_v13  ;;  %v11244_v7 = vmax.f32 %v11242_v39, %v11243_v6  ;;  %v11248_v13 = vld [vmem:[#allocation111_spill] sm:$0xff]  ;;  %v11253_v1 = vld [vmem:[#allocation110_spill] sm:$0xff] }
 0x3ed   : > { %11234 = vst [vmem:[#allocation102_spill] sm:$0xff] %v8224_v51  ;;  %v8233_v15 = vpop.eup %5465  ;;  %5485 = vpow2.f32 %v2640_v31  ;;  %v2768_v53 = vmul.f32 1.442695, %v11239_v46  ;;  %v11245_v31 = vld [vmem:[#allocation226_spill] sm:$0xff]  ;;  %v11249_v46 = vld [vmem:[#allocation112_spill] sm:$0xff] }
 0x3ee   : > { %11238 = vst [vmem:[#allocation106_spill] sm:$0xff] %v8233_v15  ;;  %v8238_v0 = vpop.eup %5467  ;;  %5487 = vpow2.f32 %v2642_v14  ;;  %v2770_v40 = vmul.f32 1.442695, %v11241_v4  ;;  %v3084_v15 = vadd.f32 %v11245_v31, %v7758_v21  ;;  %v2772_v14 = vmul.f32 1.442695, %v11247_v37 }
 0x3ef   : > { %11240 = vst [vmem:[#allocation108_spill] sm:$0xff] %v8238_v0  ;;  %2239 = vmax.xlane.f32.xlu1 %v11244_v7  ;;  %v8246_v60 = vpop.xlane.xlu1 %2089  ;;  %v8250_v51 = vpop.eup %5469  ;;  %5489 = vpow2.f32 %v2644_v33  ;;  %v11251_v21 = vsub.f32 %v11172_v62, %v8061_v25  ;;  %v11252_v33 = vld [vmem:[#allocation109_spill] sm:$0xff]  ;;  %v11255_v4 = vsub.f32 %v11175_v50, %v8074_v38  ;;  %v11258_v25 = vld [vmem:[#allocation27_spill] sm:$0xff]  ;;  %v11259_v62 = vld [vmem:[#allocation42_spill] sm:$0xff]  ;;  %v11264_v50 = vsub.f32 %v11187_v3, %v8098_v44 }
 0x3f0   : > { %3178 = vadd.xlane.f32.xlu0 %v3177_v32  ;;  %11246 = vst [vmem:[#allocation105_spill] sm:$0xff] %v8250_v51  ;;  %v8259_v7 = vpop.xlane.xlu0 %2182  ;;  %v8261_v32 = vpop.eup %5471  ;;  %5491 = vpow2.f32 %v2646_v59  ;;  %v11257_v59 = vsub.f32 %v11176_v58, %v8074_v38  ;;  %v11260_v6 = vmax.f32 %v11258_v25, %v11259_v62  ;;  %v11265_v38 = vld [vmem:[#allocation114_spill] sm:$0xff]  ;;  %v11270_v3 = vld [vmem:[#allocation115_spill] sm:$0xff] }
 0x3f1   : > { %11250 = vst [vmem:[#allocation107_spill] sm:$0xff] %v8261_v32  ;;  %v2774_v31 = vmul.f32 1.442695, %v11251_v21  ;;  %v8270_v39 = vpop.eup %5473  ;;  %5493 = vpow2.f32 %v2768_v53  ;;  %v2648_v27 = vmul.f32 1.442695, %v11255_v4  ;;  %v11262_v53 = vld [vmem:[#allocation67_spill] sm:$0xff]  ;;  %v11272_v4 = vsub.f32 %v11191_v16, %v8111_v63 }
 0x3f2   : > { %11254 = vst [vmem:[#allocation111_spill] sm:$0xff] %v8270_v39  ;;  %v8275_v51 = vpop.eup %5475  ;;  %5495 = vpow2.f32 %v2770_v40  ;;  %v2650_v21 = vmul.f32 1.442695, %v11257_v59  ;;  %v11261_v39 = vld [vmem:[#allocation68_spill] sm:$0xff]  ;;  %v2780_v40 = vmul.f32 1.442695, %v11264_v50  ;;  %v11281_v16 = vsub.f32 %v11202_v55, %v8135_v36 }
 0x3f3   : > { %11256 = vst [vmem:[#allocation112_spill] sm:$0xff] %v8275_v51  ;;  %3085 = vadd.xlane.f32.xlu1 %v3084_v15  ;;  %v8283_v37 = vpop.xlane.xlu1 %2185  ;;  %v3087_v32 = vadd.f32 %v11262_v53, %v11261_v39  ;;  %v8287_v0 = vpop.eup %5477  ;;  %5497 = vpow2.f32 %v2772_v14  ;;  %v11266_v15 = vld [vmem:[#allocation116_spill] sm:$0xff]  ;;  %v11268_v39 = vsub.f32 %v11188_v29, %v8098_v44  ;;  %v11269_v14 = vld [vmem:[#allocation113_spill] sm:$0xff]  ;;  %v2776_v58 = vmul.f32 1.442695, %v11272_v4  ;;  %v11287_v55 = vld [vmem:[#allocation118_spill] sm:$0xff] }
 0x3f4   : > { %2242 = vmax.xlane.f32.xlu0 %v11260_v6  ;;  %11263 = vst [vmem:[#allocation109_spill] sm:$0xff] %v8287_v0  ;;  %v8296_v59 = vpop.xlane.xlu0 %2092  ;;  %v8298_v6 = vpop.eup %5479  ;;  %5499 = vpow2.f32 %v2774_v31  ;;  %v11274_v44 = vsub.f32 %v11192_v19, %v8111_v63  ;;  %v11276_v31 = vld [vmem:[#allocation29_spill] sm:$0xff]  ;;  %v11282_v63 = vld [vmem:[#allocation119_spill] sm:$0xff]  ;;  %v11283_v4 = vld [vmem:[#allocation120_spill] sm:$0xff] }
 0x3f5   : > { %11267 = vst [vmem:[#allocation110_spill] sm:$0xff] %v8298_v6  ;;  %v2782_v53 = vmul.f32 1.442695, %v11268_v39  ;;  %v8307_v25 = vpop.eup %5481  ;;  %5501 = vpow2.f32 %v2648_v27  ;;  %v11275_v39 = vld [vmem:[#allocation41_spill] sm:$0xff]  ;;  %v11279_v27 = vld [vmem:[#allocation231_spill] sm:$0xff] }
 0x3f6   : > { %11271 = vst [vmem:[#allocation114_spill] sm:$0xff] %v8307_v25  ;;  %v8312_v0 = vpop.eup %5483  ;;  %5503 = vpow2.f32 %v2650_v21  ;;  %v2778_v29 = vmul.f32 1.442695, %v11274_v44  ;;  %v11277_v62 = vmax.f32 %v11275_v39, %v11276_v31  ;;  %v11278_v25 = vld [vmem:[#allocation229_spill] sm:$0xff]  ;;  %v2908_v21 = vmul.f32 1.442695, %v11281_v16 }
 0x3f7   : > { %11273 = vst [vmem:[#allocation116_spill] sm:$0xff] %v8312_v0  ;;  %v8320_v50 = vpop.xlane.xlu1 %2095  ;;  %v3180_v6 = vadd.f32 %v11279_v27, %v11278_v25  ;;  %v8324_v51 = vpop.eup %5485  ;;  %5505 = vpow2.f32 %v2780_v40  ;;  %v11285_v25 = vsub.f32 %v11203_v61, %v8135_v36  ;;  %v11286_v40 = vld [vmem:[#allocation117_spill] sm:$0xff]  ;;  %v11289_v44 = vsub.f32 %v11206_v48, %v8148_v42 }
 0x3f8   : > { %2149 = vmax.xlane.f32.xlu1 %v11277_v62  ;;  %3088 = vadd.xlane.f32.xlu0 %v3087_v32  ;;  %11280 = vst [vmem:[#allocation113_spill] sm:$0xff] %v8324_v51  ;;  %v8333_v62 = vpop.xlane.xlu0 %2188  ;;  %v8335_v32 = vpop.eup %5487  ;;  %5507 = vpow2.f32 %v2782_v53  ;;  %v11291_v36 = vsub.f32 %v11207_v23, %v8148_v42  ;;  %v11293_v53 = vld [vmem:[#allocation48_spill] sm:$0xff]  ;;  %v11297_v48 = vsub.f32 %v11217_v26, %v8172_v47  ;;  %v11298_v42 = vld [vmem:[#allocation123_spill] sm:$0xff]  ;;  %v11303_v26 = vld [vmem:[#allocation122_spill] sm:$0xff] }
 0x3f9   : > { %11284 = vst [vmem:[#allocation115_spill] sm:$0xff] %v8335_v32  ;;  %v2910_v27 = vmul.f32 1.442695, %v11285_v25  ;;  %v8344_v39 = vpop.eup %5489  ;;  %5509 = vpow2.f32 %v2776_v58  ;;  %v2784_v19 = vmul.f32 1.442695, %v11289_v44  ;;  %v11292_v25 = vld [vmem:[#allocation30_spill] sm:$0xff]  ;;  %v11305_v44 = vsub.f32 %v11221_v9, %v8185_v49 }
 0x3fa   : > { %11288 = vst [vmem:[#allocation119_spill] sm:$0xff] %v8344_v39  ;;  %v8349_v51 = vpop.eup %5491  ;;  %5511 = vpow2.f32 %v2778_v29  ;;  %v2786_v61 = vmul.f32 1.442695, %v11291_v36  ;;  %v11294_v31 = vmax.f32 %v11292_v25, %v11293_v53  ;;  %v11295_v39 = vld [vmem:[#allocation234_spill] sm:$0xff]  ;;  %v2788_v29 = vmul.f32 1.442695, %v11297_v48 }
 0x3fb   : > { %11290 = vst [vmem:[#allocation120_spill] sm:$0xff] %v8349_v51  ;;  %v8357_v16 = vpop.xlane.xlu1 %2191  ;;  %v3183_v58 = vadd.f32 %v7899_v20, %v11295_v39  ;;  %v8361_v32 = vpop.eup %5493  ;;  %5513 = vpow2.f32 %v2908_v21  ;;  %v11301_v39 = vsub.f32 %v11218_v56, %v8172_v47  ;;  %v11302_v21 = vld [vmem:[#allocation121_spill] sm:$0xff]  ;;  %v2912_v23 = vmul.f32 1.442695, %v11305_v44 }
 0x3fc   : > { %3181 = vadd.xlane.f32.xlu1 %v3180_v6  ;;  %2152 = vmax.xlane.f32.xlu0 %v11294_v31  ;;  %11296 = vst [vmem:[#allocation117_spill] sm:$0xff] %v8361_v32  ;;  %v11299_v6 = vld [vmem:[#allocation124_spill] sm:$0xff]  ;;  %v8370_v36 = vpop.xlane.xlu0 %2098  ;;  %v8372_v31 = vpop.eup %5495  ;;  %5515 = vpow2.f32 %v2910_v27  ;;  %v11307_v47 = vsub.f32 %v11222_v10, %v8185_v49  ;;  %v11309_v27 = vld [vmem:[#allocation46_spill] sm:$0xff]  ;;  %v11314_v49 = vld [vmem:[#allocation125_spill] sm:$0xff] }
 0x3fd   : > { %11300 = vst [vmem:[#allocation118_spill] sm:$0xff] %v8372_v31  ;;  %v2790_v20 = vmul.f32 1.442695, %v11301_v39  ;;  %v8381_v25 = vpop.eup %5497  ;;  %5517 = vpow2.f32 %v2784_v19  ;;  %v11308_v39 = vld [vmem:[#allocation45_spill] sm:$0xff]  ;;  %v11312_v19 = vsub.f32 %v11232_v45, %v8209_v52  ;;  %v11319_v45 = vsub.f32 %v11233_v5, %v8209_v52 }
 0x3fe   : > { %11304 = vst [vmem:[#allocation123_spill] sm:$0xff] %v8381_v25  ;;  %v8386_v32 = vpop.eup %5499  ;;  %5519 = vpow2.f32 %v2786_v61  ;;  %v2914_v56 = vmul.f32 1.442695, %v11307_v47  ;;  %v11310_v53 = vmax.f32 %v11308_v39, %v11309_v27  ;;  %v11315_v47 = vld [vmem:[#allocation126_spill] sm:$0xff]  ;;  %v11317_v27 = vld [vmem:[#allocation72_spill] sm:$0xff]  ;;  %v3093_v52 = vadd.f32 %v7956_v18, %v7942_v24 }
 0x3ff   : > { %11306 = vst [vmem:[#allocation124_spill] sm:$0xff] %v8386_v32  ;;  %v8394_v48 = vpop.eup %5501  ;;  %5521 = vpow2.f32 %v2788_v29  ;;  %v2916_v9 = vmul.f32 1.442695, %v11312_v19  ;;  %v3038_v44 = vpop.xlane.xlu1 %3037  ;;  %v2918_v19 = vmul.f32 1.442695, %v11319_v45  ;;  %v11329_v45 = vld [vmem:[#allocation130_spill] sm:$0xff] }
 0x400   : > { %2245 = vmax.xlane.f32.xlu1 %v11310_v53  ;;  %3184 = vadd.xlane.f32.xlu0 %v3183_v58  ;;  %11311 = vst [vmem:[#allocation121_spill] sm:$0xff] %v8394_v48  ;;  %v8399_v25 = vpop.xlane.xlu0 %2194  ;;  %v8401_v61 = vpop.eup %5503  ;;  %5523 = vpow2.f32 %v2790_v20  ;;  %v11316_v58 = vld [vmem:[#allocation233_spill] sm:$0xff]  ;;  %v11321_v20 = vld [vmem:[#allocation216_spill] sm:$0xff]  ;;  %v11325_v53 = vsub.f32 %v11236_v17, %v8222_v57 }
 0x401   : > { %11313 = vst [vmem:[#allocation122_spill] sm:$0xff] %v8401_v61  ;;  %v3090_v39 = vadd.f32 %v11317_v27, %v11316_v58  ;;  %v8409_v29 = vpop.eup %5505  ;;  %5525 = vpow2.f32 %v2912_v23  ;;  %v11322_v61 = vld [vmem:[#allocation50_spill] sm:$0xff] }
 0x402   : > { %11318 = vst [vmem:[#allocation125_spill] sm:$0xff] %v8409_v29  ;;  %v8414_v48 = vpop.eup %5507  ;;  %5527 = vpow2.f32 %v2914_v56  ;;  %v11323_v10 = vmax.f32 %v11321_v20, %v11322_v61  ;;  %v2792_v58 = vmul.f32 1.442695, %v11325_v53  ;;  %v11327_v56 = vsub.f32 %v11237_v30, %v8222_v57 }
 0x403   : > { %11320 = vst [vmem:[#allocation126_spill] sm:$0xff] %v8414_v48  ;;  %v8419_v32 = vpop.eup %5509  ;;  %5529 = vpow2.f32 %v2916_v9  ;;  %v8424_v23 = vpop.xlane.xlu1 %2101  ;;  %v11331_v61 = vsub.f32 %v11248_v13, %v8246_v60  ;;  %v11333_v57 = vsub.f32 %v11249_v46, %v8246_v60  ;;  %v11340_v60 = vld [vmem:[#allocation131_spill] sm:$0xff] }
 0x404   : > { %3091 = vadd.xlane.f32.xlu1 %v3090_v39  ;;  %2248 = vmax.xlane.f32.xlu0 %v11323_v10  ;;  %11324 = vst [vmem:[#allocation239_spill] sm:$0xff] %v8419_v32  ;;  %v3041_v27 = vpop.xlane.xlu0 %3040  ;;  %v8428_v5 = vpop.eup %5511  ;;  %v2794_v39 = vmul.f32 1.442695, %v11327_v56  ;;  %5531 = vrcp.f32 %v3038_v44  ;;  %v11328_v10 = vld [vmem:[#allocation128_spill] sm:$0xff]  ;;  %v11334_v44 = vld [vmem:[#allocation51_spill] sm:$0xff] }
 0x405   : > { %11326 = vst [vmem:[#allocation240_spill] sm:$0xff] %v8428_v5  ;;  %v8437_v53 = vpop.eup %5513  ;;  %5533 = vpow2.f32 %v2918_v19  ;;  %v2796_v24 = vmul.f32 1.442695, %v11331_v61  ;;  %v2798_v30 = vmul.f32 1.442695, %v11333_v57  ;;  %v11335_v56 = vld [vmem:[#allocation219_spill] sm:$0xff]  ;;  %v11338_v19 = vsub.f32 %v11252_v33, %v8259_v7 }
 0x406   : > { %11330 = vst [vmem:[#allocation128_spill] sm:$0xff] %v8437_v53  ;;  %v8442_v18 = vpop.eup %5515  ;;  %5535 = vrcp.f32 %v3041_v27  ;;  %v11336_v9 = vmax.f32 %v11334_v44, %v11335_v56  ;;  %v11341_v27 = vld [vmem:[#allocation133_spill] sm:$0xff]  ;;  %v11343_v57 = vld [vmem:[#allocation76_spill] sm:$0xff]  ;;  %v11345_v33 = vsub.f32 %v11253_v1, %v8259_v7  ;;  %v11352_v7 = vld [vmem:[#allocation78_spill] sm:$0xff] }
 0x407   : > { %11332 = vst [vmem:[#allocation130_spill] sm:$0xff] %v8442_v18  ;;  %v8450_v17 = vpop.eup %5517  ;;  %5537 = vpow2.f32 %v2792_v58  ;;  %v2920_v13 = vmul.f32 1.442695, %v11338_v19  ;;  %v3134_v61 = vpop.xlane.xlu1 %3133  ;;  %v3189_v1 = vadd.f32 %v11352_v7, %v7981_v11  ;;  %v11358_v11 = vsub.f32 %v11269_v14, %v8296_v59 }
 0x408   : > { %2155 = vmax.xlane.f32.xlu1 %v11336_v9  ;;  %3094 = vadd.xlane.f32.xlu0 %v3093_v52  ;;  %11337 = vst [vmem:[#allocation241_spill] sm:$0xff] %v8450_v17  ;;  %v8455_v20 = vpop.xlane.xlu0 %2104  ;;  %v8457_v18 = vpop.eup %5519  ;;  %5539 = vpow2.f32 %v2794_v39  ;;  %v11342_v52 = vld [vmem:[#allocation238_spill] sm:$0xff]  ;;  %v2922_v19 = vmul.f32 1.442695, %v11345_v33  ;;  %v11347_v39 = vld [vmem:[#allocation55_spill] sm:$0xff]  ;;  %v11351_v9 = vsub.f32 %v11265_v38, %v8283_v37 }
 0x409   : > { %11339 = vst [vmem:[#allocation242_spill] sm:$0xff] %v8457_v18  ;;  %v3186_v56 = vadd.f32 %v11343_v57, %v11342_v52  ;;  %v8465_v58 = vpop.eup %5521  ;;  %5541 = vpow2.f32 %v2796_v24  ;;  %v11348_v18 = vld [vmem:[#allocation53_spill] sm:$0xff]  ;;  %v2800_v7 = vmul.f32 1.442695, %v11358_v11 }
 0x40a   : > { %11344 = vst [vmem:[#allocation131_spill] sm:$0xff] %v8465_v58  ;;  %v8470_v44 = vpop.eup %5523  ;;  %5543 = vpow2.f32 %v2798_v30  ;;  %v11349_v46 = vmax.f32 %v11347_v39, %v11348_v18  ;;  %v2924_v52 = vmul.f32 1.442695, %v11351_v9  ;;  %v11354_v30 = vsub.f32 %v11266_v15, %v8283_v37  ;;  %v11356_v18 = vld [vmem:[#allocation136_spill] sm:$0xff]  ;;  %v11372_v58 = vld [vmem:[#allocation127_spill] sm:$0xff] }
 0x40b   : > { %11346 = vst [vmem:[#allocation133_spill] sm:$0xff] %v8470_v44  ;;  %v8475_v17 = vpop.eup %5525  ;;  %5545 = vpow2.f32 %v2920_v13  ;;  %v8480_v24 = vpop.xlane.xlu1 %2197  ;;  %v11364_v13 = vld [vmem:[#allocation79_spill] sm:$0xff] }
 0x40c   : > { %3187 = vadd.xlane.f32.xlu1 %v3186_v56  ;;  %2158 = vmax.xlane.f32.xlu0 %v11349_v46  ;;  %11350 = vst [vmem:[#allocation243_spill] sm:$0xff] %v8475_v17  ;;  %v3137_v57 = vpop.xlane.xlu0 %3136  ;;  %v8484_v33 = vpop.eup %5527  ;;  %v2926_v56 = vmul.f32 1.442695, %v11354_v30  ;;  %5547 = vrcp.f32 %v3134_v61  ;;  %v11355_v46 = vld [vmem:[#allocation134_spill] sm:$0xff]  ;;  %v11360_v17 = vld [vmem:[#allocation221_spill] sm:$0xff]  ;;  %v11363_v61 = vsub.f32 %v11270_v3, %v8296_v59 }
 0x40d   : > { %11353 = vst [vmem:[#allocation244_spill] sm:$0xff] %v8484_v33  ;;  %v8493_v9 = vpop.eup %5529  ;;  %5549 = vpow2.f32 %v2922_v19  ;;  %v11359_v33 = vld [vmem:[#allocation54_spill] sm:$0xff]  ;;  %v11370_v3 = vld [vmem:[#allocation129_spill] sm:$0xff] }
 0x40e   : > { %11357 = vst [vmem:[#allocation134_spill] sm:$0xff] %v8493_v9  ;;  %v5532_v39 = vpop.eup %5531  ;;  %5551 = vrcp.f32 %v3137_v57  ;;  %v11361_v37 = vmax.f32 %v11359_v33, %v11360_v17  ;;  %v2802_v30 = vmul.f32 1.442695, %v11363_v61  ;;  %v11365_v9 = vld [vmem:[#allocation80_spill] sm:$0xff]  ;;  %v11366_v57 = vsub.f32 %v11282_v63, %v8320_v50  ;;  %v11375_v63 = vld [vmem:[#allocation223_spill] sm:$0xff] }
 0x40f   : > { %v8501_v15 = vpop.eup %5533  ;;  %5553 = vpow2.f32 %v2924_v52  ;;  %v3044_v38 = vpop.xlane.xlu1 %3043  ;;  %v3096_v14 = vadd.f32 %v11365_v9, %v11364_v13  ;;  %v11368_v52 = vld [vmem:[#allocation138_spill] sm:$0xff]  ;;  %v3549_v61 = vmul.f32 %v5532_v39, %v11370_v3  ;;  %v3548_v13 = vmul.f32 %v5532_v39, %v11372_v58  ;;  %v11373_v9 = vld [vmem:[#allocation132_spill] sm:$0xff] }
 0x410   : > { %2251 = vmax.xlane.f32.xlu1 %v11361_v37  ;;  %3190 = vadd.xlane.f32.xlu0 %v3189_v1  ;;  %11362 = vst [vmem:[#allocation136_spill] sm:$0xff] %v8501_v15  ;;  %v8506_v19 = vpop.xlane.xlu0 %2200  ;;  %v5536_v11 = vpop.eup %5535  ;;  %5555 = vpow2.f32 %v2926_v56  ;;  %v2804_v37 = vmul.f32 1.442695, %v11366_v57  ;;  %v11367_v1 = vld [vmem:[#allocation137_spill] sm:$0xff]  ;;  %v11371_v15 = vld [vmem:[#allocation135_spill] sm:$0xff]  ;;  %v11376_v57 = vld [vmem:[#allocation58_spill] sm:$0xff]  ;;  %v11379_v3 = vsub.f32 %v11283_v4, %v8320_v50  ;;  %v3099_v4 = vadd.f32 %v8039_v34, %v8028_v43 }
 0x411   : > { %v8517_v59 = vpop.eup %5537  ;;  %v3551_v44 = vmul.f32 %v5536_v11, %v11371_v15  ;;  %v3550_v56 = vmul.f32 %v5536_v11, %v11373_v9  ;;  %5557 = vpow2.f32 %v2800_v7  ;;  %v11377_v17 = vmax.f32 %v11375_v63, %v11376_v57  ;;  %v11391_v57 = vld [vmem:[#allocation82_spill] sm:$0xff]  ;;  %v11395_v43 = vld [vmem:[#allocation145_spill] sm:$0xff] }
 0x412   : > { %11369 = vst [vmem:[#allocation137_spill] sm:$0xff] %v8517_v59  ;;  %v8523_v53 = vpop.eup %5539  ;;  %5559 = vpow2.f32 %v2802_v30  ;;  %v2806_v33 = vmul.f32 1.442695, %v11379_v3  ;;  %v11381_v7 = vsub.f32 %v11286_v40, %v8333_v62  ;;  %v11383_v30 = vld [vmem:[#allocation142_spill] sm:$0xff] }
 0x413   : > { %11374 = vst [vmem:[#allocation138_spill] sm:$0xff] %v8523_v53  ;;  %v8528_v5 = vpop.eup %5541  ;;  %v8533_v15 = vpop.xlane.xlu1 %2107  ;;  %v3813_v58 = vpack.c.bf16 %v3551_v44, %v3549_v61  ;;  %v3812_v9 = vpack.c.bf16 %v3550_v56, %v3548_v13  ;;  %5561 = vrcp.f32 %v3044_v38  ;;  %v11385_v13 = vsub.f32 %v11287_v55, %v8333_v62  ;;  %v11386_v38 = vld [vmem:[#allocation57_spill] sm:$0xff]  ;;  %v11392_v62 = vld [vmem:[#allocation84_spill] sm:$0xff] }
 0x414   : > { %3097 = vadd.xlane.f32.xlu1 %v3096_v14  ;;  %2254 = vmax.xlane.f32.xlu0 %v11377_v17  ;;  %11378 = vst [vmem:[#allocation129_spill] sm:$0xff] %v8528_v5  ;;  %v3047_v39 = vpop.xlane.xlu0 %3046  ;;  %v8535_v11 = vpop.eup %5543  ;;  %v2928_v14 = vmul.f32 1.442695, %v11381_v7  ;;  %v11382_v17 = vld [vmem:[#allocation141_spill] sm:$0xff]  ;;  %5563 = vpow2.f32 %v2804_v37  ;;  %v11390_v37 = vsub.f32 %v11298_v42, %v8357_v16  ;;  %v3192_v55 = vadd.f32 %v11392_v62, %v11391_v57  ;;  %v11400_v62 = vld [vmem:[#allocation144_spill] sm:$0xff] }
 0x415   : > { %11380 = vst [vmem:[#allocation135_spill] sm:$0xff] %v8535_v11  ;;  %v8544_v50 = vpop.eup %5545  ;;  %3940 = vmatprep.subr.bf16.mxu1 %v3813_v58  ;;  %v2930_v40 = vmul.f32 1.442695, %v11385_v13  ;;  %5565 = vrcp.f32 %v3047_v39  ;;  %v11387_v61 = vld [vmem:[#allocation225_spill] sm:$0xff] }
 0x416   : > { %11384 = vst [vmem:[#allocation127_spill] sm:$0xff] %v8544_v50  ;;  %v5548_v44 = vpop.eup %5547  ;;  %3941 = vmatpush1.bf16.xpose.msra.mxu1 %v3812_v9  ;;  %v11388_v56 = vmax.f32 %v11386_v38, %v11387_v61  ;;  %5567 = vpow2.f32 %v2806_v33  ;;  %v2932_v58 = vmul.f32 1.442695, %v11390_v37  ;;  %v11393_v9 = vsub.f32 %v11299_v6, %v8357_v16  ;;  %v11398_v61 = vld [vmem:[#allocation147_spill] sm:$0xff]  ;;  %v11404_v42 = vld [vmem:[#allocation61_spill] sm:$0xff] }
 0x417   : > { %v8554_v3 = vpop.eup %5549  ;;  %v3140_v7 = vpop.xlane.xlu1 %3139  ;;  %5569 = vpow2.f32 %v2928_v14  ;;  %v11402_v16 = vsub.f32 %v11302_v21, %v8370_v36 }
 0x418   : > { %2161 = vmax.xlane.f32.xlu1 %v11388_v56  ;;  %11389 = vst [vmem:[#allocation132_spill] sm:$0xff] %v8554_v3  ;;  %3100 = vadd.xlane.f32.xlu0 %v3099_v4  ;;  %v8559_v63 = vpop.xlane.xlu0 %2110  ;;  %v5552_v39 = vpop.eup %5551  ;;  %v2934_v13 = vmul.f32 1.442695, %v11393_v9  ;;  %v11394_v56 = vld [vmem:[#allocation143_spill] sm:$0xff]  ;;  %v11397_v4 = vld [vmem:[#allocation140_spill] sm:$0xff]  ;;  %5571 = vpow2.f32 %v2930_v40  ;;  %v11407_v40 = vsub.f32 %v11303_v26, %v8370_v36  ;;  %v11413_v26 = vld [vmem:[#allocation62_spill] sm:$0xff] }
 0x419   : > { %v8570_v37 = vpop.eup %5553  ;;  %v3613_v34 = vmul.f32 %v5548_v44, %v11397_v4  ;;  %v3615_v38 = vmul.f32 %v5552_v39, %v11398_v61  ;;  %v11399_v3 = vld [vmem:[#allocation139_spill] sm:$0xff]  ;;  %v3614_v14 = vmul.f32 %v5552_v39, %v11400_v62  ;;  %5573 = vpow2.f32 %v2932_v58  ;;  %v11408_v58 = vld [vmem:[#allocation146_spill] sm:$0xff] }
 0x41a   : > { %11396 = vst [vmem:[#allocation141_spill] sm:$0xff] %v8570_v37  ;;  %v3612_v57 = vmul.f32 %v5548_v44, %v11399_v3  ;;  %v8576_v50 = vpop.eup %5555  ;;  %v2808_v6 = vmul.f32 1.442695, %v11402_v16  ;;  %v11403_v9 = vld [vmem:[#allocation63_spill] sm:$0xff]  ;;  %v2810_v62 = vmul.f32 1.442695, %v11407_v40  ;;  %5575 = vrcp.f32 %v3140_v7 }
 0x41b   : > { %11401 = vst [vmem:[#allocation142_spill] sm:$0xff] %v8576_v50  ;;  %v11405_v33 = vmax.f32 %v11403_v9, %v11404_v42  ;;  %v8584_v4 = vpop.xlane.xlu1 %2203  ;;  %v3845_v61 = vpack.c.bf16 %v3615_v38, %v3613_v34  ;;  %v8586_v3 = vpop.eup %5557  ;;  %5577 = vpow2.f32 %v2934_v13  ;;  %v11411_v34 = vld [vmem:[#allocation86_spill] sm:$0xff]  ;;  %v11414_v7 = vld [vmem:[#allocation228_spill] sm:$0xff]  ;;  %v11417_v13 = vsub.f32 %v11315_v47, %v8399_v25  ;;  %v11426_v9 = vld [vmem:[#allocation151_spill] sm:$0xff] }
 0x41c   : > { %3193 = vadd.xlane.f32.xlu1 %v3192_v55  ;;  %v3143_v37 = vpop.xlane.xlu0 %3142  ;;  %v3844_v44 = vpack.c.bf16 %v3614_v14, %v3612_v57  ;;  %11406 = vst [vmem:[#allocation143_spill] sm:$0xff] %v8586_v3  ;;  %v11409_v55 = vld [vmem:[#allocation148_spill] sm:$0xff]  ;;  %v8595_v16 = vpop.eup %5559  ;;  %v3195_v57 = vadd.f32 %v11411_v34, %v8065_v2  ;;  %v11415_v14 = vmax.f32 %v11413_v26, %v11414_v7  ;;  %v11418_v2 = vld [vmem:[#allocation87_spill] sm:$0xff]  ;;  %v11421_v34 = vld [vmem:[#allocation149_spill] sm:$0xff] }
 0x41d   : > { %2164 = vmax.xlane.f32.xlu0 %v11405_v33  ;;  %11410 = vst [vmem:[#allocation145_spill] sm:$0xff] %v8595_v16  ;;  %3981 = vmatprep.subr.bf16.mxu0 %v3845_v61  ;;  %v5562_v38 = vpop.eup %5561  ;;  %v11412_v33 = vsub.f32 %v11314_v49, %v8399_v25  ;;  %5579 = vrcp.f32 %v3143_v37  ;;  %v2938_v61 = vmul.f32 1.442695, %v11417_v13  ;;  %v11419_v49 = vld [vmem:[#allocation88_spill] sm:$0xff]  ;;  %v11422_v7 = vld [vmem:[#allocation150_spill] sm:$0xff]  ;;  %v11425_v26 = vld [vmem:[#allocation159_spill] sm:$0xff] }
 0x41e   : > { %3982 = vmatpush1.bf16.xpose.msra.mxu0 %v3844_v44  ;;  %v8605_v40 = vpop.eup %5563  ;;  %5581 = vpow2.f32 %v2808_v6  ;;  %v11420_v44 = vsub.f32 %v11328_v10, %v8424_v23  ;;  %v11429_v10 = vsub.f32 %v11329_v45, %v8424_v23  ;;  %v11430_v25 = vld [vmem:[#allocation230_spill] sm:$0xff] }
 0x41f   : > { %v2936_v36 = vmul.f32 1.442695, %v11412_v33  ;;  %11416 = vst [vmem:[#allocation140_spill] sm:$0xff] %v8605_v40  ;;  %v3050_v39 = vpop.xlane.xlu1 %3049  ;;  %v3102_v33 = vadd.f32 %v11419_v49, %v11418_v2  ;;  %v5566_v37 = vpop.eup %5565  ;;  %5583 = vpow2.f32 %v2810_v62  ;;  %v3552_v2 = vmul.f32 %v5562_v38, %v11426_v9  ;;  %v11427_v49 = vld [vmem:[#allocation156_spill] sm:$0xff]  ;;  %v11431_v6 = vld [vmem:[#allocation66_spill] sm:$0xff] }
 0x420   : > { %2257 = vmax.xlane.f32.xlu1 %v11415_v14  ;;  %v8610_v21 = vpop.xlane.xlu0 %2206  ;;  %v2812_v14 = vmul.f32 1.442695, %v11420_v44  ;;  %v8621_v47 = vpop.eup %5567  ;;  %v3555_v42 = vmul.f32 %v5566_v37, %v11425_v26  ;;  %v3554_v62 = vmul.f32 %v5566_v37, %v11427_v49  ;;  %v2814_v44 = vmul.f32 1.442695, %v11429_v10  ;;  %v11435_v45 = vld [vmem:[#allocation154_spill] sm:$0xff] }
 0x421   : > { %3196 = vadd.xlane.f32.xlu0 %v3195_v57  ;;  %11423 = vst [vmem:[#allocation147_spill] sm:$0xff] %v8621_v47  ;;  %v11424_v57 = vld [vmem:[#allocation152_spill] sm:$0xff]  ;;  %v8627_v40 = vpop.eup %5569  ;;  %5585 = vpow2.f32 %v2936_v36  ;;  %v11432_v47 = vmax.f32 %v11430_v25, %v11431_v6  ;;  %v11433_v36 = vsub.f32 %v11340_v60, %v8455_v20  ;;  %v11443_v23 = vld [vmem:[#allocation90_spill] sm:$0xff]  ;;  %v11451_v6 = vld [vmem:[#allocation163_spill] sm:$0xff] }
 0x422   : > { %v3553_v13 = vmul.f32 %v5562_v38, %v11424_v57  ;;  %11428 = vst [vmem:[#allocation139_spill] sm:$0xff] %v8627_v40  ;;  %5587 = vpow2.f32 %v2938_v61  ;;  %v3814_v9 = vpack.c.bf16 %v3554_v62, %v3552_v2  ;;  %v8637_v38 = vpop.eup %5571  ;;  %v11434_v61 = vld [vmem:[#allocation153_spill] sm:$0xff]  ;;  %v3105_v2 = vadd.f32 %v8113_v22, %v8102_v54 }
 0x423   : > { %v8635_v57 = vpop.xlane.xlu1 %2113  ;;  %v2816_v49 = vmul.f32 1.442695, %v11433_v36  ;;  %5589 = vrcp.f32 %v3050_v39  ;;  %v8646_v37 = vpop.eup %5573  ;;  %v11438_v39 = vld [vmem:[#allocation65_spill] sm:$0xff] }
 0x424   : > { %3103 = vadd.xlane.f32.xlu1 %v3102_v33  ;;  %v3815_v26 = vpack.c.bf16 %v3555_v42, %v3553_v13  ;;  %v3053_v16 = vpop.xlane.xlu0 %3052  ;;  %11436 = vst [vmem:[#allocation144_spill] sm:$0xff] %v8646_v37  ;;  %5591 = vpow2.f32 %v2812_v14  ;;  %v5576_v42 = vpop.eup %5575  ;;  %v11439_v13 = vld [vmem:[#allocation232_spill] sm:$0xff]  ;;  %v11442_v14 = vsub.f32 %v11355_v46, %v8480_v24  ;;  %v11447_v54 = vld [vmem:[#allocation157_spill] sm:$0xff] }
 0x425   : > { %2260 = vmax.xlane.f32.xlu0 %v11432_v47  ;;  %v11437_v47 = vsub.f32 %v11341_v27, %v8455_v20  ;;  %5593 = vrcp.f32 %v3053_v16  ;;  %v11440_v62 = vmax.f32 %v11438_v39, %v11439_v13  ;;  %v8656_v10 = vpop.eup %5577  ;;  %v11444_v20 = vld [vmem:[#allocation92_spill] sm:$0xff]  ;;  %v11450_v13 = vld [vmem:[#allocation171_spill] sm:$0xff]  ;;  %v11455_v46 = vld [vmem:[#allocation69_spill] sm:$0xff] }
 0x426   : > { %3942 = vmatprep.subr.bf16.mxu1 %v3815_v26  ;;  %11441 = vst [vmem:[#allocation146_spill] sm:$0xff] %v8656_v10  ;;  %5595 = vpow2.f32 %v2814_v44  ;;  %v2940_v26 = vmul.f32 1.442695, %v11442_v14  ;;  %v3198_v27 = vadd.f32 %v11444_v20, %v11443_v23  ;;  %v3616_v23 = vmul.f32 %v5576_v42, %v11451_v6  ;;  %v11452_v20 = vld [vmem:[#allocation168_spill] sm:$0xff] }
 0x427   : > { %v2818_v60 = vmul.f32 1.442695, %v11437_v47  ;;  %3943 = vmatpush1.bf16.xpose.msra.mxu1 %v3814_v9  ;;  %v3146_v36 = vpop.xlane.xlu1 %3145  ;;  %v5580_v16 = vpop.eup %5579  ;;  %5597 = vpow2.f32 %v2816_v49  ;;  %v11445_v9 = vsub.f32 %v11356_v18, %v8480_v24  ;;  %v11453_v18 = vsub.f32 %v11367_v1, %v8506_v19  ;;  %v11468_v1 = vld [vmem:[#allocation95_spill] sm:$0xff] }
 0x428   : > { %2167 = vmax.xlane.f32.xlu1 %v11440_v62  ;;  %v8661_v33 = vpop.xlane.xlu0 %2116  ;;  %v11446_v62 = vld [vmem:[#allocation155_spill] sm:$0xff]  ;;  %v8672_v14 = vpop.eup %5581  ;;  %v3619_v39 = vmul.f32 %v5580_v16, %v11450_v13  ;;  %v3618_v49 = vmul.f32 %v5580_v16, %v11452_v20 }
 0x429   : > { %3106 = vadd.xlane.f32.xlu0 %v3105_v2  ;;  %v2942_v47 = vmul.f32 1.442695, %v11445_v9  ;;  %11448 = vst [vmem:[#allocation148_spill] sm:$0xff] %v8672_v14  ;;  %v11449_v2 = vld [vmem:[#allocation164_spill] sm:$0xff]  ;;  %v8678_v25 = vpop.eup %5583  ;;  %5599 = vpow2.f32 %v2818_v60  ;;  %v2944_v24 = vmul.f32 1.442695, %v11453_v18  ;;  %v11458_v60 = vsub.f32 %v11368_v52, %v8506_v19 }
 0x42a   : > { %v3617_v22 = vmul.f32 %v5576_v42, %v11449_v2  ;;  %5601 = vpow2.f32 %v2940_v26  ;;  %v11454_v9 = vld [vmem:[#allocation71_spill] sm:$0xff]  ;;  %v3846_v6 = vpack.c.bf16 %v3618_v49, %v3616_v23  ;;  %v11459_v26 = vld [vmem:[#allocation158_spill] sm:$0xff] }
 0x42b   : > { %v11456_v44 = vmax.f32 %v11454_v9, %v11455_v46  ;;  %v8686_v2 = vpop.xlane.xlu1 %2209  ;;  %v8688_v42 = vpop.eup %5585  ;;  %v2946_v20 = vmul.f32 1.442695, %v11458_v60  ;;  %5603 = vrcp.f32 %v3146_v36  ;;  %v11463_v52 = vld [vmem:[#allocation70_spill] sm:$0xff]  ;;  %v11464_v36 = vld [vmem:[#allocation235_spill] sm:$0xff] }
 0x42c   : > { %3199 = vadd.xlane.f32.xlu1 %v3198_v27  ;;  %v3847_v13 = vpack.c.bf16 %v3619_v39, %v3617_v22  ;;  %v3149_v14 = vpop.xlane.xlu0 %3148  ;;  %11457 = vst [vmem:[#allocation149_spill] sm:$0xff] %v8688_v42  ;;  %v11460_v27 = vld [vmem:[#allocation160_spill] sm:$0xff]  ;;  %v8697_v18 = vpop.eup %5587  ;;  %5605 = vpow2.f32 %v2942_v47  ;;  %v3201_v22 = vadd.f32 %v8150_v12, %v8139_v28  ;;  %v11462_v39 = vsub.f32 %v11382_v17, %v8533_v15  ;;  %v11471_v28 = vld [vmem:[#allocation161_spill] sm:$0xff]  ;;  %v11472_v12 = vld [vmem:[#allocation162_spill] sm:$0xff] }
 0x42d   : > { %2170 = vmax.xlane.f32.xlu0 %v11456_v44  ;;  %11461 = vst [vmem:[#allocation150_spill] sm:$0xff] %v8697_v18  ;;  %v5590_v23 = vpop.eup %5589  ;;  %5607 = vrcp.f32 %v3149_v14  ;;  %v11465_v44 = vmax.f32 %v11463_v52, %v11464_v36  ;;  %v11467_v47 = vsub.f32 %v11383_v30, %v8533_v15  ;;  %v11469_v17 = vld [vmem:[#allocation96_spill] sm:$0xff]  ;;  %v11475_v36 = vld [vmem:[#allocation183_spill] sm:$0xff]  ;;  %v11476_v46 = vld [vmem:[#allocation174_spill] sm:$0xff]  ;;  %v11480_v15 = vsub.f32 %v11395_v43, %v8559_v63 }
 0x42e   : > { %3983 = vmatprep.subr.bf16.mxu0 %v3847_v13  ;;  %v2820_v19 = vmul.f32 1.442695, %v11462_v39  ;;  %v8707_v49 = vpop.eup %5591  ;;  %5609 = vpow2.f32 %v2944_v24  ;;  %v3108_v39 = vadd.f32 %v11469_v17, %v11468_v1  ;;  %v3556_v1 = vmul.f32 %v5590_v23, %v11476_v46  ;;  %v11477_v17 = vld [vmem:[#allocation181_spill] sm:$0xff] }
 0x42f   : > { %3984 = vmatpush1.bf16.xpose.msra.mxu0 %v3846_v6  ;;  %11466 = vst [vmem:[#allocation152_spill] sm:$0xff] %v8707_v49  ;;  %v2822_v13 = vmul.f32 1.442695, %v11467_v47  ;;  %v3056_v60 = vpop.xlane.xlu1 %3055  ;;  %v5594_v14 = vpop.eup %5593  ;;  %5611 = vpow2.f32 %v2946_v20  ;;  %v11470_v6 = vsub.f32 %v11394_v56, %v8559_v63  ;;  %v11479_v56 = vld [vmem:[#allocation98_spill] sm:$0xff]  ;;  %v2826_v24 = vmul.f32 1.442695, %v11480_v15 }
 0x430   : > { %2263 = vmax.xlane.f32.xlu1 %v11465_v44  ;;  %v8712_v16 = vpop.xlane.xlu0 %2212  ;;  %v8723_v30 = vpop.eup %5595  ;;  %v3559_v52 = vmul.f32 %v5594_v14, %v11475_v36  ;;  %v3558_v20 = vmul.f32 %v5594_v14, %v11477_v17  ;;  %5613 = vpow2.f32 %v2820_v19  ;;  %v11484_v19 = vsub.f32 %v11408_v58, %v8584_v4  ;;  %v11486_v63 = vld [vmem:[#allocation166_spill] sm:$0xff]  ;;  %v11492_v15 = vld [vmem:[#allocation103_spill] sm:$0xff] }
 0x431   : > { %3202 = vadd.xlane.f32.xlu0 %v3201_v22  ;;  %v2824_v44 = vmul.f32 1.442695, %v11470_v6  ;;  %11473 = vst [vmem:[#allocation159_spill] sm:$0xff] %v8723_v30  ;;  %v11474_v22 = vld [vmem:[#allocation176_spill] sm:$0xff]  ;;  %v8729_v9 = vpop.eup %5597  ;;  %v3204_v6 = vadd.f32 %v8164_v41, %v11479_v56  ;;  %5615 = vpow2.f32 %v2822_v13  ;;  %v11481_v30 = vld [vmem:[#allocation237_spill] sm:$0xff]  ;;  %v3114_v43 = vadd.f32 %v8201_v35, %v11492_v15 }
 0x432   : > { %v3557_v47 = vmul.f32 %v5590_v23, %v11474_v22  ;;  %11478 = vst [vmem:[#allocation151_spill] sm:$0xff] %v8729_v9  ;;  %v11482_v22 = vld [vmem:[#allocation74_spill] sm:$0xff]  ;;  %v3816_v17 = vpack.c.bf16 %v3558_v20, %v3556_v1  ;;  %5617 = vrcp.f32 %v3056_v60  ;;  %v11485_v13 = vld [vmem:[#allocation165_spill] sm:$0xff]  ;;  %v11491_v20 = vsub.f32 %v11421_v34, %v8610_v21  ;;  %v11500_v15 = vld [vmem:[#allocation192_spill] sm:$0xff] }
 0x433   : > { %v11483_v49 = vmax.f32 %v11481_v30, %v11482_v22  ;;  %v8739_v36 = vpop.xlane.xlu1 %2119  ;;  %v8741_v14 = vpop.eup %5599  ;;  %5619 = vpow2.f32 %v2824_v44  ;;  %v11493_v41 = vld [vmem:[#allocation101_spill] sm:$0xff] }
 0x434   : > { %3109 = vadd.xlane.f32.xlu1 %v3108_v39  ;;  %v3817_v46 = vpack.c.bf16 %v3559_v52, %v3557_v47  ;;  %v3059_v23 = vpop.xlane.xlu0 %3058  ;;  %v2948_v39 = vmul.f32 1.442695, %v11484_v19  ;;  %v8750_v56 = vpop.eup %5601  ;;  %v11488_v52 = vld [vmem:[#allocation97_spill] sm:$0xff]  ;;  %v11489_v47 = vsub.f32 %v11409_v55, %v8584_v4  ;;  %v2952_v19 = vmul.f32 1.442695, %v11491_v20  ;;  %v11494_v4 = vld [vmem:[#allocation102_spill] sm:$0xff] }
 0x435   : > { %2266 = vmax.xlane.f32.xlu0 %v11483_v49  ;;  %11487 = vst [vmem:[#allocation156_spill] sm:$0xff] %v8750_v56  ;;  %v3111_v1 = vadd.f32 %v8187_v8, %v11488_v52  ;;  %v5604_v49 = vpop.eup %5603  ;;  %5621 = vrcp.f32 %v3059_v23  ;;  %v3207_v55 = vadd.f32 %v11494_v4, %v11493_v41  ;;  %v11499_v52 = vld [vmem:[#allocation179_spill] sm:$0xff]  ;;  %v11501_v22 = vld [vmem:[#allocation177_spill] sm:$0xff]  ;;  %v11502_v4 = vld [vmem:[#allocation190_spill] sm:$0xff] }
 0x436   : > { %3944 = vmatprep.subr.bf16.mxu1 %v3817_v46  ;;  %v2950_v58 = vmul.f32 1.442695, %v11489_v47  ;;  %v8757_v60 = vpop.eup %5605  ;;  %5623 = vpow2.f32 %v2826_v24  ;;  %v3621_v8 = vmul.f32 %v5604_v49, %v11499_v52  ;;  %v3620_v41 = vmul.f32 %v5604_v49, %v11501_v22 }
 0x437   : > { %3945 = vmatpush1.bf16.xpose.msra.mxu1 %v3816_v17  ;;  %11490 = vst [vmem:[#allocation153_spill] sm:$0xff] %v8757_v60  ;;  %v3152_v44 = vpop.xlane.xlu1 %3151  ;;  %v5608_v23 = vpop.eup %5607  ;;  %5625 = vpow2.f32 %v2948_v39  ;;  %v11496_v17 = vld [vmem:[#allocation167_spill] sm:$0xff]  ;;  %v11506_v47 = vsub.f32 %v11434_v61, %v8635_v57 }
 0x438   : > { %3205 = vadd.xlane.f32.xlu1 %v3204_v6  ;;  %v8762_v46 = vpop.xlane.xlu0 %2122  ;;  %v11495_v6 = vsub.f32 %v11422_v7, %v8610_v21  ;;  %v8775_v20 = vpop.eup %5609  ;;  %v3623_v35 = vmul.f32 %v5608_v23, %v11500_v15  ;;  %v3622_v39 = vmul.f32 %v5608_v23, %v11502_v4  ;;  %5627 = vpow2.f32 %v2950_v58  ;;  %v11504_v21 = vld [vmem:[#allocation106_spill] sm:$0xff]  ;;  %v11505_v7 = vld [vmem:[#allocation108_spill] sm:$0xff]  ;;  %v11517_v61 = vld [vmem:[#allocation111_spill] sm:$0xff] }
 0x439   : > { %3112 = vadd.xlane.f32.xlu0 %v3111_v1  ;;  %v11497_v1 = vld [vmem:[#allocation169_spill] sm:$0xff]  ;;  %11498 = vst [vmem:[#allocation154_spill] sm:$0xff] %v8775_v20  ;;  %v8781_v30 = vpop.eup %5611  ;;  %5629 = vpow2.f32 %v2952_v19  ;;  %v2828_v34 = vmul.f32 1.442695, %v11506_v47  ;;  %v11508_v58 = vsub.f32 %v11435_v45, %v8635_v57  ;;  %v11509_v4 = vld [vmem:[#allocation170_spill] sm:$0xff]  ;;  %v11510_v23 = vld [vmem:[#allocation172_spill] sm:$0xff] }
 0x43a   : > { %v2954_v24 = vmul.f32 1.442695, %v11495_v6  ;;  %11503 = vst [vmem:[#allocation155_spill] sm:$0xff] %v8781_v30  ;;  %v3210_v6 = vadd.f32 %v11505_v7, %v11504_v21  ;;  %v3849_v15 = vpack.c.bf16 %v3623_v35, %v3621_v8  ;;  %v3848_v22 = vpack.c.bf16 %v3622_v39, %v3620_v41  ;;  %v8790_v49 = vpop.eup %5613  ;;  %v11512_v35 = vld [vmem:[#allocation105_spill] sm:$0xff]  ;;  %v11513_v8 = vld [vmem:[#allocation107_spill] sm:$0xff]  ;;  %v11518_v19 = vld [vmem:[#allocation112_spill] sm:$0xff] }
 0x43b   : > { %v8788_v52 = vpop.xlane.xlu1 %2215  ;;  %11507 = vst [vmem:[#allocation157_spill] sm:$0xff] %v8790_v49  ;;  %5631 = vrcp.f32 %v3152_v44  ;;  %v8799_v47 = vpop.eup %5615  ;;  %v3117_v41 = vadd.f32 %v11513_v8, %v11512_v35  ;;  %v11514_v39 = vsub.f32 %v11446_v62, %v8661_v33  ;;  %v11516_v44 = vsub.f32 %v11447_v54, %v8661_v33  ;;  %v11519_v7 = vld [vmem:[#allocation109_spill] sm:$0xff]  ;;  %v11520_v62 = vld [vmem:[#allocation110_spill] sm:$0xff]  ;;  %v11523_v33 = vld [vmem:[#allocation175_spill] sm:$0xff] }
 0x43c   : > { %3115 = vadd.xlane.f32.xlu1 %v3114_v43  ;;  %v3155_v20 = vpop.xlane.xlu0 %3154  ;;  %v2830_v43 = vmul.f32 1.442695, %v11508_v58  ;;  %11511 = vst [vmem:[#allocation164_spill] sm:$0xff] %v8799_v47  ;;  %5633 = vpow2.f32 %v2954_v24  ;;  %3985 = vmatprep.subr.bf16.mxu0 %v3849_v15  ;;  %v3120_v21 = vadd.f32 %v11518_v19, %v11517_v61  ;;  %v11525_v35 = vld [vmem:[#allocation188_spill] sm:$0xff]  ;;  %v11526_v61 = vld [vmem:[#allocation199_spill] sm:$0xff] }
 0x43d   : > { %3208 = vadd.xlane.f32.xlu0 %v3207_v55  ;;  %v5618_v55 = vpop.eup %5617  ;;  %v2832_v57 = vmul.f32 1.442695, %v11514_v39  ;;  %5635 = vrcp.f32 %v3155_v20  ;;  %3986 = vmatpush1.bf16.xpose.msra.mxu0 %v3848_v22  ;;  %v2834_v58 = vmul.f32 1.442695, %v11516_v44  ;;  %v3213_v39 = vadd.f32 %v11520_v62, %v11519_v7  ;;  %v11522_v22 = vld [vmem:[#allocation173_spill] sm:$0xff] }
 0x43e   : > { %v8806_v45 = vpop.eup %5619  ;;  %5637 = vpow2.f32 %v2828_v34  ;;  %v3561_v8 = vmul.f32 %v5618_v55, %v11525_v35  ;;  %v11528_v62 = vld [vmem:[#allocation197_spill] sm:$0xff] }
 0x43f   : > { %11515 = vst [vmem:[#allocation171_spill] sm:$0xff] %v8806_v45  ;;  %v3062_v24 = vpop.xlane.xlu1 %3061  ;;  %v5622_v20 = vpop.eup %5621  ;;  %5639 = vpow2.f32 %v2830_v43  ;;  %v11527_v45 = vld [vmem:[#allocation186_spill] sm:$0xff] }
 0x440   : > { %3211 = vadd.xlane.f32.xlu1 %v3210_v6  ;;  %v8811_v15 = vpop.xlane.xlu0 %2218  ;;  %v11521_v6 = vsub.f32 %v11459_v26, %v8686_v2  ;;  %v8824_v44 = vpop.eup %5623  ;;  %v3563_v19 = vmul.f32 %v5622_v20, %v11526_v61  ;;  %v3560_v7 = vmul.f32 %v5618_v55, %v11527_v45  ;;  %v3562_v43 = vmul.f32 %v5622_v20, %v11528_v62 }
 0x441   : > { %3118 = vadd.xlane.f32.xlu0 %v3117_v41  ;;  %11524 = vst [vmem:[#allocation163_spill] sm:$0xff] %v8824_v44  ;;  %v8830_v47 = vpop.eup %5625  ;;  %5641 = vpow2.f32 %v2832_v57  ;;  %v11530_v26 = vsub.f32 %v11460_v27, %v8686_v2  ;;  %v11532_v55 = vsub.f32 %v11471_v28, %v8712_v16  ;;  %v11533_v57 = vld [vmem:[#allocation114_spill] sm:$0xff]  ;;  %v11535_v2 = vld [vmem:[#allocation113_spill] sm:$0xff]  ;;  %v11536_v27 = vld [vmem:[#allocation115_spill] sm:$0xff] }
 0x442   : > { %v2956_v34 = vmul.f32 1.442695, %v11521_v6  ;;  %11529 = vst [vmem:[#allocation168_spill] sm:$0xff] %v8830_v47  ;;  %5643 = vpow2.f32 %v2834_v58  ;;  %v3819_v54 = vpack.c.bf16 %v3563_v19, %v3561_v8  ;;  %v3818_v44 = vpack.c.bf16 %v3562_v43, %v3560_v7  ;;  %v8837_v61 = vpop.eup %5627  ;;  %v11541_v43 = vld [vmem:[#allocation119_spill] sm:$0xff] }
 0x443   : > { %v2958_v6 = vmul.f32 1.442695, %v11530_v26  ;;  %v8835_v41 = vpop.xlane.xlu1 %2125  ;;  %11531 = vst [vmem:[#allocation158_spill] sm:$0xff] %v8837_v61  ;;  %v2960_v45 = vmul.f32 1.442695, %v11532_v55  ;;  %5645 = vrcp.f32 %v3062_v24  ;;  %v8844_v58 = vpop.eup %5629  ;;  %v3123_v62 = vadd.f32 %v11536_v27, %v11535_v2  ;;  %v11542_v26 = vld [vmem:[#allocation117_spill] sm:$0xff] }
 0x444   : > { %3121 = vadd.xlane.f32.xlu1 %v3120_v21  ;;  %v3065_v35 = vpop.xlane.xlu0 %3064  ;;  %v3216_v21 = vadd.f32 %v8312_v0, %v11533_v57  ;;  %11534 = vst [vmem:[#allocation160_spill] sm:$0xff] %v8844_v58  ;;  %5647 = vpow2.f32 %v2956_v34  ;;  %3946 = vmatprep.subr.bf16.mxu1 %v3819_v54  ;;  %v11537_v7 = vsub.f32 %v11472_v12, %v8712_v16  ;;  %v11547_v57 = vld [vmem:[#allocation204_spill] sm:$0xff] }
 0x445   : > { %3214 = vadd.xlane.f32.xlu0 %v3213_v39  ;;  %v5632_v19 = vpop.eup %5631  ;;  %5649 = vrcp.f32 %v3065_v35  ;;  %3947 = vmatpush1.bf16.xpose.msra.mxu1 %v3818_v44  ;;  %v11539_v24 = vsub.f32 %v11485_v13, %v8739_v36  ;;  %v11540_v12 = vsub.f32 %v11486_v63, %v8739_v36  ;;  %v3126_v44 = vadd.f32 %v8349_v51, %v11541_v43  ;;  %v11544_v13 = vld [vmem:[#allocation195_spill] sm:$0xff] }
 0x446   : > { %v2962_v8 = vmul.f32 1.442695, %v11537_v7  ;;  %v8851_v28 = vpop.eup %5633  ;;  %5651 = vpow2.f32 %v2958_v6  ;;  %v3219_v6 = vadd.f32 %v8372_v31, %v11542_v26  ;;  %v3625_v55 = vmul.f32 %v5632_v19, %v11544_v13  ;;  %v11546_v7 = vld [vmem:[#allocation193_spill] sm:$0xff] }
 0x447   : > { %11538 = vst [vmem:[#allocation161_spill] sm:$0xff] %v8851_v28  ;;  %v2836_v39 = vmul.f32 1.442695, %v11539_v24  ;;  %v3158_v20 = vpop.xlane.xlu1 %3157  ;;  %v5636_v54 = vpop.eup %5635  ;;  %5653 = vpow2.f32 %v2960_v45  ;;  %v2838_v16 = vmul.f32 1.442695, %v11540_v12  ;;  %v3624_v24 = vmul.f32 %v5632_v19, %v11546_v7  ;;  %v11584_v31 = vld [vmem:[#allocation213_spill] sm:$0xff] }
 0x448   : > { %3217 = vadd.xlane.f32.xlu1 %v3216_v21  ;;  %v8856_v34 = vpop.xlane.xlu0 %2128  ;;  %v8865_v35 = vpop.eup %5637  ;;  %v11545_v21 = vld [vmem:[#allocation206_spill] sm:$0xff]  ;;  %v3626_v45 = vmul.f32 %v5636_v54, %v11547_v57  ;;  %5655 = vpow2.f32 %v2962_v8  ;;  %v11549_v36 = vsub.f32 %v11496_v17, %v8762_v46  ;;  %v11550_v57 = vsub.f32 %v11497_v1, %v8762_v46  ;;  %v11551_v8 = vld [vmem:[#allocation123_spill] sm:$0xff]  ;;  %v11553_v17 = vld [vmem:[#allocation121_spill] sm:$0xff] }
 0x449   : > { %3124 = vadd.xlane.f32.xlu0 %v3123_v62  ;;  %11543 = vst [vmem:[#allocation162_spill] sm:$0xff] %v8865_v35  ;;  %v3627_v62 = vmul.f32 %v5636_v54, %v11545_v21  ;;  %v8871_v0 = vpop.eup %5639  ;;  %5657 = vpow2.f32 %v2836_v39  ;;  %v11552_v54 = vld [vmem:[#allocation124_spill] sm:$0xff] }
 0x44a   : > { %11548 = vst [vmem:[#allocation176_spill] sm:$0xff] %v8871_v0  ;;  %v2840_v63 = vmul.f32 1.442695, %v11549_v36  ;;  %v3850_v51 = vpack.c.bf16 %v3626_v45, %v3624_v24  ;;  %v2842_v19 = vmul.f32 1.442695, %v11550_v57  ;;  %5659 = vrcp.f32 %v3158_v20  ;;  %v11558_v36 = vld [vmem:[#allocation240_spill] sm:$0xff] }
 0x44b   : > { %v8876_v12 = vpop.xlane.xlu1 %2221  ;;  %v3851_v43 = vpack.c.bf16 %v3627_v62, %v3625_v55  ;;  %v8878_v21 = vpop.eup %5641  ;;  %v3222_v39 = vadd.f32 %v11552_v54, %v11551_v8  ;;  %5661 = vpow2.f32 %v2838_v16  ;;  %v11555_v62 = vsub.f32 %v11509_v4, %v8788_v52  ;;  %v11559_v57 = vld [vmem:[#allocation203_spill] sm:$0xff]  ;;  %v11562_v54 = vld [vmem:[#allocation208_spill] sm:$0xff] }
 0x44c   : > { %3127 = vadd.xlane.f32.xlu1 %v3126_v44  ;;  %v3161_v13 = vpop.xlane.xlu0 %3160  ;;  %v8885_v44 = vpop.eup %5643  ;;  %v3228_v4 = vadd.f32 %v8414_v48, %v8409_v29  ;;  %v11566_v48 = vld [vmem:[#allocation180_spill] sm:$0xff] }
 0x44d   : > { %3220 = vadd.xlane.f32.xlu0 %v3219_v6  ;;  %3987 = vmatprep.subr.bf16.mxu0 %v3851_v43  ;;  %v11554_v6 = vld [vmem:[#allocation122_spill] sm:$0xff]  ;;  %v5646_v55 = vpop.eup %5645  ;;  %v2964_v24 = vmul.f32 1.442695, %v11555_v62  ;;  %5663 = vrcp.f32 %v3161_v13  ;;  %v11557_v43 = vsub.f32 %v11510_v23, %v8788_v52 }
 0x44e   : > { %v3129_v7 = vadd.f32 %v11554_v6, %v11553_v17  ;;  %3988 = vmatpush1.bf16.xpose.msra.mxu0 %v3850_v51  ;;  %v8892_v46 = vpop.eup %5647  ;;  %5665 = vpow2.f32 %v2840_v63  ;;  %v3225_v51 = vadd.f32 %v11558_v36, %v8419_v32  ;;  %v3565_v63 = vmul.f32 %v5646_v55, %v11559_v57  ;;  %v11561_v62 = vld [vmem:[#allocation202_spill] sm:$0xff] }
 0x44f   : > { %11556 = vst [vmem:[#allocation183_spill] sm:$0xff] %v8892_v46  ;;  %v3068_v1 = vpop.xlane.xlu1 %3067  ;;  %v5650_v16 = vpop.eup %5649  ;;  %5667 = vpow2.f32 %v2842_v19  ;;  %v2966_v45 = vmul.f32 1.442695, %v11557_v43  ;;  %v3564_v8 = vmul.f32 %v5646_v55, %v11561_v62  ;;  %v11564_v52 = vld [vmem:[#allocation178_spill] sm:$0xff]  ;;  %v11565_v43 = vsub.f32 %v11522_v22, %v8811_v15  ;;  %v11569_v22 = vld [vmem:[#allocation128_spill] sm:$0xff] }
 0x450   : > { %3223 = vadd.xlane.f32.xlu1 %v3222_v39  ;;  %v8894_v20 = vpop.xlane.xlu0 %2224  ;;  %v8903_v13 = vpop.eup %5651  ;;  %v11560_v39 = vld [vmem:[#allocation32_spill] sm:$0xff]  ;;  %v3566_v19 = vmul.f32 %v5650_v16, %v11562_v54  ;;  %5669 = vpow2.f32 %v2964_v24  ;;  %v2428_v23 = vsub.f32 %v11564_v52, %v8835_v41  ;;  %v2429_v57 = vsub.f32 %v11566_v48, %v8835_v41  ;;  %v11572_v41 = vld [vmem:[#allocation241_spill] sm:$0xff]  ;;  %v11583_v6 = vld [vmem:[#allocation18_spill] sm:$0xff] }
 0x451   : > { %3130 = vadd.xlane.f32.xlu0 %v3129_v7  ;;  %v3567_v7 = vmul.f32 %v5650_v16, %v11560_v39  ;;  %v8909_v17 = vpop.eup %5653  ;;  %v2968_v29 = vmul.f32 1.442695, %v11565_v43  ;;  %v11567_v24 = vsub.f32 %v11523_v33, %v8811_v15  ;;  %5671 = vrcp.f32 %v3068_v1  ;;  %v11570_v43 = vld [vmem:[#allocation130_spill] sm:$0xff]  ;;  %v11575_v1 = vld [vmem:[#allocation184_spill] sm:$0xff] }
 0x452   : > { %11563 = vst [vmem:[#allocation174_spill] sm:$0xff] %v8909_v17  ;;  %v3820_v54 = vpack.c.bf16 %v3566_v19, %v3564_v8  ;;  %v8920_v16 = vpop.eup %5655  ;;  %v3324_v36 = vadd.f32 %v11570_v43, %v11569_v22  ;;  %5673 = vpow2.f32 %v2966_v45  ;;  %v2846_v33 = vmul.f32 1.442695, %v2429_v57  ;;  %v11576_v45 = vld [vmem:[#allocation131_spill] sm:$0xff] }
 0x453   : > { %v8918_v39 = vpop.xlane.xlu1 %2131  ;;  %v3821_v55 = vpack.c.bf16 %v3567_v7, %v3565_v63  ;;  %v2970_v52 = vmul.f32 1.442695, %v11567_v24  ;;  %v8929_v48 = vpop.eup %5657  ;;  %v2844_v7 = vmul.f32 1.442695, %v2428_v23  ;;  %v2431_v19 = vsub.f32 %v11575_v1, %v8856_v34 }
 0x454   : > { %3229 = vadd.xlane.f32.xlu1 %v3228_v4  ;;  %v3071_v62 = vpop.xlane.xlu0 %3070  ;;  %v11568_v4 = vld [vmem:[#allocation182_spill] sm:$0xff]  ;;  %11571 = vst [vmem:[#allocation181_spill] sm:$0xff] %v8929_v48  ;;  %v5660_v63 = vpop.eup %5659 }
 0x455   : > { %3226 = vadd.xlane.f32.xlu0 %v3225_v51  ;;  %v2430_v32 = vsub.f32 %v11568_v4, %v8856_v34  ;;  %3948 = vmatprep.subr.bf16.mxu1 %v3821_v55  ;;  %v11573_v51 = vld [vmem:[#allocation242_spill] sm:$0xff]  ;;  %5675 = vrcp.f32 %v3071_v62  ;;  %v8933_v15 = vpop.eup %5661  ;;  %v11577_v55 = vld [vmem:[#allocation133_spill] sm:$0xff]  ;;  %v3628_v26 = vmul.f32 %v5660_v63, %v11583_v6 }
 0x456   : > { %v3231_v8 = vadd.f32 %v11573_v51, %v11572_v41  ;;  %3949 = vmatpush1.bf16.xpose.msra.mxu1 %v3820_v54  ;;  %11574 = vst [vmem:[#allocation165_spill] sm:$0xff] %v8933_v15  ;;  %5677 = vpow2.f32 %v2968_v29  ;;  %v3234_v22 = vadd.f32 %v11577_v55, %v11576_v45  ;;  %v11578_v62 = vld [vmem:[#allocation185_spill] sm:$0xff]  ;;  %v11579_v54 = vld [vmem:[#allocation243_spill] sm:$0xff]  ;;  %v11580_v41 = vld [vmem:[#allocation244_spill] sm:$0xff] }
 0x457   : > { %v3164_v24 = vpop.xlane.xlu1 %3163  ;;  %v5664_v43 = vpop.eup %5663  ;;  %5679 = vpow2.f32 %v2970_v52  ;;  %v2848_v23 = vmul.f32 1.442695, %v2430_v32  ;;  %v3327_v29 = vadd.f32 %v11580_v41, %v11579_v54  ;;  %v11581_v51 = vld [vmem:[#allocation207_spill] sm:$0xff] }
 0x458   : > { %3325 = vadd.xlane.f32.xlu1 %v3324_v36  ;;  %v8937_v4 = vpop.xlane.xlu0 %2134  ;;  %v2492_v36 = vsub.f32 %v11578_v62, %v8876_v12  ;;  %v8945_v57 = vpop.eup %5665  ;;  %v3629_v34 = vmul.f32 %v5660_v63, %v11581_v51  ;;  %v3630_v2 = vmul.f32 %v5664_v43, %v11584_v31  ;;  %5681 = vpow2.f32 %v2844_v7  ;;  %v11585_v32 = vld [vmem:[#allocation187_spill] sm:$0xff]  ;;  %v11587_v31 = vld [vmem:[#allocation189_spill] sm:$0xff]  ;;  %v11588_v63 = vld [vmem:[#allocation134_spill] sm:$0xff] }
 0x459   : > { %3232 = vadd.xlane.f32.xlu0 %v3231_v8  ;;  %v11582_v8 = vld [vmem:[#allocation34_spill] sm:$0xff]  ;;  %v8951_v45 = vpop.eup %5667  ;;  %v2493_v52 = vsub.f32 %v11585_v32, %v8876_v12  ;;  %5683 = vpow2.f32 %v2846_v33  ;;  %v2850_v62 = vmul.f32 1.442695, %v2431_v19  ;;  %v11589_v7 = vld [vmem:[#allocation136_spill] sm:$0xff]  ;;  %v3237_v12 = vadd.f32 %v8523_v53, %v8517_v59 }
 0x45a   : > { %v3631_v1 = vmul.f32 %v5664_v43, %v11582_v8  ;;  %v3852_v41 = vpack.c.bf16 %v3630_v2, %v3628_v26  ;;  %v8957_v8 = vpop.eup %5669  ;;  %v2972_v6 = vmul.f32 1.442695, %v2492_v36  ;;  %v2494_v43 = vsub.f32 %v11587_v31, %v8894_v20  ;;  %v11590_v26 = vld [vmem:[#allocation191_spill] sm:$0xff] }
 0x45b   : > { %v8955_v55 = vpop.xlane.xlu1 %2227  ;;  %11586 = vst [vmem:[#allocation166_spill] sm:$0xff] %v8957_v8  ;;  %5685 = vrcp.f32 %v3164_v24  ;;  %v3330_v27 = vadd.f32 %v11589_v7, %v11588_v63  ;;  %v2974_v33 = vmul.f32 1.442695, %v2493_v52  ;;  %v2495_v19 = vsub.f32 %v11590_v26, %v8894_v20  ;;  %v11598_v63 = vld [vmem:[#allocation22_spill] sm:$0xff] }
 0x45c   : > { %3235 = vadd.xlane.f32.xlu1 %v3234_v22  ;;  %v3853_v54 = vpack.c.bf16 %v3631_v1, %v3629_v34  ;;  %v3167_v51 = vpop.xlane.xlu0 %3166  ;;  %5687 = vpow2.f32 %v2848_v23  ;;  %v5672_v22 = vpop.eup %5671  ;;  %v3240_v23 = vadd.f32 %v8535_v11, %v8528_v5  ;;  %v11591_v34 = vld [vmem:[#allocation194_spill] sm:$0xff]  ;;  %v11593_v1 = vld [vmem:[#allocation132_spill] sm:$0xff] }
 0x45d   : > { %3328 = vadd.xlane.f32.xlu0 %v3327_v29  ;;  %5689 = vrcp.f32 %v3167_v51  ;;  %v8965_v2 = vpop.eup %5673  ;;  %v2976_v29 = vmul.f32 1.442695, %v2494_v43  ;;  %v11596_v51 = vld [vmem:[#allocation39_spill] sm:$0xff]  ;;  %v11601_v11 = vld [vmem:[#allocation198_spill] sm:$0xff] }
 0x45e   : > { %3989 = vmatprep.subr.bf16.mxu0 %v3853_v54  ;;  %5691 = vpow2.f32 %v2850_v62  ;;  %v11595_v62 = vld [vmem:[#allocation212_spill] sm:$0xff] }
 0x45f   : > { %3990 = vmatpush1.bf16.xpose.msra.mxu0 %v3852_v41  ;;  %v3074_v24 = vpop.xlane.xlu1 %3073  ;;  %v5676_v54 = vpop.eup %5675  ;;  %5693 = vpow2.f32 %v2972_v6  ;;  %v2432_v41 = vsub.f32 %v11591_v34, %v8918_v39  ;;  %v3569_v20 = vmul.f32 %v5672_v22, %v11595_v62  ;;  %v11600_v6 = vld [vmem:[#allocation196_spill] sm:$0xff]  ;;  %v2978_v34 = vmul.f32 1.442695, %v2495_v19 }
 0x460   : > { %3331 = vadd.xlane.f32.xlu1 %v3330_v27  ;;  %v8969_v36 = vpop.xlane.xlu0 %2230  ;;  %v11592_v27 = vld [vmem:[#allocation127_spill] sm:$0xff]  ;;  %v8977_v52 = vpop.eup %5677  ;;  %v3571_v31 = vmul.f32 %v5676_v54, %v11596_v51  ;;  %v3570_v7 = vmul.f32 %v5676_v54, %v11598_v63  ;;  %5695 = vpow2.f32 %v2974_v33  ;;  %v2433_v43 = vsub.f32 %v11600_v6, %v8918_v39  ;;  %v11603_v54 = vld [vmem:[#allocation200_spill] sm:$0xff] }
 0x461   : > { %3238 = vadd.xlane.f32.xlu0 %v3237_v12  ;;  %v3333_v32 = vadd.f32 %v11593_v1, %v11592_v27  ;;  %11594 = vst [vmem:[#allocation167_spill] sm:$0xff] %v8977_v52  ;;  %v11597_v12 = vld [vmem:[#allocation211_spill] sm:$0xff]  ;;  %v8983_v5 = vpop.eup %5679  ;;  %v2434_v27 = vsub.f32 %v11601_v11, %v8937_v4  ;;  %v2852_v63 = vmul.f32 1.442695, %v2432_v41  ;;  %v2435_v33 = vsub.f32 %v11603_v54, %v8937_v4  ;;  %v11606_v11 = vld [vmem:[#allocation145_spill] sm:$0xff] }
 0x462   : > { %v3568_v26 = vmul.f32 %v5672_v22, %v11597_v12  ;;  %11599 = vst [vmem:[#allocation169_spill] sm:$0xff] %v8983_v5  ;;  %v3823_v62 = vpack.c.bf16 %v3571_v31, %v3569_v20  ;;  %v8991_v22 = vpop.eup %5681  ;;  %5697 = vrcp.f32 %v3074_v24  ;;  %v11604_v12 = vld [vmem:[#allocation141_spill] sm:$0xff]  ;;  %v2854_v20 = vmul.f32 1.442695, %v2433_v43  ;;  %v11609_v6 = vld [vmem:[#allocation147_spill] sm:$0xff] }
 0x463   : > { %11602 = vst [vmem:[#allocation179_spill] sm:$0xff] %v8991_v22  ;;  %v3336_v39 = vadd.f32 %v8576_v50, %v11604_v12  ;;  %v8997_v19 = vpop.eup %5683  ;;  %5699 = vpow2.f32 %v2976_v29  ;;  %v2856_v4 = vmul.f32 1.442695, %v2434_v27  ;;  %v11607_v24 = vld [vmem:[#allocation201_spill] sm:$0xff]  ;;  %v11608_v29 = vld [vmem:[#allocation140_spill] sm:$0xff] }
 0x464   : > { %3241 = vadd.xlane.f32.xlu1 %v3240_v23  ;;  %v8989_v1 = vpop.xlane.xlu1 %2137  ;;  %v3077_v51 = vpop.xlane.xlu0 %3076  ;;  %v3822_v59 = vpack.c.bf16 %v3570_v7, %v3568_v26  ;;  %11605 = vst [vmem:[#allocation192_spill] sm:$0xff] %v8997_v19  ;;  %3950 = vmatprep.subr.bf16.mxu1 %v3823_v62  ;;  %v3243_v23 = vadd.f32 %v11606_v11, %v8586_v3  ;;  %v2858_v43 = vmul.f32 1.442695, %v2435_v33  ;;  %v11613_v50 = vld [vmem:[#allocation36_spill] sm:$0xff]  ;;  %v11614_v11 = vld [vmem:[#allocation214_spill] sm:$0xff] }
 0x465   : > { %3334 = vadd.xlane.f32.xlu0 %v3333_v32  ;;  %v5686_v32 = vpop.eup %5685  ;;  %5701 = vrcp.f32 %v3077_v51  ;;  %v2496_v41 = vsub.f32 %v11607_v24, %v8955_v55  ;;  %v3246_v62 = vadd.f32 %v11609_v6, %v11608_v29 }
 0x466   : > { %3951 = vmatpush1.bf16.xpose.msra.mxu1 %v3822_v59  ;;  %v9001_v7 = vpop.eup %5687  ;;  %5703 = vpow2.f32 %v2978_v34  ;;  %v11610_v59 = vld [vmem:[#allocation15_spill] sm:$0xff]  ;;  %v3339_v34 = vadd.f32 %v8637_v38, %v8627_v40  ;;  %v3632_v3 = vmul.f32 %v5686_v32, %v11613_v50 }
 0x467   : > { %v5690_v54 = vpop.eup %5689  ;;  %5705 = vpow2.f32 %v2852_v63  ;;  %v2497_v51 = vsub.f32 %v11610_v59, %v8955_v55  ;;  %v11616_v63 = vld [vmem:[#allocation16_spill] sm:$0xff]  ;;  %v2980_v55 = vmul.f32 1.442695, %v2496_v41 }
 0x468   : > { %3337 = vadd.xlane.f32.xlu1 %v3336_v39  ;;  %v3170_v31 = vpop.xlane.xlu1 %3169  ;;  %v9013_v27 = vpop.eup %5691  ;;  %v11611_v39 = vld [vmem:[#allocation33_spill] sm:$0xff]  ;;  %v3634_v53 = vmul.f32 %v5690_v54, %v11614_v11  ;;  %5707 = vpow2.f32 %v2854_v20  ;;  %v2498_v33 = vsub.f32 %v11616_v63, %v8969_v36  ;;  %v3342_v20 = vadd.f32 %v8656_v10, %v8646_v37  ;;  %v11623_v63 = vld [vmem:[#allocation159_spill] sm:$0xff] }
 0x469   : > { %3244 = vadd.xlane.f32.xlu0 %v3243_v23  ;;  %v9005_v26 = vpop.xlane.xlu0 %2140  ;;  %v3633_v24 = vmul.f32 %v5686_v32, %v11611_v39  ;;  %v11612_v23 = vld [vmem:[#allocation44_spill] sm:$0xff]  ;;  %v9019_v29 = vpop.eup %5693  ;;  %5709 = vpow2.f32 %v2856_v4  ;;  %v2982_v50 = vmul.f32 1.442695, %v2497_v51  ;;  %v11617_v11 = vld [vmem:[#allocation205_spill] sm:$0xff]  ;;  %v11627_v10 = vld [vmem:[#allocation47_spill] sm:$0xff] }
 0x46a   : > { %v3635_v12 = vmul.f32 %v5690_v54, %v11612_v23  ;;  %11615 = vst [vmem:[#allocation177_spill] sm:$0xff] %v9019_v29  ;;  %v3854_v40 = vpack.c.bf16 %v3634_v53, %v3632_v3  ;;  %v9025_v23 = vpop.eup %5695  ;;  %v2499_v32 = vsub.f32 %v11617_v11, %v8969_v36  ;;  %5711 = vrcp.f32 %v3170_v31  ;;  %v11618_v4 = vld [vmem:[#allocation148_spill] sm:$0xff] }
 0x46b   : > { %5713 = vpow2.f32 %v2858_v43  ;;  %v3249_v41 = vadd.f32 %v8678_v25, %v11618_v4  ;;  %v2984_v54 = vmul.f32 1.442695, %v2498_v33  ;;  %v11620_v3 = vld [vmem:[#allocation20_spill] sm:$0xff] }
 0x46c   : > { %3247 = vadd.xlane.f32.xlu1 %v3246_v62  ;;  %v9023_v59 = vpop.xlane.xlu1 %2233  ;;  %v3855_v6 = vpack.c.bf16 %v3635_v12, %v3633_v24  ;;  %v5698_v62 = vpop.eup %5697  ;;  %v2436_v36 = vsub.f32 %v11620_v3, %v8989_v1  ;;  %v2986_v51 = vmul.f32 1.442695, %v2499_v32  ;;  %v11622_v24 = vld [vmem:[#allocation152_spill] sm:$0xff]  ;;  %v11626_v3 = vld [vmem:[#allocation37_spill] sm:$0xff] }
 0x46d   : > { %3340 = vadd.xlane.f32.xlu0 %v3339_v34  ;;  %v3173_v39 = vpop.xlane.xlu0 %3172  ;;  %v9033_v53 = vpop.eup %5699  ;;  %v11621_v34 = vld [vmem:[#allocation17_spill] sm:$0xff]  ;;  %v3252_v33 = vadd.f32 %v11623_v63, %v11622_v24  ;;  %v3572_v37 = vmul.f32 %v5698_v62, %v11626_v3 }
 0x46e   : > { %3991 = vmatprep.subr.bf16.mxu0 %v3855_v6  ;;  %5715 = vrcp.f32 %v3173_v39  ;;  %11619 = vst [vmem:[#allocation190_spill] sm:$0xff] %v9033_v53  ;;  %v3345_v6 = vadd.f32 %v8697_v18, %v8688_v42  ;;  %v11624_v39 = vld [vmem:[#allocation25_spill] sm:$0xff] }
 0x46f   : > { %3992 = vmatpush1.bf16.xpose.msra.mxu0 %v3854_v40  ;;  %5717 = vpow2.f32 %v2980_v55  ;;  %v5702_v43 = vpop.eup %5701  ;;  %v2437_v40 = vsub.f32 %v11621_v34, %v8989_v1  ;;  %v3573_v11 = vmul.f32 %v5698_v62, %v11624_v39  ;;  %v2860_v1 = vmul.f32 1.442695, %v2436_v36  ;;  %v11630_v34 = vld [vmem:[#allocation209_spill] sm:$0xff] }
 0x470   : > { %3343 = vadd.xlane.f32.xlu1 %v3342_v20  ;;  %v3080_v12 = vpop.xlane.xlu1 %3079  ;;  %5719 = vpow2.f32 %v2982_v50  ;;  %v9045_v55 = vpop.eup %5703  ;;  %v11625_v20 = vld [vmem:[#allocation217_spill] sm:$0xff]  ;;  %v3574_v4 = vmul.f32 %v5702_v43, %v11627_v10  ;;  %v11629_v50 = vld [vmem:[#allocation31_spill] sm:$0xff]  ;;  %v2439_v24 = vsub.f32 %v11630_v34, %v9005_v26 }
 0x471   : > { %3250 = vadd.xlane.f32.xlu0 %v3249_v41  ;;  %v9037_v31 = vpop.xlane.xlu0 %2236  ;;  %v3575_v41 = vmul.f32 %v5702_v43, %v11625_v20  ;;  %v9051_v42 = vpop.eup %5705  ;;  %5721 = vpow2.f32 %v2984_v54  ;;  %v2438_v32 = vsub.f32 %v11629_v50, %v9005_v26  ;;  %v2862_v10 = vmul.f32 1.442695, %v2437_v40  ;;  %v11632_v43 = vld [vmem:[#allocation210_spill] sm:$0xff] }
 0x472   : > { %11628 = vst [vmem:[#allocation170_spill] sm:$0xff] %v9051_v42  ;;  %v3824_v18 = vpack.c.bf16 %v3574_v4, %v3572_v37  ;;  %v9059_v62 = vpop.eup %5707  ;;  %v2500_v54 = vsub.f32 %v11632_v43, %v9023_v59  ;;  %5723 = vrcp.f32 %v3080_v12  ;;  %v3255_v26 = vadd.f32 %v8741_v14, %v8729_v9  ;;  %v11633_v12 = vld [vmem:[#allocation19_spill] sm:$0xff] }
 0x473   : > { %v3825_v39 = vpack.c.bf16 %v3575_v41, %v3573_v11  ;;  %11631 = vst [vmem:[#allocation172_spill] sm:$0xff] %v9059_v62  ;;  %v9065_v36 = vpop.eup %5709  ;;  %5725 = vpow2.f32 %v2986_v51  ;;  %v2864_v11 = vmul.f32 1.442695, %v2438_v32  ;;  %v2866_v4 = vmul.f32 1.442695, %v2439_v24  ;;  %v11634_v51 = vld [vmem:[#allocation154_spill] sm:$0xff] }
 0x474   : > { %3253 = vadd.xlane.f32.xlu1 %v3252_v33  ;;  %v9057_v63 = vpop.xlane.xlu1 %2143  ;;  %v3348_v33 = vadd.f32 %v8757_v60, %v8750_v56  ;;  %v2501_v40 = vsub.f32 %v11633_v12, %v9023_v59  ;;  %v3351_v50 = vadd.f32 %v8781_v30, %v11634_v51  ;;  %v2988_v32 = vmul.f32 1.442695, %v2500_v54  ;;  %v11638_v43 = vld [vmem:[#allocation215_spill] sm:$0xff]  ;;  %v11641_v60 = vld [vmem:[#allocation218_spill] sm:$0xff] }
 0x475   : > { %3346 = vadd.xlane.f32.xlu0 %v3345_v6  ;;  %v3083_v20 = vpop.xlane.xlu0 %3082  ;;  %3952 = vmatprep.subr.bf16.mxu1 %v3825_v39  ;;  %v5712_v6 = vpop.eup %5711  ;;  %v11640_v12 = vld [vmem:[#allocation43_spill] sm:$0xff] }
 0x476   : > { %5727 = vrcp.f32 %v3083_v20  ;;  %3953 = vmatpush1.bf16.xpose.msra.mxu1 %v3824_v18  ;;  %v9069_v37 = vpop.eup %5713  ;;  %v11635_v18 = vld [vmem:[#allocation23_spill] sm:$0xff]  ;;  %v11636_v20 = vld [vmem:[#allocation164_spill] sm:$0xff]  ;;  %v3637_v59 = vmul.f32 %v5712_v6, %v11638_v43  ;;  %v3636_v56 = vmul.f32 %v5712_v6, %v11640_v12  ;;  %v11649_v12 = vld [vmem:[#allocation26_spill] sm:$0xff] }
 0x477   : > { %5729 = vpow2.f32 %v2860_v1  ;;  %v2502_v39 = vsub.f32 %v11635_v18, %v9037_v31  ;;  %v3258_v1 = vadd.f32 %v11636_v20, %v8790_v49  ;;  %v2990_v18 = vmul.f32 1.442695, %v2501_v40 }
 0x478   : > { %3349 = vadd.xlane.f32.xlu1 %v3348_v33  ;;  %v3176_v41 = vpop.xlane.xlu1 %3175  ;;  %v5716_v34 = vpop.eup %5715  ;;  %5731 = vpow2.f32 %v2862_v10  ;;  %v11639_v33 = vld [vmem:[#allocation220_spill] sm:$0xff] }
 0x479   : > { %3256 = vadd.xlane.f32.xlu0 %v3255_v26  ;;  %v9073_v3 = vpop.xlane.xlu0 %2146  ;;  %v9081_v24 = vpop.eup %5717  ;;  %v3639_v26 = vmul.f32 %v5716_v34, %v11639_v33  ;;  %v3638_v9 = vmul.f32 %v5716_v34, %v11641_v60  ;;  %5733 = vpow2.f32 %v2864_v11  ;;  %v11642_v10 = vld [vmem:[#allocation24_spill] sm:$0xff]  ;;  %v2992_v6 = vmul.f32 1.442695, %v2502_v39  ;;  %v11644_v60 = vld [vmem:[#allocation21_spill] sm:$0xff] }
 0x47a   : > { %11637 = vst [vmem:[#allocation173_spill] sm:$0xff] %v9081_v24  ;;  %v9087_v51 = vpop.eup %5719  ;;  %v2503_v54 = vsub.f32 %v11642_v10, %v9037_v31  ;;  %5735 = vpow2.f32 %v2866_v4  ;;  %v2440_v34 = vsub.f32 %v11644_v60, %v9057_v63  ;;  %v3354_v11 = vadd.f32 %v8837_v61, %v8830_v47  ;;  %v11645_v31 = vld [vmem:[#allocation171_spill] sm:$0xff] }
 0x47b   : > { %v3857_v20 = vpack.c.bf16 %v3639_v26, %v3637_v59  ;;  %v3856_v30 = vpack.c.bf16 %v3638_v9, %v3636_v56  ;;  %v9093_v33 = vpop.eup %5721  ;;  %5737 = vrcp.f32 %v3176_v41  ;;  %v11646_v4 = vld [vmem:[#allocation163_spill] sm:$0xff]  ;;  %v3264_v10 = vadd.f32 %v8871_v0, %v8865_v35  ;;  %v11657_v35 = vld [vmem:[#allocation28_spill] sm:$0xff] }
 0x47c   : > { %3259 = vadd.xlane.f32.xlu1 %v3258_v1  ;;  %v9091_v49 = vpop.xlane.xlu1 %2239  ;;  %11643 = vst [vmem:[#allocation175_spill] sm:$0xff] %v9093_v33  ;;  %5739 = vpow2.f32 %v2988_v32  ;;  %v3261_v40 = vadd.f32 %v11646_v4, %v11645_v31  ;;  %v2994_v1 = vmul.f32 1.442695, %v2503_v54  ;;  %v11648_v56 = vld [vmem:[#allocation35_spill] sm:$0xff]  ;;  %v3357_v32 = vadd.f32 %v8851_v28, %v8844_v58 }
 0x47d   : > { %3352 = vadd.xlane.f32.xlu0 %v3351_v50  ;;  %v3179_v43 = vpop.xlane.xlu0 %3178  ;;  %3993 = vmatprep.subr.bf16.mxu0 %v3857_v20  ;;  %v5724_v50 = vpop.eup %5723  ;;  %v2441_v39 = vsub.f32 %v11648_v56, %v9057_v63  ;;  %v2868_v26 = vmul.f32 1.442695, %v2440_v34  ;;  %v11654_v56 = vld [vmem:[#allocation224_spill] sm:$0xff]  ;;  %v2504_v0 = vsub.f32 %v11657_v35, %v9091_v49  ;;  %v3267_v35 = vadd.f32 %v8885_v44, %v8878_v21 }
 0x47e   : > { %5741 = vrcp.f32 %v3179_v43  ;;  %3994 = vmatpush1.bf16.xpose.msra.mxu0 %v3856_v30  ;;  %v9101_v9 = vpop.eup %5725  ;;  %v2442_v30 = vsub.f32 %v11649_v12, %v9073_v3  ;;  %v11652_v43 = vld [vmem:[#allocation60_spill] sm:$0xff] }
 0x47f   : > { %11647 = vst [vmem:[#allocation188_spill] sm:$0xff] %v9101_v9  ;;  %5743 = vpow2.f32 %v2990_v18  ;;  %v11651_v18 = vld [vmem:[#allocation49_spill] sm:$0xff]  ;;  %v2870_v12 = vmul.f32 1.442695, %v2441_v39 }
 0x480   : > { %3355 = vadd.xlane.f32.xlu1 %v3354_v11  ;;  %v3086_v41 = vpop.xlane.xlu1 %3085  ;;  %v5728_v20 = vpop.eup %5727  ;;  %5745 = vpow2.f32 %v2992_v6  ;;  %v3577_v63 = vmul.f32 %v5724_v50, %v11651_v18  ;;  %v11653_v11 = vld [vmem:[#allocation52_spill] sm:$0xff] }
 0x481   : > { %3262 = vadd.xlane.f32.xlu0 %v3261_v40  ;;  %v9105_v59 = vpop.xlane.xlu0 %2242  ;;  %v9113_v54 = vpop.eup %5729  ;;  %v3579_v60 = vmul.f32 %v5728_v20, %v11652_v43  ;;  %v3576_v40 = vmul.f32 %v5724_v50, %v11653_v11  ;;  %v3578_v47 = vmul.f32 %v5728_v20, %v11654_v56  ;;  %5747 = vpow2.f32 %v2994_v1  ;;  %v11656_v6 = vld [vmem:[#allocation40_spill] sm:$0xff]  ;;  %v11658_v11 = vld [vmem:[#allocation38_spill] sm:$0xff] }
 0x482   : > { %11650 = vst [vmem:[#allocation199_spill] sm:$0xff] %v9113_v54  ;;  %v9119_v58 = vpop.eup %5731  ;;  %v2443_v34 = vsub.f32 %v11656_v6, %v9073_v3  ;;  %v2872_v20 = vmul.f32 1.442695, %v2442_v30  ;;  %v2505_v1 = vsub.f32 %v11658_v11, %v9091_v49  ;;  %5749 = vrcp.f32 %v3086_v41  ;;  %v11660_v41 = vld [vmem:[#allocation27_spill] sm:$0xff]  ;;  %v11661_v6 = vld [vmem:[#allocation42_spill] sm:$0xff] }
 0x483   : > { %11655 = vst [vmem:[#allocation186_spill] sm:$0xff] %v9119_v58  ;;  %v3827_v18 = vpack.c.bf16 %v3579_v60, %v3577_v63  ;;  %v3826_v61 = vpack.c.bf16 %v3578_v47, %v3576_v40  ;;  %v9127_v50 = vpop.eup %5733  ;;  %v3360_v3 = vadd.f32 %v8903_v13, %v8892_v46  ;;  %5751 = vpow2.f32 %v2868_v26 }
 0x484   : > { %3265 = vadd.xlane.f32.xlu1 %v3264_v10  ;;  %v9133_v39 = vpop.eup %5735  ;;  %v2874_v10 = vmul.f32 1.442695, %v2443_v34  ;;  %v2996_v49 = vmul.f32 1.442695, %v2504_v0  ;;  %v2506_v30 = vsub.f32 %v11660_v41, %v9105_v59  ;;  %v3363_v26 = vadd.f32 %v8920_v16, %v8909_v17  ;;  %v11662_v0 = vld [vmem:[#allocation222_spill] sm:$0xff]  ;;  %v11665_v41 = vld [vmem:[#allocation64_spill] sm:$0xff] }
 0x485   : > { %3358 = vadd.xlane.f32.xlu0 %v3357_v32  ;;  %v9125_v28 = vpop.xlane.xlu1 %2149  ;;  %v3089_v43 = vpop.xlane.xlu0 %3088  ;;  %3954 = vmatprep.subr.bf16.mxu1 %v3827_v18  ;;  %v2998_v56 = vmul.f32 1.442695, %v2505_v1  ;;  %v3270_v34 = vadd.f32 %v8933_v15, %v8929_v48 }
 0x486   : > { %v5738_v32 = vpop.eup %5737  ;;  %5753 = vrcp.f32 %v3089_v43  ;;  %3955 = vmatpush1.bf16.xpose.msra.mxu1 %v3826_v61  ;;  %v2507_v61 = vsub.f32 %v11661_v6, %v9105_v59  ;;  %v11663_v43 = vld [vmem:[#allocation227_spill] sm:$0xff]  ;;  %v3366_v59 = vadd.f32 %v8965_v2, %v8957_v8  ;;  %v3000_v6 = vmul.f32 1.442695, %v2506_v30 }
 0x487   : > { %v9137_v47 = vpop.eup %5739  ;;  %5755 = vpow2.f32 %v2870_v12  ;;  %v3641_v18 = vmul.f32 %v5738_v32, %v11662_v0 }
 0x488   : > { %3361 = vadd.xlane.f32.xlu1 %v3360_v3  ;;  %11659 = vst [vmem:[#allocation197_spill] sm:$0xff] %v9137_v47  ;;  %v5742_v40 = vpop.eup %5741  ;;  %5757 = vpow2.f32 %v2872_v20  ;;  %v11664_v3 = vld [vmem:[#allocation56_spill] sm:$0xff]  ;;  %v11667_v20 = vld [vmem:[#allocation41_spill] sm:$0xff] }
 0x489   : > { %3268 = vadd.xlane.f32.xlu0 %v3267_v35  ;;  %v3182_v63 = vpop.xlane.xlu1 %3181  ;;  %v2153_v60 = vpop.xlane.xlu0 %2152  ;;  %v3643_v11 = vmul.f32 %v5742_v40, %v11663_v43  ;;  %v3640_v35 = vmul.f32 %v5738_v32, %v11664_v3  ;;  %v3642_v46 = vmul.f32 %v5742_v40, %v11665_v41  ;;  %5759 = vpow2.f32 %v2874_v10  ;;  %v11669_v3 = vld [vmem:[#allocation29_spill] sm:$0xff]  ;;  %v11670_v41 = vld [vmem:[#allocation30_spill] sm:$0xff] }
 0x48a   : > { %v9147_v12 = vpop.eup %5743  ;;  %v2444_v1 = vsub.f32 %v11667_v20, %v9125_v28  ;;  %5761 = vpow2.f32 %v2996_v49  ;;  %v3002_v40 = vmul.f32 1.442695, %v2507_v61  ;;  %v2445_v10 = vsub.f32 %v11669_v3, %v9125_v28  ;;  %v11672_v61 = vld [vmem:[#allocation48_spill] sm:$0xff] }
 0x48b   : > { %v9153_v17 = vpop.eup %5745  ;;  %v3859_v48 = vpack.c.bf16 %v3643_v11, %v3641_v18  ;;  %v3858_v15 = vpack.c.bf16 %v3642_v46, %v3640_v35  ;;  %5763 = vrcp.f32 %v3182_v63  ;;  %v2446_v20 = vsub.f32 %v11670_v41, %v2153_v60  ;;  %v11677_v41 = vld [vmem:[#allocation59_spill] sm:$0xff] }
 0x48c   : > { %11666 = vst [vmem:[#allocation195_spill] sm:$0xff] %v9153_v17  ;;  %3271 = vadd.xlane.f32.xlu1 %v3270_v34  ;;  %v9159_v32 = vpop.eup %5747  ;;  %5765 = vpow2.f32 %v2998_v56  ;;  %v3273_v49 = vadd.f32 %v8951_v45, %v8945_v57  ;;  %v2447_v34 = vsub.f32 %v11672_v61, %v2153_v60  ;;  %v3276_v56 = vadd.f32 %v8997_v19, %v8991_v22  ;;  %v11676_v60 = vld [vmem:[#allocation67_spill] sm:$0xff]  ;;  %v11678_v61 = vld [vmem:[#allocation68_spill] sm:$0xff]  ;;  %v11679_v19 = vld [vmem:[#allocation46_spill] sm:$0xff] }
 0x48d   : > { %3364 = vadd.xlane.f32.xlu0 %v3363_v26  ;;  %v2246_v0 = vpop.xlane.xlu1 %2245  ;;  %v3185_v43 = vpop.xlane.xlu0 %3184  ;;  %11668 = vst [vmem:[#allocation206_spill] sm:$0xff] %v9159_v32  ;;  %3995 = vmatprep.subr.bf16.mxu0 %v3859_v48  ;;  %v2876_v26 = vmul.f32 1.442695, %v2444_v1  ;;  %v3369_v48 = vadd.f32 %v8983_v5, %v8977_v52  ;;  %v2878_v11 = vmul.f32 1.442695, %v2445_v10 }
 0x48e   : > { %v5750_v30 = vpop.eup %5749  ;;  %5767 = vrcp.f32 %v3185_v43  ;;  %3996 = vmatpush1.bf16.xpose.msra.mxu0 %v3858_v15  ;;  %v2880_v35 = vmul.f32 1.442695, %v2446_v20  ;;  %v11673_v15 = vld [vmem:[#allocation45_spill] sm:$0xff]  ;;  %v2509_v52 = vsub.f32 %v11679_v19, %v2246_v0  ;;  %v2882_v10 = vmul.f32 1.442695, %v2447_v34 }
 0x48f   : > { %v9166_v46 = vpop.eup %5751  ;;  %5769 = vpow2.f32 %v3000_v6  ;;  %v2508_v1 = vsub.f32 %v11673_v15, %v2246_v0  ;;  %v11675_v6 = vld [vmem:[#allocation226_spill] sm:$0xff]  ;;  %v3279_v0 = vadd.f32 %v9013_v27, %v9001_v7 }
 0x490   : > { %3367 = vadd.xlane.f32.xlu1 %v3366_v59  ;;  %11671 = vst [vmem:[#allocation193_spill] sm:$0xff] %v9166_v46  ;;  %v5754_v18 = vpop.eup %5753  ;;  %5771 = vpow2.f32 %v3002_v40  ;;  %v3581_v43 = vmul.f32 %v5750_v30, %v11675_v6  ;;  %v3372_v40 = vadd.f32 %v9025_v23, %v9019_v29 }
 0x491   : > { %3274 = vadd.xlane.f32.xlu0 %v3273_v49  ;;  %v3092_v28 = vpop.xlane.xlu1 %3091  ;;  %v2249_v63 = vpop.xlane.xlu0 %2248  ;;  %v3583_v3 = vmul.f32 %v5754_v18, %v11676_v60  ;;  %v3580_v49 = vmul.f32 %v5750_v30, %v11677_v41  ;;  %v3582_v8 = vmul.f32 %v5754_v18, %v11678_v61  ;;  %5773 = vpow2.f32 %v2876_v26  ;;  %v11680_v18 = vld [vmem:[#allocation216_spill] sm:$0xff]  ;;  %v11681_v26 = vld [vmem:[#allocation50_spill] sm:$0xff] }
 0x492   : > { %v9174_v59 = vpop.eup %5755  ;;  %5775 = vrcp.f32 %v3092_v28  ;;  %v3004_v30 = vmul.f32 1.442695, %v2508_v1  ;;  %v2510_v41 = vsub.f32 %v11680_v18, %v2249_v63  ;;  %v2511_v61 = vsub.f32 %v11681_v26, %v2249_v63  ;;  %v11688_v26 = vld [vmem:[#allocation229_spill] sm:$0xff] }
 0x493   : > { %11674 = vst [vmem:[#allocation204_spill] sm:$0xff] %v9174_v59  ;;  %v9180_v22 = vpop.eup %5757  ;;  %v3829_v15 = vpack.c.bf16 %v3583_v3, %v3581_v43  ;;  %v3828_v60 = vpack.c.bf16 %v3582_v8, %v3580_v49  ;;  %5777 = vpow2.f32 %v2878_v11  ;;  %v3006_v28 = vmul.f32 1.442695, %v2509_v52  ;;  %v11684_v49 = vld [vmem:[#allocation219_spill] sm:$0xff] }
 0x494   : > { %3277 = vadd.xlane.f32.xlu1 %v3276_v56  ;;  %v9185_v5 = vpop.eup %5759  ;;  %5779 = vpow2.f32 %v2880_v35  ;;  %v11683_v56 = vld [vmem:[#allocation51_spill] sm:$0xff]  ;;  %v3282_v35 = vadd.f32 %v9059_v62, %v9051_v42  ;;  %v3375_v1 = vadd.f32 %v9045_v55, %v9033_v53  ;;  %v3008_v52 = vmul.f32 1.442695, %v2510_v41 }
 0x495   : > { %3370 = vadd.xlane.f32.xlu0 %v3369_v48  ;;  %v2156_v20 = vpop.xlane.xlu1 %2155  ;;  %v3095_v6 = vpop.xlane.xlu0 %3094  ;;  %3956 = vmatprep.subr.bf16.mxu1 %v3829_v15  ;;  %v3010_v3 = vmul.f32 1.442695, %v2511_v61  ;;  %v11690_v62 = vld [vmem:[#allocation55_spill] sm:$0xff] }
 0x496   : > { %v9189_v19 = vpop.eup %5761  ;;  %5781 = vrcp.f32 %v3095_v6  ;;  %3957 = vmatpush1.bf16.xpose.msra.mxu1 %v3828_v60  ;;  %v2448_v48 = vsub.f32 %v11683_v56, %v2156_v20  ;;  %v11687_v60 = vld [vmem:[#allocation236_spill] sm:$0xff]  ;;  %v11689_v56 = vld [vmem:[#allocation234_spill] sm:$0xff] }
 0x497   : > { %11682 = vst [vmem:[#allocation203_spill] sm:$0xff] %v9189_v19  ;;  %v5764_v34 = vpop.eup %5763  ;;  %5783 = vpow2.f32 %v2882_v10  ;;  %v11686_v10 = vld [vmem:[#allocation231_spill] sm:$0xff] }
 0x498   : > { %3373 = vadd.xlane.f32.xlu1 %v3372_v40  ;;  %v9193_v8 = vpop.eup %5765  ;;  %5785 = vpow2.f32 %v3004_v30  ;;  %v2449_v40 = vsub.f32 %v11684_v49, %v2156_v20  ;;  %v3645_v6 = vmul.f32 %v5764_v34, %v11686_v10  ;;  %v2884_v30 = vmul.f32 1.442695, %v2448_v48 }
 0x499   : > { %3280 = vadd.xlane.f32.xlu0 %v3279_v0  ;;  %v3188_v11 = vpop.xlane.xlu1 %3187  ;;  %v2159_v63 = vpop.xlane.xlu0 %2158  ;;  %v3644_v0 = vmul.f32 %v5764_v34, %v11688_v26  ;;  %5787 = vpow2.f32 %v3006_v28  ;;  %v11692_v34 = vld [vmem:[#allocation53_spill] sm:$0xff]  ;;  %v3285_v48 = vadd.f32 %v9069_v37, %v9065_v36 }
 0x49a   : > { %v5768_v43 = vpop.eup %5767  ;;  %v2450_v53 = vsub.f32 %v11690_v62, %v2159_v63  ;;  %5789 = vrcp.f32 %v3188_v11  ;;  %v2451_v26 = vsub.f32 %v11692_v34, %v2159_v63  ;;  %v11693_v62 = vld [vmem:[#allocation54_spill] sm:$0xff]  ;;  %v11695_v63 = vld [vmem:[#allocation221_spill] sm:$0xff] }
 0x49b   : > { %v9201_v15 = vpop.eup %5769  ;;  %v3647_v18 = vmul.f32 %v5768_v43, %v11687_v60  ;;  %v3646_v29 = vmul.f32 %v5768_v43, %v11689_v56  ;;  %5791 = vpow2.f32 %v3008_v52  ;;  %v2886_v60 = vmul.f32 1.442695, %v2449_v40  ;;  %v11696_v56 = vld [vmem:[#allocation223_spill] sm:$0xff] }
 0x49c   : > { %11685 = vst [vmem:[#allocation32_spill] sm:$0xff] %v9201_v15  ;;  %v9207_v42 = vpop.eup %5771  ;;  %3283 = vadd.xlane.f32.xlu1 %v3282_v35  ;;  %v3378_v43 = vadd.f32 %v9087_v51, %v9081_v24  ;;  %5793 = vpow2.f32 %v3010_v3 }
 0x49d   : > { %3376 = vadd.xlane.f32.xlu0 %v3375_v1  ;;  %v2252_v20 = vpop.xlane.xlu1 %2251  ;;  %v3861_v41 = vpack.c.bf16 %v3647_v18, %v3645_v6  ;;  %v3191_v61 = vpop.xlane.xlu0 %3190  ;;  %v3860_v49 = vpack.c.bf16 %v3646_v29, %v3644_v0  ;;  %v2888_v29 = vmul.f32 1.442695, %v2450_v53  ;;  %v3288_v6 = vadd.f32 %v9119_v58, %v9113_v54  ;;  %v11701_v58 = vld [vmem:[#allocation58_spill] sm:$0xff] }
 0x49e   : > { %v9210_v10 = vpop.eup %5773  ;;  %v2512_v35 = vsub.f32 %v11693_v62, %v2252_v20  ;;  %5795 = vrcp.f32 %v3191_v61  ;;  %v2513_v52 = vsub.f32 %v11695_v63, %v2252_v20  ;;  %v3381_v18 = vadd.f32 %v9101_v9, %v9093_v33  ;;  %v11697_v61 = vld [vmem:[#allocation72_spill] sm:$0xff]  ;;  %v11698_v20 = vld [vmem:[#allocation75_spill] sm:$0xff]  ;;  %v11699_v62 = vld [vmem:[#allocation233_spill] sm:$0xff] }
 0x49f   : > { %11691 = vst [vmem:[#allocation202_spill] sm:$0xff] %v9210_v10  ;;  %v5776_v28 = vpop.eup %5775  ;;  %3997 = vmatprep.subr.bf16.mxu0 %v3861_v41  ;;  %5797 = vpow2.f32 %v2884_v30  ;;  %v2890_v53 = vmul.f32 1.442695, %v2451_v26  ;;  %v11700_v63 = vld [vmem:[#allocation73_spill] sm:$0xff] }
 0x4a0   : > { %v9218_v11 = vpop.eup %5777  ;;  %3998 = vmatpush1.bf16.xpose.msra.mxu0 %v3860_v49  ;;  %3379 = vadd.xlane.f32.xlu1 %v3378_v43  ;;  %5799 = vpow2.f32 %v2886_v60  ;;  %v3585_v49 = vmul.f32 %v5776_v28, %v11697_v61  ;;  %v3012_v30 = vmul.f32 1.442695, %v2512_v35  ;;  %v3014_v60 = vmul.f32 1.442695, %v2513_v52 }
 0x4a1   : > { %11694 = vst [vmem:[#allocation208_spill] sm:$0xff] %v9218_v11  ;;  %v9220_v1 = vpop.eup %5779  ;;  %3286 = vadd.xlane.f32.xlu0 %v3285_v48  ;;  %v3098_v40 = vpop.xlane.xlu1 %3097  ;;  %v3584_v48 = vmul.f32 %v5776_v28, %v11699_v62  ;;  %5801 = vpow2.f32 %v2888_v29  ;;  %v3384_v28 = vadd.f32 %v9147_v12, %v9137_v47  ;;  %v11702_v29 = vld [vmem:[#allocation57_spill] sm:$0xff]  ;;  %v11713_v47 = vld [vmem:[#allocation228_spill] sm:$0xff] }
 0x4a2   : > { %v2255_v3 = vpop.xlane.xlu0 %2254  ;;  %v5782_v0 = vpop.eup %5781  ;;  %5803 = vrcp.f32 %v3098_v40 }
 0x4a3   : > { %v2514_v41 = vsub.f32 %v11696_v56, %v2255_v3  ;;  %v9229_v34 = vpop.eup %5783  ;;  %v3587_v43 = vmul.f32 %v5782_v0, %v11698_v20  ;;  %v3586_v24 = vmul.f32 %v5782_v0, %v11700_v63  ;;  %v2515_v33 = vsub.f32 %v11701_v58, %v2255_v3 }
 0x4a4   : > { %v9234_v54 = vpop.eup %5785  ;;  %3289 = vadd.xlane.f32.xlu1 %v3288_v6  ;;  %5805 = vpow2.f32 %v2890_v53  ;;  %v3291_v58 = vadd.f32 %v9133_v39, %v9127_v50 }
 0x4a5   : > { %3382 = vadd.xlane.f32.xlu0 %v3381_v18  ;;  %v2162_v26 = vpop.xlane.xlu1 %2161  ;;  %v3831_v56 = vpack.c.bf16 %v3587_v43, %v3585_v49  ;;  %v3830_v61 = vpack.c.bf16 %v3586_v24, %v3584_v48  ;;  %v9237_v9 = vpop.eup %5787  ;;  %v3016_v35 = vmul.f32 1.442695, %v2514_v41  ;;  %5807 = vpow2.f32 %v3012_v30  ;;  %v11703_v24 = vld [vmem:[#allocation225_spill] sm:$0xff] }
 0x4a6   : > { %v3101_v20 = vpop.xlane.xlu0 %3100  ;;  %v5790_v0 = vpop.eup %5789  ;;  %v2452_v62 = vsub.f32 %v11702_v29, %v2162_v26  ;;  %v3018_v40 = vmul.f32 1.442695, %v2515_v33  ;;  %v2453_v3 = vsub.f32 %v11703_v24, %v2162_v26  ;;  %v3294_v49 = vadd.f32 %v9174_v59, %v9166_v46  ;;  %v11704_v33 = vld [vmem:[#allocation76_spill] sm:$0xff]  ;;  %v11706_v26 = vld [vmem:[#allocation63_spill] sm:$0xff]  ;;  %v11711_v46 = vld [vmem:[#allocation77_spill] sm:$0xff] }
 0x4a7   : > { %3958 = vmatprep.subr.bf16.mxu1 %v3831_v56  ;;  %v9244_v52 = vpop.eup %5791  ;;  %5809 = vrcp.f32 %v3101_v20  ;;  %v3387_v30 = vadd.f32 %v9159_v32, %v9153_v17  ;;  %v3649_v43 = vmul.f32 %v5790_v0, %v11704_v33  ;;  %v11708_v20 = vld [vmem:[#allocation78_spill] sm:$0xff] }
 0x4a8   : > { %3959 = vmatpush1.bf16.xpose.msra.mxu1 %v3830_v61  ;;  %3385 = vadd.xlane.f32.xlu1 %v3384_v28  ;;  %v9247_v6 = vpop.eup %5793  ;;  %5811 = vpow2.f32 %v3014_v60  ;;  %v2892_v63 = vmul.f32 1.442695, %v2452_v62  ;;  %v11707_v61 = vld [vmem:[#allocation61_spill] sm:$0xff]  ;;  %v3390_v62 = vadd.f32 %v9193_v8, %v9189_v19 }
 0x4a9   : > { %3292 = vadd.xlane.f32.xlu0 %v3291_v58  ;;  %v3194_v18 = vpop.xlane.xlu1 %3193  ;;  %v5796_v53 = vpop.eup %5795  ;;  %5813 = vpow2.f32 %v3016_v35  ;;  %v2894_v35 = vmul.f32 1.442695, %v2453_v3  ;;  %v11710_v58 = vld [vmem:[#allocation238_spill] sm:$0xff] }
 0x4aa   : > { %v2165_v41 = vpop.xlane.xlu0 %2164  ;;  %v9254_v48 = vpop.eup %5797  ;;  %v3651_v28 = vmul.f32 %v5796_v53, %v11708_v20  ;;  %5815 = vpow2.f32 %v3018_v40  ;;  %v3648_v24 = vmul.f32 %v5790_v0, %v11710_v58  ;;  %v3650_v59 = vmul.f32 %v5796_v53, %v11711_v46  ;;  %v11716_v58 = vld [vmem:[#allocation230_spill] sm:$0xff] }
 0x4ab   : > { %11705 = vst [vmem:[#allocation178_spill] sm:$0xff] %v9254_v48  ;;  %v2454_v56 = vsub.f32 %v11706_v26, %v2165_v41  ;;  %v2455_v60 = vsub.f32 %v11707_v61, %v2165_v41  ;;  %v9259_v29 = vpop.eup %5799  ;;  %5817 = vrcp.f32 %v3194_v18  ;;  %v11712_v61 = vld [vmem:[#allocation62_spill] sm:$0xff]  ;;  %v3297_v46 = vadd.f32 %v9185_v5, %v9180_v22 }
 0x4ac   : > { %11709 = vst [vmem:[#allocation180_spill] sm:$0xff] %v9259_v29  ;;  %3295 = vadd.xlane.f32.xlu1 %v3294_v49  ;;  %v3863_v17 = vpack.c.bf16 %v3651_v28, %v3649_v43  ;;  %v9265_v26 = vpop.eup %5801  ;;  %v3862_v49 = vpack.c.bf16 %v3650_v59, %v3648_v24  ;;  %5819 = vpow2.f32 %v2892_v63 }
 0x4ad   : > { %3388 = vadd.xlane.f32.xlu0 %v3387_v30  ;;  %v2258_v33 = vpop.xlane.xlu1 %2257  ;;  %v2896_v41 = vmul.f32 1.442695, %v2454_v56  ;;  %v5804_v32 = vpop.eup %5803  ;;  %v2898_v0 = vmul.f32 1.442695, %v2455_v60  ;;  %5821 = vpow2.f32 %v2894_v35  ;;  %v3393_v56 = vadd.f32 %v9207_v42, %v9201_v15  ;;  %v11715_v60 = vld [vmem:[#allocation80_spill] sm:$0xff] }
 0x4ae   : > { %v2516_v20 = vsub.f32 %v11712_v61, %v2258_v33  ;;  %v2517_v40 = vsub.f32 %v11713_v47, %v2258_v33  ;;  %v3197_v3 = vpop.xlane.xlu0 %3196  ;;  %3999 = vmatprep.subr.bf16.mxu0 %v3863_v17  ;;  %v9271_v18 = vpop.eup %5805  ;;  %v3300_v17 = vadd.f32 %v9218_v11, %v9210_v10  ;;  %v3589_v28 = vmul.f32 %v5804_v32, %v11715_v60  ;;  %v11717_v33 = vld [vmem:[#allocation66_spill] sm:$0xff]  ;;  %v11718_v61 = vld [vmem:[#allocation83_spill] sm:$0xff]  ;;  %v11723_v15 = vld [vmem:[#allocation232_spill] sm:$0xff] }
 0x4af   : > { %4000 = vmatpush1.bf16.xpose.msra.mxu0 %v3862_v49  ;;  %v9273_v30 = vpop.eup %5807  ;;  %5823 = vrcp.f32 %v3197_v3  ;;  %v11721_v49 = vld [vmem:[#allocation81_spill] sm:$0xff] }
 0x4b0   : > { %v3020_v53 = vmul.f32 1.442695, %v2516_v20  ;;  %3391 = vadd.xlane.f32.xlu1 %v3390_v62  ;;  %11714 = vst [vmem:[#allocation182_spill] sm:$0xff] %v9273_v30  ;;  %v3022_v43 = vmul.f32 1.442695, %v2517_v40  ;;  %5825 = vpow2.f32 %v2896_v41  ;;  %v11720_v41 = vld [vmem:[#allocation79_spill] sm:$0xff] }
 0x4b1   : > { %3298 = vadd.xlane.f32.xlu0 %v3297_v46  ;;  %v3104_v47 = vpop.xlane.xlu1 %3103  ;;  %v5810_v59 = vpop.eup %5809  ;;  %5827 = vpow2.f32 %v2898_v0  ;;  %v3588_v3 = vmul.f32 %v5804_v32, %v11720_v41  ;;  %v3396_v0 = vadd.f32 %v9237_v9, %v9234_v54  ;;  %v11727_v41 = vld [vmem:[#allocation69_spill] sm:$0xff] }
 0x4b2   : > { %v2261_v63 = vpop.xlane.xlu0 %2260  ;;  %v9280_v35 = vpop.eup %5811  ;;  %v3591_v20 = vmul.f32 %v5810_v59, %v11718_v61  ;;  %5829 = vpow2.f32 %v3020_v53  ;;  %v3590_v46 = vmul.f32 %v5810_v59, %v11721_v49  ;;  %v11728_v49 = vld [vmem:[#allocation84_spill] sm:$0xff] }
 0x4b3   : > { %v2518_v24 = vsub.f32 %v11716_v58, %v2261_v63  ;;  %v2519_v62 = vsub.f32 %v11717_v33, %v2261_v63  ;;  %v9285_v40 = vpop.eup %5813  ;;  %5831 = vpow2.f32 %v3022_v43  ;;  %v11722_v33 = vld [vmem:[#allocation65_spill] sm:$0xff]  ;;  %v3303_v43 = vadd.f32 %v9229_v34, %v9220_v1 }
 0x4b4   : > { %11719 = vst [vmem:[#allocation184_spill] sm:$0xff] %v9285_v40  ;;  %3301 = vadd.xlane.f32.xlu1 %v3300_v17  ;;  %v3833_v11 = vpack.c.bf16 %v3591_v20, %v3589_v28  ;;  %v9291_v58 = vpop.eup %5815  ;;  %v3832_v19 = vpack.c.bf16 %v3590_v46, %v3588_v3  ;;  %5833 = vrcp.f32 %v3104_v47  ;;  %v3399_v47 = vadd.f32 %v9247_v6, %v9244_v52  ;;  %v11726_v20 = vld [vmem:[#allocation71_spill] sm:$0xff] }
 0x4b5   : > { %v3024_v10 = vmul.f32 1.442695, %v2518_v24  ;;  %3394 = vadd.xlane.f32.xlu0 %v3393_v56  ;;  %v2168_v60 = vpop.xlane.xlu1 %2167  ;;  %v3026_v63 = vmul.f32 1.442695, %v2519_v62  ;;  %v5818_v32 = vpop.eup %5817 }
 0x4b6   : > { %v2456_v61 = vsub.f32 %v11722_v33, %v2168_v60  ;;  %v2457_v53 = vsub.f32 %v11723_v15, %v2168_v60  ;;  %v3107_v17 = vpop.xlane.xlu0 %3106  ;;  %3960 = vmatprep.subr.bf16.mxu1 %v3833_v11  ;;  %v9297_v28 = vpop.eup %5819  ;;  %v3306_v11 = vadd.f32 %v9259_v29, %v9254_v48  ;;  %v3653_v46 = vmul.f32 %v5818_v32, %v11728_v49  ;;  %v11730_v33 = vld [vmem:[#allocation82_spill] sm:$0xff]  ;;  %v11734_v49 = vld [vmem:[#allocation235_spill] sm:$0xff] }
 0x4b7   : > { %5835 = vpow2.f32 %v3024_v10  ;;  %3961 = vmatpush1.bf16.xpose.msra.mxu1 %v3832_v19  ;;  %11724 = vst [vmem:[#allocation185_spill] sm:$0xff] %v9297_v28  ;;  %v9299_v62 = vpop.eup %5821 }
 0x4b8   : > { %v2900_v59 = vmul.f32 1.442695, %v2456_v61  ;;  %v2902_v56 = vmul.f32 1.442695, %v2457_v53  ;;  %3397 = vadd.xlane.f32.xlu1 %v3396_v0  ;;  %5837 = vrcp.f32 %v3107_v17  ;;  %11725 = vst [vmem:[#allocation207_spill] sm:$0xff] %v9299_v62  ;;  %v11729_v0 = vld [vmem:[#allocation86_spill] sm:$0xff]  ;;  %v3652_v61 = vmul.f32 %v5818_v32, %v11730_v33 }
 0x4b9   : > { %3304 = vadd.xlane.f32.xlu0 %v3303_v43  ;;  %v3200_v24 = vpop.xlane.xlu1 %3199  ;;  %5839 = vpow2.f32 %v3026_v63  ;;  %v5824_v10 = vpop.eup %5823  ;;  %v11731_v53 = vld [vmem:[#allocation85_spill] sm:$0xff] }
 0x4ba   : > { %v2171_v15 = vpop.xlane.xlu0 %2170  ;;  %5841 = vpow2.f32 %v2900_v59  ;;  %v9308_v60 = vpop.eup %5825  ;;  %v3655_v63 = vmul.f32 %v5824_v10, %v11729_v0  ;;  %v3654_v17 = vmul.f32 %v5824_v10, %v11731_v53 }
 0x4bb   : > { %v2458_v19 = vsub.f32 %v11726_v20, %v2171_v15  ;;  %v2459_v3 = vsub.f32 %v11727_v41, %v2171_v15  ;;  %5843 = vpow2.f32 %v2902_v56  ;;  %v9313_v43 = vpop.eup %5827  ;;  %v3402_v15 = vadd.f32 %v9280_v35, %v9273_v30  ;;  %v11733_v56 = vld [vmem:[#allocation70_spill] sm:$0xff] }
 0x4bc   : > { %3307 = vadd.xlane.f32.xlu1 %v3306_v11  ;;  %5845 = vrcp.f32 %v3200_v24  ;;  %v9317_v41 = vpop.eup %5829  ;;  %v3865_v29 = vpack.c.bf16 %v3655_v63, %v3653_v46  ;;  %v3864_v33 = vpack.c.bf16 %v3654_v17, %v3652_v61  ;;  %v3309_v24 = vadd.f32 %v9271_v18, %v9265_v26  ;;  %v11736_v17 = vld [vmem:[#allocation237_spill] sm:$0xff] }
 0x4bd   : > { %v2904_v59 = vmul.f32 1.442695, %v2458_v19  ;;  %v2906_v48 = vmul.f32 1.442695, %v2459_v3  ;;  %3400 = vadd.xlane.f32.xlu0 %v3399_v47  ;;  %v2264_v20 = vpop.xlane.xlu1 %2263  ;;  %11732 = vst [vmem:[#allocation34_spill] sm:$0xff] %v9317_v41  ;;  %v9321_v10 = vpop.eup %5831  ;;  %v3312_v63 = vadd.f32 %v9299_v62, %v9297_v28 }
 0x4be   : > { %v2520_v11 = vsub.f32 %v11733_v56, %v2264_v20  ;;  %v2521_v0 = vsub.f32 %v11734_v49, %v2264_v20  ;;  %v3203_v32 = vpop.xlane.xlu0 %3202  ;;  %4001 = vmatprep.subr.bf16.mxu0 %v3865_v29  ;;  %v5834_v3 = vpop.eup %5833  ;;  %v3405_v29 = vadd.f32 %v9291_v58, %v9285_v40 }
 0x4bf   : > { %5847 = vpow2.f32 %v2904_v59  ;;  %4002 = vmatpush1.bf16.xpose.msra.mxu0 %v3864_v33  ;;  %v11737_v59 = vld [vmem:[#allocation74_spill] sm:$0xff]  ;;  %v11741_v33 = vld [vmem:[#allocation87_spill] sm:$0xff] }
 0x4c0   : > { %5849 = vpow2.f32 %v2906_v48  ;;  %v3028_v47 = vmul.f32 1.442695, %v2520_v11  ;;  %v3030_v19 = vmul.f32 1.442695, %v2521_v0  ;;  %3403 = vadd.xlane.f32.xlu1 %v3402_v15  ;;  %v11739_v11 = vld [vmem:[#allocation88_spill] sm:$0xff]  ;;  %v11740_v0 = vld [vmem:[#allocation91_spill] sm:$0xff] }
 0x4c1   : > { %5851 = vrcp.f32 %v3203_v32  ;;  %3310 = vadd.xlane.f32.xlu0 %v3309_v24  ;;  %v3110_v53 = vpop.xlane.xlu1 %3109  ;;  %v9325_v20 = vpop.eup %5835  ;;  %v3593_v49 = vmul.f32 %v5834_v3, %v11739_v11  ;;  %v3592_v24 = vmul.f32 %v5834_v3, %v11741_v33  ;;  %v3408_v11 = vadd.f32 %v9321_v10, %v9317_v41 }
 0x4c2   : > { %11735 = vst [vmem:[#allocation18_spill] sm:$0xff] %v9325_v20  ;;  %5853 = vpow2.f32 %v3028_v47  ;;  %v2267_v46 = vpop.xlane.xlu0 %2266  ;;  %v5838_v61 = vpop.eup %5837  ;;  %v11742_v47 = vld [vmem:[#allocation89_spill] sm:$0xff]  ;;  %v3315_v3 = vadd.f32 %v9313_v43, %v9308_v60 }
 0x4c3   : > { %5855 = vpow2.f32 %v3030_v19  ;;  %v2522_v48 = vsub.f32 %v11736_v17, %v2267_v46  ;;  %v2523_v56 = vsub.f32 %v11737_v59, %v2267_v46  ;;  %v9333_v15 = vpop.eup %5839  ;;  %v3595_v32 = vmul.f32 %v5838_v61, %v11740_v0 }
 0x4c4   : > { %11738 = vst [vmem:[#allocation213_spill] sm:$0xff] %v9333_v15  ;;  %3313 = vadd.xlane.f32.xlu1 %v3312_v63  ;;  %v3594_v28 = vmul.f32 %v5838_v61, %v11742_v47  ;;  %v9339_v62 = vpop.eup %5841  ;;  %5857 = vrcp.f32 %v3110_v53  ;;  %v11750_v47 = vld [vmem:[#allocation90_spill] sm:$0xff] }
 0x4c5   : > { %11743 = vst [vmem:[#allocation187_spill] sm:$0xff] %v9339_v62  ;;  %v3032_v19 = vmul.f32 1.442695, %v2522_v48  ;;  %v3034_v17 = vmul.f32 1.442695, %v2523_v56  ;;  %3406 = vadd.xlane.f32.xlu0 %v3405_v29  ;;  %v3206_v46 = vpop.xlane.xlu1 %3205  ;;  %v9341_v59 = vpop.eup %5843  ;;  %v3835_v40 = vpack.c.bf16 %v3595_v32, %v3593_v49  ;;  %v3411_v49 = vadd.f32 %v9333_v15, %v9325_v20  ;;  %v11760_v20 = vld [vmem:[#allocation102_spill] sm:$0xff] }
 0x4c6   : > { %11744 = vst [vmem:[#allocation189_spill] sm:$0xff] %v9341_v59  ;;  %5859 = vrcp.f32 %v3206_v46  ;;  %v3113_v63 = vpop.xlane.xlu0 %3112  ;;  %v3834_v30 = vpack.c.bf16 %v3594_v28, %v3592_v24  ;;  %v5846_v0 = vpop.eup %5845  ;;  %v3318_v56 = vadd.f32 %v9341_v59, %v9339_v62  ;;  %v11749_v24 = vld [vmem:[#allocation94_spill] sm:$0xff] }
 0x4c7   : > { %5861 = vpow2.f32 %v3032_v19  ;;  %3962 = vmatprep.subr.bf16.mxu1 %v3835_v40  ;;  %v11748_v40 = vld [vmem:[#allocation92_spill] sm:$0xff]  ;;  %v3656_v19 = vmul.f32 %v5846_v0, %v11750_v47 }
 0x4c8   : > { %5863 = vpow2.f32 %v3034_v17  ;;  %3409 = vadd.xlane.f32.xlu1 %v3408_v11  ;;  %3963 = vmatpush1.bf16.xpose.msra.mxu1 %v3834_v30  ;;  %v3657_v33 = vmul.f32 %v5846_v0, %v11748_v40  ;;  %v11751_v17 = vld [vmem:[#allocation93_spill] sm:$0xff]  ;;  %v11755_v47 = vld [vmem:[#allocation96_spill] sm:$0xff] }
 0x4c9   : > { %v9347_v53 = vpop.eup %5847  ;;  %5865 = vrcp.f32 %v3113_v63  ;;  %3316 = vadd.xlane.f32.xlu0 %v3315_v3  ;;  %v3116_v61 = vpop.xlane.xlu1 %3115 }
 0x4ca   : > { %11745 = vst [vmem:[#allocation191_spill] sm:$0xff] %v9347_v53  ;;  %v9349_v48 = vpop.eup %5849  ;;  %v3209_v28 = vpop.xlane.xlu0 %3208 }
 0x4cb   : > { %11746 = vst [vmem:[#allocation194_spill] sm:$0xff] %v9349_v48  ;;  %v5852_v29 = vpop.eup %5851  ;;  %5867 = vrcp.f32 %v3209_v28  ;;  %v3321_v40 = vadd.f32 %v9349_v48, %v9347_v53  ;;  %v11759_v48 = vld [vmem:[#allocation100_spill] sm:$0xff] }
 0x4cc   : > { %v9355_v32 = vpop.eup %5853  ;;  %3319 = vadd.xlane.f32.xlu1 %v3318_v56  ;;  %v3659_v30 = vmul.f32 %v5852_v29, %v11749_v24  ;;  %v3658_v46 = vmul.f32 %v5852_v29, %v11751_v17  ;;  %5869 = vrcp.f32 %v3116_v61  ;;  %v11756_v17 = vld [vmem:[#allocation99_spill] sm:$0xff] }
 0x4cd   : > { %11747 = vst [vmem:[#allocation212_spill] sm:$0xff] %v9355_v32  ;;  %v9361_v63 = vpop.eup %5855  ;;  %3412 = vadd.xlane.f32.xlu0 %v3411_v49  ;;  %v3212_v11 = vpop.xlane.xlu1 %3211 }
 0x4ce   : > { %11752 = vst [vmem:[#allocation39_spill] sm:$0xff] %v9361_v63  ;;  %v3867_v3 = vpack.c.bf16 %v3659_v30, %v3657_v33  ;;  %v3119_v28 = vpop.xlane.xlu0 %3118  ;;  %v3866_v62 = vpack.c.bf16 %v3658_v46, %v3656_v19  ;;  %v3414_v59 = vadd.f32 %v9361_v63, %v9355_v32  ;;  %v5858_v56 = vpop.eup %5857 }
 0x4cf   : > { %5871 = vrcp.f32 %v3119_v28  ;;  %v3597_v19 = vmul.f32 %v5858_v56, %v11755_v47  ;;  %v11758_v28 = vld [vmem:[#allocation97_spill] sm:$0xff]  ;;  %v11761_v47 = vld [vmem:[#allocation98_spill] sm:$0xff] }
 0x4d0   : > { %v5860_v24 = vpop.eup %5859  ;;  %4003 = vmatprep.subr.bf16.mxu0 %v3867_v3  ;;  %3415 = vadd.xlane.f32.xlu1 %v3414_v59  ;;  %5873 = vrcp.f32 %v3212_v11  ;;  %v11757_v3 = vld [vmem:[#allocation95_spill] sm:$0xff] }
 0x4d1   : > { %v9367_v0 = vpop.eup %5861  ;;  %4004 = vmatpush1.bf16.xpose.msra.mxu0 %v3866_v62  ;;  %3322 = vadd.xlane.f32.xlu0 %v3321_v40  ;;  %v3122_v61 = vpop.xlane.xlu1 %3121  ;;  %v3596_v59 = vmul.f32 %v5858_v56, %v11757_v3 }
 0x4d2   : > { %11753 = vst [vmem:[#allocation211_spill] sm:$0xff] %v9367_v0  ;;  %v9369_v29 = vpop.eup %5863  ;;  %v3215_v49 = vpop.xlane.xlu0 %3214 }
 0x4d3   : > { %11754 = vst [vmem:[#allocation22_spill] sm:$0xff] %v9369_v29  ;;  %v5866_v33 = vpop.eup %5865  ;;  %5875 = vrcp.f32 %v3215_v49  ;;  %v3417_v30 = vadd.f32 %v9369_v29, %v9367_v0  ;;  %v3661_v49 = vmul.f32 %v5860_v24, %v11759_v48  ;;  %v3660_v29 = vmul.f32 %v5860_v24, %v11761_v47  ;;  %v11764_v48 = vld [vmem:[#allocation107_spill] sm:$0xff]  ;;  %v11768_v47 = vld [vmem:[#allocation110_spill] sm:$0xff] }
 0x4d4   : > { %v3599_v46 = vmul.f32 %v5866_v33, %v11756_v17  ;;  %v3598_v32 = vmul.f32 %v5866_v33, %v11758_v28  ;;  %5877 = vrcp.f32 %v3122_v61  ;;  %v11762_v17 = vld [vmem:[#allocation101_spill] sm:$0xff]  ;;  %v11766_v24 = vld [vmem:[#allocation103_spill] sm:$0xff] }
 0x4d5   : > { %v5868_v11 = vpop.eup %5867  ;;  %3418 = vadd.xlane.f32.xlu0 %v3417_v30  ;;  %v3218_v62 = vpop.xlane.xlu1 %3217 }
 0x4d6   : > { %v3837_v40 = vpack.c.bf16 %v3599_v46, %v3597_v19  ;;  %v3125_v63 = vpop.xlane.xlu0 %3124  ;;  %v3836_v53 = vpack.c.bf16 %v3598_v32, %v3596_v59  ;;  %v3663_v41 = vmul.f32 %v5868_v11, %v11760_v20  ;;  %v5870_v0 = vpop.eup %5869  ;;  %v3662_v15 = vmul.f32 %v5868_v11, %v11762_v17  ;;  %v11763_v32 = vld [vmem:[#allocation104_spill] sm:$0xff]  ;;  %v11765_v20 = vld [vmem:[#allocation105_spill] sm:$0xff] }
 0x4d7   : > { %5879 = vrcp.f32 %v3125_v63  ;;  %v3601_v46 = vmul.f32 %v5870_v0, %v11763_v32  ;;  %v3600_v28 = vmul.f32 %v5870_v0, %v11766_v24 }
 0x4d8   : > { %3964 = vmatprep.subr.bf16.mxu1 %v3837_v40  ;;  %v3869_v56 = vpack.c.bf16 %v3663_v41, %v3661_v49  ;;  %5881 = vrcp.f32 %v3218_v62  ;;  %v3868_v30 = vpack.c.bf16 %v3662_v15, %v3660_v29  ;;  %v538_v29 = vld [vmem:[%s10080_s4 + $0x50] sm:$0xff]  ;;  %v11767_v40 = vld [vmem:[#allocation108_spill] sm:$0xff] }
 0x4d9   : > { %v5872_v33 = vpop.eup %5871  ;;  %3965 = vmatpush1.bf16.xpose.msra.mxu1 %v3836_v53  ;;  %v3128_v61 = vpop.xlane.xlu1 %3127 }
 0x4da   : > { %4005 = vmatprep.subr.bf16.mxu0 %v3869_v56  ;;  %v3221_v19 = vpop.xlane.xlu0 %3220  ;;  %v3603_v3 = vmul.f32 %v5872_v33, %v11764_v48  ;;  %v3602_v59 = vmul.f32 %v5872_v33, %v11765_v20  ;;  %v5874_v63 = vpop.eup %5873  ;;  %v11769_v56 = vld [vmem:[#allocation106_spill] sm:$0xff]  ;;  %v4112_v20 = vld [vmem:[%s10082_s6] sm:$0xff] }
 0x4db   : > { %5883 = vrcp.f32 %v3221_v19  ;;  %4006 = vmatpush1.bf16.xpose.msra.mxu0 %v3868_v30  ;;  %v3665_v49 = vmul.f32 %v5874_v63, %v11767_v40  ;;  %v3664_v33 = vmul.f32 %v5874_v63, %v11769_v56  ;;  %v11770_v30 = vld [vmem:[#allocation109_spill] sm:$0xff]  ;;  %v11772_v63 = vld [vmem:[#allocation115_spill] sm:$0xff]  ;;  %v4113_v56 = vld [vmem:[%s10082_s6 + $0x8] sm:$0xff] }
 0x4dc   : > { %v3839_v11 = vpack.c.bf16 %v3603_v3, %v3601_v46  ;;  %5885 = vrcp.f32 %v3128_v61  ;;  %v3838_v53 = vpack.c.bf16 %v3602_v59, %v3600_v28  ;;  %v11771_v59 = vld [vmem:[#allocation112_spill] sm:$0xff]  ;;  %v11774_v40 = vld [vmem:[#allocation111_spill] sm:$0xff] }
 0x4dd   : > { %v5876_v41 = vpop.eup %5875  ;;  %v3224_v62 = vpop.xlane.xlu1 %3223 }
 0x4de   : > { %3966 = vmatprep.subr.bf16.mxu1 %v3839_v11  ;;  %v3131_v15 = vpop.xlane.xlu0 %3130  ;;  %v3667_v17 = vmul.f32 %v5876_v41, %v11768_v47  ;;  %v3666_v19 = vmul.f32 %v5876_v41, %v11770_v30  ;;  %v5878_v0 = vpop.eup %5877  ;;  %v11773_v11 = vld [vmem:[#allocation113_spill] sm:$0xff] }
 0x4df   : > { %5887 = vrcp.f32 %v3131_v15  ;;  %v3605_v24 = vmul.f32 %v5878_v0, %v11771_v59 }
 0x4e0   : > { %v3871_v32 = vpack.c.bf16 %v3667_v17, %v3665_v49  ;;  %v3870_v61 = vpack.c.bf16 %v3666_v19, %v3664_v33  ;;  %5889 = vrcp.f32 %v3224_v62  ;;  %v3604_v62 = vmul.f32 %v5878_v0, %v11774_v40  ;;  %v11775_v33 = vld [vmem:[#allocation116_spill] sm:$0xff]  ;;  %v11776_v19 = vld [vmem:[#allocation118_spill] sm:$0xff] }
 0x4e1   : > { %v5880_v46 = vpop.eup %5879  ;;  %3967 = vmatpush1.bf16.xpose.msra.mxu1 %v3838_v53  ;;  %592 = vperm.xlu1 %5234, %v538_v29   ;;  %v3230_v48 = vpop.xlane.xlu1 %3229 }
 0x4e2   : > { %4007 = vmatprep.subr.bf16.mxu0 %v3871_v32  ;;  %v3227_v3 = vpop.xlane.xlu0 %3226  ;;  %v3607_v28 = vmul.f32 %v5880_v46, %v11772_v63  ;;  %v3606_v41 = vmul.f32 %v5880_v46, %v11773_v11  ;;  %v5882_v15 = vpop.eup %5881  ;;  %v11777_v46 = vld [vmem:[#allocation114_spill] sm:$0xff] }
 0x4e3   : > { %5891 = vrcp.f32 %v3227_v3  ;;  %4008 = vmatpush1.bf16.xpose.msra.mxu0 %v3870_v61  ;;  %v3669_v30 = vmul.f32 %v5882_v15, %v11775_v33  ;;  %v3668_v61 = vmul.f32 %v5882_v15, %v11777_v46  ;;  %v11778_v3 = vld [vmem:[#allocation117_spill] sm:$0xff]  ;;  %v11779_v15 = vld [vmem:[#allocation120_spill] sm:$0xff] }
 0x4e4   : > { %v3841_v53 = vpack.c.bf16 %v3607_v28, %v3605_v24  ;;  %5893 = vrcp.f32 %v3230_v48  ;;  %v3840_v47 = vpack.c.bf16 %v3606_v41, %v3604_v62  ;;  %v4115_v41 = vld [vmem:[%s10082_s6 + $0x18] sm:$0xff] }
 0x4e5   : > { %v5884_v29 = vpop.eup %5883  ;;  %4118 = vperm.xlu1 %5234, %v4112_v20   ;;  %v3326_v49 = vpop.xlane.xlu1 %3325  ;;  %v539_v20 = vld [vmem:[%s10080_s4 + $0x58] sm:$0xff] }
 0x4e6   : > { %3968 = vmatprep.subr.bf16.mxu1 %v3841_v53  ;;  %v3233_v17 = vpop.xlane.xlu0 %3232  ;;  %v3671_v32 = vmul.f32 %v5884_v29, %v11776_v19  ;;  %v3670_v0 = vmul.f32 %v5884_v29, %v11778_v3  ;;  %v5886_v59 = vpop.eup %5885  ;;  %v11780_v62 = vld [vmem:[#allocation122_spill] sm:$0xff]  ;;  %v11781_v29 = vld [vmem:[#allocation121_spill] sm:$0xff]  ;;  %v4214_v3 = vld [vmem:[%s10083_s7 + $0x8] sm:$0xff] }
 0x4e7   : > { %5895 = vrcp.f32 %v3233_v17  ;;  %v3609_v40 = vmul.f32 %v5886_v59, %v11779_v15 }
 0x4e8   : > { %v3873_v48 = vpack.c.bf16 %v3671_v32, %v3669_v30  ;;  %v3872_v24 = vpack.c.bf16 %v3670_v0, %v3668_v61  ;;  %5897 = vrcp.f32 %v3326_v49  ;;  %v11782_v49 = vld [vmem:[#allocation119_spill] sm:$0xff]  ;;  %v4114_v30 = vld [vmem:[%s10082_s6 + $0x10] sm:$0xff]  ;;  %v11783_v0 = vld [vmem:[#allocation124_spill] sm:$0xff] }
 0x4e9   : > { %v5888_v63 = vpop.eup %5887  ;;  %3969 = vmatpush1.bf16.xpose.msra.mxu1 %v3840_v47  ;;  %4123 = vperm.xlu1 %5234, %v4113_v56   ;;  %v3236_v28 = vpop.xlane.xlu1 %3235  ;;  %v3608_v47 = vmul.f32 %v5886_v59, %v11782_v49 }
 0x4ea   : > { %4009 = vmatprep.subr.bf16.mxu0 %v3873_v48  ;;  %v3329_v11 = vpop.xlane.xlu0 %3328  ;;  %v3611_v53 = vmul.f32 %v5888_v63, %v11780_v62  ;;  %v3610_v17 = vmul.f32 %v5888_v63, %v11781_v29  ;;  %v5890_v33 = vpop.eup %5889  ;;  %v11787_v29 = vld [vmem:[#allocation10_spill] sm:$0xff] }
 0x4eb   : > { %5899 = vrcp.f32 %v3329_v11  ;;  %597 = vperm.xlu0 %5233, %v539_v20   ;;  %4010 = vmatpush1.bf16.xpose.msra.mxu0 %v3872_v24  ;;  %v3673_v48 = vmul.f32 %v5890_v33, %v11783_v0  ;;  %v11784_v20 = vld [vmem:[#allocation240_spill] sm:$0xff]  ;;  %v11785_v24 = vld [vmem:[#allocation123_spill] sm:$0xff] }
 0x4ec   : > { %v3843_v56 = vpack.c.bf16 %v3611_v53, %v3609_v40  ;;  %5901 = vrcp.f32 %v3236_v28  ;;  %v3842_v46 = vpack.c.bf16 %v3610_v17, %v3608_v47  ;;  %v3672_v63 = vmul.f32 %v5890_v33, %v11785_v24  ;;  %v11786_v11 = vld [vmem:[#allocation239_spill] sm:$0xff]  ;;  %v11794_v24 = vld [vmem:[#allocation8_spill] sm:$0xff] }
 0x4ed   : > { %v5892_v19 = vpop.eup %5891  ;;  %4133 = vperm.xlu1 %5234, %v4115_v41   ;;  %v3332_v32 = vpop.xlane.xlu1 %3331  ;;  %v4213_v41 = vld [vmem:[%s10083_s7] sm:$0xff] }
 0x4ee   : > { %3970 = vmatprep.subr.bf16.mxu1 %v3843_v56  ;;  %v3239_v61 = vpop.xlane.xlu0 %3238  ;;  %v3675_v59 = vmul.f32 %v5892_v19, %v11784_v20  ;;  %v3674_v15 = vmul.f32 %v5892_v19, %v11786_v11  ;;  %v5894_v40 = vpop.eup %5893  ;;  %v11788_v17 = vld [vmem:[#allocation7_spill] sm:$0xff]  ;;  %v4246_v56 = vld [vmem:[%s10084_s8 + $0x8] sm:$0xff] }
 0x4ef   : > { %5903 = vrcp.f32 %v3239_v61  ;;  %4128 = vperm.xlu0 %5233, %v4114_v30   ;;  %v724_v49 = vadd.f32 %v11788_v17, %v11787_v29  ;;  %v11789_v30 = vld [vmem:[#allocation126_spill] sm:$0xff] }
 0x4f0   : > { %v3875_v28 = vpack.c.bf16 %v3675_v59, %v3673_v48  ;;  %v3874_v62 = vpack.c.bf16 %v3674_v15, %v3672_v63  ;;  %5905 = vrcp.f32 %v3332_v32  ;;  %v3677_v19 = vmul.f32 %v5894_v40, %v11789_v30  ;;  %v11790_v61 = vld [vmem:[#allocation242_spill] sm:$0xff]  ;;  %v11791_v48 = vld [vmem:[#allocation241_spill] sm:$0xff]  ;;  %v4245_v15 = vld [vmem:[%s10084_s8] sm:$0xff] }
 0x4f1   : > { %v5896_v53 = vpop.eup %5895  ;;  %3971 = vmatpush1.bf16.xpose.msra.mxu1 %v3842_v46  ;;  %4224 = vperm.xlu1 %5234, %v4214_v3   ;;  %v3242_v47 = vpop.xlane.xlu1 %3241  ;;  %v11792_v32 = vld [vmem:[#allocation125_spill] sm:$0xff]  ;;  %v3804_v29 = vpack.c.bf16 %v724_v49, %v724_v49  ;;  %v11796_v30 = vld [vmem:[#allocation244_spill] sm:$0xff] }
 0x4f2   : > { %4011 = vmatprep.subr.bf16.mxu0 %v3875_v28  ;;  %v3335_v33 = vpop.xlane.xlu0 %3334  ;;  %v3679_v0 = vmul.f32 %v5896_v53, %v11790_v61  ;;  %v3678_v20 = vmul.f32 %v5896_v53, %v11791_v48  ;;  %v5898_v59 = vpop.eup %5897  ;;  %v3676_v46 = vmul.f32 %v5894_v40, %v11792_v32  ;;  %v11793_v3 = vld [vmem:[#allocation9_spill] sm:$0xff]  ;;  %v4216_v40 = vld [vmem:[%s10083_s7 + $0x18] sm:$0xff]  ;;  %v11797_v61 = vld [vmem:[#allocation128_spill] sm:$0xff] }
 0x4f3   : > { %5907 = vrcp.f32 %v3335_v33  ;;  %4219 = vperm.xlu0 %5233, %v4213_v41   ;;  %4012 = vmatpush1.bf16.xpose.msra.mxu0 %v3874_v62  ;;  %v728_v63 = vadd.f32 %v11794_v24, %v11793_v3  ;;  %v11795_v41 = vld [vmem:[#allocation130_spill] sm:$0xff]  ;;  %v11798_v48 = vld [vmem:[#allocation243_spill] sm:$0xff] }
 0x4f4   : > { %v3877_v11 = vpack.c.bf16 %v3679_v0, %v3677_v19  ;;  %5909 = vrcp.f32 %v3242_v47  ;;  %v3876_v53 = vpack.c.bf16 %v3678_v20, %v3676_v46  ;;  %v3741_v62 = vmul.f32 %v5898_v59, %v11795_v41 }
 0x4f5   : > { %v5900_v28 = vpop.eup %5899  ;;  %4256 = vperm.xlu1 %5234, %v4246_v56   ;;  %v3338_v17 = vpop.xlane.xlu1 %3337  ;;  %v3740_v0 = vmul.f32 %v5898_v59, %v11797_v61  ;;  %v3806_v49 = vpack.c.bf16 %v728_v63, %v728_v63  ;;  %v4215_v56 = vld [vmem:[%s10083_s7 + $0x10] sm:$0xff] }
 0x4f6   : > { %4022 = vmatprep.subr.bf16.mxu1 %v3877_v11  ;;  %v3245_v33 = vpop.xlane.xlu0 %3244  ;;  %v3743_v19 = vmul.f32 %v5900_v28, %v11796_v30  ;;  %v3742_v32 = vmul.f32 %v5900_v28, %v11798_v48  ;;  %v5902_v3 = vpop.eup %5901  ;;  %v4248_v11 = vld [vmem:[%s10084_s8 + $0x18] sm:$0xff]  ;;  %v11799_v63 = vld [vmem:[#allocation133_spill] sm:$0xff] }
 0x4f7   : > { %5911 = vrcp.f32 %v3245_v33  ;;  %4251 = vperm.xlu0 %5233, %v4245_v15   ;;  %v3681_v15 = vmul.f32 %v5902_v3, %v11799_v63  ;;  %v11800_v28 = vld [vmem:[#allocation138_spill] sm:$0xff]  ;;  %v11801_v33 = vld [vmem:[#allocation137_spill] sm:$0xff] }
 0x4f8   : > { %3973 = vmatmul.mubr.bf16.vlgmr.msra.gmra.mrb[128].mxu1 %v3804_v29  ;;  %v3909_v47 = vpack.c.bf16 %v3743_v19, %v3741_v62  ;;  %v3908_v20 = vpack.c.bf16 %v3742_v32, %v3740_v0  ;;  %5913 = vrcp.f32 %v3338_v17  ;;  %v11802_v17 = vld [vmem:[#allocation131_spill] sm:$0xff]  ;;  %v4247_v30 = vld [vmem:[%s10084_s8 + $0x10] sm:$0xff]  ;;  %v4298_v32 = vld [vmem:[%s10086_s10 + $0x8] sm:$0xff] }
 0x4f9   : > { %v5904_v46 = vpop.eup %5903  ;;  %4023 = vmatpush1.bf16.xpose.msra.mxu1 %v3876_v53  ;;  %4234 = vperm.xlu1 %5234, %v4216_v40   ;;  %v3248_v24 = vpop.xlane.xlu1 %3247  ;;  %v3680_v53 = vmul.f32 %v5902_v3, %v11802_v17  ;;  %v11807_v17 = vld [vmem:[#allocation135_spill] sm:$0xff] }
 0x4fa   : > { %4014 = vmatmul.mubr.bf16.vlgmr.msra.gmra.mrb[152].mxu0 %v3806_v49  ;;  %4063 = vmatprep.subr.bf16.mxu0 %v3909_v47  ;;  %v3341_v59 = vpop.xlane.xlu0 %3340  ;;  %v3683_v29 = vmul.f32 %v5904_v46, %v11800_v28  ;;  %v3682_v41 = vmul.f32 %v5904_v46, %v11801_v33  ;;  %v5906_v62 = vpop.eup %5905  ;;  %v11803_v49 = vld [vmem:[#allocation136_spill] sm:$0xff] }
 0x4fb   : > { %5915 = vrcp.f32 %v3341_v59  ;;  %4229 = vperm.xlu0 %5233, %v4215_v56   ;;  %4064 = vmatpush1.bf16.xpose.msra.mxu0 %v3908_v20  ;;  %v3745_v47 = vmul.f32 %v5906_v62, %v11803_v49  ;;  %v11804_v56 = vld [vmem:[#allocation132_spill] sm:$0xff]  ;;  %v11805_v20 = vld [vmem:[#allocation134_spill] sm:$0xff]  ;;  %v11806_v59 = vld [vmem:[#allocation127_spill] sm:$0xff] }
 0x4fc   : > { %v3879_v40 = vpack.c.bf16 %v3683_v29, %v3681_v15  ;;  %5917 = vrcp.f32 %v3248_v24  ;;  %v3878_v0 = vpack.c.bf16 %v3682_v41, %v3680_v53  ;;  %v3744_v46 = vmul.f32 %v5906_v62, %v11805_v20  ;;  %v4300_v62 = vld [vmem:[%s10086_s10 + $0x18] sm:$0xff] }
 0x4fd   : > { %v5908_v19 = vpop.eup %5907  ;;  %4266 = vperm.xlu1 %5234, %v4248_v11   ;;  %v3344_v61 = vpop.xlane.xlu1 %3343  ;;  %v4297_v11 = vld [vmem:[%s10086_s10] sm:$0xff] }
 0x4fe   : > { %4024 = vmatprep.subr.bf16.mxu1 %v3879_v40  ;;  %v3251_v48 = vpop.xlane.xlu0 %3250  ;;  %v3747_v3 = vmul.f32 %v5908_v19, %v11804_v56  ;;  %v3746_v63 = vmul.f32 %v5908_v19, %v11806_v59  ;;  %v5910_v15 = vpop.eup %5909  ;;  %v11808_v40 = vld [vmem:[#allocation145_spill] sm:$0xff]  ;;  %v11809_v19 = vld [vmem:[#allocation143_spill] sm:$0xff]  ;;  %v4302_v59 = vld [vmem:[%s10086_s10 + $0x28] sm:$0xff] }
 0x4ff   : > { %5919 = vrcp.f32 %v3251_v48  ;;  %4261 = vperm.xlu0 %5233, %v4247_v30   ;;  %v3685_v53 = vmul.f32 %v5910_v15, %v11807_v17 }
 0x500   : > { %v3911_v24 = vpack.c.bf16 %v3747_v3, %v3745_v47  ;;  %v3910_v28 = vpack.c.bf16 %v3746_v63, %v3744_v46  ;;  %5921 = vrcp.f32 %v3344_v61  ;;  %v11810_v61 = vld [vmem:[#allocation129_spill] sm:$0xff]  ;;  %v11811_v63 = vld [vmem:[#allocation142_spill] sm:$0xff] }
 0x501   : > { %v5912_v29 = vpop.eup %5911  ;;  %4025 = vmatpush1.bf16.xpose.msra.mxu1 %v3878_v0  ;;  %4320 = vperm.xlu1 %5234, %v4298_v32   ;;  %v3254_v33 = vpop.xlane.xlu1 %3253  ;;  %v3684_v0 = vmul.f32 %v5910_v15, %v11810_v61  ;;  %v4299_v47 = vld [vmem:[%s10086_s10 + $0x10] sm:$0xff] }
 0x502   : > { %4065 = vmatprep.subr.bf16.mxu0 %v3911_v24  ;;  %v3347_v41 = vpop.xlane.xlu0 %3346  ;;  %v3687_v30 = vmul.f32 %v5912_v29, %v11808_v40  ;;  %v3686_v48 = vmul.f32 %v5912_v29, %v11809_v19  ;;  %v5914_v49 = vpop.eup %5913  ;;  %v11813_v29 = vld [vmem:[#allocation139_spill] sm:$0xff]  ;;  %v4304_v19 = vld [vmem:[%s10086_s10 + $0x38] sm:$0xff] }
 0x503   : > { %5923 = vrcp.f32 %v3347_v41  ;;  %4315 = vperm.xlu0 %5233, %v4297_v11   ;;  %4066 = vmatpush1.bf16.xpose.msra.mxu0 %v3910_v28  ;;  %v3749_v24 = vmul.f32 %v5914_v49, %v11811_v63  ;;  %v11812_v11 = vld [vmem:[#allocation141_spill] sm:$0xff] }
 0x504   : > { %v3881_v32 = vpack.c.bf16 %v3687_v30, %v3685_v53  ;;  %5925 = vrcp.f32 %v3254_v33  ;;  %v3880_v20 = vpack.c.bf16 %v3686_v48, %v3684_v0  ;;  %v3748_v28 = vmul.f32 %v5914_v49, %v11812_v11  ;;  %v11814_v48 = vld [vmem:[#allocation147_spill] sm:$0xff]  ;;  %v11815_v0 = vld [vmem:[#allocation148_spill] sm:$0xff]  ;;  %v11817_v11 = vld [vmem:[#allocation146_spill] sm:$0xff] }
 0x505   : > { %v5916_v56 = vpop.eup %5915  ;;  %4330 = vperm.xlu1 %5234, %v4300_v62   ;;  %v3350_v3 = vpop.xlane.xlu1 %3349  ;;  %v4301_v62 = vld [vmem:[%s10086_s10 + $0x20] sm:$0xff] }
 0x506   : > { %4026 = vmatprep.subr.bf16.mxu1 %v3881_v32  ;;  %v3257_v46 = vpop.xlane.xlu0 %3256  ;;  %v3751_v15 = vmul.f32 %v5916_v56, %v8637_v38  ;;  %v3750_v41 = vmul.f32 %v5916_v56, %v11813_v29  ;;  %v5918_v17 = vpop.eup %5917  ;;  %v11816_v56 = vld [vmem:[#allocation140_spill] sm:$0xff]  ;;  %v11818_v29 = vld [vmem:[#allocation150_spill] sm:$0xff] }
 0x507   : > { %5927 = vrcp.f32 %v3257_v46  ;;  %4325 = vperm.xlu0 %5233, %v4299_v47   ;;  %v3689_v49 = vmul.f32 %v5918_v17, %v11814_v48  ;;  %v4303_v46 = vld [vmem:[%s10086_s10 + $0x30] sm:$0xff] }
 0x508   : > { %v3913_v33 = vpack.c.bf16 %v3751_v15, %v3749_v24  ;;  %v3912_v53 = vpack.c.bf16 %v3750_v41, %v3748_v28  ;;  %5929 = vrcp.f32 %v3350_v3  ;;  %v3688_v3 = vmul.f32 %v5918_v17, %v11816_v56  ;;  %v4306_v15 = vld [vmem:[%s10086_s10 + $0x48] sm:$0xff] }
 0x509   : > { %v5920_v40 = vpop.eup %5919  ;;  %4027 = vmatpush1.bf16.xpose.msra.mxu1 %v3880_v20  ;;  %4340 = vperm.xlu1 %5234, %v4302_v59   ;;  %v3260_v30 = vpop.xlane.xlu1 %3259  ;;  %v11819_v17 = vld [vmem:[#allocation144_spill] sm:$0xff] }
 0x50a   : > { %4067 = vmatprep.subr.bf16.mxu0 %v3913_v33  ;;  %v3353_v38 = vpop.xlane.xlu0 %3352  ;;  %v3691_v61 = vmul.f32 %v5920_v40, %v8678_v25  ;;  %v3690_v32 = vmul.f32 %v5920_v40, %v11815_v0  ;;  %v5922_v47 = vpop.eup %5921  ;;  %v4308_v0 = vld [vmem:[%s10086_s10 + $0x58] sm:$0xff] }
 0x50b   : > { %5931 = vrcp.f32 %v3353_v38  ;;  %4335 = vperm.xlu0 %5233, %v4301_v62   ;;  %4068 = vmatpush1.bf16.xpose.msra.mxu0 %v3912_v53  ;;  %v3753_v28 = vmul.f32 %v5922_v47, %v11817_v11  ;;  %v3752_v33 = vmul.f32 %v5922_v47, %v11819_v17  ;;  %v11820_v62 = vld [vmem:[#allocation149_spill] sm:$0xff]  ;;  %v4305_v38 = vld [vmem:[%s10086_s10 + $0x40] sm:$0xff] }
 0x50c   : > { %v3883_v20 = vpack.c.bf16 %v3691_v61, %v3689_v49  ;;  %5933 = vrcp.f32 %v3260_v30  ;;  %v3882_v24 = vpack.c.bf16 %v3690_v32, %v3688_v3  ;;  %v11821_v32 = vld [vmem:[#allocation159_spill] sm:$0xff] }
 0x50d   : > { %v5924_v59 = vpop.eup %5923  ;;  %4350 = vperm.xlu1 %5234, %v4304_v19   ;;  %v3356_v63 = vpop.xlane.xlu1 %3355  ;;  %v11822_v3 = vld [vmem:[#allocation151_spill] sm:$0xff] }
 0x50e   : > { %4028 = vmatprep.subr.bf16.mxu1 %v3883_v20  ;;  %v3263_v25 = vpop.xlane.xlu0 %3262  ;;  %v3755_v41 = vmul.f32 %v5924_v59, %v11818_v29  ;;  %v3754_v53 = vmul.f32 %v5924_v59, %v11820_v62  ;;  %v5926_v40 = vpop.eup %5925  ;;  %v11823_v59 = vld [vmem:[#allocation152_spill] sm:$0xff] }
 0x50f   : > { %5935 = vrcp.f32 %v3263_v25  ;;  %4345 = vperm.xlu0 %5233, %v4303_v46   ;;  %v3693_v47 = vmul.f32 %v5926_v40, %v11821_v32  ;;  %v4307_v25 = vld [vmem:[%s10086_s10 + $0x50] sm:$0xff]  ;;  %v4310_v29 = vld [vmem:[%s10086_s10 + $0x68] sm:$0xff] }
 0x510   : > { %v3915_v30 = vpack.c.bf16 %v3755_v41, %v3753_v28  ;;  %v3914_v19 = vpack.c.bf16 %v3754_v53, %v3752_v33  ;;  %5937 = vrcp.f32 %v3356_v63  ;;  %v3692_v63 = vmul.f32 %v5926_v40, %v11823_v59  ;;  %v11824_v41 = vld [vmem:[#allocation153_spill] sm:$0xff]  ;;  %v11825_v33 = vld [vmem:[#allocation155_spill] sm:$0xff]  ;;  %v11826_v53 = vld [vmem:[#allocation156_spill] sm:$0xff] }
 0x511   : > { %v5928_v48 = vpop.eup %5927  ;;  %4029 = vmatpush1.bf16.xpose.msra.mxu1 %v3882_v24  ;;  %4360 = vperm.xlu1 %5234, %v4306_v15   ;;  %v3266_v49 = vpop.xlane.xlu1 %3265 }
 0x512   : > { %4069 = vmatprep.subr.bf16.mxu0 %v3915_v30  ;;  %v3359_v61 = vpop.xlane.xlu0 %3358  ;;  %v3695_v56 = vmul.f32 %v5928_v48, %v8741_v14  ;;  %v3694_v20 = vmul.f32 %v5928_v48, %v11822_v3  ;;  %v5930_v46 = vpop.eup %5929  ;;  %v11827_v30 = vld [vmem:[#allocation154_spill] sm:$0xff]  ;;  %v11828_v3 = vld [vmem:[#allocation164_spill] sm:$0xff] }
 0x513   : > { %5939 = vrcp.f32 %v3359_v61  ;;  %4355 = vperm.xlu0 %5233, %v4305_v38   ;;  %4070 = vmatpush1.bf16.xpose.msra.mxu0 %v3914_v19  ;;  %v3757_v17 = vmul.f32 %v5930_v46, %v11824_v41  ;;  %v3756_v40 = vmul.f32 %v5930_v46, %v11826_v53  ;;  %v11830_v41 = vld [vmem:[#allocation158_spill] sm:$0xff]  ;;  %v11832_v53 = vld [vmem:[#allocation168_spill] sm:$0xff] }
 0x514   : > { %v3885_v24 = vpack.c.bf16 %v3695_v56, %v3693_v47  ;;  %5941 = vrcp.f32 %v3266_v49  ;;  %v3884_v28 = vpack.c.bf16 %v3694_v20, %v3692_v63  ;;  %v4309_v49 = vld [vmem:[%s10086_s10 + $0x60] sm:$0xff]  ;;  %v4312_v56 = vld [vmem:[%s10086_s10 + $0x78] sm:$0xff] }
 0x515   : > { %v5932_v15 = vpop.eup %5931  ;;  %4370 = vperm.xlu1 %5234, %v4308_v0   ;;  %v3362_v11 = vpop.xlane.xlu1 %3361 }
 0x516   : > { %4030 = vmatprep.subr.bf16.mxu1 %v3885_v24  ;;  %v3269_v14 = vpop.xlane.xlu0 %3268  ;;  %v3759_v62 = vmul.f32 %v5932_v15, %v11825_v33  ;;  %v3758_v38 = vmul.f32 %v5932_v15, %v11827_v30  ;;  %v5934_v19 = vpop.eup %5933  ;;  %v11829_v24 = vld [vmem:[#allocation157_spill] sm:$0xff]  ;;  %v11833_v30 = vld [vmem:[#allocation160_spill] sm:$0xff] }
 0x517   : > { %5943 = vrcp.f32 %v3269_v14  ;;  %4365 = vperm.xlu0 %5233, %v4307_v25   ;;  %v3697_v20 = vmul.f32 %v5934_v19, %v11828_v3  ;;  %v3696_v25 = vmul.f32 %v5934_v19, %v11829_v24  ;;  %v11831_v33 = vld [vmem:[#allocation161_spill] sm:$0xff]  ;;  %v11834_v3 = vld [vmem:[#allocation176_spill] sm:$0xff]  ;;  %v11835_v24 = vld [vmem:[#allocation162_spill] sm:$0xff] }
 0x518   : > { %v3917_v48 = vpack.c.bf16 %v3759_v62, %v3757_v17  ;;  %v3916_v61 = vpack.c.bf16 %v3758_v38, %v3756_v40  ;;  %5945 = vrcp.f32 %v3362_v11  ;;  %v4311_v11 = vld [vmem:[%s10086_s10 + $0x70] sm:$0xff] }
 0x519   : > { %v5936_v0 = vpop.eup %5935  ;;  %4031 = vmatpush1.bf16.xpose.msra.mxu1 %v3884_v28  ;;  %4380 = vperm.xlu1 %5234, %v4310_v29   ;;  %v3272_v32 = vpop.xlane.xlu1 %3271 }
 0x51a   : > { %4071 = vmatprep.subr.bf16.mxu0 %v3917_v48  ;;  %v3365_v47 = vpop.xlane.xlu0 %3364  ;;  %v3699_v46 = vmul.f32 %v5936_v0, %v11646_v4  ;;  %v3698_v59 = vmul.f32 %v5936_v0, %v11645_v31  ;;  %v5938_v63 = vpop.eup %5937  ;;  %v4879_v31 = vld [vmem:[%s10088_s12 + $0x8] sm:$0xff] }
 0x51b   : > { %5947 = vrcp.f32 %v3365_v47  ;;  %4375 = vperm.xlu0 %5233, %v4309_v49   ;;  %4072 = vmatpush1.bf16.xpose.msra.mxu0 %v3916_v61  ;;  %v3761_v17 = vmul.f32 %v5938_v63, %v11830_v41  ;;  %v3760_v40 = vmul.f32 %v5938_v63, %v11832_v53  ;;  %v4878_v49 = vld [vmem:[%s10088_s12] sm:$0xff] }
 0x51c   : > { %v3887_v15 = vpack.c.bf16 %v3699_v46, %v3697_v20  ;;  %5949 = vrcp.f32 %v3272_v32  ;;  %v3886_v29 = vpack.c.bf16 %v3698_v59, %v3696_v25 }
 0x51d   : > { %v5940_v28 = vpop.eup %5939  ;;  %4390 = vperm.xlu1 %5234, %v4312_v56   ;;  %v3368_v14 = vpop.xlane.xlu1 %3367  ;;  %v4881_v56 = vld [vmem:[%s10088_s12 + $0x18] sm:$0xff] }
 0x51e   : > { %4032 = vmatprep.subr.bf16.mxu1 %v3887_v15  ;;  %v3275_v4 = vpop.xlane.xlu0 %3274  ;;  %v3763_v62 = vmul.f32 %v5940_v28, %v11831_v33  ;;  %v3762_v38 = vmul.f32 %v5940_v28, %v11833_v30  ;;  %v5942_v19 = vpop.eup %5941 }
 0x51f   : > { %5951 = vrcp.f32 %v3275_v4  ;;  %4385 = vperm.xlu0 %5233, %v4311_v11   ;;  %v3701_v20 = vmul.f32 %v5942_v19, %v11834_v3  ;;  %v3700_v25 = vmul.f32 %v5942_v19, %v11835_v24  ;;  %v4880_v11 = vld [vmem:[%s10088_s12 + $0x10] sm:$0xff] }
 0x520   : > { %v3919_v48 = vpack.c.bf16 %v3763_v62, %v3761_v17  ;;  %v3918_v61 = vpack.c.bf16 %v3762_v38, %v3760_v40  ;;  %5953 = vrcp.f32 %v3368_v14  ;;  %v11837_v17 = vld [vmem:[#allocation174_spill] sm:$0xff] }
 0x521   : > { %v5944_v0 = vpop.eup %5943  ;;  %4033 = vmatpush1.bf16.xpose.msra.mxu1 %v3886_v29  ;;  %4889 = vperm.xlu1 %5234, %v4879_v31   ;;  %v3278_v32 = vpop.xlane.xlu1 %3277  ;;  %v11836_v31 = vld [vmem:[#allocation183_spill] sm:$0xff] }
 0x522   : > { %4073 = vmatprep.subr.bf16.mxu0 %v3919_v48  ;;  %v3371_v47 = vpop.xlane.xlu0 %3370  ;;  %v3703_v46 = vmul.f32 %v5944_v0, %v8885_v44  ;;  %v3702_v59 = vmul.f32 %v5944_v0, %v8878_v21  ;;  %v5946_v63 = vpop.eup %5945  ;;  %v11838_v48 = vld [vmem:[#allocation165_spill] sm:$0xff] }
 0x523   : > { %5955 = vrcp.f32 %v3371_v47  ;;  %4884 = vperm.xlu0 %5233, %v4878_v49   ;;  %4074 = vmatpush1.bf16.xpose.msra.mxu0 %v3918_v61  ;;  %v3765_v21 = vmul.f32 %v5946_v63, %v8903_v13  ;;  %v3764_v41 = vmul.f32 %v5946_v63, %v11836_v31  ;;  %v11839_v0 = vld [vmem:[#allocation181_spill] sm:$0xff] }
 0x524   : > { %v3889_v15 = vpack.c.bf16 %v3703_v46, %v3701_v20  ;;  %5957 = vrcp.f32 %v3278_v32  ;;  %v3888_v29 = vpack.c.bf16 %v3702_v59, %v3700_v25  ;;  %v11840_v63 = vld [vmem:[#allocation169_spill] sm:$0xff]  ;;  %v11841_v25 = vld [vmem:[#allocation166_spill] sm:$0xff] }
 0x525   : > { %v5948_v28 = vpop.eup %5947  ;;  %4899 = vperm.xlu1 %5234, %v4881_v56   ;;  %v3374_v14 = vpop.xlane.xlu1 %3373 }
 0x526   : > { %4034 = vmatprep.subr.bf16.mxu1 %v3889_v15  ;;  %v3281_v44 = vpop.xlane.xlu0 %3280  ;;  %v3767_v4 = vmul.f32 %v5948_v28, %v8920_v16  ;;  %v3766_v33 = vmul.f32 %v5948_v28, %v11837_v17  ;;  %v5950_v62 = vpop.eup %5949  ;;  %v11842_v15 = vld [vmem:[#allocation167_spill] sm:$0xff] }
 0x527   : > { %5959 = vrcp.f32 %v3281_v44  ;;  %4894 = vperm.xlu0 %5233, %v4880_v11   ;;  %v3705_v49 = vmul.f32 %v5950_v62, %v11838_v48  ;;  %v3704_v32 = vmul.f32 %v5950_v62, %v11839_v0 }
 0x528   : > { %v3921_v53 = vpack.c.bf16 %v3767_v4, %v3765_v21  ;;  %v3920_v40 = vpack.c.bf16 %v3766_v33, %v3764_v41  ;;  %5961 = vrcp.f32 %v3374_v14  ;;  %v11843_v4 = vld [vmem:[#allocation192_spill] sm:$0xff]  ;;  %v11844_v33 = vld [vmem:[#allocation179_spill] sm:$0xff] }
 0x529   : > { %v5952_v30 = vpop.eup %5951  ;;  %4035 = vmatpush1.bf16.xpose.msra.mxu1 %v3888_v29  ;;  %v3284_v38 = vpop.xlane.xlu1 %3283 }
 0x52a   : > { %4075 = vmatprep.subr.bf16.mxu0 %v3921_v53  ;;  %v3377_v19 = vpop.xlane.xlu0 %3376  ;;  %v3707_v13 = vmul.f32 %v5952_v30, %v8951_v45  ;;  %v3706_v16 = vmul.f32 %v5952_v30, %v8945_v57  ;;  %v5954_v61 = vpop.eup %5953 }
 0x52b   : > { %5963 = vrcp.f32 %v3377_v19  ;;  %4076 = vmatpush1.bf16.xpose.msra.mxu0 %v3920_v40  ;;  %v3769_v59 = vmul.f32 %v5954_v61, %v8965_v2  ;;  %v3768_v45 = vmul.f32 %v5954_v61, %v11841_v25 }
 0x52c   : > { %v3891_v47 = vpack.c.bf16 %v3707_v13, %v3705_v49  ;;  %5965 = vrcp.f32 %v3284_v38  ;;  %v3890_v20 = vpack.c.bf16 %v3706_v16, %v3704_v32  ;;  %v11845_v13 = vld [vmem:[#allocation177_spill] sm:$0xff]  ;;  %v11846_v16 = vld [vmem:[#allocation190_spill] sm:$0xff] }
 0x52d   : > { %v5956_v56 = vpop.eup %5955  ;;  %v3380_v3 = vpop.xlane.xlu1 %3379 }
 0x52e   : > { %4036 = vmatprep.subr.bf16.mxu1 %v3891_v47  ;;  %v3287_v46 = vpop.xlane.xlu0 %3286  ;;  %v3771_v24 = vmul.f32 %v5956_v56, %v11840_v63  ;;  %v3770_v57 = vmul.f32 %v5956_v56, %v11842_v15  ;;  %v5958_v11 = vpop.eup %5957  ;;  %v11848_v63 = vld [vmem:[#allocation170_spill] sm:$0xff] }
 0x52f   : > { %5967 = vrcp.f32 %v3287_v46  ;;  %v3709_v31 = vmul.f32 %v5958_v11, %v11843_v4  ;;  %v3708_v62 = vmul.f32 %v5958_v11, %v11844_v33 }
 0x530   : > { %v3923_v28 = vpack.c.bf16 %v3771_v24, %v3769_v59  ;;  %v3922_v14 = vpack.c.bf16 %v3770_v57, %v3768_v45  ;;  %5969 = vrcp.f32 %v3380_v3 }
 0x531   : > { %v5960_v29 = vpop.eup %5959  ;;  %4037 = vmatpush1.bf16.xpose.msra.mxu1 %v3890_v20  ;;  %v3290_v44 = vpop.xlane.xlu1 %3289  ;;  %v11847_v20 = vld [vmem:[#allocation172_spill] sm:$0xff] }
 0x532   : > { %4077 = vmatprep.subr.bf16.mxu0 %v3923_v28  ;;  %v3383_v21 = vpop.xlane.xlu0 %3382  ;;  %v3711_v2 = vmul.f32 %v5960_v29, %v9013_v27  ;;  %v3710_v41 = vmul.f32 %v5960_v29, %v9001_v7  ;;  %v5962_v17 = vpop.eup %5961 }
 0x533   : > { %5971 = vrcp.f32 %v3383_v21  ;;  %4078 = vmatpush1.bf16.xpose.msra.mxu0 %v3922_v14  ;;  %v3773_v48 = vmul.f32 %v5962_v17, %v9025_v23  ;;  %v3772_v27 = vmul.f32 %v5962_v17, %v11845_v13  ;;  %v11849_v14 = vld [vmem:[#allocation188_spill] sm:$0xff]  ;;  %v11851_v21 = vld [vmem:[#allocation175_spill] sm:$0xff] }
 0x534   : > { %v3893_v53 = vpack.c.bf16 %v3711_v2, %v3709_v31  ;;  %5973 = vrcp.f32 %v3290_v44  ;;  %v3892_v38 = vpack.c.bf16 %v3710_v41, %v3708_v62  ;;  %v11850_v44 = vld [vmem:[#allocation173_spill] sm:$0xff]  ;;  %v11852_v62 = vld [vmem:[#allocation186_spill] sm:$0xff] }
 0x535   : > { %v5964_v40 = vpop.eup %5963  ;;  %v3386_v30 = vpop.xlane.xlu1 %3385 }
 0x536   : > { %4038 = vmatprep.subr.bf16.mxu1 %v3893_v53  ;;  %v3293_v19 = vpop.xlane.xlu0 %3292  ;;  %v3775_v49 = vmul.f32 %v5964_v40, %v9045_v55  ;;  %v3774_v7 = vmul.f32 %v5964_v40, %v11846_v16  ;;  %v5966_v61 = vpop.eup %5965 }
 0x537   : > { %5975 = vrcp.f32 %v3293_v19  ;;  %v3713_v46 = vmul.f32 %v5966_v61, %v11847_v20  ;;  %v3712_v24 = vmul.f32 %v5966_v61, %v11848_v63  ;;  %v11854_v61 = vld [vmem:[#allocation206_spill] sm:$0xff] }
 0x538   : > { %v3925_v0 = vpack.c.bf16 %v3775_v49, %v3773_v48  ;;  %v3924_v32 = vpack.c.bf16 %v3774_v7, %v3772_v27  ;;  %5977 = vrcp.f32 %v3386_v30 }
 0x539   : > { %v5968_v47 = vpop.eup %5967  ;;  %4039 = vmatpush1.bf16.xpose.msra.mxu1 %v3892_v38  ;;  %v3296_v56 = vpop.xlane.xlu1 %3295  ;;  %v11853_v38 = vld [vmem:[#allocation199_spill] sm:$0xff] }
 0x53a   : > { %4079 = vmatprep.subr.bf16.mxu0 %v3925_v0  ;;  %v3389_v3 = vpop.xlane.xlu0 %3388  ;;  %v3715_v23 = vmul.f32 %v5968_v47, %v9069_v37  ;;  %v3714_v55 = vmul.f32 %v5968_v47, %v9065_v36  ;;  %v5970_v59 = vpop.eup %5969  ;;  %v11856_v47 = vld [vmem:[#allocation195_spill] sm:$0xff] }
 0x53b   : > { %5979 = vrcp.f32 %v3389_v3  ;;  %4080 = vmatpush1.bf16.xpose.msra.mxu0 %v3924_v32  ;;  %v3777_v28 = vmul.f32 %v5970_v59, %v9087_v51  ;;  %v3776_v37 = vmul.f32 %v5970_v59, %v11850_v44  ;;  %v11855_v32 = vld [vmem:[#allocation197_spill] sm:$0xff]  ;;  %v11857_v59 = vld [vmem:[#allocation204_spill] sm:$0xff] }
 0x53c   : > { %v3895_v25 = vpack.c.bf16 %v3715_v23, %v3713_v46  ;;  %5981 = vrcp.f32 %v3296_v56  ;;  %v3894_v57 = vpack.c.bf16 %v3714_v55, %v3712_v24 }
 0x53d   : > { %v5972_v45 = vpop.eup %5971  ;;  %v3392_v15 = vpop.xlane.xlu1 %3391 }
 0x53e   : > { %4040 = vmatprep.subr.bf16.mxu1 %v3895_v25  ;;  %v3299_v11 = vpop.xlane.xlu0 %3298  ;;  %v3779_v29 = vmul.f32 %v5972_v45, %v11849_v14  ;;  %v3778_v36 = vmul.f32 %v5972_v45, %v11851_v21  ;;  %v5974_v4 = vpop.eup %5973  ;;  %v11858_v45 = vld [vmem:[#allocation193_spill] sm:$0xff]  ;;  %v11859_v21 = vld [vmem:[#allocation203_spill] sm:$0xff] }
 0x53f   : > { %5983 = vrcp.f32 %v3299_v11  ;;  %v3717_v53 = vmul.f32 %v5974_v4, %v11852_v62  ;;  %v3716_v19 = vmul.f32 %v5974_v4, %v11853_v38  ;;  %v11861_v62 = vld [vmem:[#allocation208_spill] sm:$0xff] }
 0x540   : > { %v3927_v31 = vpack.c.bf16 %v3779_v29, %v3777_v28  ;;  %v3926_v2 = vpack.c.bf16 %v3778_v36, %v3776_v37  ;;  %5985 = vrcp.f32 %v3392_v15  ;;  %v11860_v36 = vld [vmem:[#allocation32_spill] sm:$0xff] }
 0x541   : > { %v5976_v41 = vpop.eup %5975  ;;  %4041 = vmatpush1.bf16.xpose.msra.mxu1 %v3894_v57  ;;  %v3302_v17 = vpop.xlane.xlu1 %3301 }
 0x542   : > { %4081 = vmatprep.subr.bf16.mxu0 %v3927_v31  ;;  %v3395_v33 = vpop.xlane.xlu0 %3394  ;;  %v3719_v51 = vmul.f32 %v5976_v41, %v9133_v39  ;;  %v3718_v40 = vmul.f32 %v5976_v41, %v9127_v50  ;;  %v5978_v30 = vpop.eup %5977 }
 0x543   : > { %5987 = vrcp.f32 %v3395_v33  ;;  %4082 = vmatpush1.bf16.xpose.msra.mxu0 %v3926_v2  ;;  %v3781_v7 = vmul.f32 %v5978_v30, %v9147_v12  ;;  %v3780_v39 = vmul.f32 %v5978_v30, %v11855_v32 }
 0x544   : > { %v3897_v48 = vpack.c.bf16 %v3719_v51, %v3717_v53  ;;  %5989 = vrcp.f32 %v3302_v17  ;;  %v3896_v27 = vpack.c.bf16 %v3718_v40, %v3716_v19  ;;  %v11862_v40 = vld [vmem:[#allocation202_spill] sm:$0xff] }
 0x545   : > { %v5980_v49 = vpop.eup %5979  ;;  %v3398_v13 = vpop.xlane.xlu1 %3397 }
 0x546   : > { %4042 = vmatprep.subr.bf16.mxu1 %v3897_v48  ;;  %v3305_v16 = vpop.xlane.xlu0 %3304  ;;  %v3783_v0 = vmul.f32 %v5980_v49, %v11854_v61  ;;  %v3782_v50 = vmul.f32 %v5980_v49, %v11856_v47  ;;  %v5982_v56 = vpop.eup %5981 }
 0x547   : > { %5991 = vrcp.f32 %v3305_v16  ;;  %v3721_v63 = vmul.f32 %v5982_v56, %v11857_v59  ;;  %v3720_v15 = vmul.f32 %v5982_v56, %v11858_v45 }
 0x548   : > { %v3929_v3 = vpack.c.bf16 %v3783_v0, %v3781_v7  ;;  %v3928_v20 = vpack.c.bf16 %v3782_v50, %v3780_v39  ;;  %5993 = vrcp.f32 %v3398_v13  ;;  %v11863_v50 = vld [vmem:[#allocation180_spill] sm:$0xff] }
 0x549   : > { %v5984_v46 = vpop.eup %5983  ;;  %4043 = vmatpush1.bf16.xpose.msra.mxu1 %v3896_v27  ;;  %v3308_v23 = vpop.xlane.xlu1 %3307 }
 0x54a   : > { %4083 = vmatprep.subr.bf16.mxu0 %v3929_v3  ;;  %v3401_v55 = vpop.xlane.xlu0 %3400  ;;  %v3723_v12 = vmul.f32 %v5984_v46, %v9185_v5  ;;  %v3722_v24 = vmul.f32 %v5984_v46, %v9180_v22  ;;  %v5986_v25 = vpop.eup %5985 }
 0x54b   : > { %5995 = vrcp.f32 %v3401_v55  ;;  %4084 = vmatpush1.bf16.xpose.msra.mxu0 %v3928_v20  ;;  %v3785_v44 = vmul.f32 %v5986_v25, %v9193_v8  ;;  %v3784_v5 = vmul.f32 %v5986_v25, %v11859_v21  ;;  %v11866_v25 = vld [vmem:[#allocation184_spill] sm:$0xff] }
 0x54c   : > { %v3899_v57 = vpack.c.bf16 %v3723_v12, %v3721_v63  ;;  %5997 = vrcp.f32 %v3308_v23  ;;  %v3898_v14 = vpack.c.bf16 %v3722_v24, %v3720_v15  ;;  %v11865_v24 = vld [vmem:[#allocation182_spill] sm:$0xff] }
 0x54d   : > { %v5988_v11 = vpop.eup %5987  ;;  %v3404_v28 = vpop.xlane.xlu1 %3403 }
 0x54e   : > { %4044 = vmatprep.subr.bf16.mxu1 %v3899_v57  ;;  %v3311_v29 = vpop.xlane.xlu0 %3310  ;;  %v3787_v37 = vmul.f32 %v5988_v11, %v9207_v42  ;;  %v3786_v22 = vmul.f32 %v5988_v11, %v11860_v36  ;;  %v5990_v4 = vpop.eup %5989  ;;  %v11869_v36 = vld [vmem:[#allocation185_spill] sm:$0xff] }
 0x54f   : > { %5999 = vrcp.f32 %v3311_v29  ;;  %v3725_v53 = vmul.f32 %v5990_v4, %v11861_v62  ;;  %v3724_v30 = vmul.f32 %v5990_v4, %v11862_v40  ;;  %v11867_v29 = vld [vmem:[#allocation12_spill] sm:$0xff] }
 0x550   : > { %v3931_v31 = vpack.c.bf16 %v3787_v37, %v3785_v44  ;;  %v3930_v2 = vpack.c.bf16 %v3786_v22, %v3784_v5  ;;  %6001 = vrcp.f32 %v3404_v28 }
 0x551   : > { %v5992_v41 = vpop.eup %5991  ;;  %4045 = vmatpush1.bf16.xpose.msra.mxu1 %v3898_v14  ;;  %v3314_v17 = vpop.xlane.xlu1 %3313 }
 0x552   : > { %4085 = vmatprep.subr.bf16.mxu0 %v3931_v31  ;;  %v3407_v33 = vpop.xlane.xlu0 %3406  ;;  %v3727_v8 = vmul.f32 %v5992_v41, %v9229_v34  ;;  %v3726_v42 = vmul.f32 %v5992_v41, %v9220_v1  ;;  %v5994_v51 = vpop.eup %5993 }
 0x553   : > { %6003 = vrcp.f32 %v3407_v33  ;;  %4086 = vmatpush1.bf16.xpose.msra.mxu0 %v3930_v2  ;;  %v3789_v27 = vmul.f32 %v5994_v51, %v9237_v9  ;;  %v3788_v34 = vmul.f32 %v5994_v51, %v9234_v54  ;;  %v11864_v54 = vld [vmem:[#allocation178_spill] sm:$0xff]  ;;  %v11870_v33 = vld [vmem:[#allocation213_spill] sm:$0xff] }
 0x554   : > { %v3901_v38 = vpack.c.bf16 %v3727_v8, %v3725_v53  ;;  %6005 = vrcp.f32 %v3314_v17  ;;  %v3900_v49 = vpack.c.bf16 %v3726_v42, %v3724_v30  ;;  %v11871_v53 = vld [vmem:[#allocation34_spill] sm:$0xff] }
 0x555   : > { %v5996_v19 = vpop.eup %5995  ;;  %v3410_v48 = vpop.xlane.xlu1 %3409  ;;  %v11872_v42 = vld [vmem:[#allocation18_spill] sm:$0xff] }
 0x556   : > { %4046 = vmatprep.subr.bf16.mxu1 %v3901_v38  ;;  %v3317_v13 = vpop.xlane.xlu0 %3316  ;;  %v3791_v16 = vmul.f32 %v5996_v19, %v9247_v6  ;;  %v3790_v1 = vmul.f32 %v5996_v19, %v9244_v52  ;;  %v5998_v7 = vpop.eup %5997  ;;  %v11873_v19 = vld [vmem:[#allocation189_spill] sm:$0xff] }
 0x557   : > { %6007 = vrcp.f32 %v3317_v13  ;;  %v3729_v56 = vmul.f32 %v5998_v7, %v11863_v50  ;;  %v3728_v52 = vmul.f32 %v5998_v7, %v11864_v54  ;;  %v11877_v7 = vld [vmem:[#allocation187_spill] sm:$0xff] }
 0x558   : > { %6009 = vrcp.f32 %v3410_v48  ;;  %v3933_v61 = vpack.c.bf16 %v3791_v16, %v3789_v27  ;;  %v3932_v0 = vpack.c.bf16 %v3790_v1, %v3788_v34  ;;  %v11876_v34 = vld [vmem:[#allocation14_spill] sm:$0xff]  ;;  %v11878_v50 = vld [vmem:[#allocation39_spill] sm:$0xff] }
 0x559   : > { %v6000_v32 = vpop.eup %5999  ;;  %4047 = vmatpush1.bf16.xpose.msra.mxu1 %v3900_v49  ;;  %v3320_v39 = vpop.xlane.xlu1 %3319  ;;  %v11874_v49 = vld [vmem:[#allocation194_spill] sm:$0xff] }
 0x55a   : > { %4087 = vmatprep.subr.bf16.mxu0 %v3933_v61  ;;  %v3413_v47 = vpop.xlane.xlu0 %3412  ;;  %v3731_v9 = vmul.f32 %v6000_v32, %v9271_v18  ;;  %v3730_v6 = vmul.f32 %v6000_v32, %v9265_v26  ;;  %v6002_v3 = vpop.eup %6001 }
 0x55b   : > { %6011 = vrcp.f32 %v3413_v47  ;;  %4088 = vmatpush1.bf16.xpose.msra.mxu0 %v3932_v0  ;;  %v3793_v63 = vmul.f32 %v6002_v3, %v9280_v35  ;;  %v3792_v18 = vmul.f32 %v6002_v3, %v11865_v24  ;;  %v11868_v35 = vld [vmem:[#allocation207_spill] sm:$0xff]  ;;  %v11880_v3 = vld [vmem:[#allocation212_spill] sm:$0xff] }
 0x55c   : > { %v3903_v20 = vpack.c.bf16 %v3731_v9, %v3729_v56  ;;  %6013 = vrcp.f32 %v3320_v39  ;;  %v3902_v55 = vpack.c.bf16 %v3730_v6, %v3728_v52  ;;  %v11879_v9 = vld [vmem:[#allocation22_spill] sm:$0xff]  ;;  %v11881_v52 = vld [vmem:[#allocation211_spill] sm:$0xff] }
 0x55d   : > { %v6004_v46 = vpop.eup %6003  ;;  %v3416_v23 = vpop.xlane.xlu1 %3415 }
 0x55e   : > { %4048 = vmatprep.subr.bf16.mxu1 %v3903_v20  ;;  %v3323_v59 = vpop.xlane.xlu0 %3322  ;;  %v3795_v12 = vmul.f32 %v6004_v46, %v9291_v58  ;;  %v3794_v26 = vmul.f32 %v6004_v46, %v11866_v25  ;;  %v6006_v45 = vpop.eup %6005  ;;  %v11884_v25 = vmov 0  }
 0x55f   : > { %6015 = vrcp.f32 %v3323_v59  ;;  %v3733_v21 = vmul.f32 %v6006_v45, %v11868_v35  ;;  %v3732_v22 = vmul.f32 %v6006_v45, %v11869_v36 }
 0x560   : > { %v3935_v15 = vpack.c.bf16 %v3795_v12, %v3793_v63  ;;  %v3934_v57 = vpack.c.bf16 %v3794_v26, %v3792_v18  ;;  %6017 = vrcp.f32 %v3416_v23  ;;  %v11883_v63 = vld [vmem:[#allocation13_spill] sm:$0xff] }
 0x561   : > { %v6008_v11 = vpop.eup %6007  ;;  %4049 = vmatpush1.bf16.xpose.msra.mxu1 %v3902_v55  ;;  %v593_v28 = vpop.permute.xlu1 %592  ;;  %v11882_v55 = vld [vmem:[#allocation11_spill] sm:$0xff] }
 0x562   : > { %v6010_v14 = vpop.eup %6009  ;;  %v736_v44 = vadd.f32 %v11867_v29, %v593_v28  ;;  %4089 = vmatprep.subr.bf16.mxu0 %v3935_v15  ;;  %v3419_v37 = vpop.xlane.xlu0 %3418  ;;  %v3735_v58 = vmul.f32 %v6008_v11, %v9313_v43  ;;  %v3734_v5 = vmul.f32 %v6008_v11, %v9308_v60  ;;  %v734_v59 = vadd.f32 %v11882_v55, %v593_v28 }
 0x563   : > { %6019 = vrcp.f32 %v3419_v37  ;;  %4090 = vmatpush1.bf16.xpose.msra.mxu0 %v3934_v57  ;;  %v3797_v17 = vmul.f32 %v6010_v14, %v9321_v10  ;;  %v3796_v8 = vmul.f32 %v6010_v14, %v11871_v53  ;;  %v11875_v10 = vld [vmem:[#allocation191_spill] sm:$0xff] }
 0x564   : > { %v3809_v4 = vpack.c.bf16 %v736_v44, %v736_v44  ;;  %v3905_v31 = vpack.c.bf16 %v3735_v58, %v3733_v21  ;;  %v3904_v41 = vpack.c.bf16 %v3734_v5, %v3732_v22  ;;  %v3808_v24 = vpack.c.bf16 %v734_v59, %v734_v59 }
 0x565   : > { %v6012_v2 = vpop.eup %6011 }
 0x566   : > { %4050 = vmatprep.subr.bf16.mxu1 %v3905_v31  ;;  %4054 = vmatprep.mubr.bf16.mxu1 %v3809_v4  ;;  %v3799_v62 = vmul.f32 %v6012_v2, %v11870_v33  ;;  %v3798_v43 = vmul.f32 %v6012_v2, %v11872_v42  ;;  %v6014_v51 = vpop.eup %6013  ;;  %v5242_v33 = vld [vmem:[%s10081_s5 + $0x8] sm:$0xff]  }
 0x567   : > { %v3737_v48 = vmul.f32 %v6014_v51, %v11873_v19  ;;  %v3736_v61 = vmul.f32 %v6014_v51, %v11877_v7 }
 0x568   : > { %v3937_v60 = vpack.c.bf16 %v3799_v62, %v3797_v17  ;;  %v3936_v40 = vpack.c.bf16 %v3798_v43, %v3796_v8  ;;  %v5241_v17 = vld [vmem:[%s10081_s5] sm:$0xff]   ;;  %v4119_v62 = vpop.permute.xlu1 %4118 }
 0x569   : > { %v6016_v30 = vpop.eup %6015  ;;  %4051 = vmatpush1.bf16.xpose.msra.mxu1 %v3904_v41 }
 0x56a   : > { %4091 = vmatprep.subr.bf16.mxu0 %v3937_v60  ;;  %v598_v38 = vpop.permute.xlu0 %597  ;;  %v3739_v13 = vmul.f32 %v6016_v30, %v11874_v49  ;;  %v3738_v27 = vmul.f32 %v6016_v30, %v11875_v10  ;;  %v6018_v16 = vpop.eup %6017 }
 0x56b   : > { %v740_v1 = vadd.f32 %v11876_v34, %v598_v38  ;;  %4092 = vmatpush1.bf16.xpose.msra.mxu0 %v3936_v40  ;;  %v3801_v56 = vmul.f32 %v6018_v16, %v11878_v50  ;;  %v3800_v54 = vmul.f32 %v6018_v16, %v11880_v3  ;;  %v738_v12 = vadd.f32 %v11883_v63, %v598_v38  ;;  %v6086_v16 = vld [vmem:[%s6342_s22 + $0x8] sm:$0xff] }
 0x56c   : > { %v3907_v0 = vpack.c.bf16 %v3739_v13, %v3737_v48  ;;  %v3906_v47 = vpack.c.bf16 %v3738_v27, %v3736_v61  ;;  %v4124_v53 = vpop.permute.xlu1 %4123  ;;  %v6085_v48 = vld [vmem:[%s6342_s22] sm:$0xff]  ;;  %v6087_v61 = vld [vmem:[%s6342_s22 + $0x10] sm:$0xff] }
 0x56d   : > { %v6020_v32 = vpop.eup %6019  ;;  %v3811_v39 = vpack.c.bf16 %v740_v1, %v740_v1  ;;  %v3810_v18 = vpack.c.bf16 %v738_v12, %v738_v12 }
 0x56e   : > { %4052 = vmatprep.subr.bf16.mxu1 %v3907_v0  ;;  %v3803_v6 = vmul.f32 %v6020_v32, %v11879_v9  ;;  %v3802_v20 = vmul.f32 %v6020_v32, %v11881_v52  ;;  %v4129_v42 = vpop.permute.xlu0 %4128 }
 0x56f   : > { %4095 = vmatprep.mubr.bf16.mxu0 %v3811_v39  ;;  %v6088_v39 = vld [vmem:[%s6342_s22 + $0x18] sm:$0xff] }
 0x570   : > { %v3939_v46 = vpack.c.bf16 %v3803_v6, %v3801_v56  ;;  %v3938_v23 = vpack.c.bf16 %v3802_v20, %v3800_v54  ;;  %v4134_v8 = vpop.permute.xlu1 %4133 }
 0x571   : > { %4053 = vmatpush1.bf16.xpose.msra.mxu1 %v3906_v47 }
 0x572   : > { %4093 = vmatprep.subr.bf16.mxu0 %v3939_v46  ;;  %v4220_v51 = vpop.permute.xlu0 %4219 }
 0x573   : > { %4094 = vmatpush1.bf16.xpose.msra.mxu0 %v3938_v23 }
 0x574   : > { %v4225_v43 = vpop.permute.xlu1 %4224 }
 0x576   : > { %v4252_v7 = vpop.permute.xlu0 %4251 }
 0x578   : > { %4055 = vmatmul.mubr.bf16.vlgmr.msra.gmra.mrb[132].mxu1 %v3808_v24  ;;  %v4257_v27 = vpop.permute.xlu1 %4256  ;;  %v6089_v24 = vld [vmem:[%s6342_s22 + $0x20] sm:$0xff] }
 0x579   : > { %4184 = vmatprep.mubr.bf16.mxu1 %v11884_v25 }
 0x57a   : > { %4096 = vmatmul.mubr.bf16.vlgmr.msra.gmra.mrb[156].mxu0 %v3810_v18  ;;  %v4230_v63 = vpop.permute.xlu0 %4229 }
 0x57b   : > { %4946 = vmatprep.mubr.bf16.mxu0 %v11884_v25 }
 0x57c   : > { %v4235_v20 = vpop.permute.xlu1 %4234 }
 0x5cb   : > { %v3974_v26 = vpop.f32.mrb[128].mxu1 }
 0x5cc   : > { %v3976_v45 = vpop.f32.mrb[129].mxu1 }
 0x5cd   : > { %v3978_v15 = vpop.f32.mrb[130].mxu1  ;;  %v4015_v57 = vpop.f32.mrb[152].mxu0 }
 0x5ce   : > { %v3979_v11 = vpop.f32.mrb[131].mxu1  ;;  %v4104_v14 = vpack.c.bf16 %v4015_v57, %v3974_v26  ;;  %v4017_v29 = vpop.f32.mrb[153].mxu0  ;;  %v6090_v15 = vld [vmem:[%s6342_s22 + $0x28] sm:$0xff] }
 0x5cf   : > { %v4105_v28 = vpack.c.bf16 %v4017_v29, %v3976_v45  ;;  %v4019_v44 = vpop.f32.mrb[154].mxu0  ;;  %v6091_v29 = vld [vmem:[%s6342_s22 + $0x30] sm:$0xff] }
 0x5d0   : > { %v4020_v37 = vpop.f32.mrb[155].mxu0 }
 0x5d1   : > { %4152 = vmatprep.subr.bf16.mxu1 %v4105_v28 }
 0x5d2   : > { %4153 = vmatpush1.bf16.msra.mxu1 %v4104_v14 }
 0x64b   : > { %v4056_v35 = vpop.f32.mrb[132].mxu1 }
 0x64c   : > { %v4058_v21 = vpop.f32.mrb[133].mxu1 }
 0x64d   : > { %v4060_v58 = vpop.f32.mrb[134].mxu1  ;;  %v4097_v5 = vpop.f32.mrb[156].mxu0 }
 0x64e   : > { %v4061_v36 = vpop.f32.mrb[135].mxu1  ;;  %v4106_v22 = vpack.c.bf16 %v4097_v5, %v4056_v35  ;;  %v4099_v4 = vpop.f32.mrb[157].mxu0  ;;  %v6092_v35 = vld [vmem:[%s6342_s22 + $0x38] sm:$0xff]  ;;  %s431_s22 = sand.u32 1, %s6147_s26  }
 0x64f   : > { %v4107_v31 = vpack.c.bf16 %v4099_v4, %v4058_v21  ;;  %v4101_v2 = vpop.f32.mrb[158].mxu0  ;;  %v4267_v36 = vpop.permute.xlu1 %4266  ;;  %s5063_s27 = sshll.u32 %s431_s22, 6  ;;  %s10035_s23 = scalar_lea.sflag [#allocation3], %s431_s22 }
 0x650   : > { %v4102_v41 = vpop.f32.mrb[159].mxu0  ;;  %v4262_v4 = vpop.permute.xlu0 %4261  ;;  %s433_s15 = scalar_lea.vmem [#allocation2], %s5063_s27  ;;  %s6097_s27 = sshll.u32 %s6158_s30, 4  ;;  %s6098_s27 = int_to_ptr.vmem [resolvable:$false] %s6097_s27 }
 0x651   : > { %4154 = vmatprep.subr.bf16.mxu1 %v4107_v31  ;;  %s4997_s16 = sshll.u32 %s433_s15, 4  ;;  %s6099_s17 = scalar_lea.vmem %s6098_s27, 2048  ;;  %s10029_s16 = int_to_ptr.vmem [resolvable:$true] %s4997_s16 }
 0x652   : > { %4155 = vmatpush1.bf16.msra.mxu1 %v4106_v22  ;;  %s6093_s24 = scalar_lea.vmem %s10029_s16, 1024  ;;  %p6100_p0 = scmp.lt.s32.totalorder %s10029_s16, %s6098_s27 }
 0x653   : > { %p6094_p11 = scmp.ne.s32.totalorder %s10029_s16, %s6093_s24  ;;  %p6101_p1 = scmp.lt.s32.totalorder %s6099_s17, %s6093_s24 }
 0x655   : > { %5148 = vmatmul.mubr.msk.bf16.vlgmr.msra.gmra.mrb[136].mxu1 %vm630_vm0, %v5241_v17  ;;  %p6095_p12 = pnand %p6094_p11, %p6269_p5  ;;  %p6102_p2 = por %p6101_p1, %p6100_p0 }
 0x656   : > { %4194 = vmatprep.mubr.bf16.mxu1 %v11884_v25 }
 0x657   : > { %p6096_p13 = pneg %p6095_p12 }
 0x659   : > { %p6103_p3 = pnand %p6102_p2, %p6096_p13 }
 0x65d   : > { %5149 = vmatmul.mubr.msk.bf16.gmra.mrb[140].mxu1 %vm630_vm0, %v5242_v33 }
 0x65e   : > { %4489 = vmatprep.mubr.bf16.mxu1 %v11884_v25 }
 0x728   : > { %v4186_v60 = vpop.f32.mrb[136].mxu1 }
 0x729   : > { %v4187_v40 = vadd.f32 %v4186_v60, %v4119_v62  ;;  %v4188_v30 = vpop.f32.mrb[137].mxu1  ;;  %v5248_v60 = vld [vmem:[%s10085_s9 + $0x28] sm:$0xff]  }
 0x72a   : > { %v4189_v38 = vadd.f32 %v4188_v30, %v4119_v62  ;;  %v4190_v19 = vpop.f32.mrb[138].mxu1  ;;  %v5250_v30 = vld [vmem:[%s10085_s9 + $0x38] sm:$0xff]  }
 0x72b   : > { %v9656_v49 = vadd.f32 %v6085_v48, %v4187_v40  ;;  %v4191_v13 = vadd.f32 %v4190_v19, %v4124_v53  ;;  %v4192_v10 = vpop.f32.mrb[139].mxu1  ;;  %v5249_v40 = vld [vmem:[%s10085_s9 + $0x30] sm:$0xff]  }
 0x72c   : > { %v9659_v34 = vadd.f32 %v6086_v16, %v4189_v38  ;;  %v4193_v1 = vadd.f32 %v4192_v10, %v4124_v53  ;;  %v5243_v53 = vld [vmem:[%s10085_s9] sm:$0xff]   ;;  %v4316_v38 = vpop.permute.xlu0 %4315  ;;  %v4321_v10 = vpop.permute.xlu1 %4320 }
 0x72d   : > { %v9662_v0 = vadd.f32 %v6087_v61, %v4191_v13  ;;  %v4237_v50 = vmul.f32 %v4220_v51, %v9656_v49 }
 0x72e   : > { %v4238_v32 = vmul.f32 %v4220_v51, %v9659_v34  ;;  %v9666_v47 = vadd.f32 %v6088_v39, %v4193_v1  ;;  %v5247_v51 = vld [vmem:[%s10085_s9 + $0x20] sm:$0xff]  }
 0x72f   : > { %v4239_v56 = vmul.f32 %v4225_v43, %v9662_v0  ;;  %v4269_v12 = vadd.f32 %v4252_v7, %v4237_v50 }
 0x730   : > { %v4240_v9 = vmul.f32 %v4225_v43, %v9666_v47  ;;  %v4196_v6 = vpop.f32.mrb[140].mxu1  ;;  %v4270_v55 = vadd.f32 %v4252_v7, %v4238_v32  ;;  %v5246_v43 = vld [vmem:[%s10085_s9 + $0x18] sm:$0xff]  }
 0x731   : > { %v4271_v3 = vadd.f32 %v4257_v27, %v4239_v56  ;;  %v4197_v54 = vadd.f32 %v4196_v6, %v4129_v42  ;;  %v4198_v52 = vpop.f32.mrb[141].mxu1 }
 0x732   : > { %v4199_v46 = vadd.f32 %v4198_v52, %v4129_v42  ;;  %v4200_v23 = vpop.f32.mrb[142].mxu1  ;;  %v4272_v59 = vadd.f32 %v4257_v27, %v4240_v9  ;;  %v5245_v42 = vld [vmem:[%s10085_s9 + $0x10] sm:$0xff]  }
 0x733   : > { %v9672_v18 = vadd.f32 %v6089_v24, %v4197_v54  ;;  %v4201_v26 = vadd.f32 %v4200_v23, %v4134_v8  ;;  %v4202_v45 = vpop.f32.mrb[143].mxu1  ;;  %v4277_v44 = vpack.c.bf16 %v4271_v3, %v4269_v12  ;;  %v4326_v54 = vpop.permute.xlu0 %4325 }
 0x734   : > { %v9675_v57 = vadd.f32 %v6090_v15, %v4199_v46  ;;  %v4203_v11 = vadd.f32 %v4202_v45, %v4134_v8  ;;  %v4278_v14 = vpack.c.bf16 %v4272_v59, %v4270_v55  ;;  %v5244_v8 = vld [vmem:[%s10085_s9 + $0x8] sm:$0xff]   ;;  %v4331_v12 = vpop.permute.xlu1 %4330 }
 0x735   : > { %v9678_v28 = vadd.f32 %v6091_v29, %v4201_v26  ;;  %v4241_v58 = vmul.f32 %v4230_v63, %v9672_v18 }
 0x736   : > { %v4242_v37 = vmul.f32 %v4230_v63, %v9675_v57  ;;  %v9682_v21 = vadd.f32 %v6092_v35, %v4203_v11  ;;  %4457 = vmatprep.subr.bf16.mxu1 %v4278_v14 }
 0x737   : > { %v4243_v5 = vmul.f32 %v4235_v20, %v9678_v28  ;;  %4458 = vmatpush1.bf16.msra.mxu1 %v4277_v44  ;;  %v4273_v17 = vadd.f32 %v4262_v4, %v4241_v58 }
 0x738   : > { %v4244_v22 = vmul.f32 %v4235_v20, %v9682_v21  ;;  %v4274_v2 = vadd.f32 %v4262_v4, %v4242_v37 }
 0x739   : > { %v4275_v31 = vadd.f32 %v4267_v36, %v4243_v5 }
 0x73a   : > { %v4276_v41 = vadd.f32 %v4267_v36, %v4244_v22 }
 0x73b   : > { %v4279_v62 = vpack.c.bf16 %v4275_v31, %v4273_v17 }
 0x73c   : > { %v4280_v33 = vpack.c.bf16 %v4276_v41, %v4274_v2 }
 0x73e   : > { %4459 = vmatprep.subr.bf16.mxu1 %v4280_v33 }
 0x73f   : > { %4460 = vmatpush1.bf16.msra.mxu1 %v4279_v62 }
 0x742   : > { %5158 = vmatmul.mubr.msk.bf16.vlgmr.msra.gmra.mrb[144].mxu1 %vm630_vm0, %v5243_v53  ;;  %v4336_v53 = vpop.permute.xlu0 %4335 }
 0x743   : > { %4499 = vmatprep.mubr.bf16.mxu1 %v11884_v25 }
 0x74a   : > { %5159 = vmatmul.mubr.msk.bf16.gmra.mrb[148].mxu1 %vm630_vm0, %v5244_v8 }
 0x74b   : > { %4509 = vmatprep.mubr.bf16.mxu1 %v11884_v25 }
 0x752   : > { %5160 = vmatmul.mubr.msk.bf16.gmra.mrb[152].mxu1 %vm630_vm0, %v5245_v42 }
 0x753   : > { %4519 = vmatprep.mubr.bf16.mxu1 %v11884_v25 }
 0x75a   : > { %5161 = vmatmul.mubr.msk.bf16.gmra.mrb[156].mxu1 %vm630_vm0, %v5246_v43 }
 0x75b   : > { %4529 = vmatprep.mubr.bf16.mxu1 %v11884_v25 }
 0x762   : > { %5162 = vmatmul.mubr.msk.bf16.gmra.mrb[160].mxu1 %vm630_vm0, %v5247_v51 }
 0x763   : > { %4539 = vmatprep.mubr.bf16.mxu1 %v11884_v25 }
 0x76a   : > { %5163 = vmatmul.mubr.msk.bf16.gmra.mrb[164].mxu1 %vm630_vm0, %v5248_v60 }
 0x76b   : > { %4549 = vmatprep.mubr.bf16.mxu1 %v11884_v25 }
 0x772   : > { %5164 = vmatmul.mubr.msk.bf16.gmra.mrb[168].mxu1 %vm630_vm0, %v5249_v40 }
 0x773   : > { %4559 = vmatprep.mubr.bf16.mxu1 %v11884_v25 }
 0x77a   : > { %5165 = vmatmul.mubr.msk.bf16.gmra.mrb[172].mxu1 %vm630_vm0, %v5250_v30 }
 0x77b   : > { %4956 = vmatprep.mubr.bf16.mxu1 %v11884_v25 }
 0x815   : > { %v4491_v19 = vpop.f32.mrb[144].mxu1 }
 0x816   : > { %v9727_v48 = vadd.f32 %v4491_v19, %v4316_v38  ;;  %v4493_v13 = vpop.f32.mrb[145].mxu1 }
 0x817   : > { %v9729_v27 = vadd.f32 %v4493_v13, %v4316_v38  ;;  %v4495_v16 = vpop.f32.mrb[146].mxu1  ;;  %v4341_v38 = vpop.permute.xlu1 %4340 }
 0x818   : > { %v4570_v1 = vmul.f32 %v9727_v48, %v9727_v48  ;;  %v9733_v7 = vadd.f32 %v4495_v16, %v4321_v10  ;;  %v4497_v61 = vpop.f32.mrb[147].mxu1 }
 0x819   : > { %v4571_v32 = vmul.f32 %v9729_v27, %v9729_v27  ;;  %v9737_v39 = vadd.f32 %v4497_v61, %v4321_v10 }
 0x81a   : > { %v4602_v25 = vmul.f32 %v4570_v1, %v9727_v48  ;;  %v4572_v50 = vmul.f32 %v9733_v7, %v9733_v7 }
 0x81b   : > { %v4603_v56 = vmul.f32 %v4571_v32, %v9729_v27  ;;  %v4573_v9 = vmul.f32 %v9737_v39, %v9737_v39 }
 0x81c   : > { %v4634_v6 = vmul.f32 0.044715, %v4602_v25  ;;  %v4604_v3 = vmul.f32 %v4572_v50, %v9733_v7 }
 0x81d   : > { %v4635_v52 = vmul.f32 0.044715, %v4603_v56  ;;  %v4605_v20 = vmul.f32 %v4573_v9, %v9737_v39  ;;  %v4501_v46 = vpop.f32.mrb[148].mxu1 }
 0x81e   : > { %v4666_v23 = vadd.f32 %v4634_v6, %v9727_v48  ;;  %v4636_v55 = vmul.f32 0.044715, %v4604_v3  ;;  %v9748_v59 = vadd.f32 %v4501_v46, %v4326_v54  ;;  %v4503_v63 = vpop.f32.mrb[149].mxu1 }
 0x81f   : > { %v4667_v24 = vadd.f32 %v4635_v52, %v9729_v27  ;;  %v4637_v26 = vmul.f32 0.044715, %v4605_v20  ;;  %v9751_v45 = vadd.f32 %v4503_v63, %v4326_v54  ;;  %v4505_v15 = vpop.f32.mrb[150].mxu1 }
 0x820   : > { %v4698_v11 = vmul.f32 0.7978846, %v4666_v23  ;;  %v4668_v14 = vadd.f32 %v4636_v55, %v9733_v7  ;;  %v4574_v29 = vmul.f32 %v9748_v59, %v9748_v59  ;;  %v9756_v44 = vadd.f32 %v4505_v15, %v4331_v12  ;;  %v4507_v37 = vpop.f32.mrb[151].mxu1  ;;  %v4346_v15 = vpop.permute.xlu0 %4345 }
 0x821   : > { %v4699_v35 = vmul.f32 0.7978846, %v4667_v24  ;;  %v4669_v58 = vadd.f32 %v4637_v26, %v9737_v39  ;;  %v4575_v5 = vmul.f32 %v9751_v45, %v9751_v45  ;;  %v9761_v36 = vadd.f32 %v4507_v37, %v4331_v12 }
 0x822   : > { %6021 = vtanh.f32 %v4698_v11  ;;  %v4700_v22 = vmul.f32 0.7978846, %v4668_v14  ;;  %v4606_v4 = vmul.f32 %v4574_v29, %v9748_v59  ;;  %v4576_v31 = vmul.f32 %v9756_v44, %v9756_v44 }
 0x823   : > { %6023 = vtanh.f32 %v4699_v35  ;;  %v4701_v2 = vmul.f32 0.7978846, %v4669_v58  ;;  %v4607_v41 = vmul.f32 %v4575_v5, %v9751_v45  ;;  %v4577_v17 = vmul.f32 %v9761_v36, %v9761_v36 }
 0x824   : > { %6025 = vtanh.f32 %v4700_v22  ;;  %v4638_v33 = vmul.f32 0.044715, %v4606_v4  ;;  %v4608_v62 = vmul.f32 %v4576_v31, %v9756_v44 }
 0x825   : > { %v4639_v8 = vmul.f32 0.044715, %v4607_v41  ;;  %v4609_v42 = vmul.f32 %v4577_v17, %v9761_v36  ;;  %v4511_v43 = vpop.f32.mrb[152].mxu1  ;;  %6027 = vtanh.f32 %v4701_v2 }
 0x826   : > { %v4670_v51 = vadd.f32 %v4638_v33, %v9748_v59  ;;  %v4640_v60 = vmul.f32 0.044715, %v4608_v62  ;;  %v9772_v40 = vadd.f32 %v4511_v43, %v4336_v53  ;;  %v4513_v30 = vpop.f32.mrb[153].mxu1 }
 0x827   : > { %v4671_v19 = vadd.f32 %v4639_v8, %v9751_v45  ;;  %v4641_v13 = vmul.f32 0.044715, %v4609_v42  ;;  %v9775_v10 = vadd.f32 %v4513_v30, %v4336_v53  ;;  %v4515_v16 = vpop.f32.mrb[154].mxu1 }
 0x828   : > { %v4702_v1 = vmul.f32 0.7978846, %v4670_v51  ;;  %v4672_v61 = vadd.f32 %v4640_v60, %v9756_v44  ;;  %v4578_v32 = vmul.f32 %v9772_v40, %v9772_v40  ;;  %v9780_v25 = vadd.f32 %v4515_v16, %v4341_v38  ;;  %v4517_v50 = vpop.f32.mrb[155].mxu1  ;;  %v4351_v16 = vpop.permute.xlu1 %4350 }
 0x829   : > { %v4703_v56 = vmul.f32 0.7978846, %v4671_v19  ;;  %v4673_v9 = vadd.f32 %v4641_v13, %v9761_v36  ;;  %v4579_v6 = vmul.f32 %v9775_v10, %v9775_v10  ;;  %v9785_v3 = vadd.f32 %v4517_v50, %v4341_v38 }
 0x82a   : > { %6029 = vtanh.f32 %v4702_v1  ;;  %v4704_v54 = vmul.f32 0.7978846, %v4672_v61  ;;  %v4610_v52 = vmul.f32 %v4578_v32, %v9772_v40  ;;  %v4580_v20 = vmul.f32 %v9780_v25, %v9780_v25 }
 0x82b   : > { %6031 = vtanh.f32 %v4703_v56  ;;  %v4705_v46 = vmul.f32 0.7978846, %v4673_v9  ;;  %v4611_v23 = vmul.f32 %v4579_v6, %v9775_v10  ;;  %v4581_v55 = vmul.f32 %v9785_v3, %v9785_v3 }
 0x82c   : > { %v6022_v63 = vpop.eup %6021  ;;  %6033 = vtanh.f32 %v4704_v54  ;;  %v4642_v12 = vmul.f32 0.044715, %v4610_v52  ;;  %v4612_v24 = vmul.f32 %v4580_v20, %v9780_v25 }
 0x82d   : > { %v6024_v26 = vpop.eup %6023  ;;  %v4762_v11 = vadd.f32 1.0, %v6022_v63  ;;  %6035 = vtanh.f32 %v4705_v46  ;;  %v4643_v14 = vmul.f32 0.044715, %v4611_v23  ;;  %v4613_v29 = vmul.f32 %v4581_v55, %v9785_v3  ;;  %v4521_v37 = vpop.f32.mrb[156].mxu1 }
 0x82e   : > { %v6026_v35 = vpop.eup %6025  ;;  %v4674_v58 = vadd.f32 %v4642_v12, %v9772_v40  ;;  %v4644_v5 = vmul.f32 0.044715, %v4612_v24  ;;  %v9796_v22 = vadd.f32 %v4521_v37, %v4346_v15  ;;  %v4523_v4 = vpop.f32.mrb[157].mxu1  ;;  %v9798_v31 = vadd.f32 1.0, %v6024_v26 }
 0x82f   : > { %v4794_v2 = vmul.f32 0.5, %v4762_v11  ;;  %v4764_v41 = vadd.f32 1.0, %v6026_v35  ;;  %v4675_v17 = vadd.f32 %v4643_v14, %v9775_v10  ;;  %v4645_v33 = vmul.f32 0.044715, %v4613_v29  ;;  %v4525_v62 = vpop.f32.mrb[158].mxu1  ;;  %v6028_v60 = vpop.eup %6027 }
 0x830   : > { %v4706_v53 = vmul.f32 0.7978846, %v4674_v58  ;;  %v4676_v8 = vadd.f32 %v4644_v5, %v9780_v25  ;;  %v4582_v42 = vmul.f32 %v9796_v22, %v9796_v22  ;;  %v9804_v43 = vadd.f32 %v4523_v4, %v4346_v15  ;;  %v4527_v51 = vpop.f32.mrb[159].mxu1  ;;  %v4356_v46 = vpop.permute.xlu0 %4355 }
 0x831   : > { %v9807_v30 = vmul.f32 %v4794_v2, %v9727_v48  ;;  %v4796_v38 = vmul.f32 0.5, %v4764_v41  ;;  %v4707_v19 = vmul.f32 0.7978846, %v4675_v17  ;;  %v4677_v13 = vadd.f32 %v4645_v33, %v9785_v3 }
 0x832   : > { %6037 = vtanh.f32 %v4706_v53  ;;  %v4708_v1 = vmul.f32 0.7978846, %v4676_v8  ;;  %v4614_v61 = vmul.f32 %v4582_v42, %v9796_v22  ;;  %v4583_v32 = vmul.f32 %v9804_v43, %v9804_v43 }
 0x833   : > { %v9814_v50 = vmul.f32 %v4796_v38, %v9733_v7  ;;  %6039 = vtanh.f32 %v4707_v19  ;;  %v4709_v56 = vmul.f32 0.7978846, %v4677_v13  ;;  %v9816_v9 = vadd.f32 %v4525_v62, %v4351_v16 }
 0x834   : > { %v6030_v48 = vpop.eup %6029  ;;  %6041 = vtanh.f32 %v4708_v1  ;;  %v4646_v6 = vmul.f32 0.044715, %v4614_v61  ;;  %v4615_v54 = vmul.f32 %v4583_v32, %v9804_v43  ;;  %v9819_v52 = vadd.f32 %v4527_v51, %v4351_v16 }
 0x835   : > { %v9821_v20 = vpop.eup %6031  ;;  %v4766_v23 = vadd.f32 1.0, %v6030_v48  ;;  %6043 = vtanh.f32 %v4709_v56  ;;  %v4584_v7 = vmul.f32 %v9816_v9, %v9816_v9  ;;  %v4531_v55 = vpop.f32.mrb[160].mxu1  ;;  %v4765_v63 = vadd.f32 1.0, %v6028_v60 }
 0x836   : > { %v6034_v12 = vpop.eup %6033  ;;  %v4678_v24 = vadd.f32 %v4646_v6, %v9796_v22  ;;  %v4647_v26 = vmul.f32 0.044715, %v4615_v54  ;;  %v4585_v15 = vmul.f32 %v9819_v52, %v9819_v52  ;;  %v9828_v11 = vadd.f32 %v4531_v55, %v4356_v46  ;;  %v4533_v14 = vpop.f32.mrb[161].mxu1 }
 0x837   : > { %v9830_v29 = vpop.eup %6035  ;;  %v4798_v37 = vmul.f32 0.5, %v4766_v23  ;;  %v4768_v35 = vadd.f32 1.0, %v6034_v12  ;;  %v4616_v58 = vmul.f32 %v4584_v7, %v9816_v9  ;;  %v9833_v5 = vadd.f32 %v4533_v14, %v4356_v46  ;;  %v4535_v4 = vpop.f32.mrb[162].mxu1 }
 0x838   : > { %v4710_v2 = vmul.f32 0.7978846, %v4678_v24  ;;  %v4679_v41 = vadd.f32 %v4647_v26, %v9804_v43  ;;  %v4617_v17 = vmul.f32 %v4585_v15, %v9819_v52  ;;  %v4586_v33 = vmul.f32 %v9828_v11, %v9828_v11  ;;  %v4537_v62 = vpop.f32.mrb[163].mxu1  ;;  %v4361_v60 = vpop.permute.xlu1 %4360 }
 0x839   : > { %v9840_v53 = vmul.f32 %v4798_v37, %v9748_v59  ;;  %v4800_v8 = vmul.f32 0.5, %v4768_v35  ;;  %v4648_v42 = vmul.f32 0.044715, %v4616_v58  ;;  %v4587_v51 = vmul.f32 %v9833_v5, %v9833_v5 }
 0x83a   : > { %6045 = vtanh.f32 %v4710_v2  ;;  %v4711_v38 = vmul.f32 0.7978846, %v4679_v41  ;;  %v4649_v19 = vmul.f32 0.044715, %v4617_v17  ;;  %v4618_v13 = vmul.f32 %v4586_v33, %v9828_v11 }
 0x83b   : > { %v9846_v16 = vmul.f32 %v4800_v8, %v9756_v44  ;;  %v4680_v1 = vadd.f32 %v4648_v42, %v9816_v9  ;;  %v4619_v61 = vmul.f32 %v4587_v51, %v9833_v5  ;;  %v9850_v59 = vadd.f32 %v4535_v4, %v4361_v60 }
 0x83c   : > { %v6038_v32 = vpop.eup %6037  ;;  %6047 = vtanh.f32 %v4711_v38  ;;  %v4681_v56 = vadd.f32 %v4649_v19, %v9819_v52  ;;  %v4650_v48 = vmul.f32 0.044715, %v4618_v13  ;;  %v9853_v6 = vadd.f32 %v4537_v62, %v4361_v60 }
 0x83d   : > { %v9855_v54 = vpop.eup %6039  ;;  %v4770_v46 = vadd.f32 1.0, %v6038_v32  ;;  %v4712_v23 = vmul.f32 0.7978846, %v4680_v1  ;;  %v4651_v7 = vmul.f32 0.044715, %v4619_v61  ;;  %v4588_v44 = vmul.f32 %v9850_v59, %v9850_v59  ;;  %v4541_v55 = vpop.f32.mrb[164].mxu1 }
 0x83e   : > { %v6042_v12 = vpop.eup %6041  ;;  %v4713_v24 = vmul.f32 0.7978846, %v4681_v56  ;;  %v4682_v26 = vadd.f32 %v4650_v48, %v9828_v11  ;;  %v4589_v15 = vmul.f32 %v9853_v6, %v9853_v6  ;;  %v4795_v14 = vmul.f32 0.5, %v9798_v31  ;;  %v4543_v37 = vpop.f32.mrb[165].mxu1 }
 0x83f   : > { %v9863_v35 = vpop.eup %6043  ;;  %v4802_v58 = vmul.f32 0.5, %v4770_v46  ;;  %v4772_v4 = vadd.f32 1.0, %v6042_v12  ;;  %6049 = vtanh.f32 %v4712_v23  ;;  %v4683_v2 = vadd.f32 %v4651_v7, %v9833_v5  ;;  %v4545_v41 = vpop.f32.mrb[166].mxu1 }
 0x840   : > { %6051 = vtanh.f32 %v4713_v24  ;;  %v4714_v17 = vmul.f32 0.7978846, %v4682_v26  ;;  %v4620_v33 = vmul.f32 %v4588_v44, %v9850_v59  ;;  %v4621_v62 = vmul.f32 %v4589_v15, %v9853_v6  ;;  %v4547_v8 = vpop.f32.mrb[167].mxu1  ;;  %v4366_v1 = vpop.permute.xlu0 %4365 }
 0x841   : > { %v9869_v42 = vmul.f32 %v4802_v58, %v9772_v40  ;;  %v4804_v31 = vmul.f32 0.5, %v4772_v4  ;;  %v4715_v51 = vmul.f32 0.7978846, %v4683_v2  ;;  %v4797_v60 = vmul.f32 0.5, %v4765_v63  ;;  %v4371_v48 = vpop.permute.xlu1 %4370 }
 0x842   : > { %6053 = vtanh.f32 %v4714_v17  ;;  %v4652_v38 = vmul.f32 0.044715, %v4620_v33  ;;  %v4653_v19 = vmul.f32 0.044715, %v4621_v62  ;;  %v4827_v13 = vmul.f32 %v4795_v14, %v9729_v27 }
 0x843   : > { %v9873_v61 = vmul.f32 %v4804_v31, %v9780_v25  ;;  %6055 = vtanh.f32 %v4715_v51  ;;  %v4829_v32 = vmul.f32 %v4797_v60, %v9737_v39  ;;  %v4858_v56 = vpack.c.bf16 %v9814_v50, %v9807_v30 }
 0x844   : > { %v6046_v40 = vpop.eup %6045  ;;  %v4684_v46 = vadd.f32 %v4652_v38, %v9850_v59  ;;  %v4685_v63 = vadd.f32 %v4653_v19, %v9853_v6  ;;  %v9880_v23 = vadd.f32 %v4541_v55, %v4366_v1  ;;  %v9882_v7 = vadd.f32 %v4543_v37, %v4366_v1 }
 0x845   : > { %v4774_v27 = vadd.f32 1.0, %v6046_v40  ;;  %v4859_v44 = vpack.c.bf16 %v4829_v32, %v4827_v13  ;;  %v9884_v25 = vadd.f32 %v4545_v41, %v4371_v48  ;;  %v9886_v12 = vadd.f32 %v4547_v8, %v4371_v48  ;;  %v4551_v39 = vpop.f32.mrb[168].mxu1 }
 0x846   : > { %v9888_v24 = vpop.eup %6047  ;;  %v4716_v30 = vmul.f32 0.7978846, %v4684_v46  ;;  %v4717_v50 = vmul.f32 0.7978846, %v4685_v63  ;;  %v4590_v26 = vmul.f32 %v9880_v23, %v9880_v23  ;;  %v4591_v55 = vmul.f32 %v9882_v7, %v9882_v7  ;;  %v4553_v15 = vpop.f32.mrb[169].mxu1 }
 0x847   : > { %v4806_v14 = vmul.f32 0.5, %v4774_v27  ;;  %4914 = vmatprep.subr.bf16.mxu0 %v4859_v44  ;;  %5175 = vmatprep.subr.bf16.mxu1 %v4859_v44  ;;  %v4592_v37 = vmul.f32 %v9884_v25, %v9884_v25  ;;  %v4593_v58 = vmul.f32 %v9886_v12, %v9886_v12  ;;  %v4767_v4 = vadd.f32 1.0, %v9821_v20  ;;  %v4555_v2 = vpop.f32.mrb[170].mxu1 }
 0x848   : > { %6057 = vtanh.f32 %v4716_v30  ;;  %4915 = vmatpush1.bf16.msra.mxu0 %v4858_v56  ;;  %5183 = vmatpush1.bf16.msra.mxu1 %v4858_v56  ;;  %v4622_v41 = vmul.f32 %v4590_v26, %v9880_v23  ;;  %v4623_v17 = vmul.f32 %v4591_v55, %v9882_v7  ;;  %v4769_v33 = vadd.f32 1.0, %v9830_v29  ;;  %v4557_v62 = vpop.f32.mrb[171].mxu1  ;;  %v4376_v30 = vpop.permute.xlu0 %4375 }
 0x849   : > { %v6050_v8 = vpop.eup %6049  ;;  %v9903_v31 = vmul.f32 %v4806_v14, %v9796_v22  ;;  %6059 = vtanh.f32 %v4717_v50  ;;  %v4624_v51 = vmul.f32 %v4592_v37, %v9884_v25  ;;  %v4625_v20 = vmul.f32 %v4593_v58, %v9886_v12 }
 0x84a   : > { %v9907_v60 = vpop.eup %6051  ;;  %v4776_v38 = vadd.f32 1.0, %v6050_v8  ;;  %v4654_v19 = vmul.f32 0.044715, %v4622_v41  ;;  %v4655_v13 = vmul.f32 0.044715, %v4623_v17  ;;  %v4799_v1 = vmul.f32 0.5, %v4767_v4 }
 0x84b   : > { %v4656_v32 = vmul.f32 0.044715, %v4624_v51  ;;  %v4657_v56 = vmul.f32 0.044715, %v4625_v20  ;;  %v4801_v40 = vmul.f32 0.5, %v4769_v33  ;;  %v4860_v29 = vpack.c.bf16 %v9846_v16, %v9840_v53 }
 0x84c   : > { %v6054_v48 = vpop.eup %6053  ;;  %v4808_v22 = vmul.f32 0.5, %v4776_v38  ;;  %v4686_v46 = vadd.f32 %v4654_v19, %v9880_v23  ;;  %v4687_v63 = vadd.f32 %v4655_v13, %v9882_v7  ;;  %v4831_v27 = vmul.f32 %v4799_v1, %v9751_v45  ;;  %v4381_v45 = vpop.permute.xlu1 %4380 }
 0x84d   : > { %v9914_v44 = vpop.eup %6055  ;;  %v4778_v50 = vadd.f32 1.0, %v6054_v48  ;;  %v4688_v26 = vadd.f32 %v4656_v32, %v9884_v25  ;;  %v4689_v55 = vadd.f32 %v4657_v56, %v9886_v12  ;;  %v4833_v14 = vmul.f32 %v4801_v40, %v9761_v36  ;;  %v4561_v37 = vpop.f32.mrb[172].mxu1 }
 0x84e   : > { %v9920_v53 = vmul.f32 %v4808_v22, %v9816_v9  ;;  %v4718_v16 = vmul.f32 0.7978846, %v4686_v46  ;;  %v4719_v58 = vmul.f32 0.7978846, %v4687_v63  ;;  %v9922_v4 = vadd.f32 %v4551_v39, %v4376_v30  ;;  %v4563_v41 = vpop.f32.mrb[173].mxu1 }
 0x84f   : > { %v4810_v17 = vmul.f32 0.5, %v4778_v50  ;;  %v4720_v33 = vmul.f32 0.7978846, %v4688_v26  ;;  %v4721_v8 = vmul.f32 0.7978846, %v4689_v55  ;;  %v4861_v51 = vpack.c.bf16 %v4833_v14, %v4831_v27  ;;  %v4565_v20 = vpop.f32.mrb[174].mxu1  ;;  %v4386_v26 = vpop.permute.xlu0 %4385 }
 0x850   : > { %6061 = vtanh.f32 %v4718_v16  ;;  %v4594_v38 = vmul.f32 %v9922_v4, %v9922_v4  ;;  %v9926_v36 = vadd.f32 %v4553_v15, %v4376_v30  ;;  %v9928_v19 = vadd.f32 %v4555_v2, %v4381_v45  ;;  %v4567_v9 = vpop.f32.mrb[175].mxu1 }
 0x851   : > { %v9931_v13 = vmul.f32 %v4810_v17, %v9828_v11  ;;  %6063 = vtanh.f32 %v4719_v58  ;;  %4916 = vmatprep.subr.bf16.mxu0 %v4861_v51  ;;  %5176 = vmatprep.subr.bf16.mxu1 %v4861_v51  ;;  %v9933_v39 = vadd.f32 %v4557_v62, %v4381_v45  ;;  %v4771_v1 = vadd.f32 1.0, %v9855_v54 }
 0x852   : > { %v6058_v32 = vpop.eup %6057  ;;  %6065 = vtanh.f32 %v4720_v33  ;;  %4917 = vmatpush1.bf16.msra.mxu0 %v4860_v29  ;;  %5184 = vmatpush1.bf16.msra.mxu1 %v4860_v29  ;;  %v4626_v15 = vmul.f32 %v4594_v38, %v9922_v4  ;;  %v4595_v2 = vmul.f32 %v9926_v36, %v9926_v36  ;;  %v4596_v11 = vmul.f32 %v9928_v19, %v9928_v19 }
 0x853   : > { %v9941_v56 = vpop.eup %6059  ;;  %v4780_v40 = vadd.f32 1.0, %v6058_v32  ;;  %6067 = vtanh.f32 %v4721_v8  ;;  %v4597_v62 = vmul.f32 %v9933_v39, %v9933_v39  ;;  %v4773_v54 = vadd.f32 1.0, %v9863_v35  ;;  %v4391_v8 = vpop.permute.xlu1 %4390 }
 0x854   : > { %v4658_v48 = vmul.f32 0.044715, %v4626_v15  ;;  %v4627_v29 = vmul.f32 %v4595_v2, %v9926_v36  ;;  %v4628_v22 = vmul.f32 %v4596_v11, %v9928_v19  ;;  %v4803_v46 = vmul.f32 0.5, %v4771_v1 }
 0x855   : > { %v4812_v63 = vmul.f32 0.5, %v4780_v40  ;;  %v4629_v27 = vmul.f32 %v4597_v62, %v9933_v39  ;;  %v4805_v30 = vmul.f32 0.5, %v4773_v54  ;;  %v4862_v50 = vpack.c.bf16 %v9873_v61, %v9869_v42 }
 0x856   : > { %v4690_v55 = vadd.f32 %v4658_v48, %v9922_v4  ;;  %v4659_v14 = vmul.f32 0.044715, %v4627_v29  ;;  %v4660_v16 = vmul.f32 0.044715, %v4628_v22  ;;  %v4835_v35 = vmul.f32 %v4803_v46, %v9775_v10 }
 0x857   : > { %v9954_v58 = vmul.f32 %v4812_v63, %v9850_v59  ;;  %v4661_v45 = vmul.f32 0.044715, %v4629_v27  ;;  %v4837_v17 = vmul.f32 %v4805_v30, %v9785_v3  ;;  %v9957_v33 = vadd.f32 %v4561_v37, %v4386_v26 }
 0x858   : > { %v4722_v51 = vmul.f32 0.7978846, %v4690_v55  ;;  %v4691_v38 = vadd.f32 %v4659_v14, %v9926_v36  ;;  %v4692_v42 = vadd.f32 %v4660_v16, %v9928_v19  ;;  %v9961_v61 = vadd.f32 %v4563_v41, %v4386_v26 }
 0x859   : > { %v4693_v1 = vadd.f32 %v4661_v45, %v9933_v39  ;;  %v4863_v32 = vpack.c.bf16 %v4837_v17, %v4835_v35  ;;  %v4598_v10 = vmul.f32 %v9957_v33, %v9957_v33  ;;  %v9966_v59 = vadd.f32 %v4565_v20, %v4391_v8 }
 0x85a   : > { %v6062_v15 = vpop.eup %6061  ;;  %6069 = vtanh.f32 %v4722_v51  ;;  %v4723_v3 = vmul.f32 0.7978846, %v4691_v38  ;;  %v4724_v37 = vmul.f32 0.7978846, %v4692_v42  ;;  %v4599_v2 = vmul.f32 %v9961_v61, %v9961_v61 }
 0x85b   : > { %v6064_v11 = vpop.eup %6063  ;;  %v4782_v40 = vadd.f32 1.0, %v6062_v15  ;;  %v4725_v62 = vmul.f32 0.7978846, %v4693_v1  ;;  %4918 = vmatprep.subr.bf16.mxu0 %v4863_v32  ;;  %5177 = vmatprep.subr.bf16.mxu1 %v4863_v32  ;;  %v4630_v41 = vmul.f32 %v4598_v10, %v9957_v33  ;;  %v4600_v54 = vmul.f32 %v9966_v59, %v9966_v59 }
 0x85c   : > { %v6066_v48 = vpop.eup %6065  ;;  %6071 = vtanh.f32 %v4723_v3  ;;  %4919 = vmatpush1.bf16.msra.mxu0 %v4862_v50  ;;  %5185 = vmatpush1.bf16.msra.mxu1 %v4862_v50  ;;  %v4631_v20 = vmul.f32 %v4599_v2, %v9961_v61  ;;  %v9974_v29 = vadd.f32 %v4567_v9, %v4391_v8  ;;  %v4775_v22 = vadd.f32 1.0, %v9888_v24 }
 0x85d   : > { %v6068_v46 = vpop.eup %6067  ;;  %v4814_v63 = vmul.f32 0.5, %v4782_v40  ;;  %v4784_v27 = vadd.f32 1.0, %v6066_v48  ;;  %6073 = vtanh.f32 %v4724_v37  ;;  %v4662_v30 = vmul.f32 0.044715, %v4630_v41 }
 0x85e   : > { %6075 = vtanh.f32 %v4725_v62  ;;  %v4663_v26 = vmul.f32 0.044715, %v4631_v20  ;;  %v4632_v55 = vmul.f32 %v4600_v54, %v9966_v59  ;;  %v4601_v14 = vmul.f32 %v9974_v29, %v9974_v29 }
 0x85f   : > { %v4846_v50 = vmul.f32 %v4814_v63, %v9880_v23  ;;  %v4816_v16 = vmul.f32 0.5, %v4784_v27  ;;  %v4694_v9 = vadd.f32 %v4662_v30, %v9957_v33  ;;  %v4777_v35 = vadd.f32 1.0, %v9907_v60 }
 0x860   : > { %v4695_v24 = vadd.f32 %v4663_v26, %v9961_v61  ;;  %v4664_v45 = vmul.f32 0.044715, %v4632_v55  ;;  %v4633_v17 = vmul.f32 %v4601_v14, %v9974_v29  ;;  %v4807_v8 = vmul.f32 0.5, %v4775_v22 }
 0x861   : > { %v4848_v51 = vmul.f32 %v4816_v16, %v9884_v25  ;;  %v4726_v38 = vmul.f32 0.7978846, %v4694_v9  ;;  %v4809_v42 = vmul.f32 0.5, %v4777_v35  ;;  %v4864_v1 = vpack.c.bf16 %v9920_v53, %v9903_v31 }
 0x862   : > { %v4727_v32 = vmul.f32 0.7978846, %v4695_v24  ;;  %v4696_v23 = vadd.f32 %v4664_v45, %v9966_v59  ;;  %v4665_v10 = vmul.f32 0.044715, %v4633_v17  ;;  %v4839_v15 = vmul.f32 %v4807_v8, %v9804_v43 }
 0x863   : > { %6077 = vtanh.f32 %v4726_v38  ;;  %v4841_v60 = vmul.f32 %v4809_v42, %v9819_v52  ;;  %v4779_v3 = vadd.f32 1.0, %v9914_v44  ;;  %v4781_v37 = vadd.f32 1.0, %v9941_v56 }
 0x864   : > { %v6070_v2 = vpop.eup %6069  ;;  %6079 = vtanh.f32 %v4727_v32  ;;  %v4728_v25 = vmul.f32 0.7978846, %v4696_v23  ;;  %v4697_v40 = vadd.f32 %v4665_v10, %v9974_v29  ;;  %v4866_v31 = vpack.c.bf16 %v9954_v58, %v9931_v13 }
 0x865   : > { %v4786_v53 = vadd.f32 1.0, %v6070_v2  ;;  %v4865_v62 = vpack.c.bf16 %v4841_v60, %v4839_v15  ;;  %v4811_v41 = vmul.f32 0.5, %v4779_v3  ;;  %v4813_v54 = vmul.f32 0.5, %v4781_v37 }
 0x866   : > { %v6072_v43 = vpop.eup %6071  ;;  %6081 = vtanh.f32 %v4728_v25  ;;  %v4729_v48 = vmul.f32 0.7978846, %v4697_v40  ;;  %v4783_v52 = vadd.f32 1.0, %v6064_v11  ;;  %v4785_v20 = vadd.f32 1.0, %v6068_v46  ;;  %v5251_v40 = vld [vmem:[%s10087_s11] sm:$0xff]  }
 0x867   : > { %v6074_v44 = vpop.eup %6073  ;;  %v4818_v22 = vmul.f32 0.5, %v4786_v53  ;;  %4920 = vmatprep.subr.bf16.mxu0 %v4865_v62  ;;  %5178 = vmatprep.subr.bf16.mxu1 %v4865_v62  ;;  %v4843_v56 = vmul.f32 %v4811_v41, %v9833_v5  ;;  %v4845_v63 = vmul.f32 %v4813_v54, %v9853_v6  ;;  %v4868_v27 = vpack.c.bf16 %v4848_v51, %v4846_v50 }
 0x868   : > { %v6076_v30 = vpop.eup %6075  ;;  %v4788_v13 = vadd.f32 1.0, %v6074_v44  ;;  %6083 = vtanh.f32 %v4729_v48  ;;  %4921 = vmatpush1.bf16.msra.mxu0 %v4864_v1  ;;  %5186 = vmatpush1.bf16.msra.mxu1 %v4864_v1  ;;  %v4815_v58 = vmul.f32 0.5, %v4783_v52  ;;  %v4817_v26 = vmul.f32 0.5, %v4785_v20 }
 0x869   : > { %v4867_v55 = vpack.c.bf16 %v4845_v63, %v4843_v56  ;;  %v4787_v14 = vadd.f32 1.0, %v6072_v43  ;;  %v4789_v11 = vadd.f32 1.0, %v6076_v30  ;;  %v4850_v50 = vmul.f32 %v4818_v22, %v9922_v4 }
 0x86a   : > { %v4820_v46 = vmul.f32 0.5, %v4788_v13  ;;  %v4847_v16 = vmul.f32 %v4815_v58, %v9882_v7  ;;  %v4849_v9 = vmul.f32 %v4817_v26, %v9886_v12 }
 0x86b   : > { %4922 = vmatprep.subr.bf16.mxu0 %v4867_v55  ;;  %5179 = vmatprep.subr.bf16.mxu1 %v4867_v55  ;;  %v4819_v5 = vmul.f32 0.5, %v4787_v14  ;;  %v4821_v6 = vmul.f32 0.5, %v4789_v11 }
 0x86c   : > { %v4852_v35 = vmul.f32 %v4820_v46, %v9928_v19  ;;  %4923 = vmatpush1.bf16.msra.mxu0 %v4866_v31  ;;  %5187 = vmatpush1.bf16.msra.mxu1 %v4866_v31  ;;  %v4869_v24 = vpack.c.bf16 %v4849_v9, %v4847_v16 }
 0x86d   : > { %v6078_v45 = vpop.eup %6077  ;;  %v4851_v17 = vmul.f32 %v4819_v5, %v9926_v36  ;;  %v4853_v8 = vmul.f32 %v4821_v6, %v9933_v39 }
 0x86e   : > { %v6080_v51 = vpop.eup %6079  ;;  %v4790_v7 = vadd.f32 1.0, %v6078_v45  ;;  %4924 = vmatprep.subr.bf16.mxu0 %v4869_v24  ;;  %5180 = vmatprep.subr.bf16.mxu1 %v4869_v24  ;;  %v4870_v12 = vpack.c.bf16 %v4852_v35, %v4850_v50 }
 0x86f   : > { %v4871_v38 = vpack.c.bf16 %v4853_v8, %v4851_v17  ;;  %v4791_v42 = vadd.f32 1.0, %v6080_v51 }
 0x870   : > { %v6082_v1 = vpop.eup %6081  ;;  %4925 = vmatpush1.bf16.msra.mxu0 %v4868_v27  ;;  %5188 = vmatpush1.bf16.msra.mxu1 %v4868_v27  ;;  %v4822_v4 = vmul.f32 0.5, %v4790_v7 }
 0x871   : > { %v4792_v19 = vadd.f32 1.0, %v6082_v1  ;;  %4926 = vmatprep.subr.bf16.mxu0 %v4871_v38  ;;  %5181 = vmatprep.subr.bf16.mxu1 %v4871_v38  ;;  %v4823_v36 = vmul.f32 0.5, %v4791_v42 }
 0x872   : > { %v6084_v32 = vpop.eup %6083  ;;  %v4854_v39 = vmul.f32 %v4822_v4, %v9957_v33  ;;  %v5252_v33 = vld [vmem:[%s10087_s11 + $0x8] sm:$0xff]  }
 0x873   : > { %v4824_v23 = vmul.f32 0.5, %v4792_v19  ;;  %v4793_v10 = vadd.f32 1.0, %v6084_v32  ;;  %v4855_v3 = vmul.f32 %v4823_v36, %v9961_v61  ;;  %v4885_v61 = vpop.permute.xlu0 %4884 }
 0x874   : > { %4927 = vmatpush1.bf16.msra.mxu0 %v4870_v12  ;;  %5189 = vmatpush1.bf16.msra.mxu1 %v4870_v12 }
 0x875   : > { %v4856_v15 = vmul.f32 %v4824_v23, %v9966_v59  ;;  %v4825_v60 = vmul.f32 0.5, %v4793_v10  ;;  %v4890_v59 = vpop.permute.xlu1 %4889 }
 0x877   : > { %v4857_v37 = vmul.f32 %v4825_v60, %v9974_v29  ;;  %v4872_v2 = vpack.c.bf16 %v4856_v15, %v4854_v39  ;;  %v4895_v31 = vpop.permute.xlu0 %4894 }
 0x879   : > { %v4873_v25 = vpack.c.bf16 %v4857_v37, %v4855_v3  ;;  %v4900_v29 = vpop.permute.xlu1 %4899 }
 0x87b   : > { %4928 = vmatprep.subr.bf16.mxu0 %v4873_v25  ;;  %5182 = vmatprep.subr.bf16.mxu1 %v4873_v25 }
 0x87c   : > { %4929 = vmatpush1.bf16.msra.mxu0 %v4872_v2  ;;  %5190 = vmatpush1.bf16.msra.mxu1 %v4872_v2 }
 0x87f   : > { %4947 = vmatmul.mubr.bf16.vlgmr.msra.gmra.mrb[160].mxu0 %v5251_v40  ;;  %4957 = vmatmul.mubr.bf16.vlgmr.msra.gmra.mrb[176].mxu1 %v5252_v33 }
 0x952   : > { %v4948_v53 = vpop.f32.mrb[160].mxu0  ;;  %v4958_v62 = vpop.f32.mrb[176].mxu1 }
 0x953   : > { %v4949_v41 = vadd.f32 %v4948_v53, %v4885_v61  ;;  %v4959_v54 = vadd.f32 %v4958_v62, %v4895_v31  ;;  %v4950_v43 = vpop.f32.mrb[161].mxu0  ;;  %v4960_v48 = vpop.f32.mrb[177].mxu1 }
 0x954   : > { %v4951_v52 = vadd.f32 %v4950_v43, %v4885_v61  ;;  %v4961_v20 = vadd.f32 %v4960_v48, %v4895_v31  ;;  %v4952_v44 = vpop.f32.mrb[162].mxu0  ;;  %v4962_v22 = vpop.f32.mrb[178].mxu1 }
 0x955   : > { %v4967_v56 = vadd.f32 %v4949_v41, %v9656_v49  ;;  %v4971_v63 = vadd.f32 %v4959_v54, %v9672_v18  ;;  %v4953_v27 = vadd.f32 %v4952_v44, %v4890_v59  ;;  %v4963_v30 = vadd.f32 %v4962_v22, %v4900_v29  ;;  %v4954_v13 = vpop.f32.mrb[163].mxu0  ;;  %v4964_v58 = vpop.f32.mrb[179].mxu1 }
 0x956   : > { %v4968_v26 = vadd.f32 %v4951_v52, %v9659_v34  ;;  %v4972_v55 = vadd.f32 %v4961_v20, %v9675_v57  ;;  %v4955_v14 = vadd.f32 %v4954_v13, %v4890_v59  ;;  %v4965_v11 = vadd.f32 %v4964_v58, %v4900_v29 }
 0x957   : > { %4975 = vst [vmem:[%s433_s15] sm:$0xff] %v4967_v56  ;;  %4979 = vst [vmem:[%s433_s15 + $0x20] sm:$0xff] %v4971_v63  ;;  %v4969_v46 = vadd.f32 %v4953_v27, %v9662_v0  ;;  %v4973_v49 = vadd.f32 %v4963_v30, %v9678_v28 }
 0x958   : > { %4976 = vst [vmem:[%s433_s15 + $0x8] sm:$0xff] %v4968_v26  ;;  %4980 = vst [vmem:[%s433_s15 + $0x28] sm:$0xff] %v4972_v55  ;;  %v4970_v34 = vadd.f32 %v4955_v14, %v9666_v47  ;;  %v4974_v18 = vadd.f32 %v4965_v11, %v9682_v21 }
 0x959   : > { %4977 = vst [vmem:[%s433_s15 + $0x10] sm:$0xff] %v4969_v46  ;;  %4981 = vst [vmem:[%s433_s15 + $0x30] sm:$0xff] %v4973_v49 }
 0x95a   : > { %4978 = vst [vmem:[%s433_s15 + $0x18] sm:$0xff] %v4970_v34  ;;  %4982 = vst [vmem:[%s433_s15 + $0x38] sm:$0xff] %v4974_v18 }
 0x95b   : > { %6106 = shalt.err (!%p6103_p3)
}
 0x95c   : > { %s6107_s22 = scalar_lea.hbm %s10027_s21, 1024  ;;  %s6111_s20 = scalar_lea.hbm %s10089_s13, 2048 }
 0x95d   : > { %p6108_p4 = scmp.ne.s32.totalorder %s10027_s21, %s6107_s22  ;;  %p6112_p9 = scmp.lt.u32.totalorder %s10027_s21, %s10089_s13 }
 0x95e   : > { %p6113_p10 = scmp.lt.u32.totalorder %s6111_s20, %s6107_s22  ;;  %p6115_p12 = scmp.lt.u32.totalorder %s6107_s22, %s10027_s21 }
 0x95f   : > { %p6109_p7 = pnand %p6108_p4, %p6269_p5 }
 0x960   : > { %p6114_p11 = por %p6113_p10, %p6112_p9 }
 0x961   : > { %p6110_p8 = pneg %p6109_p7 }
 0x962   : > { %p6116_p13 = por %p6115_p12, %p6114_p11 }
 0x964   : > { %p6117_p0 = pnand %p6116_p13, %p6110_p8 }
 0x966   : > { %6120 = shalt.err (!%p6117_p0)
}
 0x967   : > { %s6159_s24 = smov 256   ;;  %s6160_s17 = smov 16  }
 0x968   : > { %5191 = dma.vmem_to_hbm [thread:$0]  (%p6269_p5), %s10029_s16, 1024, %s10027_s21, %s10035_s23, %s6159_s24, %s6159_s24, %s6160_s17  }
 0x969 PF: > { %p5197_p1 = scmp.ge.s32.totalorder %s6155_s28, 2  ;;  %s5012_s15 = sand.u32 1, %s6143_s25  }
 0x96a   : > { %s5013_s22 = scalar_lea.sflag [#allocation3], %s5012_s15 }
 0x96b   : > { %p5194_p2 = pnand %p5197_p1, %p6273_p6 }
 0x96d   : > { %6138 = dma.done.wait (!%p5194_p2), %s5013_s22, 1024  }
 0x96e   : > { %6140 = vsyncadd (!%p5194_p2), %s5013_s22, 4294966272  ;;  %s11885_s29 = sld [smem:[#allocation5_spill]]  ;;  %s11886_s27 = sld [smem:[#allocation6_spill]] }
 0x96f   : > { %p23_p3 = scmp.ge.s32.totalorder %s6256_s14, 4   ;;  %s11887_s25 = smov %s6147_s26 }
 0x970   : > { %s11889_s28 = smov %s6256_s14 }
 0x971   :  { %25 = sbr.rel (!%p23_p3) target bundleno = 3 (0x3), region = 107 }
 0x974   : > { %s11888_s26 = smov %s11885_s29 }
 0x978   :  { %5018 = vsyncpa [#allocation3], 1 }
 0x979   :  { %5020 = vsyncpa [#allocation3 + $0x1], 1 }

</bundles_post_ra>
